<compile_context>
chip_gen: v6e
topology: v6e:2x2x1
jax: 0.10.0
libtpu: 0.0.40
codegen_flags: <defaults>
</compile_context>

<pallas_src>
import math
import functools
import numpy as np
import jax
import jax.numpy as jnp
from jax.experimental import pallas as pl
from jax.experimental.pallas import tpu as pltpu


# ----------------------------- compiler / tiling helpers -----------------------------

def _vmem_limit_bytes():
    try:
        cap = int(pltpu.get_tpu_info().vmem_capacity_bytes)
    except Exception:
        cap = 64 * 1024 * 1024          # conservative fallback (v7x-sized)
    # ~100 MiB on v5e/v6e (128 MiB physical), ~48 MiB on v7x (64 MiB physical).
    return int(min(100 * 1024 * 1024, cap * 3 // 4))


_VMEM_LIMIT = _vmem_limit_bytes()


def _cparams(*dim_sems):
    return pltpu.CompilerParams(dimension_semantics=tuple(dim_sems),
                                vmem_limit_bytes=_VMEM_LIMIT)


def _pick_row_tile(R, cap=512):
    """Largest multiple-of-8 divisor of R <= cap; falls back to the full extent."""
    for cand in range(min(cap, R), 7, -1):
        if R % cand == 0 and cand % 8 == 0:
            return cand
    return R


def _pick_wpg(nW, N, max_rows=1024):
    """Windows per grid step: largest divisor of nW with WPG*N <= max_rows rows."""
    best = 1
    for d in range(1, nW + 1):
        if nW % d == 0 and d * N <= max_rows:
            best = d
    return best


# ----------------------------- Pallas kernels -----------------------------

def _ln_kernel(x_ref, g_ref, b_ref, o_ref):
    x = x_ref[...].astype(jnp.float32)
    mu = jnp.mean(x, axis=-1, keepdims=True)
    xc = x - mu
    var = jnp.mean(xc * xc, axis=-1, keepdims=True)
    y = xc * jax.lax.rsqrt(var + 1e-5)                  # torch LayerNorm default eps
    o_ref[...] = (y * g_ref[...] + b_ref[...]).astype(o_ref.dtype)


def layernorm(x2d, gamma, beta):
    """Standalone LN — only used on the (rare) padded-input fallback path."""
    R, C = x2d.shape
    tile = _pick_row_tile(R)
    return pl.pallas_call(
        _ln_kernel,
        out_shape=jax.ShapeDtypeStruct((R, C), jnp.float32),
        grid_spec=pltpu.PrefetchScalarGridSpec(
            num_scalar_prefetch=0,
            grid=(R // tile,),
            in_specs=[pl.BlockSpec((tile, C), lambda i: (i, 0)),
                      pl.BlockSpec((1, C), lambda i: (0, 0)),
                      pl.BlockSpec((1, C), lambda i: (0, 0))],
            out_specs=pl.BlockSpec((tile, C), lambda i: (i, 0))),
        compiler_params=_cparams("parallel"),
    )(x2d, gamma, beta)


def _mlp_kernel(s_ref, a_ref, g_ref, b_ref, w1_ref, b1_ref, w2_ref, b2_ref, o_ref):
    # fused: residual-1 (shortcut + attn) -> norm2 -> fc1 -> GELU -> fc2 -> residual-2
    x = s_ref[...].astype(jnp.float32) + a_ref[...].astype(jnp.float32)
    mu = jnp.mean(x, axis=-1, keepdims=True)
    xc = x - mu
    var = jnp.mean(xc * xc, axis=-1, keepdims=True)
    xn = xc * jax.lax.rsqrt(var + 1e-5) * g_ref[...] + b_ref[...]
    h = jnp.dot(xn.astype(jnp.bfloat16), w1_ref[...],
                preferred_element_type=jnp.float32) + b1_ref[...]
    # TODO(synk): torch nn.GELU is exact (erf); tanh approximation used here (EUP slot).
    h = jax.nn.gelu(h, approximate=True)
    y = jnp.dot(h.astype(jnp.bfloat16), w2_ref[...],
                preferred_element_type=jnp.float32) + b2_ref[...]
    o_ref[...] = (x + y).astype(o_ref.dtype)


def mlp_block(shortcut2d, attn2d, gamma, beta, w1, b1, w2, b2):
    """Returns x + MLP(LayerNorm(x)) with x = shortcut + attn, over (R, C) slabs."""
    R, C = shortcut2d.shape
    Hd = w1.shape[1]
    tile = _pick_row_tile(R)
    return pl.pallas_call(
        _mlp_kernel,
        out_shape=jax.ShapeDtypeStruct((R, C), jnp.float32),
        grid_spec=pltpu.PrefetchScalarGridSpec(
            num_scalar_prefetch=0,
            grid=(R // tile,),
            in_specs=[pl.BlockSpec((tile, C), lambda i: (i, 0)),
                      pl.BlockSpec((tile, C), lambda i: (i, 0)),
                      pl.BlockSpec((1, C), lambda i: (0, 0)),
                      pl.BlockSpec((1, C), lambda i: (0, 0)),
                      pl.BlockSpec((C, Hd), lambda i: (0, 0)),
                      pl.BlockSpec((1, Hd), lambda i: (0, 0)),
                      pl.BlockSpec((Hd, C), lambda i: (0, 0)),
                      pl.BlockSpec((1, C), lambda i: (0, 0))],
            out_specs=pl.BlockSpec((tile, C), lambda i: (i, 0))),
        compiler_params=_cparams("parallel"),
    )(shortcut2d, attn2d, gamma, beta, w1, b1, w2, b2)


def _linear_kernel(x_ref, w_ref, b_ref, o_ref):
    y = jnp.dot(x_ref[...].astype(jnp.bfloat16), w_ref[...],
                preferred_element_type=jnp.float32) + b_ref[...]
    o_ref[...] = y.astype(o_ref.dtype)


def linear(x2d, w, b):
    R, Cin = x2d.shape
    Cout = w.shape[1]
    tile = _pick_row_tile(R)
    return pl.pallas_call(
        _linear_kernel,
        out_shape=jax.ShapeDtypeStruct((R, Cout), jnp.float32),
        grid_spec=pltpu.PrefetchScalarGridSpec(
            num_scalar_prefetch=0,
            grid=(R // tile,),
            in_specs=[pl.BlockSpec((tile, Cin), lambda i: (i, 0)),
                      pl.BlockSpec((Cin, Cout), lambda i: (0, 0)),
                      pl.BlockSpec((1, Cout), lambda i: (0, 0))],
            out_specs=pl.BlockSpec((tile, Cout), lambda i: (i, 0))),
        compiler_params=_cparams("parallel"),
    )(x2d, w, b)


def _make_attn_kernel(num_heads, head_dim, C, N, WPG, use_mask, fuse_ln):
    rows = WPG * N

    def kernel(*refs):
        i = 0
        x_ref = refs[i]; i += 1
        if fuse_ln:
            g_ref, be_ref = refs[i], refs[i + 1]; i += 2
        if use_mask:
            mask_ref = refs[i]; i += 1
        relb_ref, wqkv_ref, bqkv_ref, wproj_ref, bproj_ref, o_ref = refs[i:i + 6]

        x = x_ref[0].astype(jnp.float32)                       # (rows, C)
        if fuse_ln:                                            # fused norm1 (f32 math)
            mu = jnp.mean(x, axis=-1, keepdims=True)
            xc = x - mu
            var = jnp.mean(xc * xc, axis=-1, keepdims=True)
            x = xc * jax.lax.rsqrt(var + 1e-5) * g_ref[...] + be_ref[...]
        xb = x.astype(jnp.bfloat16)

        if use_mask:
            maskf = mask_ref[...].astype(jnp.float32)          # (WPG, N, N)

        y = jnp.zeros((rows, C), jnp.float32)
        # Static unroll over heads; every slice below is a leading-dim index (no lane
        # relayouts) and every reshape only splits the leading row dim.
        for h in range(num_heads):
            q = jnp.dot(xb, wqkv_ref[0, h],                    # qk scale folded at init
                        preferred_element_type=jnp.float32) + bqkv_ref[0, h]
            k = jnp.dot(xb, wqkv_ref[1, h],
                        preferred_element_type=jnp.float32) + bqkv_ref[1, h]
            v = jnp.dot(xb, wqkv_ref[2, h],
                        preferred_element_type=jnp.float32) + bqkv_ref[2, h]
            q3 = q.reshape(WPG, N, head_dim).astype(jnp.bfloat16)
            k3 = k.reshape(WPG, N, head_dim).astype(jnp.bfloat16)
            v3 = v.reshape(WPG, N, head_dim).astype(jnp.bfloat16)
            s = jax.lax.dot_general(q3, k3, (((2,), (2,)), ((0,), (0,))),
                                    preferred_element_type=jnp.float32)   # (WPG,N,N)
            s = s + relb_ref[h].astype(jnp.float32)[None]
            if use_mask:
                s = s + maskf
            s = s - jnp.max(s, axis=-1, keepdims=True)
            p = jnp.exp(s)
            p = p * pl.reciprocal(jnp.sum(p, axis=-1, keepdims=True), approx=True)
            o3 = jax.lax.dot_general(p.astype(jnp.bfloat16), v3,
                                     (((2,), (1,)), ((0,), (0,))),
                                     preferred_element_type=jnp.float32)  # (WPG,N,hd)
            # per-head projection accumulated directly (replaces concat + proj)
            y = y + jnp.dot(o3.reshape(rows, head_dim).astype(jnp.bfloat16),
                            wproj_ref[h], preferred_element_type=jnp.float32)
        o_ref[0] = (y + bproj_ref[...]).astype(o_ref.dtype)    # single block store
    return kernel


def window_attention(x_flat, nW, N, mask, relb, wqkv, bqkv, wproj, bproj,
                     gamma, beta, num_heads):
    """x_flat: (B, nW*N, C) tokens in window order.
    gamma/beta == None -> norm1 not fused; mask == None -> no mask DMA'd / added."""
    B, R, C = x_flat.shape
    head_dim = C // num_heads
    use_mask = mask is not None
    fuse_ln = gamma is not None
    WPG = _pick_wpg(nW, N)
    rows = WPG * N
    kernel = _make_attn_kernel(num_heads, head_dim, C, N, WPG, use_mask, fuse_ln)

    in_specs = [pl.BlockSpec((1, rows, C), lambda b, w: (b, w, 0))]
    args = [x_flat]
    if fuse_ln:
        in_specs += [pl.BlockSpec((1, C), lambda b, w: (0, 0)),
                     pl.BlockSpec((1, C), lambda b, w: (0, 0))]
        args += [gamma, beta]
    if use_mask:
        in_specs += [pl.BlockSpec((WPG, N, N), lambda b, w: (w, 0, 0))]
        args += [mask]
    # TODO(synk): the grid-invariant operands below should be single-buffered
    # (pipeline_mode=pl.Buffered(1)) at production weight sizes to halve their VMEM.
    in_specs += [
        pl.BlockSpec((num_heads, N, N), lambda b, w: (0, 0, 0)),
        pl.BlockSpec((3, num_heads, C, head_dim), lambda b, w: (0, 0, 0, 0)),
        pl.BlockSpec((3, num_heads, 1, head_dim), lambda b, w: (0, 0, 0, 0)),
        pl.BlockSpec((num_heads, head_dim, C), lambda b, w: (0, 0, 0)),
        pl.BlockSpec((1, C), lambda b, w: (0, 0)),
    ]
    args += [relb, wqkv, bqkv, wproj, bproj]

    return pl.pallas_call(
        kernel,
        out_shape=jax.ShapeDtypeStruct((B, R, C), jnp.float32),
        grid_spec=pltpu.PrefetchScalarGridSpec(
            num_scalar_prefetch=0,
            grid=(B, nW // WPG),
            in_specs=in_specs,
            out_specs=pl.BlockSpec((1, rows, C), lambda b, w: (b, w, 0))),
        compiler_params=_cparams("parallel", "parallel"),
    )(*args)


# ----------------------------- plain-JAX glue -----------------------------

def window_partition_jax(x, ws):
    B, S, H, W, C = x.shape
    x = x.reshape(B, S // ws[0], ws[0], H // ws[1], ws[1], W // ws[2], ws[2], C)
    x = jnp.transpose(x, (0, 1, 3, 5, 2, 4, 6, 7))
    nW = (S // ws[0]) * (H // ws[1]) * (W // ws[2])
    return x.reshape(B, nW * ws[0] * ws[1] * ws[2], C), nW


def window_reverse_jax(flat, ws, B, Sp, Hp, Wp):
    C = flat.shape[-1]
    x = flat.reshape(B, Sp // ws[0], Hp // ws[1], Wp // ws[2], ws[0], ws[1], ws[2], C)
    x = jnp.transpose(x, (0, 1, 4, 2, 5, 3, 6, 7))
    return x.reshape(B, Sp, Hp, Wp, C)


def window_partition_np(x, ws):
    B, S, H, W, C = x.shape
    x = x.reshape(B, S // ws[0], ws[0], H // ws[1], ws[1], W // ws[2], ws[2], C)
    x = x.transpose(0, 1, 3, 5, 2, 4, 6, 7)
    return x.reshape(-1, ws[0], ws[1], ws[2], C)


@functools.lru_cache(maxsize=None)
def _attn_mask_np(S, H, W, ws, ss):
    Sp = int(math.ceil(S / ws[0])) * ws[0]
    Hp = int(math.ceil(H / ws[1])) * ws[1]
    Wp = int(math.ceil(W / ws[2])) * ws[2]
    img_mask = np.zeros((1, Sp, Hp, Wp, 1), dtype=np.float32)
    s_slices = (slice(0, -ws[0]), slice(-ws[0], -ss[0]), slice(-ss[0], None))
    h_slices = (slice(0, -ws[1]), slice(-ws[1], -ss[1]), slice(-ss[1], None))
    w_slices = (slice(0, -ws[2]), slice(-ws[2], -ss[2]), slice(-ss[2], None))
    cnt = 0
    for s in s_slices:
        for h in h_slices:
            for w in w_slices:
                img_mask[:, s, h, w, :] = cnt
                cnt += 1
    N = ws[0] * ws[1] * ws[2]
    mw = window_partition_np(img_mask, ws).reshape(-1, N)
    attn = mw[:, None, :] - mw[:, :, None]
    return np.where(attn != 0, -100.0, 0.0).astype(np.float32)      # (nW, N, N)


def compute_attn_mask(S, H, W, ws, ss):
    # mask values are exactly 0 / -100 -> lossless in bf16 (halves DMA + VMEM)
    return jnp.asarray(_attn_mask_np(S, H, W, tuple(ws), tuple(ss)),
                       dtype=jnp.bfloat16)


def relative_position_index(ws):
    coords = np.stack(np.meshgrid(np.arange(ws[0]), np.arange(ws[1]),
                                  np.arange(ws[2]), indexing='ij'))
    cf = coords.reshape(3, -1)
    rel = (cf[:, :, None] - cf[:, None, :]).transpose(1, 2, 0).astype(np.int64)
    rel[:, :, 0] += ws[0] - 1
    rel[:, :, 1] += ws[1] - 1
    rel[:, :, 2] += ws[2] - 1
    rel[:, :, 1] *= 2 * ws[2] - 1
    rel[:, :, 0] *= 2 * (ws[1] + ws[2]) - 1
    return rel.sum(-1)                                              # (N, N)


def init_block_params(key, dim, num_heads, window_size, mlp_ratio):
    ws = list(window_size)
    N = ws[0] * ws[1] * ws[2]
    hd = dim // num_heads
    scale = hd ** (-0.5)
    hidden = int(dim * mlp_ratio)
    table_size = (2 * ws[0] - 1) * (2 * ws[1] - 1) * (2 * ws[2] - 1)
    ks = jax.random.split(key, 5)

    rel_idx = relative_position_index(ws)
    table = 0.02 * jax.random.normal(ks[1], (table_size, num_heads), jnp.float32)
    bias = table[jnp.asarray(rel_idx.reshape(-1))].reshape(N, N, num_heads)
    rel_bias = jnp.transpose(bias, (2, 0, 1)).astype(jnp.bfloat16)   # (nH, N, N)

    qkv_w = 0.02 * jax.random.normal(ks[0], (dim, 3 * dim), jnp.float32)
    qkv_b = jnp.zeros((3 * dim,), jnp.float32)
    # (C, 3C) -> (3, nH, C, hd): per-head weight blocks; fold qk scale into Q; bf16 once.
    wqkv = jnp.transpose(qkv_w.reshape(dim, 3, num_heads, hd), (1, 2, 0, 3))
    wqkv = wqkv.at[0].multiply(scale).astype(jnp.bfloat16)
    bqkv = qkv_b.reshape(3, num_heads, 1, hd).at[0].multiply(scale)

    proj_w = 0.02 * jax.random.normal(ks[2], (dim, dim), jnp.float32)

    return {
        'norm1_w': jnp.ones((1, dim), jnp.float32),
        'norm1_b': jnp.zeros((1, dim), jnp.float32),
        'qkv_w': wqkv,                                               # (3,nH,C,hd) bf16
        'qkv_b': bqkv,                                               # (3,nH,1,hd) f32
        'rel_bias': rel_bias,                                        # (nH,N,N) bf16
        'proj_w': proj_w.reshape(num_heads, hd, dim).astype(jnp.bfloat16),
        'proj_b': jnp.zeros((1, dim), jnp.float32),
        'norm2_w': jnp.ones((1, dim), jnp.float32),
        'norm2_b': jnp.zeros((1, dim), jnp.float32),
        'fc1_w': (0.02 * jax.random.normal(ks[3], (dim, hidden), jnp.float32)
                  ).astype(jnp.bfloat16),
        'fc1_b': jnp.zeros((1, hidden), jnp.float32),
        'fc2_w': (0.02 * jax.random.normal(ks[4], (hidden, dim), jnp.float32)
                  ).astype(jnp.bfloat16),
        'fc2_b': jnp.zeros((1, dim), jnp.float32),
    }


def swin_block(x, S, H, W, p, window_size, shift_size, num_heads):
    B, L, C = x.shape
    assert L == S * H * W
    ws = list(window_size)
    if (S, H, W) == tuple(ws):
        shift_size = [0, 0, 0]
    shifted = min(shift_size) > 0            # matches the torch reference's check
    shortcut = x

    pad_g = (ws[0] - S % ws[0]) % ws[0]
    pad_b = (ws[1] - H % ws[1]) % ws[1]
    pad_r = (ws[2] - W % ws[2]) % ws[2]
    need_pad = (pad_g + pad_b + pad_r) > 0

    if need_pad:
        # fallback path: torch pads AFTER norm1, so LN cannot be fused with zero-pad
        xn = layernorm(x.reshape(B * L, C), p['norm1_w'], p['norm1_b'])
        xs = xn.reshape(B, S, H, W, C)
        xs = jnp.pad(xs, ((0, 0), (0, pad_g), (0, pad_b), (0, pad_r), (0, 0)))
        gamma, beta = None, None
    else:
        xs = x.reshape(B, S, H, W, C)        # LN fused inside the attention kernel
        gamma, beta = p['norm1_w'], p['norm1_b']

    Sp, Hp, Wp = S + pad_g, H + pad_b, W + pad_r
    if shifted:
        xs = jnp.roll(xs, shift=(-shift_size[0], -shift_size[1], -shift_size[2]),
                      axis=(1, 2, 3))
        mask = compute_attn_mask(S, H, W, ws, shift_size)
    else:
        mask = None                          # no mask materialized / DMA'd / added

    N = ws[0] * ws[1] * ws[2]
    x_flat, nW = window_partition_jax(xs, ws)                        # (B, nW*N, C)
    attn = window_attention(x_flat, nW, N, mask, p['rel_bias'],
                            p['qkv_w'], p['qkv_b'], p['proj_w'], p['proj_b'],
                            gamma, beta, num_heads)
    xs = window_reverse_jax(attn, ws, B, Sp, Hp, Wp)
    if shifted:
        xs = jnp.roll(xs, shift=tuple(shift_size), axis=(1, 2, 3))
    if need_pad:
        xs = xs[:, :S, :H, :W, :]

    # fused: residual-1 + norm2 + MLP + residual-2, one kernel, one HBM pass
    out = mlp_block(shortcut.reshape(B * L, C), xs.reshape(B * L, C),
                    p['norm2_w'], p['norm2_b'],
                    p['fc1_w'], p['fc1_b'], p['fc2_w'], p['fc2_b'])
    return out.reshape(B, L, C)


def basic_layer_forward(x, S, H, W, params, dim, num_heads, window_size, mlp_ratio):
    # stage 1: block11 runs with shift=[0,0,0] -> the mask torch builds is never used,
    # so it is not built at all.
    x = swin_block(x, S, H, W, params['block11'], window_size, [0, 0, 0], num_heads)

    # stage 2: channel-split blocks with rectangular shifted windows
    ws_total = [[window_size[0], window_size[1] // 2, window_size[2] * 2],
                [window_size[0], window_size[1] * 2, window_size[2] // 2]]
    ss_total = [[w // 2 for w in ws_total[0]], [w // 2 for w in ws_total[1]]]
    split = int(dim * 0.5)
    x_total = []
    for idx in range(2):
        if idx == 0:
            x_this, bp = x[:, :, :split], params['block1']
        else:
            x_this, bp = x[:, :, split:], params['block2']
        nh = int(num_heads * 0.5)
        x_total.append(swin_block(x_this, S, H, W, bp, ws_total[idx], ss_total[idx], nh))
    x = jnp.concatenate(x_total, axis=2)
    B, L, C = x.shape
    x = linear(x.reshape(B * L, C), params['dim_mix_w'],
               params['dim_mix_b']).reshape(B, L, C)
    # TODO(synk): `downsample` (PatchMerging) is not defined in the reference snippet;
    # this reproduces the downsample=None branch: return (x, S, H, W).
    return x, S, H, W


if __name__ == "__main__":
    B, S, H, W = 2, 4, 8, 8
    dim, num_heads = 16, 4
    window_size = [2, 4, 4]
    mlp_ratio = 4.0
    L = S * H * W

    key = jax.random.PRNGKey(0)
    kx, k1, k2, k3, k4 = jax.random.split(key, 5)
    x = jax.random.normal(kx, (B, L, dim), jnp.float32)

    params = {
        'block11': init_block_params(k1, dim, num_heads, window_size, mlp_ratio),
        'block1': init_block_params(
            k2, dim // 2, num_heads // 2,
            [window_size[0], window_size[1] // 2, window_size[2] * 2], mlp_ratio),
        'block2': init_block_params(
            k3, dim // 2, num_heads // 2,
            [window_size[0], window_size[1] * 2, window_size[2] // 2], mlp_ratio),
        'dim_mix_w': (0.02 * jax.random.normal(k4, (dim, dim), jnp.float32)
                      ).astype(jnp.bfloat16),
        'dim_mix_b': jnp.zeros((1, dim), jnp.float32),
    }

    out, S_o, H_o, W_o = basic_layer_forward(x, S, H, W, params, dim, num_heads,
                                             window_size, mlp_ratio)
    jax.block_until_ready(out)
    assert out.shape == (B, L, dim)
    print("KERNEL_OK")
</pallas_src>

<mosaic_0001>
module attributes {stable_mosaic.version = 11 : i64} {
  func.func @kernel(%arg0: i32, %arg1: i32, %arg2: memref<1x256x16xf32, #tpu.memory_space<vmem>>, %arg3: memref<1x16xf32, #tpu.memory_space<vmem>>, %arg4: memref<1x16xf32, #tpu.memory_space<vmem>>, %arg5: memref<4x32x32xbf16, #tpu.memory_space<vmem>>, %arg6: memref<3x4x16x4xbf16, #tpu.memory_space<vmem>>, %arg7: memref<3x4x1x4xf32, #tpu.memory_space<vmem>>, %arg8: memref<4x4x16xbf16, #tpu.memory_space<vmem>>, %arg9: memref<1x16xf32, #tpu.memory_space<vmem>>, %arg10: memref<1x256x16xf32, #tpu.memory_space<vmem>>) attributes {dimension_semantics = [#tpu.dimension_semantics<parallel>, #tpu.dimension_semantics<parallel>], iteration_bounds = array<i64: 2, 1>, scalar_prefetch = 0 : i64, scratch_operands = 0 : i64, tpu.core_type = #tpu.core_type<tc>, window_params = [{transform_indices = @transform_0, window_bounds = array<i64: 1, 256, 16>}, {pipeline_mode = #tpu.pipeline_mode<synchronous>, transform_indices = @transform_1, window_bounds = array<i64: 1, 16>}, {pipeline_mode = #tpu.pipeline_mode<synchronous>, transform_indices = @transform_2, window_bounds = array<i64: 1, 16>}, {pipeline_mode = #tpu.pipeline_mode<synchronous>, transform_indices = @transform_3, window_bounds = array<i64: 4, 32, 32>}, {pipeline_mode = #tpu.pipeline_mode<synchronous>, transform_indices = @transform_4, window_bounds = array<i64: 3, 4, 16, 4>}, {pipeline_mode = #tpu.pipeline_mode<synchronous>, transform_indices = @transform_5, window_bounds = array<i64: 3, 4, 1, 4>}, {pipeline_mode = #tpu.pipeline_mode<synchronous>, transform_indices = @transform_6, window_bounds = array<i64: 4, 4, 16>}, {pipeline_mode = #tpu.pipeline_mode<synchronous>, transform_indices = @transform_7, window_bounds = array<i64: 1, 16>}, {transform_indices = @transform_8, window_bounds = array<i64: 1, 256, 16>}]} {
    %c0 = arith.constant 0 : index
    %c0_0 = arith.constant 0 : index
    %c0_1 = arith.constant 0 : index
    %0 = vector.load %arg2[%c0, %c0_0, %c0_1] : memref<1x256x16xf32, #tpu.memory_space<vmem>>, vector<1x256x16xf32>
    %1 = vector.shape_cast %0 : vector<1x256x16xf32> to vector<256x16xf32>
    %cst = arith.constant dense<0.000000e+00> : vector<256xf32>
    %2 = vector.multi_reduction <add>, %1, %cst [1] : vector<256x16xf32> to vector<256xf32>
    %3 = vector.shape_cast %2 : vector<256xf32> to vector<256x1xf32>
    %cst_2 = arith.constant 1.600000e+01 : f32
    %4 = vector.broadcast %cst_2 : f32 to vector<256x1xf32>
    %5 = arith.divf %3, %4 : vector<256x1xf32>
    %6 = vector.broadcast %5 : vector<256x1xf32> to vector<256x16xf32>
    %7 = arith.subf %1, %6 : vector<256x16xf32>
    %8 = arith.mulf %7, %7 : vector<256x16xf32>
    %cst_3 = arith.constant dense<0.000000e+00> : vector<256xf32>
    %9 = vector.multi_reduction <add>, %8, %cst_3 [1] : vector<256x16xf32> to vector<256xf32>
    %10 = vector.shape_cast %9 : vector<256xf32> to vector<256x1xf32>
    %cst_4 = arith.constant 1.600000e+01 : f32
    %11 = vector.broadcast %cst_4 : f32 to vector<256x1xf32>
    %12 = arith.divf %10, %11 : vector<256x1xf32>
    %cst_5 = arith.constant 9.99999974E-6 : f32
    %13 = vector.broadcast %cst_5 : f32 to vector<256x1xf32>
    %14 = arith.addf %12, %13 : vector<256x1xf32>
    %15 = math.rsqrt %14 : vector<256x1xf32>
    %16 = vector.broadcast %15 : vector<256x1xf32> to vector<256x16xf32>
    %17 = arith.mulf %7, %16 : vector<256x16xf32>
    %c0_6 = arith.constant 0 : index
    %c0_7 = arith.constant 0 : index
    %18 = vector.load %arg3[%c0_6, %c0_7] : memref<1x16xf32, #tpu.memory_space<vmem>>, vector<1x16xf32>
    %19 = vector.broadcast %18 : vector<1x16xf32> to vector<256x16xf32>
    %20 = arith.mulf %17, %19 : vector<256x16xf32>
    %c0_8 = arith.constant 0 : index
    %c0_9 = arith.constant 0 : index
    %21 = vector.load %arg4[%c0_8, %c0_9] : memref<1x16xf32, #tpu.memory_space<vmem>>, vector<1x16xf32>
    %22 = vector.broadcast %21 : vector<1x16xf32> to vector<256x16xf32>
    %23 = arith.addf %20, %22 : vector<256x16xf32>
    %24 = arith.truncf %23 : vector<256x16xf32> to vector<256x16xbf16>
    %cst_10 = arith.constant 0.000000e+00 : f32
    %25 = vector.broadcast %cst_10 : f32 to vector<256x16xf32>
    %c0_11 = arith.constant 0 : index
    %c0_12 = arith.constant 0 : index
    %c0_13 = arith.constant 0 : index
    %c0_14 = arith.constant 0 : index
    %26 = vector.load %arg6[%c0_11, %c0_12, %c0_13, %c0_14] : memref<3x4x16x4xbf16, #tpu.memory_space<vmem>>, vector<1x1x16x4xbf16>
    %27 = vector.shape_cast %26 : vector<1x1x16x4xbf16> to vector<16x4xbf16>
    %cst_15 = arith.constant dense<0.000000e+00> : vector<256x4xf32>
    %28 = tpu.matmul %24, %27, %cst_15 {dimension_numbers = #tpu.dot_dimension_numbers<[1], [0], [0], [1], [0, 0, 1, 1], [], []>} : vector<256x16xbf16>, vector<16x4xbf16>, vector<256x4xf32> -> vector<256x4xf32>
    %c0_16 = arith.constant 0 : index
    %c0_17 = arith.constant 0 : index
    %c0_18 = arith.constant 0 : index
    %c0_19 = arith.constant 0 : index
    %29 = vector.load %arg7[%c0_16, %c0_17, %c0_18, %c0_19] : memref<3x4x1x4xf32, #tpu.memory_space<vmem>>, vector<1x1x1x4xf32>
    %30 = vector.shape_cast %29 : vector<1x1x1x4xf32> to vector<1x4xf32>
    %31 = vector.broadcast %30 : vector<1x4xf32> to vector<256x4xf32>
    %32 = arith.addf %28, %31 : vector<256x4xf32>
    %c1 = arith.constant 1 : index
    %c0_20 = arith.constant 0 : index
    %c0_21 = arith.constant 0 : index
    %c0_22 = arith.constant 0 : index
    %33 = vector.load %arg6[%c1, %c0_20, %c0_21, %c0_22] : memref<3x4x16x4xbf16, #tpu.memory_space<vmem>>, vector<1x1x16x4xbf16>
    %34 = vector.shape_cast %33 : vector<1x1x16x4xbf16> to vector<16x4xbf16>
    %cst_23 = arith.constant dense<0.000000e+00> : vector<256x4xf32>
    %35 = tpu.matmul %24, %34, %cst_23 {dimension_numbers = #tpu.dot_dimension_numbers<[1], [0], [0], [1], [0, 0, 1, 1], [], []>} : vector<256x16xbf16>, vector<16x4xbf16>, vector<256x4xf32> -> vector<256x4xf32>
    %c1_24 = arith.constant 1 : index
    %c0_25 = arith.constant 0 : index
    %c0_26 = arith.constant 0 : index
    %c0_27 = arith.constant 0 : index
    %36 = vector.load %arg7[%c1_24, %c0_25, %c0_26, %c0_27] : memref<3x4x1x4xf32, #tpu.memory_space<vmem>>, vector<1x1x1x4xf32>
    %37 = vector.shape_cast %36 : vector<1x1x1x4xf32> to vector<1x4xf32>
    %38 = vector.broadcast %37 : vector<1x4xf32> to vector<256x4xf32>
    %39 = arith.addf %35, %38 : vector<256x4xf32>
    %c2 = arith.constant 2 : index
    %c0_28 = arith.constant 0 : index
    %c0_29 = arith.constant 0 : index
    %c0_30 = arith.constant 0 : index
    %40 = vector.load %arg6[%c2, %c0_28, %c0_29, %c0_30] : memref<3x4x16x4xbf16, #tpu.memory_space<vmem>>, vector<1x1x16x4xbf16>
    %41 = vector.shape_cast %40 : vector<1x1x16x4xbf16> to vector<16x4xbf16>
    %cst_31 = arith.constant dense<0.000000e+00> : vector<256x4xf32>
    %42 = tpu.matmul %24, %41, %cst_31 {dimension_numbers = #tpu.dot_dimension_numbers<[1], [0], [0], [1], [0, 0, 1, 1], [], []>} : vector<256x16xbf16>, vector<16x4xbf16>, vector<256x4xf32> -> vector<256x4xf32>
    %c2_32 = arith.constant 2 : index
    %c0_33 = arith.constant 0 : index
    %c0_34 = arith.constant 0 : index
    %c0_35 = arith.constant 0 : index
    %43 = vector.load %arg7[%c2_32, %c0_33, %c0_34, %c0_35] : memref<3x4x1x4xf32, #tpu.memory_space<vmem>>, vector<1x1x1x4xf32>
    %44 = vector.shape_cast %43 : vector<1x1x1x4xf32> to vector<1x4xf32>
    %45 = vector.broadcast %44 : vector<1x4xf32> to vector<256x4xf32>
    %46 = arith.addf %42, %45 : vector<256x4xf32>
    %47 = vector.shape_cast %32 : vector<256x4xf32> to vector<8x32x4xf32>
    %48 = arith.truncf %47 : vector<8x32x4xf32> to vector<8x32x4xbf16>
    %49 = vector.shape_cast %39 : vector<256x4xf32> to vector<8x32x4xf32>
    %50 = arith.truncf %49 : vector<8x32x4xf32> to vector<8x32x4xbf16>
    %51 = vector.shape_cast %46 : vector<256x4xf32> to vector<8x32x4xf32>
    %52 = arith.truncf %51 : vector<8x32x4xf32> to vector<8x32x4xbf16>
    %cst_36 = arith.constant dense<0.000000e+00> : vector<8x32x32xf32>
    %53 = tpu.matmul %48, %50, %cst_36 {dimension_numbers = #tpu.dot_dimension_numbers<[2], [2], [1], [1], [0, 0, 0, 1, 1, 1], [0], [0]>} : vector<8x32x4xbf16>, vector<8x32x4xbf16>, vector<8x32x32xf32> -> vector<8x32x32xf32>
    %c0_37 = arith.constant 0 : index
    %c0_38 = arith.constant 0 : index
    %c0_39 = arith.constant 0 : index
    %54 = vector.load %arg5[%c0_37, %c0_38, %c0_39] : memref<4x32x32xbf16, #tpu.memory_space<vmem>>, vector<1x32x32xbf16>
    %55 = vector.shape_cast %54 : vector<1x32x32xbf16> to vector<32x32xbf16>
    %56 = arith.extf %55 : vector<32x32xbf16> to vector<32x32xf32>
    %57 = vector.shape_cast %56 : vector<32x32xf32> to vector<1x32x32xf32>
    %58 = vector.broadcast %57 : vector<1x32x32xf32> to vector<8x32x32xf32>
    %59 = arith.addf %53, %58 : vector<8x32x32xf32>
    %cst_40 = arith.constant dense<0xFF800000> : vector<8x32xf32>
    %60 = vector.multi_reduction <maximumf>, %59, %cst_40 [2] : vector<8x32x32xf32> to vector<8x32xf32>
    %61 = vector.shape_cast %60 : vector<8x32xf32> to vector<8x32x1xf32>
    %62 = vector.broadcast %61 : vector<8x32x1xf32> to vector<8x32x32xf32>
    %63 = arith.subf %59, %62 : vector<8x32x32xf32>
    %64 = math.exp %63 : vector<8x32x32xf32>
    %cst_41 = arith.constant dense<0.000000e+00> : vector<8x32xf32>
    %65 = vector.multi_reduction <add>, %64, %cst_41 [2] : vector<8x32x32xf32> to vector<8x32xf32>
    %66 = vector.shape_cast %65 : vector<8x32xf32> to vector<8x32x1xf32>
    %67 = tpu.reciprocal %66 {approx = true} : vector<8x32x1xf32> -> vector<8x32x1xf32>
    %68 = vector.broadcast %67 : vector<8x32x1xf32> to vector<8x32x32xf32>
    %69 = arith.mulf %64, %68 : vector<8x32x32xf32>
    %70 = arith.truncf %69 : vector<8x32x32xf32> to vector<8x32x32xbf16>
    %cst_42 = arith.constant dense<0.000000e+00> : vector<8x32x4xf32>
    %71 = tpu.matmul %70, %52, %cst_42 {dimension_numbers = #tpu.dot_dimension_numbers<[2], [1], [1], [2], [0, 0, 0, 1, 1, 2], [0], [0]>} : vector<8x32x32xbf16>, vector<8x32x4xbf16>, vector<8x32x4xf32> -> vector<8x32x4xf32>
    %72 = vector.shape_cast %71 : vector<8x32x4xf32> to vector<256x4xf32>
    %73 = arith.truncf %72 : vector<256x4xf32> to vector<256x4xbf16>
    %c0_43 = arith.constant 0 : index
    %c0_44 = arith.constant 0 : index
    %c0_45 = arith.constant 0 : index
    %74 = vector.load %arg8[%c0_43, %c0_44, %c0_45] : memref<4x4x16xbf16, #tpu.memory_space<vmem>>, vector<1x4x16xbf16>
    %75 = vector.shape_cast %74 : vector<1x4x16xbf16> to vector<4x16xbf16>
    %cst_46 = arith.constant dense<0.000000e+00> : vector<256x16xf32>
    %76 = tpu.matmul %73, %75, %cst_46 {dimension_numbers = #tpu.dot_dimension_numbers<[1], [0], [0], [1], [0, 0, 1, 1], [], []>} : vector<256x4xbf16>, vector<4x16xbf16>, vector<256x16xf32> -> vector<256x16xf32>
    %77 = arith.addf %25, %76 : vector<256x16xf32>
    %c0_47 = arith.constant 0 : index
    %c1_48 = arith.constant 1 : index
    %c0_49 = arith.constant 0 : index
    %c0_50 = arith.constant 0 : index
    %78 = vector.load %arg6[%c0_47, %c1_48, %c0_49, %c0_50] : memref<3x4x16x4xbf16, #tpu.memory_space<vmem>>, vector<1x1x16x4xbf16>
    %79 = vector.shape_cast %78 : vector<1x1x16x4xbf16> to vector<16x4xbf16>
    %cst_51 = arith.constant dense<0.000000e+00> : vector<256x4xf32>
    %80 = tpu.matmul %24, %79, %cst_51 {dimension_numbers = #tpu.dot_dimension_numbers<[1], [0], [0], [1], [0, 0, 1, 1], [], []>} : vector<256x16xbf16>, vector<16x4xbf16>, vector<256x4xf32> -> vector<256x4xf32>
    %c0_52 = arith.constant 0 : index
    %c1_53 = arith.constant 1 : index
    %c0_54 = arith.constant 0 : index
    %c0_55 = arith.constant 0 : index
    %81 = vector.load %arg7[%c0_52, %c1_53, %c0_54, %c0_55] : memref<3x4x1x4xf32, #tpu.memory_space<vmem>>, vector<1x1x1x4xf32>
    %82 = vector.shape_cast %81 : vector<1x1x1x4xf32> to vector<1x4xf32>
    %83 = vector.broadcast %82 : vector<1x4xf32> to vector<256x4xf32>
    %84 = arith.addf %80, %83 : vector<256x4xf32>
    %c1_56 = arith.constant 1 : index
    %c1_57 = arith.constant 1 : index
    %c0_58 = arith.constant 0 : index
    %c0_59 = arith.constant 0 : index
    %85 = vector.load %arg6[%c1_56, %c1_57, %c0_58, %c0_59] : memref<3x4x16x4xbf16, #tpu.memory_space<vmem>>, vector<1x1x16x4xbf16>
    %86 = vector.shape_cast %85 : vector<1x1x16x4xbf16> to vector<16x4xbf16>
    %cst_60 = arith.constant dense<0.000000e+00> : vector<256x4xf32>
    %87 = tpu.matmul %24, %86, %cst_60 {dimension_numbers = #tpu.dot_dimension_numbers<[1], [0], [0], [1], [0, 0, 1, 1], [], []>} : vector<256x16xbf16>, vector<16x4xbf16>, vector<256x4xf32> -> vector<256x4xf32>
    %c1_61 = arith.constant 1 : index
    %c1_62 = arith.constant 1 : index
    %c0_63 = arith.constant 0 : index
    %c0_64 = arith.constant 0 : index
    %88 = vector.load %arg7[%c1_61, %c1_62, %c0_63, %c0_64] : memref<3x4x1x4xf32, #tpu.memory_space<vmem>>, vector<1x1x1x4xf32>
    %89 = vector.shape_cast %88 : vector<1x1x1x4xf32> to vector<1x4xf32>
    %90 = vector.broadcast %89 : vector<1x4xf32> to vector<256x4xf32>
    %91 = arith.addf %87, %90 : vector<256x4xf32>
    %c2_65 = arith.constant 2 : index
    %c1_66 = arith.constant 1 : index
    %c0_67 = arith.constant 0 : index
    %c0_68 = arith.constant 0 : index
    %92 = vector.load %arg6[%c2_65, %c1_66, %c0_67, %c0_68] : memref<3x4x16x4xbf16, #tpu.memory_space<vmem>>, vector<1x1x16x4xbf16>
    %93 = vector.shape_cast %92 : vector<1x1x16x4xbf16> to vector<16x4xbf16>
    %cst_69 = arith.constant dense<0.000000e+00> : vector<256x4xf32>
    %94 = tpu.matmul %24, %93, %cst_69 {dimension_numbers = #tpu.dot_dimension_numbers<[1], [0], [0], [1], [0, 0, 1, 1], [], []>} : vector<256x16xbf16>, vector<16x4xbf16>, vector<256x4xf32> -> vector<256x4xf32>
    %c2_70 = arith.constant 2 : index
    %c1_71 = arith.constant 1 : index
    %c0_72 = arith.constant 0 : index
    %c0_73 = arith.constant 0 : index
    %95 = vector.load %arg7[%c2_70, %c1_71, %c0_72, %c0_73] : memref<3x4x1x4xf32, #tpu.memory_space<vmem>>, vector<1x1x1x4xf32>
    %96 = vector.shape_cast %95 : vector<1x1x1x4xf32> to vector<1x4xf32>
    %97 = vector.broadcast %96 : vector<1x4xf32> to vector<256x4xf32>
    %98 = arith.addf %94, %97 : vector<256x4xf32>
    %99 = vector.shape_cast %84 : vector<256x4xf32> to vector<8x32x4xf32>
    %100 = arith.truncf %99 : vector<8x32x4xf32> to vector<8x32x4xbf16>
    %101 = vector.shape_cast %91 : vector<256x4xf32> to vector<8x32x4xf32>
    %102 = arith.truncf %101 : vector<8x32x4xf32> to vector<8x32x4xbf16>
    %103 = vector.shape_cast %98 : vector<256x4xf32> to vector<8x32x4xf32>
    %104 = arith.truncf %103 : vector<8x32x4xf32> to vector<8x32x4xbf16>
    %cst_74 = arith.constant dense<0.000000e+00> : vector<8x32x32xf32>
    %105 = tpu.matmul %100, %102, %cst_74 {dimension_numbers = #tpu.dot_dimension_numbers<[2], [2], [1], [1], [0, 0, 0, 1, 1, 1], [0], [0]>} : vector<8x32x4xbf16>, vector<8x32x4xbf16>, vector<8x32x32xf32> -> vector<8x32x32xf32>
    %c1_75 = arith.constant 1 : index
    %c0_76 = arith.constant 0 : index
    %c0_77 = arith.constant 0 : index
    %106 = vector.load %arg5[%c1_75, %c0_76, %c0_77] : memref<4x32x32xbf16, #tpu.memory_space<vmem>>, vector<1x32x32xbf16>
    %107 = vector.shape_cast %106 : vector<1x32x32xbf16> to vector<32x32xbf16>
    %108 = arith.extf %107 : vector<32x32xbf16> to vector<32x32xf32>
    %109 = vector.shape_cast %108 : vector<32x32xf32> to vector<1x32x32xf32>
    %110 = vector.broadcast %109 : vector<1x32x32xf32> to vector<8x32x32xf32>
    %111 = arith.addf %105, %110 : vector<8x32x32xf32>
    %cst_78 = arith.constant dense<0xFF800000> : vector<8x32xf32>
    %112 = vector.multi_reduction <maximumf>, %111, %cst_78 [2] : vector<8x32x32xf32> to vector<8x32xf32>
    %113 = vector.shape_cast %112 : vector<8x32xf32> to vector<8x32x1xf32>
    %114 = vector.broadcast %113 : vector<8x32x1xf32> to vector<8x32x32xf32>
    %115 = arith.subf %111, %114 : vector<8x32x32xf32>
    %116 = math.exp %115 : vector<8x32x32xf32>
    %cst_79 = arith.constant dense<0.000000e+00> : vector<8x32xf32>
    %117 = vector.multi_reduction <add>, %116, %cst_79 [2] : vector<8x32x32xf32> to vector<8x32xf32>
    %118 = vector.shape_cast %117 : vector<8x32xf32> to vector<8x32x1xf32>
    %119 = tpu.reciprocal %118 {approx = true} : vector<8x32x1xf32> -> vector<8x32x1xf32>
    %120 = vector.broadcast %119 : vector<8x32x1xf32> to vector<8x32x32xf32>
    %121 = arith.mulf %116, %120 : vector<8x32x32xf32>
    %122 = arith.truncf %121 : vector<8x32x32xf32> to vector<8x32x32xbf16>
    %cst_80 = arith.constant dense<0.000000e+00> : vector<8x32x4xf32>
    %123 = tpu.matmul %122, %104, %cst_80 {dimension_numbers = #tpu.dot_dimension_numbers<[2], [1], [1], [2], [0, 0, 0, 1, 1, 2], [0], [0]>} : vector<8x32x32xbf16>, vector<8x32x4xbf16>, vector<8x32x4xf32> -> vector<8x32x4xf32>
    %124 = vector.shape_cast %123 : vector<8x32x4xf32> to vector<256x4xf32>
    %125 = arith.truncf %124 : vector<256x4xf32> to vector<256x4xbf16>
    %c1_81 = arith.constant 1 : index
    %c0_82 = arith.constant 0 : index
    %c0_83 = arith.constant 0 : index
    %126 = vector.load %arg8[%c1_81, %c0_82, %c0_83] : memref<4x4x16xbf16, #tpu.memory_space<vmem>>, vector<1x4x16xbf16>
    %127 = vector.shape_cast %126 : vector<1x4x16xbf16> to vector<4x16xbf16>
    %cst_84 = arith.constant dense<0.000000e+00> : vector<256x16xf32>
    %128 = tpu.matmul %125, %127, %cst_84 {dimension_numbers = #tpu.dot_dimension_numbers<[1], [0], [0], [1], [0, 0, 1, 1], [], []>} : vector<256x4xbf16>, vector<4x16xbf16>, vector<256x16xf32> -> vector<256x16xf32>
    %129 = arith.addf %77, %128 : vector<256x16xf32>
    %c0_85 = arith.constant 0 : index
    %c2_86 = arith.constant 2 : index
    %c0_87 = arith.constant 0 : index
    %c0_88 = arith.constant 0 : index
    %130 = vector.load %arg6[%c0_85, %c2_86, %c0_87, %c0_88] : memref<3x4x16x4xbf16, #tpu.memory_space<vmem>>, vector<1x1x16x4xbf16>
    %131 = vector.shape_cast %130 : vector<1x1x16x4xbf16> to vector<16x4xbf16>
    %cst_89 = arith.constant dense<0.000000e+00> : vector<256x4xf32>
    %132 = tpu.matmul %24, %131, %cst_89 {dimension_numbers = #tpu.dot_dimension_numbers<[1], [0], [0], [1], [0, 0, 1, 1], [], []>} : vector<256x16xbf16>, vector<16x4xbf16>, vector<256x4xf32> -> vector<256x4xf32>
    %c0_90 = arith.constant 0 : index
    %c2_91 = arith.constant 2 : index
    %c0_92 = arith.constant 0 : index
    %c0_93 = arith.constant 0 : index
    %133 = vector.load %arg7[%c0_90, %c2_91, %c0_92, %c0_93] : memref<3x4x1x4xf32, #tpu.memory_space<vmem>>, vector<1x1x1x4xf32>
    %134 = vector.shape_cast %133 : vector<1x1x1x4xf32> to vector<1x4xf32>
    %135 = vector.broadcast %134 : vector<1x4xf32> to vector<256x4xf32>
    %136 = arith.addf %132, %135 : vector<256x4xf32>
    %c1_94 = arith.constant 1 : index
    %c2_95 = arith.constant 2 : index
    %c0_96 = arith.constant 0 : index
    %c0_97 = arith.constant 0 : index
    %137 = vector.load %arg6[%c1_94, %c2_95, %c0_96, %c0_97] : memref<3x4x16x4xbf16, #tpu.memory_space<vmem>>, vector<1x1x16x4xbf16>
    %138 = vector.shape_cast %137 : vector<1x1x16x4xbf16> to vector<16x4xbf16>
    %cst_98 = arith.constant dense<0.000000e+00> : vector<256x4xf32>
    %139 = tpu.matmul %24, %138, %cst_98 {dimension_numbers = #tpu.dot_dimension_numbers<[1], [0], [0], [1], [0, 0, 1, 1], [], []>} : vector<256x16xbf16>, vector<16x4xbf16>, vector<256x4xf32> -> vector<256x4xf32>
    %c1_99 = arith.constant 1 : index
    %c2_100 = arith.constant 2 : index
    %c0_101 = arith.constant 0 : index
    %c0_102 = arith.constant 0 : index
    %140 = vector.load %arg7[%c1_99, %c2_100, %c0_101, %c0_102] : memref<3x4x1x4xf32, #tpu.memory_space<vmem>>, vector<1x1x1x4xf32>
    %141 = vector.shape_cast %140 : vector<1x1x1x4xf32> to vector<1x4xf32>
    %142 = vector.broadcast %141 : vector<1x4xf32> to vector<256x4xf32>
    %143 = arith.addf %139, %142 : vector<256x4xf32>
    %c2_103 = arith.constant 2 : index
    %c2_104 = arith.constant 2 : index
    %c0_105 = arith.constant 0 : index
    %c0_106 = arith.constant 0 : index
    %144 = vector.load %arg6[%c2_103, %c2_104, %c0_105, %c0_106] : memref<3x4x16x4xbf16, #tpu.memory_space<vmem>>, vector<1x1x16x4xbf16>
    %145 = vector.shape_cast %144 : vector<1x1x16x4xbf16> to vector<16x4xbf16>
    %cst_107 = arith.constant dense<0.000000e+00> : vector<256x4xf32>
    %146 = tpu.matmul %24, %145, %cst_107 {dimension_numbers = #tpu.dot_dimension_numbers<[1], [0], [0], [1], [0, 0, 1, 1], [], []>} : vector<256x16xbf16>, vector<16x4xbf16>, vector<256x4xf32> -> vector<256x4xf32>
    %c2_108 = arith.constant 2 : index
    %c2_109 = arith.constant 2 : index
    %c0_110 = arith.constant 0 : index
    %c0_111 = arith.constant 0 : index
    %147 = vector.load %arg7[%c2_108, %c2_109, %c0_110, %c0_111] : memref<3x4x1x4xf32, #tpu.memory_space<vmem>>, vector<1x1x1x4xf32>
    %148 = vector.shape_cast %147 : vector<1x1x1x4xf32> to vector<1x4xf32>
    %149 = vector.broadcast %148 : vector<1x4xf32> to vector<256x4xf32>
    %150 = arith.addf %146, %149 : vector<256x4xf32>
    %151 = vector.shape_cast %136 : vector<256x4xf32> to vector<8x32x4xf32>
    %152 = arith.truncf %151 : vector<8x32x4xf32> to vector<8x32x4xbf16>
    %153 = vector.shape_cast %143 : vector<256x4xf32> to vector<8x32x4xf32>
    %154 = arith.truncf %153 : vector<8x32x4xf32> to vector<8x32x4xbf16>
    %155 = vector.shape_cast %150 : vector<256x4xf32> to vector<8x32x4xf32>
    %156 = arith.truncf %155 : vector<8x32x4xf32> to vector<8x32x4xbf16>
    %cst_112 = arith.constant dense<0.000000e+00> : vector<8x32x32xf32>
    %157 = tpu.matmul %152, %154, %cst_112 {dimension_numbers = #tpu.dot_dimension_numbers<[2], [2], [1], [1], [0, 0, 0, 1, 1, 1], [0], [0]>} : vector<8x32x4xbf16>, vector<8x32x4xbf16>, vector<8x32x32xf32> -> vector<8x32x32xf32>
    %c2_113 = arith.constant 2 : index
    %c0_114 = arith.constant 0 : index
    %c0_115 = arith.constant 0 : index
    %158 = vector.load %arg5[%c2_113, %c0_114, %c0_115] : memref<4x32x32xbf16, #tpu.memory_space<vmem>>, vector<1x32x32xbf16>
    %159 = vector.shape_cast %158 : vector<1x32x32xbf16> to vector<32x32xbf16>
    %160 = arith.extf %159 : vector<32x32xbf16> to vector<32x32xf32>
    %161 = vector.shape_cast %160 : vector<32x32xf32> to vector<1x32x32xf32>
    %162 = vector.broadcast %161 : vector<1x32x32xf32> to vector<8x32x32xf32>
    %163 = arith.addf %157, %162 : vector<8x32x32xf32>
    %cst_116 = arith.constant dense<0xFF800000> : vector<8x32xf32>
    %164 = vector.multi_reduction <maximumf>, %163, %cst_116 [2] : vector<8x32x32xf32> to vector<8x32xf32>
    %165 = vector.shape_cast %164 : vector<8x32xf32> to vector<8x32x1xf32>
    %166 = vector.broadcast %165 : vector<8x32x1xf32> to vector<8x32x32xf32>
    %167 = arith.subf %163, %166 : vector<8x32x32xf32>
    %168 = math.exp %167 : vector<8x32x32xf32>
    %cst_117 = arith.constant dense<0.000000e+00> : vector<8x32xf32>
    %169 = vector.multi_reduction <add>, %168, %cst_117 [2] : vector<8x32x32xf32> to vector<8x32xf32>
    %170 = vector.shape_cast %169 : vector<8x32xf32> to vector<8x32x1xf32>
    %171 = tpu.reciprocal %170 {approx = true} : vector<8x32x1xf32> -> vector<8x32x1xf32>
    %172 = vector.broadcast %171 : vector<8x32x1xf32> to vector<8x32x32xf32>
    %173 = arith.mulf %168, %172 : vector<8x32x32xf32>
    %174 = arith.truncf %173 : vector<8x32x32xf32> to vector<8x32x32xbf16>
    %cst_118 = arith.constant dense<0.000000e+00> : vector<8x32x4xf32>
    %175 = tpu.matmul %174, %156, %cst_118 {dimension_numbers = #tpu.dot_dimension_numbers<[2], [1], [1], [2], [0, 0, 0, 1, 1, 2], [0], [0]>} : vector<8x32x32xbf16>, vector<8x32x4xbf16>, vector<8x32x4xf32> -> vector<8x32x4xf32>
    %176 = vector.shape_cast %175 : vector<8x32x4xf32> to vector<256x4xf32>
    %177 = arith.truncf %176 : vector<256x4xf32> to vector<256x4xbf16>
    %c2_119 = arith.constant 2 : index
    %c0_120 = arith.constant 0 : index
    %c0_121 = arith.constant 0 : index
    %178 = vector.load %arg8[%c2_119, %c0_120, %c0_121] : memref<4x4x16xbf16, #tpu.memory_space<vmem>>, vector<1x4x16xbf16>
    %179 = vector.shape_cast %178 : vector<1x4x16xbf16> to vector<4x16xbf16>
    %cst_122 = arith.constant dense<0.000000e+00> : vector<256x16xf32>
    %180 = tpu.matmul %177, %179, %cst_122 {dimension_numbers = #tpu.dot_dimension_numbers<[1], [0], [0], [1], [0, 0, 1, 1], [], []>} : vector<256x4xbf16>, vector<4x16xbf16>, vector<256x16xf32> -> vector<256x16xf32>
    %181 = arith.addf %129, %180 : vector<256x16xf32>
    %c0_123 = arith.constant 0 : index
    %c3 = arith.constant 3 : index
    %c0_124 = arith.constant 0 : index
    %c0_125 = arith.constant 0 : index
    %182 = vector.load %arg6[%c0_123, %c3, %c0_124, %c0_125] : memref<3x4x16x4xbf16, #tpu.memory_space<vmem>>, vector<1x1x16x4xbf16>
    %183 = vector.shape_cast %182 : vector<1x1x16x4xbf16> to vector<16x4xbf16>
    %cst_126 = arith.constant dense<0.000000e+00> : vector<256x4xf32>
    %184 = tpu.matmul %24, %183, %cst_126 {dimension_numbers = #tpu.dot_dimension_numbers<[1], [0], [0], [1], [0, 0, 1, 1], [], []>} : vector<256x16xbf16>, vector<16x4xbf16>, vector<256x4xf32> -> vector<256x4xf32>
    %c0_127 = arith.constant 0 : index
    %c3_128 = arith.constant 3 : index
    %c0_129 = arith.constant 0 : index
    %c0_130 = arith.constant 0 : index
    %185 = vector.load %arg7[%c0_127, %c3_128, %c0_129, %c0_130] : memref<3x4x1x4xf32, #tpu.memory_space<vmem>>, vector<1x1x1x4xf32>
    %186 = vector.shape_cast %185 : vector<1x1x1x4xf32> to vector<1x4xf32>
    %187 = vector.broadcast %186 : vector<1x4xf32> to vector<256x4xf32>
    %188 = arith.addf %184, %187 : vector<256x4xf32>
    %c1_131 = arith.constant 1 : index
    %c3_132 = arith.constant 3 : index
    %c0_133 = arith.constant 0 : index
    %c0_134 = arith.constant 0 : index
    %189 = vector.load %arg6[%c1_131, %c3_132, %c0_133, %c0_134] : memref<3x4x16x4xbf16, #tpu.memory_space<vmem>>, vector<1x1x16x4xbf16>
    %190 = vector.shape_cast %189 : vector<1x1x16x4xbf16> to vector<16x4xbf16>
    %cst_135 = arith.constant dense<0.000000e+00> : vector<256x4xf32>
    %191 = tpu.matmul %24, %190, %cst_135 {dimension_numbers = #tpu.dot_dimension_numbers<[1], [0], [0], [1], [0, 0, 1, 1], [], []>} : vector<256x16xbf16>, vector<16x4xbf16>, vector<256x4xf32> -> vector<256x4xf32>
    %c1_136 = arith.constant 1 : index
    %c3_137 = arith.constant 3 : index
    %c0_138 = arith.constant 0 : index
    %c0_139 = arith.constant 0 : index
    %192 = vector.load %arg7[%c1_136, %c3_137, %c0_138, %c0_139] : memref<3x4x1x4xf32, #tpu.memory_space<vmem>>, vector<1x1x1x4xf32>
    %193 = vector.shape_cast %192 : vector<1x1x1x4xf32> to vector<1x4xf32>
    %194 = vector.broadcast %193 : vector<1x4xf32> to vector<256x4xf32>
    %195 = arith.addf %191, %194 : vector<256x4xf32>
    %c2_140 = arith.constant 2 : index
    %c3_141 = arith.constant 3 : index
    %c0_142 = arith.constant 0 : index
    %c0_143 = arith.constant 0 : index
    %196 = vector.load %arg6[%c2_140, %c3_141, %c0_142, %c0_143] : memref<3x4x16x4xbf16, #tpu.memory_space<vmem>>, vector<1x1x16x4xbf16>
    %197 = vector.shape_cast %196 : vector<1x1x16x4xbf16> to vector<16x4xbf16>
    %cst_144 = arith.constant dense<0.000000e+00> : vector<256x4xf32>
    %198 = tpu.matmul %24, %197, %cst_144 {dimension_numbers = #tpu.dot_dimension_numbers<[1], [0], [0], [1], [0, 0, 1, 1], [], []>} : vector<256x16xbf16>, vector<16x4xbf16>, vector<256x4xf32> -> vector<256x4xf32>
    %c2_145 = arith.constant 2 : index
    %c3_146 = arith.constant 3 : index
    %c0_147 = arith.constant 0 : index
    %c0_148 = arith.constant 0 : index
    %199 = vector.load %arg7[%c2_145, %c3_146, %c0_147, %c0_148] : memref<3x4x1x4xf32, #tpu.memory_space<vmem>>, vector<1x1x1x4xf32>
    %200 = vector.shape_cast %199 : vector<1x1x1x4xf32> to vector<1x4xf32>
    %201 = vector.broadcast %200 : vector<1x4xf32> to vector<256x4xf32>
    %202 = arith.addf %198, %201 : vector<256x4xf32>
    %203 = vector.shape_cast %188 : vector<256x4xf32> to vector<8x32x4xf32>
    %204 = arith.truncf %203 : vector<8x32x4xf32> to vector<8x32x4xbf16>
    %205 = vector.shape_cast %195 : vector<256x4xf32> to vector<8x32x4xf32>
    %206 = arith.truncf %205 : vector<8x32x4xf32> to vector<8x32x4xbf16>
    %207 = vector.shape_cast %202 : vector<256x4xf32> to vector<8x32x4xf32>
    %208 = arith.truncf %207 : vector<8x32x4xf32> to vector<8x32x4xbf16>
    %cst_149 = arith.constant dense<0.000000e+00> : vector<8x32x32xf32>
    %209 = tpu.matmul %204, %206, %cst_149 {dimension_numbers = #tpu.dot_dimension_numbers<[2], [2], [1], [1], [0, 0, 0, 1, 1, 1], [0], [0]>} : vector<8x32x4xbf16>, vector<8x32x4xbf16>, vector<8x32x32xf32> -> vector<8x32x32xf32>
    %c3_150 = arith.constant 3 : index
    %c0_151 = arith.constant 0 : index
    %c0_152 = arith.constant 0 : index
    %210 = vector.load %arg5[%c3_150, %c0_151, %c0_152] : memref<4x32x32xbf16, #tpu.memory_space<vmem>>, vector<1x32x32xbf16>
    %211 = vector.shape_cast %210 : vector<1x32x32xbf16> to vector<32x32xbf16>
    %212 = arith.extf %211 : vector<32x32xbf16> to vector<32x32xf32>
    %213 = vector.shape_cast %212 : vector<32x32xf32> to vector<1x32x32xf32>
    %214 = vector.broadcast %213 : vector<1x32x32xf32> to vector<8x32x32xf32>
    %215 = arith.addf %209, %214 : vector<8x32x32xf32>
    %cst_153 = arith.constant dense<0xFF800000> : vector<8x32xf32>
    %216 = vector.multi_reduction <maximumf>, %215, %cst_153 [2] : vector<8x32x32xf32> to vector<8x32xf32>
    %217 = vector.shape_cast %216 : vector<8x32xf32> to vector<8x32x1xf32>
    %218 = vector.broadcast %217 : vector<8x32x1xf32> to vector<8x32x32xf32>
    %219 = arith.subf %215, %218 : vector<8x32x32xf32>
    %220 = math.exp %219 : vector<8x32x32xf32>
    %cst_154 = arith.constant dense<0.000000e+00> : vector<8x32xf32>
    %221 = vector.multi_reduction <add>, %220, %cst_154 [2] : vector<8x32x32xf32> to vector<8x32xf32>
    %222 = vector.shape_cast %221 : vector<8x32xf32> to vector<8x32x1xf32>
    %223 = tpu.reciprocal %222 {approx = true} : vector<8x32x1xf32> -> vector<8x32x1xf32>
    %224 = vector.broadcast %223 : vector<8x32x1xf32> to vector<8x32x32xf32>
    %225 = arith.mulf %220, %224 : vector<8x32x32xf32>
    %226 = arith.truncf %225 : vector<8x32x32xf32> to vector<8x32x32xbf16>
    %cst_155 = arith.constant dense<0.000000e+00> : vector<8x32x4xf32>
    %227 = tpu.matmul %226, %208, %cst_155 {dimension_numbers = #tpu.dot_dimension_numbers<[2], [1], [1], [2], [0, 0, 0, 1, 1, 2], [0], [0]>} : vector<8x32x32xbf16>, vector<8x32x4xbf16>, vector<8x32x4xf32> -> vector<8x32x4xf32>
    %228 = vector.shape_cast %227 : vector<8x32x4xf32> to vector<256x4xf32>
    %229 = arith.truncf %228 : vector<256x4xf32> to vector<256x4xbf16>
    %c3_156 = arith.constant 3 : index
    %c0_157 = arith.constant 0 : index
    %c0_158 = arith.constant 0 : index
    %230 = vector.load %arg8[%c3_156, %c0_157, %c0_158] : memref<4x4x16xbf16, #tpu.memory_space<vmem>>, vector<1x4x16xbf16>
    %231 = vector.shape_cast %230 : vector<1x4x16xbf16> to vector<4x16xbf16>
    %cst_159 = arith.constant dense<0.000000e+00> : vector<256x16xf32>
    %232 = tpu.matmul %229, %231, %cst_159 {dimension_numbers = #tpu.dot_dimension_numbers<[1], [0], [0], [1], [0, 0, 1, 1], [], []>} : vector<256x4xbf16>, vector<4x16xbf16>, vector<256x16xf32> -> vector<256x16xf32>
    %233 = arith.addf %181, %232 : vector<256x16xf32>
    %c0_160 = arith.constant 0 : index
    %c0_161 = arith.constant 0 : index
    %234 = vector.load %arg9[%c0_160, %c0_161] : memref<1x16xf32, #tpu.memory_space<vmem>>, vector<1x16xf32>
    %235 = vector.broadcast %234 : vector<1x16xf32> to vector<256x16xf32>
    %236 = arith.addf %233, %235 : vector<256x16xf32>
    %c0_162 = arith.constant 0 : index
    %c0_163 = arith.constant 0 : index
    %c0_164 = arith.constant 0 : index
    %237 = vector.load %arg10[%c0_162, %c0_163, %c0_164] : memref<1x256x16xf32, #tpu.memory_space<vmem>>, vector<1x256x16xf32>
    %238 = vector.shape_cast %237 : vector<1x256x16xf32> to vector<256x16xf32>
    %239 = vector.shape_cast %236 : vector<256x16xf32> to vector<1x256x16xf32>
    tpu.vector_store %arg10[%c0_162, %c0_163, %c0_164], %239 {strides = array<i32>} : memref<1x256x16xf32, #tpu.memory_space<vmem>>, vector<1x256x16xf32>,
    return
  }
  func.func @transform_0(%arg0: i32, %arg1: i32) -> (i32, i32, i32) {
    %c0_i32 = arith.constant 0 : i32
    %c0_i32_0 = arith.constant 0 : i32
    return %arg0, %arg1, %c0_i32 : i32, i32, i32
  }
  func.func @transform_1(%arg0: i32, %arg1: i32) -> (i32, i32) {
    %c0_i32 = arith.constant 0 : i32
    %c0_i32_0 = arith.constant 0 : i32
    %c0_i32_1 = arith.constant 0 : i32
    return %c0_i32, %c0_i32_0 : i32, i32
  }
  func.func @transform_2(%arg0: i32, %arg1: i32) -> (i32, i32) {
    %c0_i32 = arith.constant 0 : i32
    %c0_i32_0 = arith.constant 0 : i32
    %c0_i32_1 = arith.constant 0 : i32
    return %c0_i32, %c0_i32_0 : i32, i32
  }
  func.func @transform_3(%arg0: i32, %arg1: i32) -> (i32, i32, i32) {
    %c0_i32 = arith.constant 0 : i32
    %c0_i32_0 = arith.constant 0 : i32
    %c0_i32_1 = arith.constant 0 : i32
    %c0_i32_2 = arith.constant 0 : i32
    return %c0_i32, %c0_i32_0, %c0_i32_1 : i32, i32, i32
  }
  func.func @transform_4(%arg0: i32, %arg1: i32) -> (i32, i32, i32, i32) {
    %c0_i32 = arith.constant 0 : i32
    %c0_i32_0 = arith.constant 0 : i32
    %c0_i32_1 = arith.constant 0 : i32
    %c0_i32_2 = arith.constant 0 : i32
    %c0_i32_3 = arith.constant 0 : i32
    return %c0_i32, %c0_i32_0, %c0_i32_1, %c0_i32_2 : i32, i32, i32, i32
  }
  func.func @transform_5(%arg0: i32, %arg1: i32) -> (i32, i32, i32, i32) {
    %c0_i32 = arith.constant 0 : i32
    %c0_i32_0 = arith.constant 0 : i32
    %c0_i32_1 = arith.constant 0 : i32
    %c0_i32_2 = arith.constant 0 : i32
    %c0_i32_3 = arith.constant 0 : i32
    return %c0_i32, %c0_i32_0, %c0_i32_1, %c0_i32_2 : i32, i32, i32, i32
  }
  func.func @transform_6(%arg0: i32, %arg1: i32) -> (i32, i32, i32) {
    %c0_i32 = arith.constant 0 : i32
    %c0_i32_0 = arith.constant 0 : i32
    %c0_i32_1 = arith.constant 0 : i32
    %c0_i32_2 = arith.constant 0 : i32
    return %c0_i32, %c0_i32_0, %c0_i32_1 : i32, i32, i32
  }
  func.func @transform_7(%arg0: i32, %arg1: i32) -> (i32, i32) {
    %c0_i32 = arith.constant 0 : i32
    %c0_i32_0 = arith.constant 0 : i32
    %c0_i32_1 = arith.constant 0 : i32
    return %c0_i32, %c0_i32_0 : i32, i32
  }
  func.func @transform_8(%arg0: i32, %arg1: i32) -> (i32, i32, i32) {
    %c0_i32 = arith.constant 0 : i32
    %c0_i32_0 = arith.constant 0 : i32
    return %arg0, %arg1, %c0_i32 : i32, i32, i32
  }
}

</mosaic_0001>

<bundles_post_ra>
// kernel: tpu_custom_call.1
= control target key start
LH: loop header
LB: loop body
LE: loop exit
PB: predicated region body
PF: predicated region fallthrough
CT: control target
= control target key end

     0   :  { %s12473_s27 = smov 0   ;;  %s12475_s28 = smov 0   ;;  %s16724_s0 = inlined_call_operand.vmem [shape: f32[2,256,16], index: 0, kind: input, shape index: {}]   ;;  %s16725_s1 = inlined_call_operand.vmem [shape: f32[1,16], index: 1, kind: input, shape index: {}]   ;;  %s16726_s2 = inlined_call_operand.vmem [shape: f32[1,16], index: 2, kind: input, shape index: {}]   ;;  %s16727_s3 = inlined_call_operand.vmem [shape: bf16[4,32,32], index: 3, kind: input, shape index: {}]   ;;  %s16728_s4 = inlined_call_operand.vmem [shape: bf16[3,4,16,4], index: 4, kind: input, shape index: {}]   ;;  %s16729_s5 = inlined_call_operand.vmem [shape: f32[3,4,1,4], index: 5, kind: input, shape index: {}]   ;;  %s16730_s6 = inlined_call_operand.vmem [shape: bf16[4,4,16], index: 6, kind: input, shape index: {}]   ;;  %s16731_s7 = inlined_call_operand.vmem [shape: f32[1,16], index: 7, kind: input, shape index: {}]   ;;  %s16732_s8 = inlined_call_operand.vmem [shape: f32[2,256,16], index: 8, kind: output, shape index: {}]  }
   0x1   :  { %s12477_s29 = smov 0  }
   0x2 LB: > { %s30_s30 = sadd.s32 1, %s12422_s28  ;;  %p9631_p0 = scmp.ge.s32.totalorder %s12426_s29, 1  ;;  %s12426_s29 = sphi %s12477_s29, %s18_s29   ;;  %s12422_s28 = sphi %s12475_s28, %s17129_s28   ;;  %s12418_s27 = sphi %s12473_s27, %s17128_s27  }
   0x3   : > { %p32_p1 = scmp.ge.s32.totalorder %s30_s30, 2  ;;  %p283_p2 = scmp.lt.s32.totalorder %s12426_s29, 3 }
   0x5   : > { %s17131_s30 = smov (%p32_p1, %s30_s30), 0  ;;  %p284_p3 = pnand %p9631_p0, %p283_p2 }
   0x7   : > { %287 = sbr.rel (%p284_p3) target bundleno = 4430 (0x114e), region = 52 }
   0xc   : > { %p326_p4 = scmp.lt.s32.totalorder %s12418_s27, 1  ;;  %vm378_vm0 = vcmask 130048   ;;  %vm1526_vm1 = vcmask 31744   ;;  %vm2015_vm2 = vcmask 261120   ;;  %vm4794_vm3 = vcmask 1041408  }
   0xe   : > { %s17133_s27 = smov (!%p326_p4, %s12418_s27), 1 }
   0xf   : > { %s10097_s9 = sshll.u32 %s17133_s27, 8 }
  0x10   : > { %s12499_s12 = scalar_lea.vmem %s16724_s0, %s10097_s9  ;;  %s16570_s25 = scalar_lea.vmem %s16732_s8, %s10097_s9 }
  0x11   : > { %v12502_v0 = vld [vmem:[%s12499_s12 + $0x80] sm:$0xff]  ;;  %v12505_v1 = vld [vmem:[%s12499_s12 + $0x90] sm:$0xff]  ;;  %v12508_v2 = vld [vmem:[%s12499_s12 + $0x88] sm:$0xff] }
  0x12   : > { %v427_v3 = vsel %vm378_vm0, %v12502_v0, 0.0  ;;  %v433_v4 = vsel %vm378_vm0, %v12505_v1, 0.0  ;;  %v12515_v5 = vld [vmem:[%s12499_s12 + $0x98] sm:$0xff]  ;;  %v430_v6 = vsel %vm378_vm0, %v12508_v2, 0.0  ;;  %v12522_v8 = vld [vmem:[%s12499_s12 + $0xa0] sm:$0xff]  ;;  %v12525_v9 = vld [vmem:[%s12499_s12 + $0xa8] sm:$0xff] }
  0x13   : > { %428 = vadd.xlane.f32.xlu0 %v427_v3  ;;  %434 = vadd.xlane.f32.xlu1 %v433_v4  ;;  %v436_v7 = vsel %vm378_vm0, %v12515_v5, 0.0  ;;  %v439_v10 = vsel %vm378_vm0, %v12522_v8, 0.0  ;;  %v442_v11 = vsel %vm378_vm0, %v12525_v9, 0.0  ;;  %v12532_v12 = vld [vmem:[%s12499_s12 + $0xb0] sm:$0xff]  ;;  %v12535_v13 = vld [vmem:[%s12499_s12 + $0xb8] sm:$0xff]  ;;  %v12540_v15 = vld [vmem:[%s12499_s12 + $0xc0] sm:$0xff] }
  0x14   : > { %v445_v14 = vsel %vm378_vm0, %v12532_v12, 0.0  ;;  %v448_v16 = vsel %vm378_vm0, %v12535_v13, 0.0  ;;  %v12545_v17 = vld [vmem:[%s12499_s12 + $0xc8] sm:$0xff]  ;;  %v451_v18 = vsel %vm378_vm0, %v12540_v15, 0.0  ;;  %v12552_v20 = vld [vmem:[%s12499_s12 + $0xd0] sm:$0xff]  ;;  %v12555_v21 = vld [vmem:[%s12499_s12 + $0xd8] sm:$0xff] }
  0x15   : > { %v454_v19 = vsel %vm378_vm0, %v12545_v17, 0.0  ;;  %v457_v22 = vsel %vm378_vm0, %v12552_v20, 0.0  ;;  %v460_v23 = vsel %vm378_vm0, %v12555_v21, 0.0  ;;  %v12562_v24 = vld [vmem:[%s12499_s12 + $0xe0] sm:$0xff]  ;;  %v12565_v25 = vld [vmem:[%s12499_s12 + $0xe8] sm:$0xff]  ;;  %v12572_v28 = vld [vmem:[%s12499_s12 + $0xf0] sm:$0xff] }
  0x16   : > { %v463_v26 = vsel %vm378_vm0, %v12562_v24, 0.0  ;;  %v466_v27 = vsel %vm378_vm0, %v12565_v25, 0.0  ;;  %v12575_v29 = vld [vmem:[%s12499_s12 + $0xf8] sm:$0xff]  ;;  %v469_v30 = vsel %vm378_vm0, %v12572_v28, 0.0  ;;  %v12582_v32 = vld [vmem:[%s12499_s12] sm:$0xff]  ;;  %v12585_v33 = vld [vmem:[%s12499_s12 + $0x8] sm:$0xff] }
  0x17   : > { %431 = vadd.xlane.f32.xlu0 %v430_v6  ;;  %437 = vadd.xlane.f32.xlu1 %v436_v7  ;;  %v472_v31 = vsel %vm378_vm0, %v12575_v29, 0.0  ;;  %v379_v34 = vsel %vm378_vm0, %v12582_v32, 0.0  ;;  %v382_v35 = vsel %vm378_vm0, %v12585_v33, 0.0  ;;  %v12592_v36 = vld [vmem:[%s12499_s12 + $0x10] sm:$0xff]  ;;  %v12595_v37 = vld [vmem:[%s12499_s12 + $0x18] sm:$0xff]  ;;  %v12602_v40 = vld [vmem:[%s12499_s12 + $0x20] sm:$0xff] }
  0x18   : > { %v385_v38 = vsel %vm378_vm0, %v12592_v36, 0.0  ;;  %v388_v39 = vsel %vm378_vm0, %v12595_v37, 0.0  ;;  %v12605_v41 = vld [vmem:[%s12499_s12 + $0x28] sm:$0xff]  ;;  %v391_v42 = vsel %vm378_vm0, %v12602_v40, 0.0  ;;  %v12612_v44 = vld [vmem:[%s12499_s12 + $0x30] sm:$0xff]  ;;  %v12615_v45 = vld [vmem:[%s12499_s12 + $0x38] sm:$0xff] }
  0x19   : > { %v394_v43 = vsel %vm378_vm0, %v12605_v41, 0.0  ;;  %v397_v46 = vsel %vm378_vm0, %v12612_v44, 0.0  ;;  %v400_v47 = vsel %vm378_vm0, %v12615_v45, 0.0  ;;  %v12622_v48 = vld [vmem:[%s12499_s12 + $0x40] sm:$0xff]  ;;  %v12625_v49 = vld [vmem:[%s12499_s12 + $0x48] sm:$0xff]  ;;  %v12632_v52 = vld [vmem:[%s12499_s12 + $0x50] sm:$0xff] }
  0x1a   : > { %v403_v50 = vsel %vm378_vm0, %v12622_v48, 0.0  ;;  %v406_v51 = vsel %vm378_vm0, %v12625_v49, 0.0  ;;  %v12635_v53 = vld [vmem:[%s12499_s12 + $0x58] sm:$0xff]  ;;  %v409_v54 = vsel %vm378_vm0, %v12632_v52, 0.0  ;;  %v12642_v56 = vld [vmem:[%s12499_s12 + $0x60] sm:$0xff]  ;;  %v12645_v57 = vld [vmem:[%s12499_s12 + $0x68] sm:$0xff] }
  0x1b   : > { %440 = vadd.xlane.f32.xlu0 %v439_v10  ;;  %443 = vadd.xlane.f32.xlu1 %v442_v11  ;;  %v412_v55 = vsel %vm378_vm0, %v12635_v53, 0.0  ;;  %v415_v58 = vsel %vm378_vm0, %v12642_v56, 0.0  ;;  %v418_v59 = vsel %vm378_vm0, %v12645_v57, 0.0  ;;  %v12652_v60 = vld [vmem:[%s12499_s12 + $0x70] sm:$0xff]  ;;  %v12655_v61 = vld [vmem:[%s12499_s12 + $0x78] sm:$0xff] }
  0x1c   : > { %v421_v62 = vsel %vm378_vm0, %v12652_v60, 0.0  ;;  %v424_v63 = vsel %vm378_vm0, %v12655_v61, 0.0 }
  0x1f   : > { %446 = vadd.xlane.f32.xlu0 %v445_v14  ;;  %449 = vadd.xlane.f32.xlu1 %v448_v16 }
  0x23   : > { %452 = vadd.xlane.f32.xlu0 %v451_v18  ;;  %455 = vadd.xlane.f32.xlu1 %v454_v19 }
  0x27   : > { %458 = vadd.xlane.f32.xlu0 %v457_v22  ;;  %461 = vadd.xlane.f32.xlu1 %v460_v23 }
  0x2b   : > { %464 = vadd.xlane.f32.xlu0 %v463_v26  ;;  %467 = vadd.xlane.f32.xlu1 %v466_v27 }
  0x2f   : > { %470 = vadd.xlane.f32.xlu0 %v469_v30  ;;  %473 = vadd.xlane.f32.xlu1 %v472_v31 }
  0x33   : > { %380 = vadd.xlane.f32.xlu0 %v379_v34  ;;  %383 = vadd.xlane.f32.xlu1 %v382_v35 }
  0x37   : > { %386 = vadd.xlane.f32.xlu0 %v385_v38  ;;  %389 = vadd.xlane.f32.xlu1 %v388_v39 }
  0x3b   : > { %392 = vadd.xlane.f32.xlu0 %v391_v42  ;;  %395 = vadd.xlane.f32.xlu1 %v394_v43 }
  0x3f   : > { %398 = vadd.xlane.f32.xlu0 %v397_v46  ;;  %401 = vadd.xlane.f32.xlu1 %v400_v47 }
  0x43   : > { %404 = vadd.xlane.f32.xlu0 %v403_v50  ;;  %407 = vadd.xlane.f32.xlu1 %v406_v51 }
  0x47   : > { %410 = vadd.xlane.f32.xlu0 %v409_v54  ;;  %413 = vadd.xlane.f32.xlu1 %v412_v55 }
  0x4b   : > { %416 = vadd.xlane.f32.xlu0 %v415_v58  ;;  %419 = vadd.xlane.f32.xlu1 %v418_v59 }
  0x4f   : > { %422 = vadd.xlane.f32.xlu0 %v421_v62  ;;  %425 = vadd.xlane.f32.xlu1 %v424_v63 }
  0x9c   : > { %v429_v3 = vpop.xlane.xlu0 %428  ;;  %v435_v4 = vpop.xlane.xlu1 %434 }
  0x9d   : > { %v492_v6 = vmul.f32 0.0625, %v429_v3  ;;  %v494_v7 = vmul.f32 0.0625, %v435_v4 }
  0x9f   : > { %v12662_v10 = vsub.f32 %v12502_v0, %v492_v6  ;;  %v12665_v11 = vsub.f32 %v12505_v1, %v494_v7 }
  0xa0   : > { %v432_v14 = vpop.xlane.xlu0 %431  ;;  %v438_v16 = vpop.xlane.xlu1 %437 }
  0xa1   : > { %v493_v18 = vmul.f32 0.0625, %v432_v14  ;;  %v495_v19 = vmul.f32 0.0625, %v438_v16  ;;  %v556_v22 = vmul.f32 %v12662_v10, %v12662_v10  ;;  %v558_v23 = vmul.f32 %v12665_v11, %v12665_v11 }
  0xa3   : > { %v12672_v26 = vsub.f32 %v12508_v2, %v493_v18  ;;  %v12675_v27 = vsub.f32 %v12515_v5, %v495_v19  ;;  %v620_v0 = vsel %vm378_vm0, %v556_v22, 0.0  ;;  %v626_v31 = vsel %vm378_vm0, %v558_v23, 0.0 }
  0xa4   : > { %v441_v1 = vpop.xlane.xlu0 %440  ;;  %621 = vadd.xlane.f32.xlu0 %v620_v0  ;;  %v444_v30 = vpop.xlane.xlu1 %443 }
  0xa5   : > { %v496_v34 = vmul.f32 0.0625, %v441_v1  ;;  %v497_v35 = vmul.f32 0.0625, %v444_v30  ;;  %v557_v38 = vmul.f32 %v12672_v26, %v12672_v26  ;;  %v559_v39 = vmul.f32 %v12675_v27, %v12675_v27 }
  0xa7   : > { %v12684_v2 = vsub.f32 %v12522_v8, %v496_v34  ;;  %v12687_v5 = vsub.f32 %v12525_v9, %v497_v35  ;;  %v623_v42 = vsel %vm378_vm0, %v557_v38, 0.0  ;;  %v629_v47 = vsel %vm378_vm0, %v559_v39, 0.0 }
  0xa8   : > { %v447_v43 = vpop.xlane.xlu0 %446  ;;  %624 = vadd.xlane.f32.xlu1 %v623_v42  ;;  %627 = vadd.xlane.f32.xlu0 %v626_v31  ;;  %v450_v46 = vpop.xlane.xlu1 %449 }
  0xa9   : > { %v498_v50 = vmul.f32 0.0625, %v447_v43  ;;  %v499_v51 = vmul.f32 0.0625, %v450_v46  ;;  %v560_v54 = vmul.f32 %v12684_v2, %v12684_v2  ;;  %v561_v8 = vmul.f32 %v12687_v5, %v12687_v5 }
  0xab   : > { %v12696_v55 = vsub.f32 %v12532_v12, %v498_v50  ;;  %v12699_v9 = vsub.f32 %v12535_v13, %v499_v51  ;;  %v632_v58 = vsel %vm378_vm0, %v560_v54, 0.0  ;;  %v635_v63 = vsel %vm378_vm0, %v561_v8, 0.0 }
  0xac   : > { %v453_v59 = vpop.xlane.xlu0 %452  ;;  %630 = vadd.xlane.f32.xlu1 %v629_v47  ;;  %633 = vadd.xlane.f32.xlu0 %v632_v58  ;;  %v456_v62 = vpop.xlane.xlu1 %455 }
  0xad   : > { %v500_v3 = vmul.f32 0.0625, %v453_v59  ;;  %v501_v4 = vmul.f32 0.0625, %v456_v62  ;;  %v562_v6 = vmul.f32 %v12696_v55, %v12696_v55  ;;  %v563_v12 = vmul.f32 %v12699_v9, %v12699_v9 }
  0xaf   : > { %v12708_v7 = vsub.f32 %v12540_v15, %v500_v3  ;;  %v12711_v13 = vsub.f32 %v12545_v17, %v501_v4  ;;  %v638_v14 = vsel %vm378_vm0, %v562_v6, 0.0  ;;  %v641_v19 = vsel %vm378_vm0, %v563_v12, 0.0 }
  0xb0   : > { %v459_v16 = vpop.xlane.xlu0 %458  ;;  %636 = vadd.xlane.f32.xlu1 %v635_v63  ;;  %639 = vadd.xlane.f32.xlu0 %v638_v14  ;;  %v462_v18 = vpop.xlane.xlu1 %461 }
  0xb1   : > { %v502_v22 = vmul.f32 0.0625, %v459_v16  ;;  %v503_v23 = vmul.f32 0.0625, %v462_v18  ;;  %v564_v0 = vmul.f32 %v12708_v7, %v12708_v7  ;;  %v565_v15 = vmul.f32 %v12711_v13, %v12711_v13 }
  0xb3   : > { %v12720_v1 = vsub.f32 %v12552_v20, %v502_v22  ;;  %v12723_v17 = vsub.f32 %v12555_v21, %v503_v23  ;;  %v644_v30 = vsel %vm378_vm0, %v564_v0, 0.0  ;;  %v647_v35 = vsel %vm378_vm0, %v565_v15, 0.0 }
  0xb4   : > { %v465_v31 = vpop.xlane.xlu0 %464  ;;  %642 = vadd.xlane.f32.xlu1 %v641_v19  ;;  %645 = vadd.xlane.f32.xlu0 %v644_v30  ;;  %v468_v34 = vpop.xlane.xlu1 %467 }
  0xb5   : > { %v504_v38 = vmul.f32 0.0625, %v465_v31  ;;  %v505_v39 = vmul.f32 0.0625, %v468_v34  ;;  %v566_v42 = vmul.f32 %v12720_v1, %v12720_v1  ;;  %v567_v20 = vmul.f32 %v12723_v17, %v12723_v17 }
  0xb7   : > { %v12732_v43 = vsub.f32 %v12562_v24, %v504_v38  ;;  %v12735_v21 = vsub.f32 %v12565_v25, %v505_v39  ;;  %v650_v46 = vsel %vm378_vm0, %v566_v42, 0.0  ;;  %v653_v51 = vsel %vm378_vm0, %v567_v20, 0.0 }
  0xb8   : > { %v471_v47 = vpop.xlane.xlu0 %470  ;;  %648 = vadd.xlane.f32.xlu1 %v647_v35  ;;  %651 = vadd.xlane.f32.xlu0 %v650_v46  ;;  %v474_v50 = vpop.xlane.xlu1 %473 }
  0xb9   : > { %v506_v54 = vmul.f32 0.0625, %v471_v47  ;;  %v507_v8 = vmul.f32 0.0625, %v474_v50  ;;  %v568_v58 = vmul.f32 %v12732_v43, %v12732_v43  ;;  %v569_v24 = vmul.f32 %v12735_v21, %v12735_v21 }
  0xbb   : > { %v12744_v59 = vsub.f32 %v12572_v28, %v506_v54  ;;  %v12747_v25 = vsub.f32 %v12575_v29, %v507_v8  ;;  %v656_v62 = vsel %vm378_vm0, %v568_v58, 0.0  ;;  %v659_v3 = vsel %vm378_vm0, %v569_v24, 0.0 }
  0xbc   : > { %654 = vadd.xlane.f32.xlu1 %v653_v51  ;;  %657 = vadd.xlane.f32.xlu0 %v656_v62  ;;  %v381_v63 = vpop.xlane.xlu0 %380  ;;  %v384_v4 = vpop.xlane.xlu1 %383 }
  0xbd   : > { %v476_v6 = vmul.f32 0.0625, %v381_v63  ;;  %v477_v12 = vmul.f32 0.0625, %v384_v4  ;;  %v570_v14 = vmul.f32 %v12744_v59, %v12744_v59  ;;  %v571_v28 = vmul.f32 %v12747_v25, %v12747_v25  ;;  %v11816_v4 = vld [vmem:[%s16728_s4] sm:$0xff]  }
  0xbe   : > { %11722 = vmatprep.subr.bf16.mxu1 %v11816_v4  ;;  %10666 = vmatprep.subr.bf16.mxu0 %v11816_v4 }
  0xbf   : > { %v12756_v16 = vsub.f32 %v12582_v32, %v476_v6  ;;  %v12759_v29 = vsub.f32 %v12585_v33, %v477_v12  ;;  %v662_v18 = vsel %vm378_vm0, %v570_v14, 0.0  ;;  %v665_v22 = vsel %vm378_vm0, %v571_v28, 0.0  ;;  %11723 = vmatpush3.bf16.msra.mxu1 %v11816_v4  ;;  %10667 = vmatpush3.bf16.msra.mxu0 %v11816_v4 }
  0xc0   : > { %660 = vadd.xlane.f32.xlu1 %v659_v3  ;;  %663 = vadd.xlane.f32.xlu0 %v662_v18  ;;  %v387_v19 = vpop.xlane.xlu0 %386  ;;  %v390_v23 = vpop.xlane.xlu1 %389 }
  0xc1   : > { %v478_v0 = vmul.f32 0.0625, %v387_v19  ;;  %v479_v15 = vmul.f32 0.0625, %v390_v23  ;;  %v540_v30 = vmul.f32 %v12756_v16, %v12756_v16  ;;  %v541_v32 = vmul.f32 %v12759_v29, %v12759_v29 }
  0xc3   : > { %v12768_v31 = vsub.f32 %v12592_v36, %v478_v0  ;;  %v12771_v33 = vsub.f32 %v12595_v37, %v479_v15  ;;  %v572_v34 = vsel %vm378_vm0, %v540_v30, 0.0  ;;  %v575_v38 = vsel %vm378_vm0, %v541_v32, 0.0 }
  0xc4   : > { %666 = vadd.xlane.f32.xlu1 %v665_v22  ;;  %573 = vadd.xlane.f32.xlu0 %v572_v34  ;;  %v393_v35 = vpop.xlane.xlu0 %392  ;;  %v396_v39 = vpop.xlane.xlu1 %395 }
  0xc5   : > { %v480_v42 = vmul.f32 0.0625, %v393_v35  ;;  %v481_v20 = vmul.f32 0.0625, %v396_v39  ;;  %v542_v46 = vmul.f32 %v12768_v31, %v12768_v31  ;;  %v543_v36 = vmul.f32 %v12771_v33, %v12771_v33 }
  0xc7   : > { %v12780_v47 = vsub.f32 %v12602_v40, %v480_v42  ;;  %v12783_v37 = vsub.f32 %v12605_v41, %v481_v20  ;;  %v578_v50 = vsel %vm378_vm0, %v542_v46, 0.0  ;;  %v581_v54 = vsel %vm378_vm0, %v543_v36, 0.0 }
  0xc8   : > { %576 = vadd.xlane.f32.xlu1 %v575_v38  ;;  %579 = vadd.xlane.f32.xlu0 %v578_v50  ;;  %v399_v51 = vpop.xlane.xlu0 %398  ;;  %v402_v8 = vpop.xlane.xlu1 %401 }
  0xc9   : > { %v482_v58 = vmul.f32 0.0625, %v399_v51  ;;  %v483_v24 = vmul.f32 0.0625, %v402_v8  ;;  %v544_v62 = vmul.f32 %v12780_v47, %v12780_v47  ;;  %v545_v40 = vmul.f32 %v12783_v37, %v12783_v37 }
  0xcb   : > { %v12792_v63 = vsub.f32 %v12612_v44, %v482_v58  ;;  %v12795_v41 = vsub.f32 %v12615_v45, %v483_v24  ;;  %v584_v3 = vsel %vm378_vm0, %v544_v62, 0.0  ;;  %v587_v12 = vsel %vm378_vm0, %v545_v40, 0.0 }
  0xcc   : > { %582 = vadd.xlane.f32.xlu1 %v581_v54  ;;  %585 = vadd.xlane.f32.xlu0 %v584_v3  ;;  %v405_v6 = vpop.xlane.xlu0 %404  ;;  %v408_v14 = vpop.xlane.xlu1 %407 }
  0xcd   : > { %v484_v28 = vmul.f32 0.0625, %v405_v6  ;;  %v485_v18 = vmul.f32 0.0625, %v408_v14  ;;  %v546_v44 = vmul.f32 %v12792_v63, %v12792_v63  ;;  %v547_v45 = vmul.f32 %v12795_v41, %v12795_v41 }
  0xcf   : > { %v12807_v19 = vsub.f32 %v12622_v48, %v484_v28  ;;  %v12810_v22 = vsub.f32 %v12625_v49, %v485_v18  ;;  %v590_v23 = vsel %vm378_vm0, %v546_v44, 0.0  ;;  %v593_v15 = vsel %vm378_vm0, %v547_v45, 0.0  ;;  %v12865_v45 = vld [vmem:[%s16728_s4 + $0x40] sm:$0xff]  }
  0xd0   : > { %588 = vadd.xlane.f32.xlu1 %v587_v12  ;;  %591 = vadd.xlane.f32.xlu0 %v590_v23  ;;  %v411_v0 = vpop.xlane.xlu0 %410  ;;  %v414_v30 = vpop.xlane.xlu1 %413 }
  0xd1   : > { %v486_v32 = vmul.f32 0.0625, %v411_v0  ;;  %v487_v34 = vmul.f32 0.0625, %v414_v30  ;;  %v548_v35 = vmul.f32 %v12807_v19, %v12807_v19  ;;  %v549_v48 = vmul.f32 %v12810_v22, %v12810_v22  ;;  %10734 = vmatprep.subr.bf16.mxu0 %v12865_v45 }
  0xd3   : > { %v12819_v38 = vsub.f32 %v12632_v52, %v486_v32  ;;  %v12822_v49 = vsub.f32 %v12635_v53, %v487_v34  ;;  %v596_v39 = vsel %vm378_vm0, %v548_v35, 0.0  ;;  %v599_v20 = vsel %vm378_vm0, %v549_v48, 0.0 }
  0xd4   : > { %594 = vadd.xlane.f32.xlu1 %v593_v15  ;;  %597 = vadd.xlane.f32.xlu0 %v596_v39  ;;  %v417_v42 = vpop.xlane.xlu0 %416  ;;  %v420_v46 = vpop.xlane.xlu1 %419 }
  0xd5   : > { %v488_v36 = vmul.f32 0.0625, %v417_v42  ;;  %v489_v50 = vmul.f32 0.0625, %v420_v46  ;;  %v550_v51 = vmul.f32 %v12819_v38, %v12819_v38  ;;  %v551_v52 = vmul.f32 %v12822_v49, %v12822_v49 }
  0xd7   : > { %v12831_v54 = vsub.f32 %v12642_v56, %v488_v36  ;;  %v12834_v53 = vsub.f32 %v12645_v57, %v489_v50  ;;  %v602_v8 = vsel %vm378_vm0, %v550_v51, 0.0  ;;  %v605_v24 = vsel %vm378_vm0, %v551_v52, 0.0 }
  0xd8   : > { %600 = vadd.xlane.f32.xlu1 %v599_v20  ;;  %603 = vadd.xlane.f32.xlu0 %v602_v8  ;;  %v423_v58 = vpop.xlane.xlu0 %422  ;;  %v426_v62 = vpop.xlane.xlu1 %425 }
  0xd9   : > { %v490_v40 = vmul.f32 0.0625, %v423_v58  ;;  %v491_v3 = vmul.f32 0.0625, %v426_v62  ;;  %v552_v4 = vmul.f32 %v12831_v54, %v12831_v54  ;;  %v553_v56 = vmul.f32 %v12834_v53, %v12834_v53 }
  0xdb   : > { %v12843_v6 = vsub.f32 %v12652_v60, %v490_v40  ;;  %v12846_v57 = vsub.f32 %v12655_v61, %v491_v3  ;;  %v608_v12 = vsel %vm378_vm0, %v552_v4, 0.0  ;;  %v611_v14 = vsel %vm378_vm0, %v553_v56, 0.0  ;;  %v12859_v61 = vld [vmem:[%s16728_s4 + $0x20] sm:$0xff]  }
  0xdc   : > { %606 = vadd.xlane.f32.xlu1 %v605_v24  ;;  %609 = vadd.xlane.f32.xlu0 %v608_v12 }
  0xdd   : > { %v554_v28 = vmul.f32 %v12843_v6, %v12843_v6  ;;  %v555_v18 = vmul.f32 %v12846_v57, %v12846_v57  ;;  %10700 = vmatprep.subr.bf16.mxu1 %v12859_v61 }
  0xdf   : > { %v614_v44 = vsel %vm378_vm0, %v554_v28, 0.0  ;;  %v617_v60 = vsel %vm378_vm0, %v555_v18, 0.0  ;;  %v12871_v28 = vld [vmem:[%s16725_s1] ss:$0 sm:$0xff] }
  0xe0   : > { %612 = vadd.xlane.f32.xlu1 %v611_v14  ;;  %615 = vadd.xlane.f32.xlu0 %v614_v44 }
  0xe4   : > { %618 = vadd.xlane.f32.xlu1 %v617_v60 }
 0x12d   : > { %v622_v23 = vpop.xlane.xlu0 %621 }
 0x12e   : > { %v684_v0 = vmul.f32 0.0625, %v622_v23 }
 0x130   : > { %v716_v15 = vadd.f32 1e-05, %v684_v0 }
 0x131   : > { %v625_v30 = vpop.xlane.xlu1 %624  ;;  %v628_v32 = vpop.xlane.xlu0 %627 }
 0x132   : > { %11828 = vrsqrt.f32 %v716_v15  ;;  %v685_v34 = vmul.f32 0.0625, %v625_v30  ;;  %v686_v35 = vmul.f32 0.0625, %v628_v32 }
 0x134   : > { %v717_v48 = vadd.f32 1e-05, %v685_v34  ;;  %v718_v39 = vadd.f32 1e-05, %v686_v35 }
 0x135   : > { %v631_v42 = vpop.xlane.xlu1 %630  ;;  %v634_v20 = vpop.xlane.xlu0 %633 }
 0x136   : > { %11830 = vrsqrt.f32 %v717_v48  ;;  %v687_v46 = vmul.f32 0.0625, %v631_v42  ;;  %v688_v36 = vmul.f32 0.0625, %v634_v20  ;;  %v12878_v48 = vld [vmem:[%s16726_s2] ss:$0 sm:$0xff] }
 0x137   : > { %11832 = vrsqrt.f32 %v718_v39 }
 0x138   : > { %v719_v50 = vadd.f32 1e-05, %v687_v46  ;;  %v720_v51 = vadd.f32 1e-05, %v688_v36 }
 0x139   : > { %v637_v52 = vpop.xlane.xlu1 %636  ;;  %v640_v8 = vpop.xlane.xlu0 %639 }
 0x13a   : > { %11834 = vrsqrt.f32 %v719_v50  ;;  %v689_v58 = vmul.f32 0.0625, %v637_v52  ;;  %v690_v24 = vmul.f32 0.0625, %v640_v8 }
 0x13b   : > { %11836 = vrsqrt.f32 %v720_v51 }
 0x13c   : > { %v721_v62 = vadd.f32 1e-05, %v689_v58  ;;  %v722_v40 = vadd.f32 1e-05, %v690_v24 }
 0x13d   : > { %v643_v3 = vpop.xlane.xlu1 %642  ;;  %v646_v4 = vpop.xlane.xlu0 %645 }
 0x13e   : > { %11838 = vrsqrt.f32 %v721_v62  ;;  %v691_v56 = vmul.f32 0.0625, %v643_v3  ;;  %v692_v12 = vmul.f32 0.0625, %v646_v4 }
 0x13f   : > { %v11829_v14 = vpop.eup %11828  ;;  %11840 = vrsqrt.f32 %v722_v40 }
 0x140   : > { %v780_v18 = vmul.f32 %v11829_v14, %v12662_v10  ;;  %v723_v44 = vadd.f32 1e-05, %v691_v56  ;;  %v724_v60 = vadd.f32 1e-05, %v692_v12 }
 0x141   : > { %v649_v23 = vpop.xlane.xlu1 %648  ;;  %v652_v0 = vpop.xlane.xlu0 %651 }
 0x142   : > { %11842 = vrsqrt.f32 %v723_v44  ;;  %v693_v15 = vmul.f32 0.0625, %v649_v23  ;;  %v694_v30 = vmul.f32 0.0625, %v652_v0  ;;  %v819_v34 = vmul.f32 %v12871_v28, %v780_v18 }
 0x143   : > { %v11831_v32 = vpop.eup %11830  ;;  %11844 = vrsqrt.f32 %v724_v60 }
 0x144   : > { %v11833_v35 = vpop.eup %11832  ;;  %v781_v39 = vmul.f32 %v11831_v32, %v12672_v26  ;;  %v725_v10 = vadd.f32 1e-05, %v693_v15  ;;  %v726_v42 = vadd.f32 1e-05, %v694_v30  ;;  %v858_v58 = vadd.f32 %v12878_v48, %v819_v34 }
 0x145   : > { %v782_v20 = vmul.f32 %v11833_v35, %v12665_v11  ;;  %v655_v46 = vpop.xlane.xlu1 %654  ;;  %v658_v36 = vpop.xlane.xlu0 %657 }
 0x146   : > { %v820_v50 = vmul.f32 %v12871_v28, %v781_v39  ;;  %11846 = vrsqrt.f32 %v725_v10  ;;  %v695_v51 = vmul.f32 0.0625, %v655_v46  ;;  %v696_v52 = vmul.f32 0.0625, %v658_v36 }
 0x147   : > { %v11835_v8 = vpop.eup %11834  ;;  %v821_v24 = vmul.f32 %v12871_v28, %v782_v20  ;;  %11848 = vrsqrt.f32 %v726_v42 }
 0x148   : > { %v11837_v62 = vpop.eup %11836  ;;  %v859_v26 = vadd.f32 %v12878_v48, %v820_v50  ;;  %v783_v40 = vmul.f32 %v11835_v8, %v12675_v27  ;;  %v727_v3 = vadd.f32 1e-05, %v695_v51  ;;  %v728_v11 = vadd.f32 1e-05, %v696_v52 }
 0x149   : > { %v784_v4 = vmul.f32 %v11837_v62, %v12684_v2  ;;  %v661_v56 = vpop.xlane.xlu1 %660  ;;  %v664_v12 = vpop.xlane.xlu0 %663  ;;  %v860_v27 = vadd.f32 %v12878_v48, %v821_v24 }
 0x14a   : > { %v12888_v14 = vpack.c.bf16 %v859_v26, %v858_v58  ;;  %v822_v18 = vmul.f32 %v12871_v28, %v783_v40  ;;  %11850 = vrsqrt.f32 %v727_v3  ;;  %v697_v44 = vmul.f32 0.0625, %v661_v56 }
 0x14b   : > { %v11839_v60 = vpop.eup %11838  ;;  %v823_v23 = vmul.f32 %v12871_v28, %v784_v4  ;;  %11852 = vrsqrt.f32 %v728_v11  ;;  %v698_v0 = vmul.f32 0.0625, %v664_v12 }
 0x14c   : > { %16807 = vst [vmem:[#allocation2_spill] sm:$0xff] %v12888_v14  ;;  %v11841_v15 = vpop.eup %11840  ;;  %v861_v30 = vadd.f32 %v12878_v48, %v822_v18  ;;  %v785_v2 = vmul.f32 %v11839_v60, %v12687_v5  ;;  %v729_v32 = vadd.f32 1e-05, %v697_v44  ;;  %10684 = vmatprep.mubr.msk.bf16.mxu1 %vm378_vm0, %v12888_v14 }
 0x14d   : > { %v786_v34 = vmul.f32 %v11841_v15, %v12696_v55  ;;  %v730_v35 = vadd.f32 1e-05, %v698_v0  ;;  %v667_v39 = vpop.xlane.xlu1 %666  ;;  %v574_v10 = vpop.xlane.xlu0 %573  ;;  %v862_v50 = vadd.f32 %v12878_v48, %v823_v23 }
 0x14e   : > { %v12898_v42 = vpack.c.bf16 %v861_v30, %v860_v27  ;;  %v824_v20 = vmul.f32 %v12871_v28, %v785_v2  ;;  %11854 = vrsqrt.f32 %v729_v32  ;;  %v699_v46 = vmul.f32 0.0625, %v667_v39 }
 0x14f   : > { %v11843_v36 = vpop.eup %11842  ;;  %11856 = vrsqrt.f32 %v730_v35  ;;  %v668_v5 = vmul.f32 0.0625, %v574_v10  ;;  %v825_v8 = vmul.f32 %v12871_v28, %v786_v34 }
 0x150   : > { %16808 = vst [vmem:[#allocation3_spill] sm:$0xff] %v12898_v42  ;;  %v11845_v51 = vpop.eup %11844  ;;  %v863_v52 = vadd.f32 %v12878_v48, %v824_v20  ;;  %v787_v55 = vmul.f32 %v11843_v36, %v12699_v9  ;;  %v731_v58 = vadd.f32 1e-05, %v699_v46  ;;  %10685 = vmatmul.mubr.msk.bf16.vlgmr.msra.gmra.mxu1 %vm378_vm0, %v12898_v42 }
 0x151   : > { %v788_v24 = vmul.f32 %v11845_v51, %v12708_v7  ;;  %v700_v62 = vadd.f32 1e-05, %v668_v5  ;;  %v577_v26 = vpop.xlane.xlu1 %576  ;;  %v580_v40 = vpop.xlane.xlu0 %579  ;;  %10701 = vmatpush3.bf16.msra.mxu1 %v12859_v61  ;;  %v864_v44 = vadd.f32 %v12878_v48, %v825_v8 }
 0x152   : > { %v12909_v3 = vpack.c.bf16 %v863_v52, %v862_v50  ;;  %v826_v11 = vmul.f32 %v12871_v28, %v787_v55  ;;  %11858 = vrsqrt.f32 %v731_v58  ;;  %v669_v4 = vmul.f32 0.0625, %v577_v26 }
 0x153   : > { %v11847_v56 = vpop.eup %11846  ;;  %v827_v9 = vmul.f32 %v12871_v28, %v788_v24  ;;  %11860 = vrsqrt.f32 %v700_v62  ;;  %v670_v12 = vmul.f32 0.0625, %v580_v40 }
 0x154   : > { %16809 = vst [vmem:[#allocation4_spill] sm:$0xff] %v12909_v3  ;;  %v11849_v18 = vpop.eup %11848  ;;  %v865_v7 = vadd.f32 %v12878_v48, %v826_v11  ;;  %v789_v60 = vmul.f32 %v11847_v56, %v12711_v13  ;;  %v701_v23 = vadd.f32 1e-05, %v669_v4  ;;  %10688 = vmatprep.mubr.msk.bf16.mxu1 %vm378_vm0, %v12909_v3 }
 0x155   : > { %v790_v61 = vmul.f32 %v11849_v18, %v12720_v1  ;;  %v702_v0 = vadd.f32 1e-05, %v670_v12  ;;  %v583_v15 = vpop.xlane.xlu1 %582  ;;  %v586_v27 = vpop.xlane.xlu0 %585  ;;  %v866_v35 = vadd.f32 %v12878_v48, %v827_v9 }
 0x156   : > { %v12919_v30 = vpack.c.bf16 %v865_v7, %v864_v44  ;;  %v828_v2 = vmul.f32 %v12871_v28, %v789_v60  ;;  %11862 = vrsqrt.f32 %v701_v23  ;;  %v671_v32 = vmul.f32 0.0625, %v583_v15 }
 0x157   : > { %v11851_v34 = vpop.eup %11850  ;;  %11864 = vrsqrt.f32 %v702_v0  ;;  %v672_v13 = vmul.f32 0.0625, %v586_v27  ;;  %v829_v20 = vmul.f32 %v12871_v28, %v790_v61 }
 0x158   : > { %16810 = vst [vmem:[#allocation5_spill] sm:$0xff] %v12919_v30  ;;  %v11853_v39 = vpop.eup %11852  ;;  %v867_v10 = vadd.f32 %v12878_v48, %v828_v2  ;;  %v791_v1 = vmul.f32 %v11851_v34, %v12723_v17  ;;  %v703_v46 = vadd.f32 1e-05, %v671_v32  ;;  %10689 = vmatmul.mubr.msk.bf16.gmra.mxu1 %vm378_vm0, %v12919_v30 }
 0x159   : > { %v792_v36 = vmul.f32 %v11853_v39, %v12732_v43  ;;  %v704_v50 = vadd.f32 1e-05, %v672_v13  ;;  %v589_v5 = vpop.xlane.xlu1 %588  ;;  %v592_v51 = vpop.xlane.xlu0 %591  ;;  %v868_v26 = vadd.f32 %v12878_v48, %v829_v20 }
 0x15a   : > { %v12929_v52 = vpack.c.bf16 %v867_v10, %v866_v35  ;;  %v830_v8 = vmul.f32 %v12871_v28, %v791_v1  ;;  %11866 = vrsqrt.f32 %v703_v46  ;;  %v673_v55 = vmul.f32 0.0625, %v589_v5 }
 0x15b   : > { %v11855_v58 = vpop.eup %11854  ;;  %v831_v24 = vmul.f32 %v12871_v28, %v792_v36  ;;  %11868 = vrsqrt.f32 %v704_v50  ;;  %v674_v17 = vmul.f32 0.0625, %v592_v51 }
 0x15c   : > { %16811 = vst [vmem:[#allocation6_spill] sm:$0xff] %v12929_v52  ;;  %v11857_v62 = vpop.eup %11856  ;;  %v869_v40 = vadd.f32 %v12878_v48, %v830_v8  ;;  %v793_v43 = vmul.f32 %v11855_v58, %v12735_v21  ;;  %v705_v11 = vadd.f32 1e-05, %v673_v55  ;;  %10692 = vmatprep.mubr.msk.bf16.mxu1 %vm378_vm0, %v12929_v52 }
 0x15d   : > { %v794_v4 = vmul.f32 %v11857_v62, %v12744_v59  ;;  %v706_v56 = vadd.f32 1e-05, %v674_v17  ;;  %v595_v9 = vpop.xlane.xlu1 %594  ;;  %v598_v12 = vpop.xlane.xlu0 %597  ;;  %v870_v23 = vadd.f32 %v12878_v48, %v831_v24 }
 0x15e   : > { %v12939_v18 = vpack.c.bf16 %v869_v40, %v868_v26  ;;  %v832_v44 = vmul.f32 %v12871_v28, %v793_v43  ;;  %11870 = vrsqrt.f32 %v705_v11  ;;  %v675_v7 = vmul.f32 0.0625, %v595_v9 }
 0x15f   : > { %v11859_v60 = vpop.eup %11858  ;;  %11872 = vrsqrt.f32 %v706_v56  ;;  %v676_v21 = vmul.f32 0.0625, %v598_v12  ;;  %v833_v15 = vmul.f32 %v12871_v28, %v794_v4 }
 0x160   : > { %16812 = vst [vmem:[#allocation7_spill] sm:$0xff] %v12939_v18  ;;  %v11861_v61 = vpop.eup %11860  ;;  %v871_v0 = vadd.f32 %v12878_v48, %v832_v44  ;;  %v795_v59 = vmul.f32 %v11859_v60, %v12747_v25  ;;  %v707_v27 = vadd.f32 1e-05, %v675_v7  ;;  %10693 = vmatmul.mubr.msk.bf16.gmra.mxu1 %vm378_vm0, %v12939_v18 }
 0x161   : > { %v764_v2 = vmul.f32 %v11861_v61, %v12756_v16  ;;  %v708_v32 = vadd.f32 1e-05, %v676_v21  ;;  %v601_v34 = vpop.xlane.xlu1 %600  ;;  %v604_v35 = vpop.xlane.xlu0 %603  ;;  %v872_v36 = vadd.f32 %v12878_v48, %v833_v15 }
 0x162   : > { %v12949_v13 = vpack.c.bf16 %v871_v0, %v870_v23  ;;  %v834_v39 = vmul.f32 %v12871_v28, %v795_v59  ;;  %11874 = vrsqrt.f32 %v707_v27  ;;  %v677_v10 = vmul.f32 0.0625, %v601_v34 }
 0x163   : > { %v11863_v20 = vpop.eup %11862  ;;  %v803_v1 = vmul.f32 %v12871_v28, %v764_v2  ;;  %11876 = vrsqrt.f32 %v708_v32  ;;  %v678_v25 = vmul.f32 0.0625, %v604_v35 }
 0x164   : > { %16813 = vst [vmem:[#allocation8_spill] sm:$0xff] %v12949_v13  ;;  %v11865_v46 = vpop.eup %11864  ;;  %v873_v50 = vadd.f32 %v12878_v48, %v834_v39  ;;  %v765_v16 = vmul.f32 %v11863_v20, %v12759_v29  ;;  %v709_v5 = vadd.f32 1e-05, %v677_v10  ;;  %10696 = vmatprep.mubr.msk.bf16.mxu1 %vm378_vm0, %v12949_v13 }
 0x165   : > { %v766_v51 = vmul.f32 %v11865_v46, %v12768_v31  ;;  %v710_v8 = vadd.f32 1e-05, %v678_v25  ;;  %v607_v55 = vpop.xlane.xlu1 %606  ;;  %v610_v58 = vpop.xlane.xlu0 %609  ;;  %v842_v40 = vadd.f32 %v12878_v48, %v803_v1 }
 0x166   : > { %v12959_v24 = vpack.c.bf16 %v873_v50, %v872_v36  ;;  %v804_v17 = vmul.f32 %v12871_v28, %v765_v16  ;;  %11878 = vrsqrt.f32 %v709_v5  ;;  %v679_v62 = vmul.f32 0.0625, %v607_v55 }
 0x167   : > { %v11867_v26 = vpop.eup %11866  ;;  %11880 = vrsqrt.f32 %v710_v8  ;;  %v680_v29 = vmul.f32 0.0625, %v610_v58  ;;  %v805_v4 = vmul.f32 %v12871_v28, %v766_v51 }
 0x168   : > { %16814 = vst [vmem:[#allocation9_spill] sm:$0xff] %v12959_v24  ;;  %v11869_v43 = vpop.eup %11868  ;;  %v843_v11 = vadd.f32 %v12878_v48, %v804_v17  ;;  %v767_v31 = vmul.f32 %v11867_v26, %v12771_v33  ;;  %v711_v56 = vadd.f32 1e-05, %v679_v62  ;;  %10697 = vmatmul.mubr.msk.bf16.gmra.mxu1 %vm378_vm0, %v12959_v24 }
 0x169   : > { %v768_v9 = vmul.f32 %v11869_v43, %v12780_v47  ;;  %v712_v12 = vadd.f32 1e-05, %v680_v29  ;;  %v613_v44 = vpop.xlane.xlu1 %612  ;;  %v616_v7 = vpop.xlane.xlu0 %615  ;;  %v844_v59 = vadd.f32 %v12878_v48, %v805_v4 }
 0x16a   : > { %v12969_v60 = vpack.c.bf16 %v843_v11, %v842_v40  ;;  %v806_v23 = vmul.f32 %v12871_v28, %v767_v31  ;;  %11882 = vrsqrt.f32 %v711_v56  ;;  %v681_v21 = vmul.f32 0.0625, %v613_v44 }
 0x16b   : > { %v11871_v61 = vpop.eup %11870  ;;  %v807_v0 = vmul.f32 %v12871_v28, %v768_v9  ;;  %11884 = vrsqrt.f32 %v712_v12  ;;  %v682_v33 = vmul.f32 0.0625, %v616_v7 }
 0x16c   : > { %16815 = vst [vmem:[#allocation10_spill] sm:$0xff] %v12969_v60  ;;  %v11873_v15 = vpop.eup %11872  ;;  %v845_v27 = vadd.f32 %v12878_v48, %v806_v23  ;;  %v769_v47 = vmul.f32 %v11871_v61, %v12783_v37  ;;  %v713_v2 = vadd.f32 1e-05, %v681_v21  ;;  %10668 = vmatprep.mubr.msk.bf16.mxu0 %vm378_vm0, %v12969_v60  ;;  %10702 = vmatprep.mubr.msk.bf16.mxu1 %vm378_vm0, %v12969_v60 }
 0x16d   : > { %v770_v32 = vmul.f32 %v11873_v15, %v12792_v63  ;;  %v714_v34 = vadd.f32 1e-05, %v682_v33  ;;  %v619_v35 = vpop.xlane.xlu1 %618  ;;  %v846_v37 = vadd.f32 %v12878_v48, %v807_v0 }
 0x16e   : > { %v12981_v39 = vpack.c.bf16 %v845_v27, %v844_v59  ;;  %v808_v10 = vmul.f32 %v12871_v28, %v769_v47  ;;  %11886 = vrsqrt.f32 %v713_v2  ;;  %v683_v20 = vmul.f32 0.0625, %v619_v35 }
 0x16f   : > { %v11875_v1 = vpop.eup %11874  ;;  %11888 = vrsqrt.f32 %v714_v34  ;;  %v809_v36 = vmul.f32 %v12871_v28, %v770_v32 }
 0x170   : > { %16816 = vst [vmem:[#allocation11_spill] sm:$0xff] %v12981_v39  ;;  %v11877_v25 = vpop.eup %11876  ;;  %v847_v46 = vadd.f32 %v12878_v48, %v808_v10  ;;  %v771_v50 = vmul.f32 %v11875_v1, %v12795_v41  ;;  %v715_v63 = vadd.f32 1e-05, %v683_v20  ;;  %10669 = vmatmul.mubr.msk.bf16.vlgmr.msra.gmra.mxu0 %vm378_vm0, %v12981_v39  ;;  %10703 = vmatmul.mubr.msk.bf16.vlgmr.msra.gmra.mxu1 %vm378_vm0, %v12981_v39 }
 0x171   : > { %v772_v16 = vmul.f32 %v11877_v25, %v12807_v19  ;;  %10735 = vmatpush3.bf16.msra.mxu0 %v12865_v45  ;;  %v848_v58 = vadd.f32 %v12878_v48, %v809_v36 }
 0x172   : > { %v12994_v5 = vpack.c.bf16 %v847_v46, %v846_v37  ;;  %v810_v51 = vmul.f32 %v12871_v28, %v771_v50  ;;  %11890 = vrsqrt.f32 %v715_v63 }
 0x173   : > { %v11879_v8 = vpop.eup %11878  ;;  %v811_v55 = vmul.f32 %v12871_v28, %v772_v16 }
 0x174   : > { %16817 = vst [vmem:[#allocation12_spill] sm:$0xff] %v12994_v5  ;;  %v11881_v41 = vpop.eup %11880  ;;  %v849_v17 = vadd.f32 %v12878_v48, %v810_v51  ;;  %v773_v62 = vmul.f32 %v11879_v8, %v12810_v22  ;;  %10672 = vmatprep.mubr.msk.bf16.mxu0 %vm378_vm0, %v12994_v5  ;;  %10706 = vmatprep.mubr.msk.bf16.mxu1 %vm378_vm0, %v12994_v5 }
 0x175   : > { %v774_v19 = vmul.f32 %v11881_v41, %v12819_v38  ;;  %v850_v29 = vadd.f32 %v12878_v48, %v811_v55 }
 0x176   : > { %v13006_v45 = vpack.c.bf16 %v849_v17, %v848_v58  ;;  %v812_v26 = vmul.f32 %v12871_v28, %v773_v62 }
 0x177   : > { %v11883_v40 = vpop.eup %11882  ;;  %v813_v22 = vmul.f32 %v12871_v28, %v774_v19 }
 0x178   : > { %16818 = vst [vmem:[#allocation13_spill] sm:$0xff] %v13006_v45  ;;  %v11885_v43 = vpop.eup %11884  ;;  %v851_v11 = vadd.f32 %v12878_v48, %v812_v26  ;;  %v775_v4 = vmul.f32 %v11883_v40, %v12822_v49  ;;  %10673 = vmatmul.mubr.msk.bf16.gmra.mxu0 %vm378_vm0, %v13006_v45  ;;  %10707 = vmatmul.mubr.msk.bf16.gmra.mxu1 %vm378_vm0, %v13006_v45 }
 0x179   : > { %v776_v38 = vmul.f32 %v11885_v43, %v12831_v54  ;;  %v852_v7 = vadd.f32 %v12878_v48, %v813_v22 }
 0x17a   : > { %v13018_v31 = vpack.c.bf16 %v851_v11, %v850_v29  ;;  %v814_v56 = vmul.f32 %v12871_v28, %v775_v4 }
 0x17b   : > { %v11887_v9 = vpop.eup %11886  ;;  %v815_v12 = vmul.f32 %v12871_v28, %v776_v38 }
 0x17c   : > { %16819 = vst [vmem:[#allocation14_spill] sm:$0xff] %v13018_v31  ;;  %v11889_v44 = vpop.eup %11888  ;;  %v853_v49 = vadd.f32 %v12878_v48, %v814_v56  ;;  %v777_v23 = vmul.f32 %v11887_v9, %v12834_v53  ;;  %10676 = vmatprep.mubr.msk.bf16.mxu0 %vm378_vm0, %v13018_v31  ;;  %10710 = vmatprep.mubr.msk.bf16.mxu1 %vm378_vm0, %v13018_v31 }
 0x17d   : > { %v778_v54 = vmul.f32 %v11889_v44, %v12843_v6  ;;  %v854_v33 = vadd.f32 %v12878_v48, %v815_v12 }
 0x17e   : > { %v13030_v21 = vpack.c.bf16 %v853_v49, %v852_v7  ;;  %v816_v61 = vmul.f32 %v12871_v28, %v777_v23 }
 0x17f   : > { %v11891_v0 = vpop.eup %11890  ;;  %v817_v59 = vmul.f32 %v12871_v28, %v778_v54 }
 0x180   : > { %16820 = vst [vmem:[#allocation15_spill] sm:$0xff] %v13030_v21  ;;  %v855_v15 = vadd.f32 %v12878_v48, %v816_v61  ;;  %v779_v53 = vmul.f32 %v11891_v0, %v12846_v57  ;;  %10677 = vmatmul.mubr.msk.bf16.gmra.mxu0 %vm378_vm0, %v13030_v21  ;;  %10711 = vmatmul.mubr.msk.bf16.gmra.mxu1 %vm378_vm0, %v13030_v21 }
 0x181   : > { %v856_v47 = vadd.f32 %v12878_v48, %v817_v59  ;;  %v13171_v59 = vld [vmem:[%s16729_s5 + $0x4] ss:$0 sm:$0xff] }
 0x182   : > { %v13041_v6 = vpack.c.bf16 %v855_v15, %v854_v33  ;;  %v818_v27 = vmul.f32 %v12871_v28, %v779_v53  ;;  %v13107_v28 = vld [vmem:[%s16729_s5] ss:$0 sm:$0xff] }
 0x184   : > { %16821 = vst [vmem:[#allocation16_spill] sm:$0xff] %v13041_v6  ;;  %v857_v2 = vadd.f32 %v12878_v48, %v818_v27  ;;  %10680 = vmatprep.mubr.msk.bf16.mxu0 %vm378_vm0, %v13041_v6  ;;  %10714 = vmatprep.mubr.msk.bf16.mxu1 %vm378_vm0, %v13041_v6 }
 0x186   : > { %v13050_v57 = vpack.c.bf16 %v857_v2, %v856_v47 }
 0x188   : > { %16822 = vst [vmem:[#allocation17_spill] sm:$0xff] %v13050_v57  ;;  %10681 = vmatmul.mubr.msk.bf16.gmra.mxu0 %vm378_vm0, %v13050_v57  ;;  %10715 = vmatmul.mubr.msk.bf16.gmra.mxu1 %vm378_vm0, %v13050_v57 }
 0x189   : > { %10718 = vmatprep.mubr.msk.bf16.mxu1 %vm378_vm0, %v12888_v14  ;;  %10736 = vmatprep.mubr.msk.bf16.mxu0 %vm378_vm0, %v12969_v60 }
 0x190   : > { %10719 = vmatmul.mubr.msk.bf16.gmra.mxu1 %vm378_vm0, %v12898_v42  ;;  %10737 = vmatmul.mubr.msk.bf16.vlgmr.msra.gmra.mxu0 %vm378_vm0, %v12981_v39 }
 0x191   : > { %10722 = vmatprep.mubr.msk.bf16.mxu1 %vm378_vm0, %v12909_v3  ;;  %10740 = vmatprep.mubr.msk.bf16.mxu0 %vm378_vm0, %v12994_v5 }
 0x198   : > { %10723 = vmatmul.mubr.msk.bf16.gmra.mxu1 %vm378_vm0, %v12919_v30  ;;  %10741 = vmatmul.mubr.msk.bf16.gmra.mxu0 %vm378_vm0, %v13006_v45 }
 0x199   : > { %10726 = vmatprep.mubr.msk.bf16.mxu1 %vm378_vm0, %v12929_v52  ;;  %10744 = vmatprep.mubr.msk.bf16.mxu0 %vm378_vm0, %v13018_v31 }
 0x1a0   : > { %10727 = vmatmul.mubr.msk.bf16.gmra.mxu1 %vm378_vm0, %v12939_v18  ;;  %10745 = vmatmul.mubr.msk.bf16.gmra.mxu0 %vm378_vm0, %v13030_v21 }
 0x1a1   : > { %10730 = vmatprep.mubr.msk.bf16.mxu1 %vm378_vm0, %v12949_v13  ;;  %10748 = vmatprep.mubr.msk.bf16.mxu0 %vm378_vm0, %v13041_v6 }
 0x1a8   : > { %10731 = vmatmul.mubr.msk.bf16.gmra.mxu1 %vm378_vm0, %v12959_v24  ;;  %10749 = vmatmul.mubr.msk.bf16.gmra.mxu0 %vm378_vm0, %v13050_v57 }
 0x1a9   : > { %10752 = vmatprep.mubr.msk.bf16.mxu0 %vm378_vm0, %v12888_v14 }
 0x1b0   : > { %10753 = vmatmul.mubr.msk.bf16.gmra.mxu0 %vm378_vm0, %v12898_v42 }
 0x1b1   : > { %10756 = vmatprep.mubr.msk.bf16.mxu0 %vm378_vm0, %v12909_v3 }
 0x1b8   : > { %10757 = vmatmul.mubr.msk.bf16.gmra.mxu0 %vm378_vm0, %v12919_v30 }
 0x1b9   : > { %10760 = vmatprep.mubr.msk.bf16.mxu0 %vm378_vm0, %v12929_v52 }
 0x1c0   : > { %10761 = vmatmul.mubr.msk.bf16.gmra.mxu0 %vm378_vm0, %v12939_v18 }
 0x1c1   : > { %10764 = vmatprep.mubr.msk.bf16.mxu0 %vm378_vm0, %v12949_v13 }
 0x1c8   : > { %10765 = vmatmul.mubr.msk.bf16.gmra.mxu0 %vm378_vm0, %v12959_v24 }
 0x210   : > { %v10686_v48 = vpop.f32.mrf.mxu1 }
 0x211   : > { %v13110_v32 = vadd.f32 %v10686_v48, %v13107_v28 }
 0x212   : > { %v1051_v34 = vpop.f32.mrf.mxu1 }
 0x213   : > { %v1052_v1 = vadd.f32 %v13107_v28, %v1051_v34 }
 0x214   : > { %v10687_v35 = vpop.f32.mrf.mxu1 }
 0x215   : > { %v13113_v10 = vadd.f32 %v10687_v35, %v13107_v28 }
 0x216   : > { %v1054_v20 = vpop.f32.mrf.mxu1 }
 0x217   : > { %v1055_v25 = vadd.f32 %v13107_v28, %v1054_v20 }
 0x218   : > { %v10690_v46 = vpop.f32.mrf.mxu1 }
 0x219   : > { %v1478_v36 = vpack.c.bf16 %v1055_v25, %v1052_v1  ;;  %v13120_v50 = vadd.f32 %v10690_v46, %v13107_v28 }
 0x21a   : > { %v1067_v63 = vpop.f32.mrf.mxu1 }
 0x21b   : > { %v13123_v16 = vadd.f32 %v13107_v28, %v1067_v63  ;;  %10804 = vmatprep.mubr.msk.bf16.mxu0 %vm1526_vm1, %v1478_v36 }
 0x21c   : > { %v10691_v51 = vpop.f32.mrf.mxu1 }
 0x21d   : > { %v13127_v8 = vadd.f32 %v10691_v51, %v13107_v28 }
 0x21e   : > { %v1070_v55 = vpop.f32.mrf.mxu1 }
 0x21f   : > { %v13132_v58 = vadd.f32 %v13107_v28, %v1070_v55 }
 0x220   : > { %v10694_v17 = vpop.f32.mrf.mxu1 }
 0x221   : > { %v13137_v19 = vadd.f32 %v10694_v17, %v13107_v28 }
 0x222   : > { %v1083_v26 = vpop.f32.mrf.mxu1 }
 0x223   : > { %v13140_v40 = vadd.f32 %v13107_v28, %v1083_v26 }
 0x224   : > { %v10695_v29 = vpop.f32.mrf.mxu1 }
 0x225   : > { %v13143_v43 = vadd.f32 %v10695_v29, %v13107_v28 }
 0x226   : > { %v1086_v11 = vpop.f32.mrf.mxu1 }
 0x227   : > { %v13148_v4 = vadd.f32 %v13107_v28, %v1086_v11 }
 0x228   : > { %v10698_v38 = vpop.f32.mrf.mxu1 }
 0x229   : > { %v13153_v9 = vadd.f32 %v10698_v38, %v13107_v28 }
 0x22a   : > { %v1099_v12 = vpop.f32.mrf.mxu1 }
 0x22b   : > { %v13156_v44 = vadd.f32 %v13107_v28, %v1099_v12 }
 0x22c   : > { %v10699_v7 = vpop.f32.mrf.mxu1 }
 0x22d   : > { %v13159_v49 = vadd.f32 %v10699_v7, %v13107_v28 }
 0x22e   : > { %v1102_v23 = vpop.f32.mrf.mxu1 }
 0x22f   : > { %v13164_v61 = vadd.f32 %v13107_v28, %v1102_v23 }
 0x230   : > { %v10670_v0 = vpop.f32.mrf.mxu0  ;;  %v10704_v33 = vpop.f32.mrf.mxu1 }
 0x231   : > { %v1174_v48 = vadd.f32 %v10704_v33, %v13171_v59 }
 0x232   : > { %v987_v53 = vpop.f32.mrf.mxu0  ;;  %v1165_v27 = vpop.f32.mrf.mxu1 }
 0x233   : > { %v988_v35 = vadd.f32 %v13107_v28, %v987_v53  ;;  %v1166_v25 = vadd.f32 %v13171_v59, %v1165_v27 }
 0x234   : > { %v10671_v47 = vpop.f32.mrf.mxu0  ;;  %v10705_v2 = vpop.f32.mrf.mxu1 }
 0x235   : > { %v1177_v34 = vadd.f32 %v10705_v2, %v13171_v59 }
 0x236   : > { %v990_v20 = vpop.f32.mrf.mxu0  ;;  %v1168_v1 = vpop.f32.mrf.mxu1 }
 0x237   : > { %v1487_v46 = vpack.c.bf16 %v1177_v34, %v1174_v48  ;;  %v991_v36 = vadd.f32 %v13107_v28, %v990_v20  ;;  %v1169_v63 = vadd.f32 %v13171_v59, %v1168_v1 }
 0x238   : > { %v13179_v51 = vpop.f32.mrf.mxu0  ;;  %v10708_v55 = vpop.f32.mrf.mxu1 }
 0x239   : > { %v1470_v17 = vpack.c.bf16 %v991_v36, %v988_v35  ;;  %v1486_v26 = vpack.c.bf16 %v1169_v63, %v1166_v25  ;;  %11724 = vmatprep.subr.msk.bf16.mxu1 %vm1526_vm1, %v1487_v46  ;;  %v1537_v38 = vsel %vm1526_vm1, %v1487_v46, 0  ;;  %v1190_v27 = vadd.f32 %v10708_v55, %v13171_v59 }
 0x23a   : > { %v1003_v29 = vpop.f32.mrf.mxu0  ;;  %v1181_v11 = vpop.f32.mrf.mxu1  ;;  %10769 = vmatpush3.bf16.xpose.msra.mxu1 %v1537_v38  ;;  %v999_v25 = vadd.f32 %v10671_v47, %v13107_v28  ;;  %v996_v55 = vadd.f32 %v10670_v0, %v13107_v28 }
 0x23b   : > { %10772 = vmatprep.mubr.msk.bf16.mxu1 %vm1526_vm1, %v1470_v17  ;;  %11725 = vmatprep.subr.msk.bf16.mxu1 %vm1526_vm1, %v1486_v26  ;;  %v1534_v1 = vsel %vm1526_vm1, %v1486_v26, 0  ;;  %v1182_v26 = vadd.f32 %v13171_v59, %v1181_v11 }
 0x23c   : > { %v10675_v12 = vpop.f32.mrf.mxu0  ;;  %v10709_v7 = vpop.f32.mrf.mxu1 }
 0x23d   : > { %v1193_v23 = vadd.f32 %v10709_v7, %v13171_v59 }
 0x23e   : > { %v1006_v33 = vpop.f32.mrf.mxu0  ;;  %v1184_v53 = vpop.f32.mrf.mxu1 }
 0x23f   : > { %v1489_v34 = vpack.c.bf16 %v1193_v23, %v1190_v27  ;;  %v1007_v63 = vadd.f32 %v13107_v28, %v1006_v33  ;;  %v1185_v17 = vadd.f32 %v13171_v59, %v1184_v53  ;;  %v1004_v23 = vadd.f32 %v13107_v28, %v1003_v29 }
 0x240   : > { %v13187_v2 = vpop.f32.mrf.mxu0  ;;  %v10712_v48 = vpop.f32.mrf.mxu1  ;;  %v1471_v27 = vpack.c.bf16 %v999_v25, %v996_v55 }
 0x241   : > { %v1472_v54 = vpack.c.bf16 %v1007_v63, %v1004_v23  ;;  %v1488_v15 = vpack.c.bf16 %v1185_v17, %v1182_v26  ;;  %v1598_v0 = vsel %vm1526_vm1, %v1489_v34, 0  ;;  %v1206_v55 = vadd.f32 %v10712_v48, %v13171_v59 }
 0x242   : > { %v1019_v35 = vpop.f32.mrf.mxu0  ;;  %v1197_v20 = vpop.f32.mrf.mxu1  ;;  %10771 = vmatpush3.bf16.xpose.msra.mxu1 %v1534_v1 }
 0x243   : > { %11726 = vmatprep.subr.msk.bf16.mxu1 %vm1526_vm1, %v1489_v34 }
 0x244   : > { %v13192_v46 = vpop.f32.mrf.mxu0  ;;  %v10713_v36 = vpop.f32.mrf.mxu1 }
 0x245   : > { %v1209_v53 = vadd.f32 %v10713_v36, %v13171_v59 }
 0x246   : > { %v1022_v38 = vpop.f32.mrf.mxu0  ;;  %v1200_v7 = vpop.f32.mrf.mxu1 }
 0x247   : > { %v1491_v34 = vpack.c.bf16 %v1209_v53, %v1206_v55  ;;  %v1023_v22 = vadd.f32 %v13107_v28, %v1022_v38  ;;  %v1012_v53 = vadd.f32 %v13179_v51, %v13107_v28  ;;  %v1201_v55 = vadd.f32 %v13171_v59, %v1200_v7 }
 0x248   : > { %v13199_v1 = vpop.f32.mrf.mxu0  ;;  %v10716_v47 = vpop.f32.mrf.mxu1 }
 0x249   : > { %10773 = vmatmul.mubr.msk.bf16.vlgmr.msra.gmra.mxu1 %vm1526_vm1, %v1471_v27 }
 0x24a   : > { %v13202_v41 = vpop.f32.mrf.mxu0  ;;  %v13204_v33 = vpop.f32.mrf.mxu1  ;;  %10777 = vmatpush3.bf16.xpose.msra.mxu1 %v1598_v0  ;;  %10780 = vmatprep.mubr.msk.bf16.mxu1 %vm1526_vm1, %v1472_v54  ;;  %v1595_v54 = vsel %vm1526_vm1, %v1488_v15, 0  ;;  %v1015_v0 = vadd.f32 %v10675_v12, %v13107_v28  ;;  %v1020_v12 = vadd.f32 %v13107_v28, %v1019_v35 }
 0x24b   : > { %11727 = vmatprep.subr.msk.bf16.mxu1 %vm1526_vm1, %v1488_v15 }
 0x24c   : > { %v13209_v29 = vpop.f32.mrf.mxu0  ;;  %v10717_v11 = vpop.f32.mrf.mxu1  ;;  %v1473_v38 = vpack.c.bf16 %v1015_v0, %v1012_v53  ;;  %v1474_v51 = vpack.c.bf16 %v1023_v22, %v1020_v12 }
 0x24d   : > { %v1225_v22 = vadd.f32 %v10717_v11, %v13171_v59 }
 0x24e   : > { %v13212_v25 = vpop.f32.mrf.mxu0  ;;  %v13214_v63 = vpop.f32.mrf.mxu1 }
 0x250   : > { %v10720_v17 = vpop.f32.mrf.mxu1  ;;  %v13217_v23 = vpop.f32.mrf.mxu0 }
 0x251   : > { %v1238_v48 = vadd.f32 %v10720_v17, %v13171_v59  ;;  %v1198_v17 = vadd.f32 %v13171_v59, %v1197_v20 }
 0x252   : > { %v1229_v27 = vpop.f32.mrf.mxu1  ;;  %v13219_v26 = vpop.f32.mrf.mxu0  ;;  %10779 = vmatpush3.bf16.xpose.msra.mxu1 %v1595_v54 }
 0x253   : > { %11728 = vmatprep.subr.msk.bf16.mxu1 %vm1526_vm1, %v1491_v34  ;;  %v1230_v37 = vadd.f32 %v13171_v59, %v1229_v27  ;;  %v1490_v7 = vpack.c.bf16 %v1201_v55, %v1198_v17 }
 0x254   : > { %v10721_v36 = vpop.f32.mrf.mxu1  ;;  %v13224_v62 = vpop.f32.mrf.mxu0 }
 0x255   : > { %v1241_v56 = vadd.f32 %v10721_v36, %v13171_v59  ;;  %v1656_v17 = vsel %vm1526_vm1, %v1490_v7, 0 }
 0x256   : > { %v1232_v15 = vpop.f32.mrf.mxu1  ;;  %v13232_v54 = vpop.f32.mrf.mxu0 }
 0x257   : > { %v1495_v24 = vpack.c.bf16 %v1241_v56, %v1238_v48  ;;  %v1233_v13 = vadd.f32 %v13171_v59, %v1232_v15  ;;  %v1659_v56 = vsel %vm1526_vm1, %v1491_v34, 0  ;;  %v1222_v34 = vadd.f32 %v10716_v47, %v13171_v59  ;;  %v13266_v15 = vld [vmem:[%s16729_s5 + $0x8] ss:$0 sm:$0xff] }
 0x258   : > { %v13238_v18 = vpop.f32.mrf.mxu1  ;;  %v13240_v36 = vpop.f32.mrf.mxu0  ;;  %v1031_v47 = vadd.f32 %v13192_v46, %v13107_v28  ;;  %v1217_v46 = vadd.f32 %v13171_v59, %v13214_v63 }
 0x259   : > { %v1494_v52 = vpack.c.bf16 %v1233_v13, %v1230_v37  ;;  %11732 = vmatprep.subr.msk.bf16.mxu0 %vm1526_vm1, %v1495_v24  ;;  %10781 = vmatmul.mubr.msk.bf16.vlgmr.msra.gmra.mxu1 %vm1526_vm1, %v1473_v38  ;;  %v1781_v0 = vsel %vm1526_vm1, %v1495_v24, 0  ;;  %v1493_v55 = vpack.c.bf16 %v1225_v22, %v1222_v34 }
 0x25a   : > { %v13244_v35 = vpop.f32.mrf.mxu1  ;;  %v13246_v27 = vpop.f32.mrf.mxu0  ;;  %10785 = vmatpush3.bf16.xpose.msra.mxu1 %v1659_v56  ;;  %10788 = vmatprep.mubr.msk.bf16.mxu1 %vm1526_vm1, %v1474_v51 }
 0x25b   : > { %10801 = vmatpush3.bf16.xpose.msra.mxu0 %v1781_v0  ;;  %11729 = vmatprep.subr.msk.bf16.mxu1 %vm1526_vm1, %v1490_v7  ;;  %v1778_v51 = vsel %vm1526_vm1, %v1494_v52, 0  ;;  %v1028_v7 = vadd.f32 %v13187_v2, %v13107_v28 }
 0x25c   : > { %v10725_v13 = vpop.f32.mrf.mxu1  ;;  %v13252_v37 = vpop.f32.mrf.mxu0  ;;  %11733 = vmatprep.subr.msk.bf16.mxu0 %vm1526_vm1, %v1494_v52 }
 0x25d   : > { %v1475_v42 = vpack.c.bf16 %v1031_v47, %v1028_v7  ;;  %v1720_v47 = vsel %vm1526_vm1, %v1493_v55, 0 }
 0x25e   : > { %v13256_v20 = vpop.f32.mrf.mxu1  ;;  %v13258_v48 = vpop.f32.mrf.mxu0 }
 0x260   : > { %v10728_v24 = vpop.f32.mrf.mxu1  ;;  %v13261_v53 = vpop.f32.mrf.mxu0 }
 0x261   : > { %v1270_v22 = vadd.f32 %v10728_v24, %v13171_v59  ;;  %v1036_v24 = vadd.f32 %v13107_v28, %v13202_v41 }
 0x262   : > { %v1261_v12 = vpop.f32.mrf.mxu1  ;;  %v1375_v38 = vpop.f32.mrf.mxu0  ;;  %10787 = vmatpush3.bf16.xpose.msra.mxu1 %v1656_v17 }
 0x263   : > { %v1376_v11 = vadd.f32 %v13266_v15, %v1375_v38  ;;  %10803 = vmatpush3.bf16.xpose.msra.mxu0 %v1778_v51  ;;  %11730 = vmatprep.subr.msk.bf16.mxu1 %vm1526_vm1, %v1493_v55  ;;  %v1039_v38 = vadd.f32 %v13107_v28, %v13212_v25  ;;  %v1214_v25 = vadd.f32 %v13171_v59, %v13204_v33 }
 0x264   : > { %v10729_v56 = vpop.f32.mrf.mxu1  ;;  %v13274_v0 = vpop.f32.mrf.mxu0  ;;  %v1257_v33 = vadd.f32 %v10725_v13, %v13171_v59 }
 0x265   : > { %v1273_v34 = vadd.f32 %v10729_v56, %v13171_v59  ;;  %v1262_v56 = vadd.f32 %v13171_v59, %v1261_v12  ;;  %v1476_v63 = vpack.c.bf16 %v1039_v38, %v1036_v24  ;;  %v1492_v7 = vpack.c.bf16 %v1217_v46, %v1214_v25 }
 0x266   : > { %v1264_v52 = vpop.f32.mrf.mxu1  ;;  %v1378_v17 = vpop.f32.mrf.mxu0  ;;  %v16823_v12 = vpack.c.bf16 %v13113_v10, %v13110_v32  ;;  %v1355_v10 = vadd.f32 %v13224_v62, %v13266_v15 }
 0x267   : > { %v1499_v51 = vpack.c.bf16 %v1273_v34, %v1270_v22  ;;  %v1265_v30 = vadd.f32 %v13171_v59, %v1264_v52  ;;  %v1379_v3 = vadd.f32 %v13266_v15, %v1378_v17  ;;  %v1717_v46 = vsel %vm1526_vm1, %v1492_v7, 0 }
 0x268   : > { %v13289_v2 = vpop.f32.mrf.mxu0  ;;  %v10732_v24 = vpop.f32.mrf.mxu1 }
 0x269   : > { %v13293_v14 = vpack.c.bf16 %v1379_v3, %v1376_v11  ;;  %11736 = vmatprep.subr.msk.bf16.mxu0 %vm1526_vm1, %v1499_v51  ;;  %v1498_v22 = vpack.c.bf16 %v1265_v30, %v1262_v56  ;;  %10789 = vmatmul.mubr.msk.bf16.vlgmr.msra.gmra.mxu1 %vm1526_vm1, %v1475_v42  ;;  %v1903_v41 = vsel %vm1526_vm1, %v1499_v51, 0  ;;  %v16824_v42 = vpack.c.bf16 %v13148_v4, %v13140_v40 }
 0x26a   : > { %v1391_v34 = vpop.f32.mrf.mxu0  ;;  %10805 = vmatmul.mubr.msk.bf16.vlgmr.msra.gmra.mxu0 %vm1526_vm1, %v16823_v12  ;;  %10793 = vmatpush3.bf16.xpose.msra.mxu1 %v1720_v47  ;;  %v1254_v11 = vadd.f32 %v13238_v18, %v13171_v59  ;;  %v1352_v40 = vadd.f32 %v13217_v23, %v13266_v15  ;;  %v1047_v18 = vadd.f32 %v13209_v29, %v13107_v28 }
 0x26b   : > { %v1392_v3 = vadd.f32 %v13266_v15, %v1391_v34  ;;  %10796 = vmatprep.mubr.msk.bf16.mxu1 %vm1526_vm1, %v1476_v63  ;;  %10817 = vmatpush3.bf16.xpose.msra.mxu0 %v1903_v41  ;;  %v1900_v56 = vsel %vm1526_vm1, %v1498_v22, 0  ;;  %v1044_v63 = vadd.f32 %v13199_v1, %v13107_v28  ;;  %v1347_v34 = vadd.f32 %v13266_v15, %v13232_v54  ;;  %v1277_v41 = vpop.f32.mrf.mxu1 }
 0x26c   : > { %v13305_v30 = vpop.f32.mrf.mxu0  ;;  %10820 = vmatprep.mubr.msk.bf16.mxu0 %vm1526_vm1, %v16824_v42  ;;  %11731 = vmatprep.subr.msk.bf16.mxu1 %vm1526_vm1, %v1492_v7  ;;  %v1497_v13 = vpack.c.bf16 %v1257_v33, %v1254_v11  ;;  %v1503_v51 = vpack.c.bf16 %v1355_v10, %v1352_v40  ;;  %v1246_v28 = vadd.f32 %v13171_v59, %v13244_v35 }
 0x26d   : > { %11737 = vmatprep.subr.msk.bf16.mxu0 %vm1526_vm1, %v1498_v22  ;;  %v1249_v22 = vadd.f32 %v13171_v59, %v13256_v20  ;;  %v1477_v12 = vpack.c.bf16 %v1047_v18, %v1044_v63  ;;  %v10733_v11 = vpop.f32.mrf.mxu1 }
 0x26e   : > { %v1394_v32 = vpop.f32.mrf.mxu0 }
 0x26f   : > { %v1395_v55 = vadd.f32 %v13266_v15, %v1394_v32  ;;  %v1842_v32 = vsel %vm1526_vm1, %v1497_v13, 0  ;;  %v1496_v10 = vpack.c.bf16 %v1249_v22, %v1246_v28 }
 0x270   : > { %v10754_v38 = vpop.f32.mrf.mxu0 }
 0x271   : > { %v13321_v4 = vpack.c.bf16 %v1395_v55, %v1392_v3  ;;  %v1416_v52 = vadd.f32 %v10754_v38, %v13266_v15  ;;  %v1344_v3 = vadd.f32 %v13266_v15, %v13219_v26  ;;  %v1387_v55 = vadd.f32 %v13274_v0, %v13266_v15 }
 0x272   : > { %v1407_v17 = vpop.f32.mrf.mxu0  ;;  %10795 = vmatpush3.bf16.xpose.msra.mxu1 %v1717_v46  ;;  %v16825_v26 = vpack.c.bf16 %v13143_v43, %v13137_v19  ;;  %v16826_v38 = vpack.c.bf16 %v13132_v58, %v13123_v16  ;;  %v1289_v43 = vadd.f32 %v10733_v11, %v13171_v59  ;;  %v1286_v58 = vadd.f32 %v10732_v24, %v13171_v59 }
 0x273   : > { %v1408_v62 = vadd.f32 %v13266_v15, %v1407_v17  ;;  %10819 = vmatpush3.bf16.xpose.msra.mxu0 %v1900_v56  ;;  %11734 = vmatprep.subr.msk.bf16.mxu1 %vm1526_vm1, %v1497_v13  ;;  %v1502_v33 = vpack.c.bf16 %v1347_v34, %v1344_v3  ;;  %v1839_v18 = vsel %vm1526_vm1, %v1496_v10, 0 }
 0x274   : > { %v10755_v23 = vpop.f32.mrf.mxu0  ;;  %10832 = vmatprep.subr.bf16.mxu0 %v1503_v51 }
 0x275   : > { %v1419_v25 = vadd.f32 %v10755_v23, %v13266_v15  ;;  %v1280_v23 = vpop.f32.mrf.mxu1 }
 0x276   : > { %v1410_v47 = vpop.f32.mrf.mxu0  ;;  %v1281_v34 = vadd.f32 %v13171_v59, %v1280_v23 }
 0x277   : > { %v13337_v7 = vpack.c.bf16 %v1419_v25, %v1416_v52  ;;  %v1411_v29 = vadd.f32 %v13266_v15, %v1410_v47  ;;  %v1384_v52 = vadd.f32 %v13261_v53, %v13266_v15 }
 0x278   : > { %v10758_v42 = vpop.f32.mrf.mxu0 }
 0x279   : > { %v13344_v1 = vpack.c.bf16 %v1411_v29, %v1408_v62  ;;  %v1432_v54 = vadd.f32 %v10758_v42, %v13266_v15  ;;  %10797 = vmatmul.mubr.msk.bf16.vlgmr.msra.gmra.mxu1 %vm1526_vm1, %v1477_v12  ;;  %v13365_v13 = vpack.c.bf16 %v1387_v55, %v1384_v52  ;;  %v1501_v62 = vpack.c.bf16 %v1289_v43, %v1286_v58 }
 0x27a   : > { %v1423_v20 = vpop.f32.mrf.mxu0  ;;  %10821 = vmatmul.mubr.msk.bf16.vlgmr.msra.gmra.mxu0 %vm1526_vm1, %v16825_v26  ;;  %10809 = vmatpush3.bf16.xpose.msra.mxu1 %v1842_v32  ;;  %v1278_v12 = vadd.f32 %v13171_v59, %v1277_v41  ;;  %v16828_v59 = vpack.c.bf16 %v13164_v61, %v13156_v44  ;;  %v1400_v43 = vadd.f32 %v13289_v2, %v13266_v15 }
 0x27b   : > { %v1424_v35 = vadd.f32 %v13266_v15, %v1423_v20  ;;  %10812 = vmatprep.mubr.msk.bf16.mxu1 %vm1526_vm1, %v16826_v38  ;;  %10833 = vmatpush3.bf16.msra.mxu0 %v1503_v51  ;;  %v1964_v32 = vsel %vm1526_vm1, %v1501_v62, 0 }
 0x27c   : > { %v10759_v40 = vpop.f32.mrf.mxu0  ;;  %11735 = vmatprep.subr.msk.bf16.mxu1 %vm1526_vm1, %v1496_v10  ;;  %10834 = vmatprep.subr.bf16.mxu0 %v1502_v33 }
 0x27d   : > { %v1435_v19 = vadd.f32 %v10759_v40, %v13266_v15  ;;  %v1363_v40 = vadd.f32 %v13266_v15, %v13258_v48 }
 0x27e   : > { %v1426_v0 = vpop.f32.mrf.mxu0 }
 0x27f   : > { %v13367_v17 = vpack.c.bf16 %v1435_v19, %v1432_v54  ;;  %v1427_v16 = vadd.f32 %v13266_v15, %v1426_v0  ;;  %10835 = vmatpush3.bf16.msra.mxu0 %v1502_v33  ;;  %v1500_v54 = vpack.c.bf16 %v1281_v34, %v1278_v12  ;;  %v16827_v33 = vpack.c.bf16 %v13127_v8, %v13120_v50 }
 0x280   : > { %v10762_v46 = vpop.f32.mrf.mxu0  ;;  %10848 = vmatprep.subr.bf16.mxu0 %v13365_v13  ;;  %v1371_v50 = vadd.f32 %v13252_v37, %v13266_v15  ;;  %v1360_v37 = vadd.f32 %v13266_v15, %v13246_v27  ;;  %v1403_v19 = vadd.f32 %v13305_v30, %v13266_v15  ;;  %v10131_v27 = vld [vmem:[%s16727_s3 + $0x8] sm:$0xff]  }
 0x281   : > { %v13371_v51 = vpack.c.bf16 %v1427_v16, %v1424_v35  ;;  %v1448_v53 = vadd.f32 %v10762_v46, %v13266_v15  ;;  %v1368_v35 = vadd.f32 %v13240_v36, %v13266_v15  ;;  %v1961_v61 = vsel %vm1526_vm1, %v1500_v54, 0 }
 0x282   : > { %v1439_v56 = vpop.f32.mrf.mxu0  ;;  %10811 = vmatpush3.bf16.xpose.msra.mxu1 %v1839_v18  ;;  %v1504_v52 = vpack.c.bf16 %v1363_v40, %v1360_v37  ;;  %v16829_v36 = vpack.c.bf16 %v13159_v49, %v13153_v9  ;;  %v13421_v0 = vpack.c.bf16 %v1403_v19, %v1400_v43  ;;  %v10100_v9 = vld [vmem:[%s16727_s3] sm:$0xff]   ;;  %v13430_v49 = vunpack.c.l.bf16 %v10131_v27 }
 0x283   : > { %v1440_v25 = vadd.f32 %v13266_v15, %v1439_v56  ;;  %11738 = vmatprep.subr.msk.bf16.mxu1 %vm1526_vm1, %v1501_v62  ;;  %v1505_v44 = vpack.c.bf16 %v1371_v50, %v1368_v35  ;;  %v13432_v48 = vunpack.c.l.bf16 %v10100_v9  ;;  %v13437_v2 = vunpack.c.h.bf16 %v10131_v27 }
 0x284   : > { %v10763_v63 = vpop.f32.mrf.mxu0 }
 0x285   : > { %v1451_v24 = vadd.f32 %v10763_v63, %v13266_v15 }
 0x286   : > { %v1442_v47 = vpop.f32.mrf.mxu0 }
 0x287   : > { %v13380_v22 = vpack.c.bf16 %v1451_v24, %v1448_v53  ;;  %v1443_v29 = vadd.f32 %v13266_v15, %v1442_v47  ;;  %v13444_v53 = vunpack.c.h.bf16 %v10100_v9 }
 0x288   : > { %v10766_v3 = vpop.f32.mrf.mxu0 }
 0x289   : > { %v13384_v42 = vpack.c.bf16 %v1443_v29, %v1440_v25  ;;  %v1464_v28 = vadd.f32 %v10766_v3, %v13266_v15  ;;  %10813 = vmatmul.mubr.msk.bf16.vlgmr.msra.gmra.mxu1 %vm1526_vm1, %v16827_v33 }
 0x28a   : > { %v1455_v20 = vpop.f32.mrf.mxu0  ;;  %10825 = vmatpush3.bf16.xpose.msra.mxu1 %v1964_v32  ;;  %10828 = vmatprep.mubr.msk.bf16.mxu1 %vm1526_vm1, %v16828_v59 }
 0x28b   : > { %v1456_v10 = vadd.f32 %v13266_v15, %v1455_v20  ;;  %11739 = vmatprep.subr.msk.bf16.mxu1 %vm1526_vm1, %v1500_v54 }
 0x28c   : > { %v10767_v41 = vpop.f32.mrf.mxu0 }
 0x28d   : > { %v1467_v55 = vadd.f32 %v10767_v41, %v13266_v15 }
 0x28e   : > { %v1458_v8 = vpop.f32.mrf.mxu0 }
 0x28f   : > { %v13401_v11 = vpack.c.bf16 %v1467_v55, %v1464_v28  ;;  %v1459_v26 = vadd.f32 %v13266_v15, %v1458_v8 }
 0x291   : > { %v13406_v38 = vpack.c.bf16 %v1459_v26, %v1456_v10 }
 0x292   : > { %10827 = vmatpush3.bf16.xpose.msra.mxu1 %v1961_v61 }
 0x293   : > { %10840 = vmatprep.subr.bf16.mxu1 %v1505_v44 }
 0x299   : > { %10829 = vmatmul.mubr.msk.bf16.vlgmr.msra.gmra.mxu1 %vm1526_vm1, %v16829_v36 }
 0x29a   : > { %10841 = vmatpush3.bf16.msra.mxu1 %v1505_v44 }
 0x29b   : > { %10842 = vmatprep.subr.bf16.mxu1 %v1504_v52 }
 0x29e   : > { %10843 = vmatpush3.bf16.msra.mxu1 %v1504_v52 }
 0x29f   : > { %10856 = vmatprep.subr.bf16.mxu1 %v13421_v0 }
 0x309   : > { %v10774_v30 = vpop.f32.mrf.mxu1 }
 0x30a   : > { %v13435_v15 = vadd.f32 %v10774_v30, %v13430_v49 }
 0x30b   : > { %v1573_v16 = vpop.f32.mrf.mxu1 }
 0x30c   : > { %v13440_v58 = vadd.f32 %v13432_v48, %v1573_v16  ;;  %v2022_v46 = vsel %vm2015_vm2, %v13435_v15, -inf }
 0x30d   : > { %2023 = vmax.xlane.f32.xlu0 %v2022_v46  ;;  %v10775_v62 = vpop.f32.mrf.mxu1 }
 0x30e   : > { %v13447_v56 = vadd.f32 %v10775_v62, %v13437_v2  ;;  %v2016_v63 = vsel %vm2015_vm2, %v13440_v58, -inf }
 0x30f   : > { %v1576_v18 = vpop.f32.mrf.mxu1 }
 0x310   : > { %v13450_v23 = vadd.f32 %v13444_v53, %v1576_v18  ;;  %v2025_v25 = vsel %vm2015_vm2, %v13447_v56, -inf }
 0x311   : > { %2026 = vmax.xlane.f32.xlu1 %v2025_v25  ;;  %2017 = vmax.xlane.f32.xlu0 %v2016_v63 }
 0x312   : > { %v2019_v24 = vsel %vm2015_vm2, %v13450_v23, -inf }
 0x315   : > { %2020 = vmax.xlane.f32.xlu1 %v2019_v24 }
 0x319   : > { %v10782_v34 = vpop.f32.mrf.mxu1 }
 0x31a   : > { %v13459_v47 = vadd.f32 %v10782_v34, %v13430_v49 }
 0x31b   : > { %v1634_v29 = vpop.f32.mrf.mxu1 }
 0x31c   : > { %v13462_v12 = vadd.f32 %v13432_v48, %v1634_v29  ;;  %v2034_v3 = vsel %vm2015_vm2, %v13459_v47, -inf }
 0x31d   : > { %v10783_v28 = vpop.f32.mrf.mxu1  ;;  %2035 = vmax.xlane.f32.xlu0 %v2034_v3 }
 0x31e   : > { %v13467_v54 = vadd.f32 %v10783_v28, %v13437_v2  ;;  %v2028_v10 = vsel %vm2015_vm2, %v13462_v12, -inf }
 0x31f   : > { %v1637_v33 = vpop.f32.mrf.mxu1 }
 0x320   : > { %v13470_v20 = vadd.f32 %v13444_v53, %v1637_v33  ;;  %v2037_v32 = vsel %vm2015_vm2, %v13467_v54, -inf }
 0x321   : > { %2038 = vmax.xlane.f32.xlu1 %v2037_v32  ;;  %2029 = vmax.xlane.f32.xlu0 %v2028_v10 }
 0x322   : > { %v2031_v59 = vsel %vm2015_vm2, %v13470_v20, -inf }
 0x325   : > { %2032 = vmax.xlane.f32.xlu1 %v2031_v59 }
 0x329   : > { %v10790_v41 = vpop.f32.mrf.mxu1 }
 0x32a   : > { %v13479_v55 = vadd.f32 %v10790_v41, %v13430_v49  ;;  %v10806_v59 = vpop.f32.mrf.mxu0 }
 0x32b   : > { %v1695_v50 = vpop.f32.mrf.mxu1 }
 0x32c   : > { %v13482_v8 = vadd.f32 %v13432_v48, %v1695_v50  ;;  %v2046_v26 = vsel %vm2015_vm2, %v13479_v55, -inf }
 0x32d   : > { %v10791_v35 = vpop.f32.mrf.mxu1  ;;  %2047 = vmax.xlane.f32.xlu0 %v2046_v26 }
 0x32e   : > { %v13487_v44 = vadd.f32 %v10791_v35, %v13437_v2  ;;  %v2040_v52 = vsel %vm2015_vm2, %v13482_v8, -inf }
 0x32f   : > { %v1698_v61 = vpop.f32.mrf.mxu1 }
 0x330   : > { %v13490_v40 = vadd.f32 %v13444_v53, %v1698_v61  ;;  %v2049_v37 = vsel %vm2015_vm2, %v13487_v44, -inf  ;;  %v1817_v61 = vpop.f32.mrf.mxu0 }
 0x331   : > { %2050 = vmax.xlane.f32.xlu1 %v2049_v37  ;;  %2041 = vmax.xlane.f32.xlu0 %v2040_v52 }
 0x332   : > { %v2043_v19 = vsel %vm2015_vm2, %v13490_v40, -inf  ;;  %v10807_v52 = vpop.f32.mrf.mxu0 }
 0x335   : > { %2044 = vmax.xlane.f32.xlu1 %v2043_v19 }
 0x339   : > { %v10798_v36 = vpop.f32.mrf.mxu1 }
 0x33a   : > { %v13499_v43 = vadd.f32 %v10798_v36, %v13430_v49 }
 0x33b   : > { %v1756_v27 = vpop.f32.mrf.mxu1 }
 0x33c   : > { %v13502_v9 = vadd.f32 %v13432_v48, %v1756_v27  ;;  %v2058_v30 = vsel %vm2015_vm2, %v13499_v43, -inf  ;;  %v1820_v27 = vpop.f32.mrf.mxu0 }
 0x33d   : > { %2059 = vmax.xlane.f32.xlu0 %v2058_v30  ;;  %v10799_v16 = vpop.f32.mrf.mxu1 }
 0x33e   : > { %v13507_v46 = vadd.f32 %v10799_v16, %v13437_v2  ;;  %v2052_v63 = vsel %vm2015_vm2, %v13502_v9, -inf }
 0x33f   : > { %v1759_v62 = vpop.f32.mrf.mxu1 }
 0x340   : > { %v13510_v18 = vadd.f32 %v13444_v53, %v1759_v62  ;;  %v2061_v25 = vsel %vm2015_vm2, %v13507_v46, -inf }
 0x341   : > { %2062 = vmax.xlane.f32.xlu1 %v2061_v25  ;;  %2053 = vmax.xlane.f32.xlu0 %v2052_v63  ;;  %v10822_v25 = vpop.f32.mrf.mxu0 }
 0x342   : > { %v2055_v24 = vsel %vm2015_vm2, %v13510_v18, -inf }
 0x345   : > { %2056 = vmax.xlane.f32.xlu1 %v2055_v24 }
 0x349   : > { %v10814_v34 = vpop.f32.mrf.mxu1 }
 0x34a   : > { %v13519_v29 = vadd.f32 %v10814_v34, %v13430_v49 }
 0x34b   : > { %v1878_v3 = vpop.f32.mrf.mxu1 }
 0x34c   : > { %v13522_v28 = vadd.f32 %v13432_v48, %v1878_v3  ;;  %v2082_v33 = vsel %vm2015_vm2, %v13519_v29, -inf  ;;  %v13550_v3 = vadd.f32 %v13432_v48, %v1817_v61 }
 0x34d   : > { %v10815_v32 = vpop.f32.mrf.mxu1  ;;  %2083 = vmax.xlane.f32.xlu0 %v2082_v33 }
 0x34e   : > { %v13527_v10 = vadd.f32 %v10815_v32, %v13437_v2  ;;  %v2076_v35 = vsel %vm2015_vm2, %v13522_v28, -inf }
 0x34f   : > { %v1881_v41 = vpop.f32.mrf.mxu1 }
 0x350   : > { %v13530_v50 = vadd.f32 %v13444_v53, %v1881_v41  ;;  %v2085_v26 = vsel %vm2015_vm2, %v13527_v10, -inf }
 0x351   : > { %2086 = vmax.xlane.f32.xlu1 %v2085_v26  ;;  %2077 = vmax.xlane.f32.xlu0 %v2076_v35  ;;  %v1939_v26 = vpop.f32.mrf.mxu0  ;;  %v13560_v35 = vadd.f32 %v10806_v59, %v13430_v49 }
 0x352   : > { %v2079_v37 = vsel %vm2015_vm2, %v13530_v50, -inf }
 0x355   : > { %2080 = vmax.xlane.f32.xlu1 %v2079_v37  ;;  %v13563_v37 = vadd.f32 %v13444_v53, %v1820_v27  ;;  %v2070_v27 = vsel %vm2015_vm2, %v13560_v35, -inf }
 0x357   : > { %v2067_v59 = vsel %vm2015_vm2, %v13563_v37, -inf }
 0x359   : > { %v10830_v19 = vpop.f32.mrf.mxu1 }
 0x35a   : > { %v13539_v36 = vadd.f32 %v10830_v19, %v13430_v49  ;;  %v2064_v19 = vsel %vm2015_vm2, %v13550_v3, -inf }
 0x35b   : > { %v2000_v30 = vpop.f32.mrf.mxu1 }
 0x35c   : > { %v13542_v16 = vadd.f32 %v13432_v48, %v2000_v30  ;;  %v2106_v62 = vsel %vm2015_vm2, %v13539_v36, -inf  ;;  %v10823_v30 = vpop.f32.mrf.mxu0 }
 0x35d   : > { %v10831_v63 = vpop.f32.mrf.mxu1  ;;  %2107 = vmax.xlane.f32.xlu0 %v2106_v62  ;;  %v13570_v62 = vadd.f32 %v10807_v52, %v13437_v2 }
 0x35e   : > { %v13547_v24 = vadd.f32 %v10831_v63, %v13437_v2  ;;  %v2100_v41 = vsel %vm2015_vm2, %v13542_v16, -inf  ;;  %v13573_v63 = vadd.f32 %v13432_v48, %v1939_v26  ;;  %v13590_v26 = vadd.f32 %v10823_v30, %v13437_v2 }
 0x35f   : > { %v2003_v34 = vpop.f32.mrf.mxu1  ;;  %v2073_v52 = vsel %vm2015_vm2, %v13570_v62, -inf }
 0x360   : > { %v13553_v33 = vadd.f32 %v13444_v53, %v2003_v34  ;;  %v2109_v32 = vsel %vm2015_vm2, %v13547_v24, -inf  ;;  %v1942_v34 = vpop.f32.mrf.mxu0  ;;  %v2088_v48 = vsel %vm2015_vm2, %v13573_v63, -inf }
 0x361   : > { %2110 = vmax.xlane.f32.xlu1 %v2109_v32  ;;  %2101 = vmax.xlane.f32.xlu0 %v2100_v41  ;;  %v13580_v32 = vadd.f32 %v10822_v25, %v13430_v49  ;;  %v13583_v41 = vadd.f32 %v13444_v53, %v1942_v34  ;;  %v2097_v53 = vsel %vm2015_vm2, %v13590_v26, -inf }
 0x362   : > { %v2103_v61 = vsel %vm2015_vm2, %v13553_v33, -inf }
 0x363   : > { %v2094_v49 = vsel %vm2015_vm2, %v13580_v32, -inf }
 0x365   : > { %2104 = vmax.xlane.f32.xlu1 %v2103_v61  ;;  %2065 = vmax.xlane.f32.xlu0 %v2064_v19  ;;  %v2091_v61 = vsel %vm2015_vm2, %v13583_v41, -inf }
 0x369   : > { %2068 = vmax.xlane.f32.xlu1 %v2067_v59  ;;  %2071 = vmax.xlane.f32.xlu0 %v2070_v27 }
 0x36d   : > { %2074 = vmax.xlane.f32.xlu1 %v2073_v52  ;;  %2089 = vmax.xlane.f32.xlu0 %v2088_v48 }
 0x371   : > { %2092 = vmax.xlane.f32.xlu1 %v2091_v61  ;;  %2095 = vmax.xlane.f32.xlu0 %v2094_v49 }
 0x375   : > { %2098 = vmax.xlane.f32.xlu1 %v2097_v53 }
 0x396   : > { %v2024_v25 = vpop.xlane.xlu0 %2023 }
 0x397   : > { %v2114_v19 = vsub.f32 %v13435_v15, %v2024_v25 }
 0x399   : > { %v2148_v59 = vmul.f32 1.442695, %v2114_v19 }
 0x39a   : > { %v2027_v27 = vpop.xlane.xlu1 %2026  ;;  %v2018_v34 = vpop.xlane.xlu0 %2017 }
 0x39b   : > { %11892 = vpow2.f32 %v2148_v59  ;;  %v2115_v2 = vsub.f32 %v13447_v56, %v2027_v27  ;;  %v2112_v30 = vsub.f32 %v13440_v58, %v2018_v34 }
 0x39d   : > { %v2150_v52 = vmul.f32 1.442695, %v2115_v2  ;;  %v2144_v48 = vmul.f32 1.442695, %v2112_v30 }
 0x39e   : > { %v2021_v57 = vpop.xlane.xlu1 %2020 }
 0x39f   : > { %11894 = vpow2.f32 %v2150_v52  ;;  %v2113_v61 = vsub.f32 %v13450_v23, %v2021_v57 }
 0x3a0   : > { %11896 = vpow2.f32 %v2144_v48 }
 0x3a1   : > { %v2146_v49 = vmul.f32 1.442695, %v2113_v61 }
 0x3a3   : > { %11898 = vpow2.f32 %v2146_v49 }
 0x3a6   : > { %v2036_v53 = vpop.xlane.xlu0 %2035 }
 0x3a7   : > { %v2118_v15 = vsub.f32 %v13459_v47, %v2036_v53 }
 0x3a8   : > { %v13603_v25 = vpop.eup %11892 }
 0x3a9   : > { %v2156_v19 = vmul.f32 1.442695, %v2118_v15  ;;  %v2214_v56 = vsel %vm2015_vm2, %v13603_v25, 0.0 }
 0x3aa   : > { %v2039_v59 = vpop.xlane.xlu1 %2038  ;;  %v2030_v58 = vpop.xlane.xlu0 %2029  ;;  %2215 = vadd.xlane.f32.xlu0 %v2214_v56 }
 0x3ab   : > { %11900 = vpow2.f32 %v2156_v19  ;;  %v2119_v27 = vsub.f32 %v13467_v54, %v2039_v59  ;;  %v2116_v57 = vsub.f32 %v13462_v12, %v2030_v58 }
 0x3ac   : > { %v13609_v23 = vpop.eup %11894 }
 0x3ad   : > { %v13611_v34 = vpop.eup %11896  ;;  %v2158_v2 = vmul.f32 1.442695, %v2119_v27  ;;  %v2152_v47 = vmul.f32 1.442695, %v2116_v57  ;;  %v2217_v30 = vsel %vm2015_vm2, %v13609_v23, 0.0 }
 0x3ae   : > { %v2033_v52 = vpop.xlane.xlu1 %2032  ;;  %2218 = vadd.xlane.f32.xlu1 %v2217_v30  ;;  %v2208_v48 = vsel %vm2015_vm2, %v13611_v34, 0.0 }
 0x3af   : > { %11902 = vpow2.f32 %v2158_v2  ;;  %v2117_v61 = vsub.f32 %v13470_v20, %v2033_v52  ;;  %2209 = vadd.xlane.f32.xlu0 %v2208_v48 }
 0x3b0   : > { %v13618_v54 = vpop.eup %11898  ;;  %11904 = vpow2.f32 %v2152_v47 }
 0x3b1   : > { %v2154_v12 = vmul.f32 1.442695, %v2117_v61  ;;  %v2211_v49 = vsel %vm2015_vm2, %v13618_v54, 0.0 }
 0x3b2   : > { %2212 = vadd.xlane.f32.xlu1 %v2211_v49 }
 0x3b3   : > { %11906 = vpow2.f32 %v2154_v12 }
 0x3b6   : > { %v2048_v53 = vpop.xlane.xlu0 %2047 }
 0x3b7   : > { %v2122_v15 = vsub.f32 %v13479_v55, %v2048_v53 }
 0x3b8   : > { %v13623_v19 = vpop.eup %11900 }
 0x3b9   : > { %v2164_v56 = vmul.f32 1.442695, %v2122_v15  ;;  %v2226_v59 = vsel %vm2015_vm2, %v13623_v19, 0.0 }
 0x3ba   : > { %v2051_v20 = vpop.xlane.xlu1 %2050  ;;  %v2042_v58 = vpop.xlane.xlu0 %2041  ;;  %2227 = vadd.xlane.f32.xlu0 %v2226_v59 }
 0x3bb   : > { %11908 = vpow2.f32 %v2164_v56  ;;  %v2123_v27 = vsub.f32 %v13487_v44, %v2051_v20  ;;  %v2120_v57 = vsub.f32 %v13482_v8, %v2042_v58 }
 0x3bc   : > { %v13629_v2 = vpop.eup %11902 }
 0x3bd   : > { %v13631_v47 = vpop.eup %11904  ;;  %v2166_v30 = vmul.f32 1.442695, %v2123_v27  ;;  %v2160_v55 = vmul.f32 1.442695, %v2120_v57  ;;  %v2229_v52 = vsel %vm2015_vm2, %v13629_v2, 0.0 }
 0x3be   : > { %v2045_v48 = vpop.xlane.xlu1 %2044  ;;  %2230 = vadd.xlane.f32.xlu1 %v2229_v52  ;;  %v2220_v61 = vsel %vm2015_vm2, %v13631_v47, 0.0 }
 0x3bf   : > { %11910 = vpow2.f32 %v2166_v30  ;;  %v2121_v12 = vsub.f32 %v13490_v40, %v2045_v48  ;;  %2221 = vadd.xlane.f32.xlu0 %v2220_v61 }
 0x3c0   : > { %v13638_v44 = vpop.eup %11906  ;;  %11912 = vpow2.f32 %v2160_v55 }
 0x3c1   : > { %v2162_v8 = vmul.f32 1.442695, %v2121_v12  ;;  %v2223_v49 = vsel %vm2015_vm2, %v13638_v44, 0.0 }
 0x3c2   : > { %2224 = vadd.xlane.f32.xlu1 %v2223_v49 }
 0x3c3   : > { %11914 = vpow2.f32 %v2162_v8 }
 0x3c6   : > { %v2060_v53 = vpop.xlane.xlu0 %2059 }
 0x3c7   : > { %v2126_v15 = vsub.f32 %v13499_v43, %v2060_v53 }
 0x3c8   : > { %v13643_v56 = vpop.eup %11908 }
 0x3c9   : > { %v2172_v59 = vmul.f32 1.442695, %v2126_v15  ;;  %v2238_v20 = vsel %vm2015_vm2, %v13643_v56, 0.0 }
 0x3ca   : > { %v2063_v40 = vpop.xlane.xlu1 %2062  ;;  %2239 = vadd.xlane.f32.xlu0 %v2238_v20  ;;  %v2054_v58 = vpop.xlane.xlu0 %2053 }
 0x3cb   : > { %11916 = vpow2.f32 %v2172_v59  ;;  %v2127_v27 = vsub.f32 %v13507_v46, %v2063_v40  ;;  %v2124_v57 = vsub.f32 %v13502_v9, %v2054_v58 }
 0x3cc   : > { %v13649_v30 = vpop.eup %11910 }
 0x3cd   : > { %v13651_v55 = vpop.eup %11912  ;;  %v2174_v52 = vmul.f32 1.442695, %v2127_v27  ;;  %v2168_v43 = vmul.f32 1.442695, %v2124_v57  ;;  %v2241_v48 = vsel %vm2015_vm2, %v13649_v30, 0.0 }
 0x3ce   : > { %2242 = vadd.xlane.f32.xlu1 %v2241_v48  ;;  %v2057_v61 = vpop.xlane.xlu1 %2056  ;;  %v2232_v12 = vsel %vm2015_vm2, %v13651_v55, 0.0 }
 0x3cf   : > { %11918 = vpow2.f32 %v2174_v52  ;;  %v2125_v8 = vsub.f32 %v13510_v18, %v2057_v61  ;;  %2233 = vadd.xlane.f32.xlu0 %v2232_v12 }
 0x3d0   : > { %v13658_v46 = vpop.eup %11914  ;;  %11920 = vpow2.f32 %v2168_v43 }
 0x3d1   : > { %v2170_v9 = vmul.f32 1.442695, %v2125_v8  ;;  %v2235_v49 = vsel %vm2015_vm2, %v13658_v46, 0.0 }
 0x3d2   : > { %2236 = vadd.xlane.f32.xlu1 %v2235_v49 }
 0x3d3   : > { %11922 = vpow2.f32 %v2170_v9 }
 0x3d6   : > { %v2084_v53 = vpop.xlane.xlu0 %2083 }
 0x3d7   : > { %v2134_v15 = vsub.f32 %v13519_v29, %v2084_v53 }
 0x3d8   : > { %v13663_v59 = vpop.eup %11916 }
 0x3d9   : > { %v2188_v20 = vmul.f32 1.442695, %v2134_v15  ;;  %v2250_v40 = vsel %vm2015_vm2, %v13663_v59, 0.0 }
 0x3da   : > { %v2087_v18 = vpop.xlane.xlu1 %2086  ;;  %2251 = vadd.xlane.f32.xlu0 %v2250_v40  ;;  %v2078_v58 = vpop.xlane.xlu0 %2077 }
 0x3db   : > { %11924 = vpow2.f32 %v2188_v20  ;;  %v2135_v27 = vsub.f32 %v13527_v10, %v2087_v18  ;;  %v2132_v57 = vsub.f32 %v13522_v28, %v2078_v58 }
 0x3dc   : > { %v13669_v52 = vpop.eup %11918 }
 0x3dd   : > { %v13671_v43 = vpop.eup %11920  ;;  %v2190_v48 = vmul.f32 1.442695, %v2135_v27  ;;  %v2184_v29 = vmul.f32 1.442695, %v2132_v57  ;;  %v2253_v61 = vsel %vm2015_vm2, %v13669_v52, 0.0 }
 0x3de   : > { %2254 = vadd.xlane.f32.xlu1 %v2253_v61  ;;  %v2081_v12 = vpop.xlane.xlu1 %2080  ;;  %v2244_v8 = vsel %vm2015_vm2, %v13671_v43, 0.0 }
 0x3df   : > { %11926 = vpow2.f32 %v2190_v48  ;;  %v2133_v9 = vsub.f32 %v13530_v50, %v2081_v12  ;;  %2245 = vadd.xlane.f32.xlu0 %v2244_v8 }
 0x3e0   : > { %v13678_v10 = vpop.eup %11922  ;;  %11928 = vpow2.f32 %v2184_v29 }
 0x3e1   : > { %v2186_v28 = vmul.f32 1.442695, %v2133_v9  ;;  %v2247_v49 = vsel %vm2015_vm2, %v13678_v10, 0.0 }
 0x3e2   : > { %2248 = vadd.xlane.f32.xlu1 %v2247_v49 }
 0x3e3   : > { %11930 = vpow2.f32 %v2186_v28 }
 0x3e6   : > { %v2108_v53 = vpop.xlane.xlu0 %2107 }
 0x3e7   : > { %v2142_v15 = vsub.f32 %v13539_v36, %v2108_v53 }
 0x3e8   : > { %v13683_v20 = vpop.eup %11924 }
 0x3e9   : > { %v2204_v40 = vmul.f32 1.442695, %v2142_v15  ;;  %v2274_v18 = vsel %vm2015_vm2, %v13683_v20, 0.0 }
 0x3ea   : > { %v2111_v50 = vpop.xlane.xlu1 %2110  ;;  %2275 = vadd.xlane.f32.xlu0 %v2274_v18  ;;  %v2102_v58 = vpop.xlane.xlu0 %2101 }
 0x3eb   : > { %11932 = vpow2.f32 %v2204_v40  ;;  %v2143_v27 = vsub.f32 %v13547_v24, %v2111_v50  ;;  %v2140_v57 = vsub.f32 %v13542_v16, %v2102_v58 }
 0x3ec   : > { %v13689_v48 = vpop.eup %11926 }
 0x3ed   : > { %v13691_v29 = vpop.eup %11928  ;;  %v2206_v61 = vmul.f32 1.442695, %v2143_v27  ;;  %v2200_v36 = vmul.f32 1.442695, %v2140_v57  ;;  %v2277_v12 = vsel %vm2015_vm2, %v13689_v48, 0.0 }
 0x3ee   : > { %2278 = vadd.xlane.f32.xlu1 %v2277_v12  ;;  %v2105_v8 = vpop.xlane.xlu1 %2104  ;;  %v2268_v9 = vsel %vm2015_vm2, %v13691_v29, 0.0  ;;  %v2066_v28 = vpop.xlane.xlu0 %2065 }
 0x3ef   : > { %11934 = vpow2.f32 %v2206_v61  ;;  %v2141_v24 = vsub.f32 %v13553_v33, %v2105_v8  ;;  %2269 = vadd.xlane.f32.xlu0 %v2268_v9  ;;  %v2128_v16 = vsub.f32 %v13550_v3, %v2066_v28 }
 0x3f0   : > { %v13699_v49 = vpop.eup %11930  ;;  %11936 = vpow2.f32 %v2200_v36 }
 0x3f1   : > { %v2202_v53 = vmul.f32 1.442695, %v2141_v24  ;;  %v2176_v15 = vmul.f32 1.442695, %v2128_v16  ;;  %v2271_v40 = vsel %vm2015_vm2, %v13699_v49, 0.0 }
 0x3f2   : > { %2272 = vadd.xlane.f32.xlu1 %v2271_v40  ;;  %v2069_v18 = vpop.xlane.xlu1 %2068  ;;  %v2072_v50 = vpop.xlane.xlu0 %2071 }
 0x3f3   : > { %11938 = vpow2.f32 %v2202_v53  ;;  %v2129_v58 = vsub.f32 %v13563_v37, %v2069_v18  ;;  %v2130_v27 = vsub.f32 %v13560_v35, %v2072_v50 }
 0x3f4   : > { %11940 = vpow2.f32 %v2176_v15 }
 0x3f5   : > { %v2178_v33 = vmul.f32 1.442695, %v2129_v58  ;;  %v2180_v57 = vmul.f32 1.442695, %v2130_v27 }
 0x3f6   : > { %v2075_v3 = vpop.xlane.xlu1 %2074  ;;  %v2090_v61 = vpop.xlane.xlu0 %2089 }
 0x3f7   : > { %11942 = vpow2.f32 %v2178_v33  ;;  %v2131_v36 = vsub.f32 %v13570_v62, %v2075_v3  ;;  %v2136_v12 = vsub.f32 %v13573_v63, %v2090_v61 }
 0x3f8   : > { %v13707_v8 = vpop.eup %11932  ;;  %11944 = vpow2.f32 %v2180_v57 }
 0x3f9   : > { %v2182_v9 = vmul.f32 1.442695, %v2131_v36  ;;  %v2192_v28 = vmul.f32 1.442695, %v2136_v12  ;;  %v2298_v37 = vsel %vm2015_vm2, %v13707_v8, 0.0 }
 0x3fa   : > { %v2093_v24 = vpop.xlane.xlu1 %2092  ;;  %2299 = vadd.xlane.f32.xlu0 %v2298_v37  ;;  %v2096_v35 = vpop.xlane.xlu0 %2095 }
 0x3fb   : > { %11946 = vpow2.f32 %v2182_v9  ;;  %v2137_v16 = vsub.f32 %v13583_v41, %v2093_v24  ;;  %v2138_v53 = vsub.f32 %v13580_v32, %v2096_v35 }
 0x3fc   : > { %v13713_v15 = vpop.eup %11934  ;;  %11948 = vpow2.f32 %v2192_v28 }
 0x3fd   : > { %v13715_v62 = vpop.eup %11936  ;;  %v2194_v63 = vmul.f32 1.442695, %v2137_v16  ;;  %v2196_v40 = vmul.f32 1.442695, %v2138_v53  ;;  %v2301_v18 = vsel %vm2015_vm2, %v13713_v15, 0.0 }
 0x3fe   : > { %2302 = vadd.xlane.f32.xlu1 %v2301_v18  ;;  %v2099_v50 = vpop.xlane.xlu1 %2098  ;;  %v2292_v58 = vsel %vm2015_vm2, %v13715_v62, 0.0 }
 0x3ff   : > { %11950 = vpow2.f32 %v2194_v63  ;;  %v2139_v41 = vsub.f32 %v13590_v26, %v2099_v50  ;;  %2293 = vadd.xlane.f32.xlu0 %v2292_v58 }
 0x400   : > { %v13722_v32 = vpop.eup %11938  ;;  %11952 = vpow2.f32 %v2196_v40 }
 0x401   : > { %v13724_v27 = vpop.eup %11940  ;;  %v2198_v33 = vmul.f32 1.442695, %v2139_v41  ;;  %v2295_v57 = vsel %vm2015_vm2, %v13722_v32, 0.0 }
 0x402   : > { %2296 = vadd.xlane.f32.xlu1 %v2295_v57  ;;  %v2256_v3 = vsel %vm2015_vm2, %v13724_v27, 0.0 }
 0x403   : > { %11954 = vpow2.f32 %v2198_v33  ;;  %2257 = vadd.xlane.f32.xlu0 %v2256_v3 }
 0x404   : > { %v13730_v61 = vpop.eup %11942 }
 0x405   : > { %v13732_v36 = vpop.eup %11944  ;;  %v2259_v26 = vsel %vm2015_vm2, %v13730_v61, 0.0 }
 0x406   : > { %2260 = vadd.xlane.f32.xlu1 %v2259_v26  ;;  %v2262_v12 = vsel %vm2015_vm2, %v13732_v36, 0.0 }
 0x407   : > { %2263 = vadd.xlane.f32.xlu0 %v2262_v12 }
 0x408   : > { %v13738_v9 = vpop.eup %11946 }
 0x409   : > { %v13740_v28 = vpop.eup %11948  ;;  %v2265_v37 = vsel %vm2015_vm2, %v13738_v9, 0.0 }
 0x40a   : > { %2266 = vadd.xlane.f32.xlu1 %v2265_v37  ;;  %v2280_v24 = vsel %vm2015_vm2, %v13740_v28, 0.0 }
 0x40b   : > { %2281 = vadd.xlane.f32.xlu0 %v2280_v24 }
 0x40c   : > { %v13746_v35 = vpop.eup %11950 }
 0x40d   : > { %v13748_v16 = vpop.eup %11952  ;;  %v2283_v53 = vsel %vm2015_vm2, %v13746_v35, 0.0 }
 0x40e   : > { %2284 = vadd.xlane.f32.xlu1 %v2283_v53  ;;  %v2286_v63 = vsel %vm2015_vm2, %v13748_v16, 0.0 }
 0x40f   : > { %2287 = vadd.xlane.f32.xlu0 %v2286_v63 }
 0x410   : > { %v13754_v40 = vpop.eup %11954 }
 0x411   : > { %v2289_v18 = vsel %vm2015_vm2, %v13754_v40, 0.0 }
 0x412   : > { %2290 = vadd.xlane.f32.xlu1 %v2289_v18 }
 0x433   : > { %v2216_v50 = vpop.xlane.xlu0 %2215 }
 0x437   : > { %v2219_v58 = vpop.xlane.xlu1 %2218 }
 0x438   : > { %v2210_v41 = vpop.xlane.xlu0 %2209  ;;  %11956 = vrcp.f32 %v2219_v58 }
 0x439   : > { %11958 = vrcp.f32 %v2210_v41 }
 0x43a   : > { %11960 = vrcp.f32 %v2216_v50 }
 0x43b   : > { %v2213_v33 = vpop.xlane.xlu1 %2212 }
 0x43c   : > { %11962 = vrcp.f32 %v2213_v33 }
 0x443   : > { %v2228_v57 = vpop.xlane.xlu0 %2227 }
 0x445   : > { %v11957_v3 = vpop.eup %11956 }
 0x446   : > { %v11959_v26 = vpop.eup %11958  ;;  %v2339_v63 = vmul.f32 %v11957_v3, %v13609_v23 }
 0x447   : > { %v2231_v12 = vpop.xlane.xlu1 %2230  ;;  %v11961_v37 = vpop.eup %11960  ;;  %v2336_v18 = vmul.f32 %v11959_v26, %v13611_v34 }
 0x448   : > { %v2222_v24 = vpop.xlane.xlu0 %2221  ;;  %11964 = vrcp.f32 %v2231_v12  ;;  %v2338_v50 = vmul.f32 %v11961_v37, %v13603_v25 }
 0x449   : > { %v11963_v53 = vpop.eup %11962  ;;  %11966 = vrcp.f32 %v2222_v24 }
 0x44a   : > { %v2337_v6 = vmul.f32 %v11963_v53, %v13618_v54  ;;  %11968 = vrcp.f32 %v2228_v57  ;;  %v2369_v33 = vpack.c.bf16 %v2339_v63, %v2338_v50 }
 0x44b   : > { %v2225_v58 = vpop.xlane.xlu1 %2224 }
 0x44c   : > { %11970 = vrcp.f32 %v2225_v58  ;;  %v2368_v41 = vpack.c.bf16 %v2337_v6, %v2336_v18 }
 0x44e   : > { %10836 = vmatprep.mubr.msk.bf16.mxu0 %vm2015_vm2, %v2368_v41 }
 0x44f   : > { %10837 = vmatmul.mubr.msk.bf16.vlgmr.msra.gmra.mxu0 %vm2015_vm2, %v2369_v33 }
 0x450   : > { %10849 = vmatpush3.bf16.msra.mxu0 %v13365_v13 }
 0x451   : > { %10850 = vmatprep.subr.bf16.mxu0 %v13293_v14 }
 0x453   : > { %v2240_v23 = vpop.xlane.xlu0 %2239 }
 0x454   : > { %10851 = vmatpush3.bf16.msra.mxu0 %v13293_v14 }
 0x455   : > { %10864 = vmatprep.subr.bf16.mxu0 %v13337_v7  ;;  %v11965_v34 = vpop.eup %11964 }
 0x456   : > { %v11967_v54 = vpop.eup %11966  ;;  %v2343_v26 = vmul.f32 %v11965_v34, %v13629_v2 }
 0x457   : > { %v2243_v57 = vpop.xlane.xlu1 %2242  ;;  %v11969_v25 = vpop.eup %11968  ;;  %v2340_v12 = vmul.f32 %v11967_v54, %v13631_v47 }
 0x458   : > { %v2234_v3 = vpop.xlane.xlu0 %2233  ;;  %11972 = vrcp.f32 %v2243_v57  ;;  %v2342_v14 = vmul.f32 %v11969_v25, %v13623_v19 }
 0x459   : > { %v11971_v6 = vpop.eup %11970  ;;  %11974 = vrcp.f32 %v2234_v3 }
 0x45a   : > { %v2341_v13 = vmul.f32 %v11971_v6, %v13638_v44  ;;  %11976 = vrcp.f32 %v2240_v23  ;;  %v2371_v53 = vpack.c.bf16 %v2343_v26, %v2342_v14 }
 0x45b   : > { %v2237_v37 = vpop.xlane.xlu1 %2236 }
 0x45c   : > { %11978 = vrcp.f32 %v2237_v37  ;;  %v2370_v24 = vpack.c.bf16 %v2341_v13, %v2340_v12 }
 0x45e   : > { %10844 = vmatprep.mubr.msk.bf16.mxu1 %vm2015_vm2, %v2370_v24 }
 0x45f   : > { %10845 = vmatmul.mubr.msk.bf16.vlgmr.msra.gmra.mxu1 %vm2015_vm2, %v2371_v53 }
 0x460   : > { %10857 = vmatpush3.bf16.msra.mxu1 %v13421_v0 }
 0x461   : > { %10858 = vmatprep.subr.bf16.mxu1 %v13321_v4 }
 0x463   : > { %v2252_v2 = vpop.xlane.xlu0 %2251 }
 0x464   : > { %10859 = vmatpush3.bf16.msra.mxu1 %v13321_v4 }
 0x465   : > { %10872 = vmatprep.subr.bf16.mxu1 %v13367_v17  ;;  %v11973_v47 = vpop.eup %11972 }
 0x466   : > { %v11975_v44 = vpop.eup %11974  ;;  %v2347_v50 = vmul.f32 %v11973_v47, %v13649_v30 }
 0x467   : > { %v2255_v63 = vpop.xlane.xlu1 %2254  ;;  %v11977_v19 = vpop.eup %11976  ;;  %v2344_v41 = vmul.f32 %v11975_v44, %v13651_v55 }
 0x468   : > { %v2246_v18 = vpop.xlane.xlu0 %2245  ;;  %11980 = vrcp.f32 %v2255_v63  ;;  %v2346_v4 = vmul.f32 %v11977_v19, %v13643_v56 }
 0x469   : > { %v11979_v58 = vpop.eup %11978  ;;  %11982 = vrcp.f32 %v2246_v18 }
 0x46a   : > { %v2345_v0 = vmul.f32 %v11979_v58, %v13658_v46  ;;  %11984 = vrcp.f32 %v2252_v2  ;;  %v2373_v34 = vpack.c.bf16 %v2347_v50, %v2346_v4 }
 0x46b   : > { %v2249_v33 = vpop.xlane.xlu1 %2248 }
 0x46c   : > { %11986 = vrcp.f32 %v2249_v33  ;;  %v2372_v23 = vpack.c.bf16 %v2345_v0, %v2344_v41 }
 0x46e   : > { %10852 = vmatprep.mubr.msk.bf16.mxu0 %vm2015_vm2, %v2372_v23 }
 0x46f   : > { %10853 = vmatmul.mubr.msk.bf16.vlgmr.msra.gmra.mxu0 %vm2015_vm2, %v2373_v34 }
 0x470   : > { %10865 = vmatpush3.bf16.msra.mxu0 %v13337_v7 }
 0x471   : > { %10866 = vmatprep.subr.bf16.mxu0 %v13344_v1 }
 0x473   : > { %v2276_v30 = vpop.xlane.xlu0 %2275 }
 0x474   : > { %10867 = vmatpush3.bf16.msra.mxu0 %v13344_v1 }
 0x475   : > { %10880 = vmatprep.subr.bf16.mxu0 %v13380_v22  ;;  %v11981_v55 = vpop.eup %11980 }
 0x476   : > { %v11983_v46 = vpop.eup %11982  ;;  %v2351_v3 = vmul.f32 %v11981_v55, %v13669_v52 }
 0x477   : > { %v2279_v54 = vpop.xlane.xlu1 %2278  ;;  %v11985_v56 = vpop.eup %11984  ;;  %v2348_v6 = vmul.f32 %v11983_v46, %v13671_v43 }
 0x478   : > { %v2270_v57 = vpop.xlane.xlu0 %2269  ;;  %11988 = vrcp.f32 %v2279_v54  ;;  %v2350_v1 = vmul.f32 %v11985_v56, %v13663_v59 }
 0x479   : > { %v11987_v25 = vpop.eup %11986  ;;  %11990 = vrcp.f32 %v2270_v57 }
 0x47a   : > { %v2349_v7 = vmul.f32 %v11987_v25, %v13678_v10  ;;  %11992 = vrcp.f32 %v2276_v30  ;;  %v2375_v13 = vpack.c.bf16 %v2351_v3, %v2350_v1 }
 0x47b   : > { %v2273_v26 = vpop.xlane.xlu1 %2272 }
 0x47c   : > { %11994 = vrcp.f32 %v2273_v26  ;;  %v2374_v12 = vpack.c.bf16 %v2349_v7, %v2348_v6 }
 0x47e   : > { %10860 = vmatprep.mubr.msk.bf16.mxu1 %vm2015_vm2, %v2374_v12 }
 0x47f   : > { %10861 = vmatmul.mubr.msk.bf16.vlgmr.msra.gmra.mxu1 %vm2015_vm2, %v2375_v13  ;;  %v11821_v13 = vld [vmem:[%s16728_s4 + $0x48] sm:$0xff]  }
 0x480   : > { %10873 = vmatpush3.bf16.msra.mxu1 %v13367_v17 }
 0x481   : > { %10874 = vmatprep.subr.bf16.mxu1 %v13371_v51 }
 0x483   : > { %v2300_v52 = vpop.xlane.xlu0 %2299 }
 0x484   : > { %10875 = vmatpush3.bf16.msra.mxu1 %v13371_v51 }
 0x485   : > { %10888 = vmatprep.subr.bf16.mxu1 %v13401_v11  ;;  %v11989_v43 = vpop.eup %11988 }
 0x486   : > { %v11991_v10 = vpop.eup %11990  ;;  %v2359_v53 = vmul.f32 %v11989_v43, %v13689_v48  ;;  %v16834_v43 = vld [vmem:[#allocation4_spill] sm:$0xff] }
 0x487   : > { %v2303_v37 = vpop.xlane.xlu1 %2302  ;;  %v11993_v59 = vpop.eup %11992  ;;  %v2356_v2 = vmul.f32 %v11991_v10, %v13691_v29  ;;  %v16835_v10 = vld [vmem:[#allocation5_spill] sm:$0xff] }
 0x488   : > { %v2294_v14 = vpop.xlane.xlu0 %2293  ;;  %11996 = vrcp.f32 %v2303_v37  ;;  %v2358_v51 = vmul.f32 %v11993_v59, %v13683_v20  ;;  %v11819_v20 = vld [vmem:[%s16728_s4 + $0x28] sm:$0xff]   ;;  %v16836_v37 = vld [vmem:[#allocation6_spill] sm:$0xff] }
 0x489   : > { %v11995_v24 = vpop.eup %11994  ;;  %11998 = vrcp.f32 %v2294_v14  ;;  %v16837_v59 = vld [vmem:[#allocation7_spill] sm:$0xff]  ;;  %v16838_v14 = vld [vmem:[#allocation8_spill] sm:$0xff] }
 0x48a   : > { %v2357_v17 = vmul.f32 %v11995_v24, %v13699_v49  ;;  %12000 = vrcp.f32 %v2300_v52  ;;  %v2379_v19 = vpack.c.bf16 %v2359_v53, %v2358_v51  ;;  %v16833_v52 = vld [vmem:[#allocation3_spill] sm:$0xff]  ;;  %v16839_v24 = vld [vmem:[#allocation9_spill] sm:$0xff] }
 0x48b   : > { %v2297_v47 = vpop.xlane.xlu1 %2296 }
 0x48c   : > { %12002 = vrcp.f32 %v2297_v47  ;;  %v2258_v44 = vpop.xlane.xlu0 %2257  ;;  %v2378_v63 = vpack.c.bf16 %v2357_v17, %v2356_v2 }
 0x48d   : > { %12004 = vrcp.f32 %v2258_v44 }
 0x48e   : > { %10876 = vmatprep.mubr.msk.bf16.mxu1 %vm2015_vm2, %v2378_v63 }
 0x48f   : > { %v2261_v18 = vpop.xlane.xlu1 %2260  ;;  %10877 = vmatmul.mubr.msk.bf16.vlgmr.msra.gmra.mxu1 %vm2015_vm2, %v2379_v19 }
 0x490   : > { %12006 = vrcp.f32 %v2261_v18  ;;  %10889 = vmatpush3.bf16.msra.mxu1 %v13401_v11  ;;  %v2264_v48 = vpop.xlane.xlu0 %2263 }
 0x491   : > { %10890 = vmatprep.subr.bf16.mxu1 %v13406_v38  ;;  %12008 = vrcp.f32 %v2264_v48 }
 0x493   : > { %v2267_v29 = vpop.xlane.xlu1 %2266 }
 0x494   : > { %12010 = vrcp.f32 %v2267_v29  ;;  %10891 = vmatpush3.bf16.msra.mxu1 %v13406_v38  ;;  %v2282_v49 = vpop.xlane.xlu0 %2281 }
 0x495   : > { %10930 = vmatprep.subr.bf16.mxu1 %v11819_v20  ;;  %v11997_v58 = vpop.eup %11996  ;;  %12012 = vrcp.f32 %v2282_v49 }
 0x496   : > { %v11999_v50 = vpop.eup %11998  ;;  %v2367_v4 = vmul.f32 %v11997_v58, %v13713_v15 }
 0x497   : > { %v2285_v41 = vpop.xlane.xlu1 %2284  ;;  %v12001_v0 = vpop.eup %12000  ;;  %v2364_v23 = vmul.f32 %v11999_v50, %v13715_v62 }
 0x498   : > { %12014 = vrcp.f32 %v2285_v41  ;;  %v2288_v11 = vpop.xlane.xlu0 %2287  ;;  %v2366_v38 = vmul.f32 %v12001_v0, %v13707_v8 }
 0x499   : > { %v12003_v33 = vpop.eup %12002  ;;  %12016 = vrcp.f32 %v2288_v11 }
 0x49a   : > { %v2365_v34 = vmul.f32 %v12003_v33, %v13722_v32  ;;  %v12005_v30 = vpop.eup %12004  ;;  %v2383_v56 = vpack.c.bf16 %v2367_v4, %v2366_v38 }
 0x49b   : > { %v2291_v55 = vpop.xlane.xlu1 %2290  ;;  %v2352_v57 = vmul.f32 %v12005_v30, %v13724_v27 }
 0x49c   : > { %12018 = vrcp.f32 %v2291_v55  ;;  %v2382_v46 = vpack.c.bf16 %v2365_v34, %v2364_v23 }
 0x49d   : > { %v12007_v54 = vpop.eup %12006 }
 0x49e   : > { %10892 = vmatprep.mubr.msk.bf16.mxu1 %vm2015_vm2, %v2382_v46  ;;  %v2353_v25 = vmul.f32 %v12007_v54, %v13730_v61  ;;  %v12009_v15 = vpop.eup %12008 }
 0x49f   : > { %10893 = vmatmul.mubr.msk.bf16.vlgmr.msra.gmra.mxu1 %vm2015_vm2, %v2383_v56  ;;  %v2354_v8 = vmul.f32 %v12009_v15, %v13732_v36 }
 0x4a0   : > { %10932 = vmatprep.mubr.msk.bf16.mxu1 %vm378_vm0, %v12969_v60  ;;  %v2376_v62 = vpack.c.bf16 %v2353_v25, %v2352_v57  ;;  %10931 = vmatpush3.bf16.msra.mxu1 %v11819_v20 }
 0x4a1   : > { %v12011_v32 = vpop.eup %12010 }
 0x4a2   : > { %10868 = vmatprep.mubr.msk.bf16.mxu0 %vm2015_vm2, %v2376_v62  ;;  %v2355_v3 = vmul.f32 %v12011_v32, %v13738_v9  ;;  %v12013_v6 = vpop.eup %12012  ;;  %v11820_v9 = vld [vmem:[%s16728_s4 + $0x8] sm:$0xff]  }
 0x4a3   : > { %v2360_v61 = vmul.f32 %v12013_v6, %v13740_v28 }
 0x4a4   : > { %v2377_v7 = vpack.c.bf16 %v2355_v3, %v2354_v8  ;;  %v14000_v8 = vld [vmem:[%s16729_s5 + $0x5] ss:$0 sm:$0xff] }
 0x4a5   : > { %v12015_v27 = vpop.eup %12014 }
 0x4a6   : > { %10869 = vmatmul.mubr.msk.bf16.vlgmr.msra.gmra.mxu0 %vm2015_vm2, %v2377_v7  ;;  %v2361_v26 = vmul.f32 %v12015_v27, %v13746_v35  ;;  %v12017_v1 = vpop.eup %12016 }
 0x4a7   : > { %10881 = vmatpush3.bf16.msra.mxu0 %v13380_v22  ;;  %10933 = vmatmul.mubr.msk.bf16.vlgmr.msra.gmra.mxu1 %vm378_vm0, %v12981_v39  ;;  %v2362_v28 = vmul.f32 %v12017_v1, %v13748_v16  ;;  %v16831_v16 = vld [vmem:[#allocation17_spill] sm:$0xff] }
 0x4a8   : > { %10882 = vmatprep.subr.bf16.mxu0 %v13384_v42  ;;  %10936 = vmatprep.mubr.msk.bf16.mxu1 %vm378_vm0, %v12994_v5  ;;  %v2380_v36 = vpack.c.bf16 %v2361_v26, %v2360_v61 }
 0x4a9   : > { %v12019_v12 = vpop.eup %12018 }
 0x4aa   : > { %10884 = vmatprep.mubr.msk.bf16.mxu0 %vm2015_vm2, %v2380_v36  ;;  %v2363_v22 = vmul.f32 %v12019_v12, %v13754_v40  ;;  %v16832_v40 = vld [vmem:[#allocation2_spill] sm:$0xff] }
 0x4ab   : > { %10883 = vmatpush3.bf16.msra.mxu0 %v13384_v42  ;;  %v16830_v42 = vld [vmem:[#allocation16_spill] sm:$0xff] }
 0x4ac   : > { %v2381_v35 = vpack.c.bf16 %v2363_v22, %v2362_v28  ;;  %10896 = vmatprep.subr.bf16.mxu0 %v11820_v9 }
 0x4ae   : > { %10885 = vmatmul.mubr.msk.bf16.vlgmr.msra.gmra.mxu0 %vm2015_vm2, %v2381_v35 }
 0x4af   : > { %10898 = vmatprep.mubr.msk.bf16.mxu0 %vm378_vm0, %v12969_v60  ;;  %10937 = vmatmul.mubr.msk.bf16.gmra.mxu1 %vm378_vm0, %v13006_v45 }
 0x4b0   : > { %10940 = vmatprep.mubr.msk.bf16.mxu1 %vm378_vm0, %v13018_v31  ;;  %10897 = vmatpush3.bf16.msra.mxu0 %v11820_v9 }
 0x4b1   : > { %10964 = vmatprep.subr.bf16.mxu0 %v11821_v13 }
 0x4b6   : > { %10899 = vmatmul.mubr.msk.bf16.vlgmr.msra.gmra.mxu0 %vm378_vm0, %v12981_v39 }
 0x4b7   : > { %10902 = vmatprep.mubr.msk.bf16.mxu0 %vm378_vm0, %v12994_v5  ;;  %10941 = vmatmul.mubr.msk.bf16.gmra.mxu1 %vm378_vm0, %v13030_v21 }
 0x4b8   : > { %10944 = vmatprep.mubr.msk.bf16.mxu1 %vm378_vm0, %v16830_v42  ;;  %10965 = vmatpush3.bf16.msra.mxu0 %v11821_v13 }
 0x4be   : > { %10903 = vmatmul.mubr.msk.bf16.gmra.mxu0 %vm378_vm0, %v13006_v45 }
 0x4bf   : > { %10906 = vmatprep.mubr.msk.bf16.mxu0 %vm378_vm0, %v13018_v31  ;;  %10945 = vmatmul.mubr.msk.bf16.gmra.mxu1 %vm378_vm0, %v16831_v16 }
 0x4c0   : > { %10948 = vmatprep.mubr.msk.bf16.mxu1 %vm378_vm0, %v16832_v40 }
 0x4c6   : > { %10907 = vmatmul.mubr.msk.bf16.gmra.mxu0 %vm378_vm0, %v13030_v21 }
 0x4c7   : > { %10910 = vmatprep.mubr.msk.bf16.mxu0 %vm378_vm0, %v16830_v42  ;;  %10949 = vmatmul.mubr.msk.bf16.gmra.mxu1 %vm378_vm0, %v16833_v52 }
 0x4c8   : > { %10952 = vmatprep.mubr.msk.bf16.mxu1 %vm378_vm0, %v16834_v43 }
 0x4ce   : > { %10911 = vmatmul.mubr.msk.bf16.gmra.mxu0 %vm378_vm0, %v16831_v16 }
 0x4cf   : > { %10914 = vmatprep.mubr.msk.bf16.mxu0 %vm378_vm0, %v16832_v40  ;;  %10953 = vmatmul.mubr.msk.bf16.gmra.mxu1 %vm378_vm0, %v16835_v10 }
 0x4d0   : > { %10956 = vmatprep.mubr.msk.bf16.mxu1 %vm378_vm0, %v16836_v37 }
 0x4d6   : > { %10915 = vmatmul.mubr.msk.bf16.gmra.mxu0 %vm378_vm0, %v16833_v52 }
 0x4d7   : > { %10918 = vmatprep.mubr.msk.bf16.mxu0 %vm378_vm0, %v16834_v43  ;;  %10957 = vmatmul.mubr.msk.bf16.gmra.mxu1 %vm378_vm0, %v16837_v59 }
 0x4d8   : > { %10960 = vmatprep.mubr.msk.bf16.mxu1 %vm378_vm0, %v16838_v14 }
 0x4de   : > { %10919 = vmatmul.mubr.msk.bf16.gmra.mxu0 %vm378_vm0, %v16835_v10 }
 0x4df   : > { %10922 = vmatprep.mubr.msk.bf16.mxu0 %vm378_vm0, %v16836_v37  ;;  %10961 = vmatmul.mubr.msk.bf16.gmra.mxu1 %vm378_vm0, %v16839_v24 }
 0x4e6   : > { %10923 = vmatmul.mubr.msk.bf16.gmra.mxu0 %vm378_vm0, %v16837_v59 }
 0x4e7   : > { %10926 = vmatprep.mubr.msk.bf16.mxu0 %vm378_vm0, %v16838_v14 }
 0x4ee   : > { %10927 = vmatmul.mubr.msk.bf16.gmra.mxu0 %vm378_vm0, %v16839_v24 }
 0x4ef   : > { %10966 = vmatprep.mubr.msk.bf16.mxu0 %vm378_vm0, %v12969_v60 }
 0x4f6   : > { %10967 = vmatmul.mubr.msk.bf16.vlgmr.msra.gmra.mxu0 %vm378_vm0, %v12981_v39 }
 0x4f7   : > { %10970 = vmatprep.mubr.msk.bf16.mxu0 %vm378_vm0, %v12994_v5 }
 0x4fe   : > { %10971 = vmatmul.mubr.msk.bf16.gmra.mxu0 %vm378_vm0, %v13006_v45 }
 0x4ff   : > { %10974 = vmatprep.mubr.msk.bf16.mxu0 %vm378_vm0, %v13018_v31 }
 0x506   : > { %10975 = vmatmul.mubr.msk.bf16.gmra.mxu0 %vm378_vm0, %v13030_v21 }
 0x507   : > { %10978 = vmatprep.mubr.msk.bf16.mxu0 %vm378_vm0, %v16830_v42 }
 0x50e   : > { %10979 = vmatmul.mubr.msk.bf16.gmra.mxu0 %vm378_vm0, %v16831_v16 }
 0x50f   : > { %v13917_v53 = vpop.f32.mrf.mxu0  ;;  %10982 = vmatprep.mubr.msk.bf16.mxu0 %vm378_vm0, %v16832_v40 }
 0x511   : > { %v13921_v2 = vpop.f32.mrf.mxu0 }
 0x513   : > { %v13923_v17 = vpop.f32.mrf.mxu0 }
 0x515   : > { %v13947_v18 = vpop.f32.mrf.mxu0 }
 0x516   : > { %10983 = vmatmul.mubr.msk.bf16.gmra.mxu0 %vm378_vm0, %v16833_v52 }
 0x517   : > { %10986 = vmatprep.mubr.msk.bf16.mxu0 %vm378_vm0, %v16834_v43 }
 0x51e   : > { %10987 = vmatmul.mubr.msk.bf16.gmra.mxu0 %vm378_vm0, %v16835_v10 }
 0x51f   : > { %v13933_v51 = vpop.f32.mrf.mxu1  ;;  %10990 = vmatprep.mubr.msk.bf16.mxu0 %vm378_vm0, %v16836_v37 }
 0x520   : > { %16840 = vst [vmem:[#allocation18_spill] sm:$0xff] %v13933_v51 }
 0x521   : > { %v13937_v44 = vpop.f32.mrf.mxu1 }
 0x523   : > { %v13939_v63 = vpop.f32.mrf.mxu1 }
 0x524   : > { %16841 = vst [vmem:[#allocation19_spill] sm:$0xff] %v13939_v63 }
 0x525   : > { %v13959_v58 = vpop.f32.mrf.mxu1 }
 0x526   : > { %10991 = vmatmul.mubr.msk.bf16.gmra.mxu0 %vm378_vm0, %v16837_v59 }
 0x527   : > { %10994 = vmatprep.mubr.msk.bf16.mxu0 %vm378_vm0, %v16838_v14 }
 0x52e   : > { %10995 = vmatmul.mubr.msk.bf16.gmra.mxu0 %vm378_vm0, %v16839_v24 }
 0x52f   : > { %v13951_v48 = vpop.f32.mrf.mxu0 }
 0x530   : > { %16842 = vst [vmem:[#allocation20_spill] sm:$0xff] %v13951_v48 }
 0x531   : > { %v13953_v20 = vpop.f32.mrf.mxu0 }
 0x533   : > { %v13955_v29 = vpop.f32.mrf.mxu0 }
 0x534   : > { %16843 = vst [vmem:[#allocation21_spill] sm:$0xff] %v13955_v29 }
 0x535   : > { %v13987_v56 = vpop.f32.mrf.mxu0 }
 0x536   : > { %16855 = vst [vmem:[#allocation33_spill] sm:$0xff] %v13987_v56 }
 0x53f   : > { %v13961_v50 = vpop.f32.mrf.mxu1 }
 0x540   : > { %16844 = vst [vmem:[#allocation22_spill] sm:$0xff] %v13961_v50 }
 0x541   : > { %v13963_v41 = vpop.f32.mrf.mxu1 }
 0x542   : > { %16845 = vst [vmem:[#allocation23_spill] sm:$0xff] %v13963_v41 }
 0x543   : > { %v13965_v0 = vpop.f32.mrf.mxu1 }
 0x544   : > { %16846 = vst [vmem:[#allocation24_spill] sm:$0xff] %v13965_v0 }
 0x545   : > { %v13969_v33 = vpop.f32.mrf.mxu1 }
 0x546   : > { %16847 = vst [vmem:[#allocation25_spill] sm:$0xff] %v13969_v33 }
 0x54f   : > { %v13971_v4 = vpop.f32.mrf.mxu1 }
 0x550   : > { %16848 = vst [vmem:[#allocation26_spill] sm:$0xff] %v13971_v4 }
 0x551   : > { %v13973_v23 = vpop.f32.mrf.mxu1 }
 0x552   : > { %16849 = vst [vmem:[#allocation27_spill] sm:$0xff] %v13973_v23 }
 0x553   : > { %v13975_v34 = vpop.f32.mrf.mxu1 }
 0x554   : > { %16850 = vst [vmem:[#allocation28_spill] sm:$0xff] %v13975_v34 }
 0x555   : > { %v13979_v55 = vpop.f32.mrf.mxu1 }
 0x556   : > { %16851 = vst [vmem:[#allocation29_spill] sm:$0xff] %v13979_v55 }
 0x55f   : > { %v13981_v38 = vpop.f32.mrf.mxu1 }
 0x560   : > { %16852 = vst [vmem:[#allocation30_spill] sm:$0xff] %v13981_v38 }
 0x561   : > { %v13983_v46 = vpop.f32.mrf.mxu1 }
 0x562   : > { %16853 = vst [vmem:[#allocation31_spill] sm:$0xff] %v13983_v46 }
 0x563   : > { %v13985_v54 = vpop.f32.mrf.mxu1 }
 0x564   : > { %16854 = vst [vmem:[#allocation32_spill] sm:$0xff] %v13985_v54 }
 0x565   : > { %v13991_v25 = vpop.f32.mrf.mxu1 }
 0x566   : > { %16856 = vst [vmem:[#allocation34_spill] sm:$0xff] %v13991_v25  ;;  %v13993_v15 = vpop.f32.mrf.mxu0 }
 0x567   : > { %16857 = vst [vmem:[#allocation35_spill] sm:$0xff] %v13993_v15  ;;  %v10934_v62 = vpop.f32.mrf.mxu1 }
 0x568   : > { %v13995_v32 = vpop.f32.mrf.mxu0  ;;  %v3079_v61 = vadd.f32 %v10934_v62, %v14000_v8 }
 0x569   : > { %16858 = vst [vmem:[#allocation36_spill] sm:$0xff] %v13995_v32  ;;  %v3070_v3 = vpop.f32.mrf.mxu1 }
 0x56a   : > { %v14002_v6 = vpop.f32.mrf.mxu0  ;;  %v3071_v9 = vadd.f32 %v14000_v8, %v3070_v3 }
 0x56b   : > { %16859 = vst [vmem:[#allocation37_spill] sm:$0xff] %v14002_v6  ;;  %v10935_v27 = vpop.f32.mrf.mxu1 }
 0x56c   : > { %v3082_v26 = vadd.f32 %v10935_v27, %v14000_v8  ;;  %v14008_v1 = vpop.f32.mrf.mxu0 }
 0x56d   : > { %16860 = vst [vmem:[#allocation38_spill] sm:$0xff] %v14008_v1  ;;  %v3073_v36 = vpop.f32.mrf.mxu1 }
 0x56e   : > { %v3392_v12 = vpack.c.bf16 %v3082_v26, %v3079_v61  ;;  %v3074_v28 = vadd.f32 %v14000_v8, %v3073_v36  ;;  %v14012_v22 = vpop.f32.mrf.mxu0 }
 0x56f   : > { %16861 = vst [vmem:[#allocation39_spill] sm:$0xff] %v14012_v22  ;;  %v10938_v35 = vpop.f32.mrf.mxu1 }
 0x570   : > { %v3391_v13 = vpack.c.bf16 %v3074_v28, %v3071_v9  ;;  %v14014_v57 = vpop.f32.mrf.mxu0  ;;  %11740 = vmatprep.subr.msk.bf16.mxu1 %vm1526_vm1, %v3392_v12  ;;  %v3442_v62 = vsel %vm1526_vm1, %v3392_v12, 0  ;;  %v3095_v28 = vadd.f32 %v10938_v35, %v14000_v8 }
 0x571   : > { %16862 = vst [vmem:[#allocation40_spill] sm:$0xff] %v14014_v57  ;;  %v3086_v30 = vpop.f32.mrf.mxu1  ;;  %10999 = vmatpush3.bf16.xpose.msra.mxu1 %v3442_v62 }
 0x572   : > { %v14018_v27 = vpop.f32.mrf.mxu0  ;;  %11741 = vmatprep.subr.msk.bf16.mxu1 %vm1526_vm1, %v3391_v13  ;;  %v3439_v62 = vsel %vm1526_vm1, %v3391_v13, 0  ;;  %v3087_v43 = vadd.f32 %v14000_v8, %v3086_v30 }
 0x573   : > { %16863 = vst [vmem:[#allocation41_spill] sm:$0xff] %v14018_v27  ;;  %v10939_v61 = vpop.f32.mrf.mxu1 }
 0x574   : > { %v3098_v26 = vadd.f32 %v10939_v61, %v14000_v8  ;;  %v14024_v36 = vpop.f32.mrf.mxu0  ;;  %v14032_v61 = vld [vmem:[%s16729_s5 + $0x1] ss:$0 sm:$0xff] }
 0x575   : > { %16864 = vst [vmem:[#allocation42_spill] sm:$0xff] %v14024_v36  ;;  %v3089_v9 = vpop.f32.mrf.mxu1 }
 0x576   : > { %v10900_v7 = vpop.f32.mrf.mxu0  ;;  %v3394_v12 = vpack.c.bf16 %v3098_v26, %v3095_v28  ;;  %v3090_v13 = vadd.f32 %v14000_v8, %v3089_v9 }
 0x577   : > { %v10942_v11 = vpop.f32.mrf.mxu1 }
 0x578   : > { %v2892_v49 = vpop.f32.mrf.mxu0  ;;  %v3503_v9 = vsel %vm1526_vm1, %v3394_v12, 0 }
 0x579   : > { %v3102_v19 = vpop.f32.mrf.mxu1  ;;  %11001 = vmatpush3.bf16.xpose.msra.mxu1 %v3439_v62  ;;  %v2893_v14 = vadd.f32 %v14032_v61, %v2892_v49  ;;  %v2901_v62 = vadd.f32 %v10900_v7, %v14032_v61 }
 0x57a   : > { %v10901_v47 = vpop.f32.mrf.mxu0  ;;  %11742 = vmatprep.subr.msk.bf16.mxu1 %vm1526_vm1, %v3394_v12  ;;  %v3103_v5 = vadd.f32 %v14000_v8, %v3102_v19 }
 0x57b   : > { %v10943_v3 = vpop.f32.mrf.mxu1  ;;  %v2904_v24 = vadd.f32 %v10901_v47, %v14032_v61  ;;  %v3393_v47 = vpack.c.bf16 %v3090_v13, %v3087_v43 }
 0x57c   : > { %v2895_v35 = vpop.f32.mrf.mxu0 }
 0x57d   : > { %v2896_v26 = vadd.f32 %v14032_v61, %v2895_v35  ;;  %v3105_v28 = vpop.f32.mrf.mxu1  ;;  %v3376_v52 = vpack.c.bf16 %v2904_v24, %v2901_v62 }
 0x57e   : > { %v10904_v59 = vpop.f32.mrf.mxu0 }
 0x57f   : > { %v3375_v37 = vpack.c.bf16 %v2896_v26, %v2893_v14  ;;  %v14039_v10 = vpop.f32.mrf.mxu1  ;;  %v3114_v26 = vadd.f32 %v10943_v3, %v14000_v8 }
 0x580   : > { %v2908_v40 = vpop.f32.mrf.mxu0 }
 0x581   : > { %v14042_v16 = vpop.f32.mrf.mxu1  ;;  %11002 = vmatprep.mubr.msk.bf16.mxu1 %vm1526_vm1, %v3375_v37  ;;  %v2909_v35 = vadd.f32 %v14032_v61, %v2908_v40  ;;  %v3500_v40 = vsel %vm1526_vm1, %v3393_v47, 0 }
 0x582   : > { %v10905_v49 = vpop.f32.mrf.mxu0  ;;  %11003 = vmatmul.mubr.msk.bf16.vlgmr.msra.gmra.mxu1 %vm1526_vm1, %v3376_v52  ;;  %v3111_v52 = vadd.f32 %v10942_v11, %v14000_v8  ;;  %v3106_v11 = vadd.f32 %v14000_v8, %v3105_v28 }
 0x583   : > { %11007 = vmatpush3.bf16.xpose.msra.mxu1 %v3503_v9  ;;  %v10947_v7 = vpop.f32.mrf.mxu1  ;;  %v2920_v21 = vadd.f32 %v10905_v49, %v14032_v61 }
 0x584   : > { %11743 = vmatprep.subr.msk.bf16.mxu1 %vm1526_vm1, %v3393_v47  ;;  %v2911_v14 = vpop.f32.mrf.mxu0  ;;  %v3396_v9 = vpack.c.bf16 %v3114_v26, %v3111_v52  ;;  %v2917_v47 = vadd.f32 %v10904_v59, %v14032_v61 }
 0x585   : > { %v2912_v24 = vadd.f32 %v14032_v61, %v2911_v14  ;;  %v14050_v30 = vpop.f32.mrf.mxu1 }
 0x586   : > { %v14053_v37 = vpop.f32.mrf.mxu0  ;;  %v3378_v28 = vpack.c.bf16 %v2920_v21, %v2917_v47 }
 0x587   : > { %v3377_v43 = vpack.c.bf16 %v2912_v24, %v2909_v35  ;;  %v10950_v13 = vpop.f32.mrf.mxu1 }
 0x588   : > { %v2924_v12 = vpop.f32.mrf.mxu0  ;;  %v3143_v3 = vadd.f32 %v10950_v13, %v14000_v8 }
 0x589   : > { %v3134_v62 = vpop.f32.mrf.mxu1  ;;  %11010 = vmatprep.mubr.msk.bf16.mxu1 %vm1526_vm1, %v3377_v43  ;;  %v2925_v24 = vadd.f32 %v14032_v61, %v2924_v12 }
 0x58a   : > { %v10909_v42 = vpop.f32.mrf.mxu0  ;;  %v3135_v52 = vadd.f32 %v14000_v8, %v3134_v62 }
 0x58b   : > { %11009 = vmatpush3.bf16.xpose.msra.mxu1 %v3500_v40  ;;  %v10951_v14 = vpop.f32.mrf.mxu1 }
 0x58c   : > { %v3146_v31 = vadd.f32 %v10951_v14, %v14000_v8  ;;  %11744 = vmatprep.subr.msk.bf16.mxu1 %vm1526_vm1, %v3396_v9  ;;  %v2927_v35 = vpop.f32.mrf.mxu0 }
 0x58d   : > { %v2928_v26 = vadd.f32 %v14032_v61, %v2927_v35  ;;  %v3137_v43 = vpop.f32.mrf.mxu1 }
 0x58e   : > { %v3400_v40 = vpack.c.bf16 %v3146_v31, %v3143_v3  ;;  %v3138_v49 = vadd.f32 %v14000_v8, %v3137_v43  ;;  %v14068_v13 = vpop.f32.mrf.mxu0  ;;  %v3395_v31 = vpack.c.bf16 %v3106_v11, %v3103_v5  ;;  %v3564_v3 = vsel %vm1526_vm1, %v3396_v9, 0 }
 0x58f   : > { %v3379_v14 = vpack.c.bf16 %v2928_v26, %v2925_v24  ;;  %v14070_v45 = vpop.f32.mrf.mxu1  ;;  %v3130_v26 = vadd.f32 %v10947_v7, %v14000_v8  ;;  %v3127_v43 = vadd.f32 %v14039_v10, %v14000_v8 }
 0x590   : > { %v3399_v39 = vpack.c.bf16 %v3138_v49, %v3135_v52  ;;  %v2940_v12 = vpop.f32.mrf.mxu0  ;;  %11748 = vmatprep.subr.msk.bf16.mxu0 %vm1526_vm1, %v3400_v40  ;;  %v3686_v35 = vsel %vm1526_vm1, %v3400_v40, 0 }
 0x591   : > { %v14075_v59 = vpop.f32.mrf.mxu1  ;;  %11031 = vmatpush3.bf16.xpose.msra.mxu0 %v3686_v35  ;;  %v3398_v40 = vpack.c.bf16 %v3130_v26, %v3127_v43  ;;  %v2936_v35 = vadd.f32 %v10909_v42, %v14032_v61  ;;  %v2933_v42 = vadd.f32 %v14053_v37, %v14032_v61  ;;  %v2941_v38 = vadd.f32 %v14032_v61, %v2940_v12 }
 0x592   : > { %11011 = vmatmul.mubr.msk.bf16.vlgmr.msra.gmra.mxu1 %vm1526_vm1, %v3378_v28  ;;  %v14078_v62 = vpop.f32.mrf.mxu0  ;;  %11749 = vmatprep.subr.msk.bf16.mxu0 %vm1526_vm1, %v3399_v39  ;;  %v3683_v9 = vsel %vm1526_vm1, %v3399_v39, 0  ;;  %v3122_v39 = vadd.f32 %v14000_v8, %v14050_v30 }
 0x593   : > { %11015 = vmatpush3.bf16.xpose.msra.mxu1 %v3564_v3  ;;  %11018 = vmatprep.mubr.msk.bf16.mxu1 %vm1526_vm1, %v3379_v14  ;;  %v10955_v21 = vpop.f32.mrf.mxu1  ;;  %v3561_v14 = vsel %vm1526_vm1, %v3395_v31, 0 }
 0x594   : > { %11745 = vmatprep.subr.msk.bf16.mxu1 %vm1526_vm1, %v3395_v31  ;;  %v2943_v19 = vpop.f32.mrf.mxu0 }
 0x595   : > { %v14084_v24 = vpop.f32.mrf.mxu1  ;;  %v2944_v26 = vadd.f32 %v14032_v61, %v2943_v19 }
 0x596   : > { %v10916_v5 = vpop.f32.mrf.mxu0 }
 0x597   : > { %v10958_v11 = vpop.f32.mrf.mxu1  ;;  %v3381_v37 = vpack.c.bf16 %v2944_v26, %v2941_v38  ;;  %v3162_v38 = vadd.f32 %v10955_v21, %v14000_v8 }
 0x598   : > { %v2956_v47 = vpop.f32.mrf.mxu0  ;;  %v3175_v7 = vadd.f32 %v10958_v11, %v14000_v8  ;;  %v2965_v11 = vadd.f32 %v10916_v5, %v14032_v61 }
 0x599   : > { %v3166_v52 = vpop.f32.mrf.mxu1  ;;  %11033 = vmatpush3.bf16.xpose.msra.mxu0 %v3683_v9  ;;  %v2957_v31 = vadd.f32 %v14032_v61, %v2956_v47  ;;  %v3119_v47 = vadd.f32 %v14000_v8, %v14042_v16 }
 0x59a   : > { %v10917_v49 = vpop.f32.mrf.mxu0  ;;  %v3167_v30 = vadd.f32 %v14000_v8, %v3166_v52  ;;  %v3625_v52 = vsel %vm1526_vm1, %v3398_v40, 0 }
 0x59b   : > { %11017 = vmatpush3.bf16.xpose.msra.mxu1 %v3561_v14  ;;  %v10959_v28 = vpop.f32.mrf.mxu1  ;;  %v2968_v3 = vadd.f32 %v10917_v49, %v14032_v61 }
 0x59c   : > { %v3178_v60 = vadd.f32 %v10959_v28, %v14000_v8  ;;  %11746 = vmatprep.subr.msk.bf16.mxu1 %vm1526_vm1, %v3398_v40  ;;  %v2959_v10 = vpop.f32.mrf.mxu0 }
 0x59d   : > { %v2960_v43 = vadd.f32 %v14032_v61, %v2959_v10  ;;  %v3169_v9 = vpop.f32.mrf.mxu1  ;;  %v3380_v10 = vpack.c.bf16 %v2936_v35, %v2933_v42  ;;  %v3384_v54 = vpack.c.bf16 %v2968_v3, %v2965_v11  ;;  %v3159_v3 = vadd.f32 %v14070_v45, %v14000_v8 }
 0x59e   : > { %v3404_v49 = vpack.c.bf16 %v3178_v60, %v3175_v7  ;;  %v3170_v14 = vadd.f32 %v14000_v8, %v3169_v9  ;;  %v14105_v28 = vpop.f32.mrf.mxu0  ;;  %v3397_v7 = vpack.c.bf16 %v3122_v39, %v3119_v47  ;;  %v2952_v9 = vadd.f32 %v14078_v62, %v14032_v61 }
 0x59f   : > { %v3383_v19 = vpack.c.bf16 %v2960_v43, %v2957_v31  ;;  %v3402_v26 = vpack.c.bf16 %v3162_v38, %v3159_v3  ;;  %v10962_v31 = vpop.f32.mrf.mxu1 }
 0x5a0   : > { %v2972_v22 = vpop.f32.mrf.mxu0  ;;  %11752 = vmatprep.subr.msk.bf16.mxu0 %vm1526_vm1, %v3404_v49  ;;  %v3403_v5 = vpack.c.bf16 %v3170_v14, %v3167_v30  ;;  %v3808_v60 = vsel %vm1526_vm1, %v3404_v49, 0  ;;  %v2949_v49 = vadd.f32 %v14068_v13, %v14032_v61  ;;  %v3154_v14 = vadd.f32 %v14000_v8, %v14084_v24 }
 0x5a1   : > { %11034 = vmatprep.mubr.msk.bf16.mxu0 %vm1526_vm1, %v3383_v19  ;;  %v2973_v62 = vadd.f32 %v14032_v61, %v2972_v22  ;;  %v3182_v47 = vpop.f32.mrf.mxu1  ;;  %v3747_v38 = vsel %vm1526_vm1, %v3402_v26, 0 }
 0x5a2   : > { %11019 = vmatmul.mubr.msk.bf16.vlgmr.msra.gmra.mxu1 %vm1526_vm1, %v3380_v10  ;;  %v10921_v12 = vpop.f32.mrf.mxu0  ;;  %11035 = vmatmul.mubr.msk.bf16.vlgmr.msra.gmra.mxu0 %vm1526_vm1, %v3384_v54  ;;  %v3622_v54 = vsel %vm1526_vm1, %v3397_v7, 0  ;;  %v3805_v43 = vsel %vm1526_vm1, %v3403_v5, 0 }
 0x5a3   : > { %11023 = vmatpush3.bf16.xpose.msra.mxu1 %v3625_v52  ;;  %11026 = vmatprep.mubr.msk.bf16.mxu1 %vm1526_vm1, %v3381_v37  ;;  %v3151_v37 = vadd.f32 %v14000_v8, %v14075_v59  ;;  %v10963_v22 = vpop.f32.mrf.mxu1 }
 0x5a4   : > { %11047 = vmatpush3.bf16.xpose.msra.mxu0 %v3808_v60  ;;  %11747 = vmatprep.subr.msk.bf16.mxu1 %vm1526_vm1, %v3397_v7  ;;  %v2975_v16 = vpop.f32.mrf.mxu0 }
 0x5a5   : > { %11753 = vmatprep.subr.msk.bf16.mxu0 %vm1526_vm1, %v3403_v5  ;;  %v2976_v42 = vadd.f32 %v14032_v61, %v2975_v16  ;;  %v3382_v5 = vpack.c.bf16 %v2952_v9, %v2949_v49  ;;  %v3401_v13 = vpack.c.bf16 %v3154_v14, %v3151_v37 }
 0x5a6   : > { %v10924_v35 = vpop.f32.mrf.mxu0 }
 0x5a7   : > { %v2997_v60 = vadd.f32 %v10924_v35, %v14032_v61  ;;  %v3385_v52 = vpack.c.bf16 %v2976_v42, %v2973_v62  ;;  %v3194_v35 = vadd.f32 %v10963_v22, %v14000_v8  ;;  %v3744_v9 = vsel %vm1526_vm1, %v3401_v13, 0 }
 0x5a8   : > { %v2988_v39 = vpop.f32.mrf.mxu0 }
 0x5a9   : > { %v2989_v45 = vadd.f32 %v14032_v61, %v2988_v39  ;;  %v3191_v39 = vadd.f32 %v10962_v31, %v14000_v8 }
 0x5aa   : > { %v10925_v40 = vpop.f32.mrf.mxu0 }
 0x5ab   : > { %11025 = vmatpush3.bf16.xpose.msra.mxu1 %v3622_v54  ;;  %v3000_v30 = vadd.f32 %v10925_v40, %v14032_v61  ;;  %v14153_v40 = vld [vmem:[%s16729_s5 + $0x9] ss:$0 sm:$0xff]  ;;  %v3406_v54 = vpack.c.bf16 %v3194_v35, %v3191_v39 }
 0x5ac   : > { %11049 = vmatpush3.bf16.xpose.msra.mxu0 %v3805_v43  ;;  %11750 = vmatprep.subr.msk.bf16.mxu1 %vm1526_vm1, %v3402_v26  ;;  %v2991_v21 = vpop.f32.mrf.mxu0 }
 0x5ad   : > { %v2992_v11 = vadd.f32 %v14032_v61, %v2991_v21  ;;  %v3388_v24 = vpack.c.bf16 %v3000_v30, %v2997_v60  ;;  %v3185_v21 = vpop.f32.mrf.mxu1 }
 0x5ae   : > { %v14136_v19 = vpop.f32.mrf.mxu0  ;;  %v3186_v37 = vadd.f32 %v14000_v8, %v3185_v21 }
 0x5af   : > { %v3387_v10 = vpack.c.bf16 %v2992_v11, %v2989_v45  ;;  %v2984_v11 = vadd.f32 %v10921_v12, %v14032_v61  ;;  %v3183_v12 = vadd.f32 %v14000_v8, %v3182_v47 }
 0x5b0   : > { %v3004_v7 = vpop.f32.mrf.mxu0 }
 0x5b1   : > { %11050 = vmatprep.mubr.msk.bf16.mxu0 %vm1526_vm1, %v3387_v10  ;;  %v2981_v10 = vadd.f32 %v14105_v28, %v14032_v61  ;;  %v3005_v60 = vadd.f32 %v14032_v61, %v3004_v7  ;;  %v3405_v22 = vpack.c.bf16 %v3186_v37, %v3183_v12  ;;  %v3869_v28 = vsel %vm1526_vm1, %v3406_v54, 0 }
 0x5b2   : > { %11027 = vmatmul.mubr.msk.bf16.vlgmr.msra.gmra.mxu1 %vm1526_vm1, %v3382_v5  ;;  %v10929_v16 = vpop.f32.mrf.mxu0 }
 0x5b3   : > { %11039 = vmatpush3.bf16.xpose.msra.mxu1 %v3747_v38  ;;  %11042 = vmatprep.mubr.msk.bf16.mxu1 %vm1526_vm1, %v3385_v52 }
 0x5b4   : > { %11051 = vmatmul.mubr.msk.bf16.vlgmr.msra.gmra.mxu0 %vm1526_vm1, %v3388_v24  ;;  %11751 = vmatprep.subr.msk.bf16.mxu1 %vm1526_vm1, %v3401_v13  ;;  %v3007_v59 = vpop.f32.mrf.mxu0  ;;  %v3386_v13 = vpack.c.bf16 %v2984_v11, %v2981_v10 }
 0x5b5   : > { %v3008_v49 = vadd.f32 %v14032_v61, %v3007_v59 }
 0x5b6   : > { %v10968_v3 = vpop.f32.mrf.mxu0 }
 0x5b7   : > { %v3257_v42 = vadd.f32 %v10968_v3, %v14153_v40  ;;  %v3389_v38 = vpack.c.bf16 %v3008_v49, %v3005_v60  ;;  %v3013_v49 = vadd.f32 %v14136_v19, %v14032_v61 }
 0x5b8   : > { %v3248_v26 = vpop.f32.mrf.mxu0 }
 0x5b9   : > { %v3249_v14 = vadd.f32 %v14153_v40, %v3248_v26 }
 0x5ba   : > { %v10969_v43 = vpop.f32.mrf.mxu0 }
 0x5bb   : > { %v3260_v45 = vadd.f32 %v10969_v43, %v14153_v40  ;;  %11041 = vmatpush3.bf16.xpose.msra.mxu1 %v3744_v9  ;;  %v3866_v9 = vsel %vm1526_vm1, %v3405_v22, 0 }
 0x5bc   : > { %11754 = vmatprep.subr.msk.bf16.mxu1 %vm1526_vm1, %v3406_v54  ;;  %v3251_v31 = vpop.f32.mrf.mxu0 }
 0x5bd   : > { %v3408_v30 = vpack.c.bf16 %v3260_v45, %v3257_v42  ;;  %v3252_v62 = vadd.f32 %v14153_v40, %v3251_v31  ;;  %v3016_v42 = vadd.f32 %v10929_v16, %v14032_v61 }
 0x5be   : > { %v10972_v5 = vpop.f32.mrf.mxu0 }
 0x5bf   : > { %v3407_v52 = vpack.c.bf16 %v3252_v62, %v3249_v14  ;;  %11062 = vmatprep.subr.bf16.mxu0 %v3408_v30  ;;  %v3273_v35 = vadd.f32 %v10972_v5, %v14153_v40  ;;  %v3390_v10 = vpack.c.bf16 %v3016_v42, %v3013_v49 }
 0x5c0   : > { %v3264_v24 = vpop.f32.mrf.mxu0  ;;  %11063 = vmatpush3.bf16.msra.mxu0 %v3408_v30 }
 0x5c1   : > { %11064 = vmatprep.subr.bf16.mxu0 %v3407_v52  ;;  %v3265_v37 = vadd.f32 %v14153_v40, %v3264_v24 }
 0x5c2   : > { %11043 = vmatmul.mubr.msk.bf16.vlgmr.msra.gmra.mxu1 %vm1526_vm1, %v3386_v13  ;;  %v10973_v59 = vpop.f32.mrf.mxu0 }
 0x5c3   : > { %11055 = vmatpush3.bf16.xpose.msra.mxu1 %v3869_v28  ;;  %11058 = vmatprep.mubr.msk.bf16.mxu1 %vm1526_vm1, %v3389_v38  ;;  %v3276_v8 = vadd.f32 %v10973_v59, %v14153_v40 }
 0x5c4   : > { %11755 = vmatprep.subr.msk.bf16.mxu1 %vm1526_vm1, %v3405_v22  ;;  %v3267_v7 = vpop.f32.mrf.mxu0  ;;  %11065 = vmatpush3.bf16.msra.mxu0 %v3407_v52 }
 0x5c5   : > { %v3410_v26 = vpack.c.bf16 %v3276_v8, %v3273_v35  ;;  %v3268_v14 = vadd.f32 %v14153_v40, %v3267_v7 }
 0x5c6   : > { %v10976_v47 = vpop.f32.mrf.mxu0 }
 0x5c7   : > { %v3289_v54 = vadd.f32 %v10976_v47, %v14153_v40  ;;  %v3409_v60 = vpack.c.bf16 %v3268_v14, %v3265_v37 }
 0x5c8   : > { %v3280_v3 = vpop.f32.mrf.mxu0 }
 0x5c9   : > { %v3281_v39 = vadd.f32 %v14153_v40, %v3280_v3 }
 0x5ca   : > { %v10977_v43 = vpop.f32.mrf.mxu0 }
 0x5cb   : > { %v3292_v21 = vadd.f32 %v10977_v43, %v14153_v40  ;;  %11057 = vmatpush3.bf16.xpose.msra.mxu1 %v3866_v9 }
 0x5cc   : > { %11070 = vmatprep.subr.bf16.mxu1 %v3410_v26  ;;  %v3283_v45 = vpop.f32.mrf.mxu0 }
 0x5cd   : > { %v14179_v11 = vpack.c.bf16 %v3292_v21, %v3289_v54  ;;  %v3284_v31 = vadd.f32 %v14153_v40, %v3283_v45 }
 0x5ce   : > { %v10980_v30 = vpop.f32.mrf.mxu0 }
 0x5cf   : > { %v14185_v62 = vpack.c.bf16 %v3284_v31, %v3281_v39  ;;  %11078 = vmatprep.subr.bf16.mxu0 %v14179_v11  ;;  %v3305_v12 = vadd.f32 %v10980_v30, %v14153_v40 }
 0x5d0   : > { %v3296_v16 = vpop.f32.mrf.mxu0 }
 0x5d1   : > { %v3297_v5 = vadd.f32 %v14153_v40, %v3296_v16 }
 0x5d2   : > { %11059 = vmatmul.mubr.msk.bf16.vlgmr.msra.gmra.mxu1 %vm1526_vm1, %v3390_v10  ;;  %v10981_v52 = vpop.f32.mrf.mxu0 }
 0x5d3   : > { %v3308_v61 = vadd.f32 %v10981_v52, %v14153_v40  ;;  %11071 = vmatpush3.bf16.msra.mxu1 %v3410_v26 }
 0x5d4   : > { %11072 = vmatprep.subr.bf16.mxu1 %v3409_v60  ;;  %v3299_v19 = vpop.f32.mrf.mxu0 }
 0x5d5   : > { %v14193_v13 = vpack.c.bf16 %v3308_v61, %v3305_v12  ;;  %v3300_v38 = vadd.f32 %v14153_v40, %v3299_v19 }
 0x5d6   : > { %v10984_v22 = vpop.f32.mrf.mxu0 }
 0x5d7   : > { %v14196_v24 = vpack.c.bf16 %v3300_v38, %v3297_v5  ;;  %v3321_v59 = vadd.f32 %v10984_v22, %v14153_v40  ;;  %11073 = vmatpush3.bf16.msra.mxu1 %v3409_v60 }
 0x5d8   : > { %11086 = vmatprep.subr.bf16.mxu1 %v14193_v13  ;;  %v3312_v28 = vpop.f32.mrf.mxu0 }
 0x5d9   : > { %v3313_v7 = vadd.f32 %v14153_v40, %v3312_v28 }
 0x5da   : > { %v10985_v8 = vpop.f32.mrf.mxu0 }
 0x5db   : > { %v3324_v47 = vadd.f32 %v10985_v8, %v14153_v40 }
 0x5dc   : > { %v3315_v35 = vpop.f32.mrf.mxu0 }
 0x5dd   : > { %v14202_v3 = vpack.c.bf16 %v3324_v47, %v3321_v59  ;;  %v3316_v39 = vadd.f32 %v14153_v40, %v3315_v35 }
 0x5de   : > { %v10988_v26 = vpop.f32.mrf.mxu0 }
 0x5df   : > { %v14205_v43 = vpack.c.bf16 %v3316_v39, %v3313_v7  ;;  %v3337_v9 = vadd.f32 %v10988_v26, %v14153_v40 }
 0x5e0   : > { %v3328_v54 = vpop.f32.mrf.mxu0 }
 0x5e1   : > { %v3329_v21 = vadd.f32 %v14153_v40, %v3328_v54  ;;  %v10132_v54 = vld [vmem:[%s16727_s3 + $0x10] sm:$0xff]  }
 0x5e2   : > { %v10989_v42 = vpop.f32.mrf.mxu0 }
 0x5e3   : > { %v3340_v45 = vadd.f32 %v10989_v42, %v14153_v40  ;;  %v14237_v42 = vunpack.c.l.bf16 %v10132_v54 }
 0x5e4   : > { %v3331_v31 = vpop.f32.mrf.mxu0 }
 0x5e5   : > { %v14210_v49 = vpack.c.bf16 %v3340_v45, %v3337_v9  ;;  %v3332_v14 = vadd.f32 %v14153_v40, %v3331_v31 }
 0x5e6   : > { %v10992_v30 = vpop.f32.mrf.mxu0 }
 0x5e7   : > { %v14213_v10 = vpack.c.bf16 %v3332_v14, %v3329_v21  ;;  %v3353_v37 = vadd.f32 %v10992_v30, %v14153_v40  ;;  %v10133_v21 = vld [vmem:[%s16727_s3 + $0x18] sm:$0xff]  }
 0x5e8   : > { %v3344_v16 = vpop.f32.mrf.mxu0  ;;  %v14239_v31 = vunpack.c.l.bf16 %v10133_v21 }
 0x5e9   : > { %v3345_v5 = vadd.f32 %v14153_v40, %v3344_v16 }
 0x5ea   : > { %v10993_v60 = vpop.f32.mrf.mxu0 }
 0x5eb   : > { %v3356_v52 = vadd.f32 %v10993_v60, %v14153_v40 }
 0x5ec   : > { %v3347_v12 = vpop.f32.mrf.mxu0 }
 0x5ed   : > { %v14218_v61 = vpack.c.bf16 %v3356_v52, %v3353_v37  ;;  %v3348_v19 = vadd.f32 %v14153_v40, %v3347_v12 }
 0x5ee   : > { %v10996_v38 = vpop.f32.mrf.mxu0 }
 0x5ef   : > { %v14221_v22 = vpack.c.bf16 %v3348_v19, %v3345_v5  ;;  %v3369_v59 = vadd.f32 %v10996_v38, %v14153_v40  ;;  %v14249_v5 = vunpack.c.h.bf16 %v10133_v21 }
 0x5f0   : > { %v3360_v28 = vpop.f32.mrf.mxu0 }
 0x5f1   : > { %v3361_v7 = vadd.f32 %v14153_v40, %v3360_v28 }
 0x5f2   : > { %v10997_v8 = vpop.f32.mrf.mxu0 }
 0x5f3   : > { %v3372_v47 = vadd.f32 %v10997_v8, %v14153_v40 }
 0x5f4   : > { %v3363_v35 = vpop.f32.mrf.mxu0 }
 0x5f5   : > { %v14226_v39 = vpack.c.bf16 %v3372_v47, %v3369_v59  ;;  %v3364_v26 = vadd.f32 %v14153_v40, %v3363_v35  ;;  %v14244_v40 = vunpack.c.h.bf16 %v10132_v54 }
 0x5f7   : > { %v14229_v9 = vpack.c.bf16 %v3364_v26, %v3361_v7 }
 0x642   : > { %v11004_v45 = vpop.f32.mrf.mxu1 }
 0x643   : > { %v14247_v16 = vadd.f32 %v11004_v45, %v14239_v31 }
 0x644   : > { %v3478_v14 = vpop.f32.mrf.mxu1 }
 0x645   : > { %v14242_v30 = vadd.f32 %v14237_v42, %v3478_v14  ;;  %v3926_v59 = vsel %vm2015_vm2, %v14247_v16, -inf }
 0x646   : > { %v11005_v37 = vpop.f32.mrf.mxu1 }
 0x647   : > { %v3920_v60 = vsel %vm2015_vm2, %v14242_v30, -inf  ;;  %v14257_v19 = vadd.f32 %v11005_v37, %v14249_v5 }
 0x648   : > { %v3481_v52 = vpop.f32.mrf.mxu1  ;;  %3921 = vmax.xlane.f32.xlu0 %v3920_v60 }
 0x649   : > { %v14254_v12 = vadd.f32 %v14244_v40, %v3481_v52  ;;  %v3929_v28 = vsel %vm2015_vm2, %v14257_v19, -inf }
 0x64b   : > { %v3923_v38 = vsel %vm2015_vm2, %v14254_v12, -inf }
 0x64c   : > { %3924 = vmax.xlane.f32.xlu1 %v3923_v38  ;;  %3927 = vmax.xlane.f32.xlu0 %v3926_v59 }
 0x650   : > { %3930 = vmax.xlane.f32.xlu1 %v3929_v28 }
 0x652   : > { %v11012_v7 = vpop.f32.mrf.mxu1 }
 0x653   : > { %v14269_v26 = vadd.f32 %v11012_v7, %v14239_v31 }
 0x654   : > { %v3539_v8 = vpop.f32.mrf.mxu1 }
 0x655   : > { %v14266_v47 = vadd.f32 %v14237_v42, %v3539_v8  ;;  %v3938_v60 = vsel %vm2015_vm2, %v14269_v26, -inf }
 0x656   : > { %v11013_v35 = vpop.f32.mrf.mxu1 }
 0x657   : > { %v3932_v54 = vsel %vm2015_vm2, %v14266_v47, -inf  ;;  %v14277_v14 = vadd.f32 %v11013_v35, %v14249_v5 }
 0x658   : > { %v3542_v21 = vpop.f32.mrf.mxu1  ;;  %3933 = vmax.xlane.f32.xlu0 %v3932_v54 }
 0x659   : > { %v14274_v45 = vadd.f32 %v14244_v40, %v3542_v21  ;;  %v3941_v52 = vsel %vm2015_vm2, %v14277_v14, -inf }
 0x65b   : > { %v3935_v37 = vsel %vm2015_vm2, %v14274_v45, -inf }
 0x65c   : > { %3936 = vmax.xlane.f32.xlu1 %v3935_v37  ;;  %3939 = vmax.xlane.f32.xlu0 %v3938_v60 }
 0x660   : > { %3942 = vmax.xlane.f32.xlu1 %v3941_v52 }
 0x662   : > { %v11020_v38 = vpop.f32.mrf.mxu1 }
 0x663   : > { %v14289_v8 = vadd.f32 %v11020_v38, %v14239_v31 }
 0x664   : > { %v3600_v59 = vpop.f32.mrf.mxu1 }
 0x665   : > { %v14286_v28 = vadd.f32 %v14237_v42, %v3600_v59  ;;  %v3950_v52 = vsel %vm2015_vm2, %v14289_v8, -inf  ;;  %v11036_v59 = vpop.f32.mrf.mxu0 }
 0x666   : > { %v11021_v7 = vpop.f32.mrf.mxu1 }
 0x667   : > { %v3944_v35 = vsel %vm2015_vm2, %v14286_v28, -inf  ;;  %v14297_v37 = vadd.f32 %v11021_v7, %v14249_v5  ;;  %v3722_v27 = vpop.f32.mrf.mxu0 }
 0x668   : > { %v3603_v54 = vpop.f32.mrf.mxu1  ;;  %3945 = vmax.xlane.f32.xlu0 %v3944_v35 }
 0x669   : > { %v14294_v21 = vadd.f32 %v14244_v40, %v3603_v54  ;;  %v3953_v38 = vsel %vm2015_vm2, %v14297_v37, -inf }
 0x66b   : > { %v3947_v60 = vsel %vm2015_vm2, %v14294_v21, -inf }
 0x66c   : > { %3948 = vmax.xlane.f32.xlu1 %v3947_v60  ;;  %3951 = vmax.xlane.f32.xlu0 %v3950_v52  ;;  %v11037_v60 = vpop.f32.mrf.mxu0 }
 0x66d   : > { %v14337_v55 = vadd.f32 %v11037_v60, %v14249_v5 }
 0x66e   : > { %v3725_v57 = vpop.f32.mrf.mxu0 }
 0x66f   : > { %v3977_v60 = vsel %vm2015_vm2, %v14337_v55, -inf }
 0x670   : > { %3954 = vmax.xlane.f32.xlu1 %v3953_v38  ;;  %v14317_v38 = vadd.f32 %v14237_v42, %v3722_v27 }
 0x672   : > { %v11028_v35 = vpop.f32.mrf.mxu1 }
 0x673   : > { %v14309_v46 = vadd.f32 %v11028_v35, %v14239_v31 }
 0x674   : > { %v3661_v54 = vpop.f32.mrf.mxu1  ;;  %v11052_v15 = vpop.f32.mrf.mxu0 }
 0x675   : > { %v14306_v25 = vadd.f32 %v14237_v42, %v3661_v54  ;;  %v3962_v35 = vsel %vm2015_vm2, %v14309_v46, -inf }
 0x676   : > { %v11029_v7 = vpop.f32.mrf.mxu1 }
 0x677   : > { %v3956_v4 = vsel %vm2015_vm2, %v14306_v25, -inf  ;;  %v14320_v36 = vadd.f32 %v11029_v7, %v14249_v5  ;;  %v3968_v7 = vsel %vm2015_vm2, %v14317_v38, -inf }
 0x678   : > { %v3664_v52 = vpop.f32.mrf.mxu1  ;;  %3957 = vmax.xlane.f32.xlu0 %v3956_v4  ;;  %v14327_v4 = vadd.f32 %v11036_v59, %v14239_v31 }
 0x679   : > { %v14314_v34 = vadd.f32 %v14244_v40, %v3664_v52  ;;  %v14330_v52 = vadd.f32 %v14244_v40, %v3725_v57  ;;  %v3965_v27 = vsel %vm2015_vm2, %v14320_v36, -inf }
 0x67a   : > { %v3974_v57 = vsel %vm2015_vm2, %v14327_v4, -inf }
 0x67b   : > { %v3959_v54 = vsel %vm2015_vm2, %v14314_v34, -inf  ;;  %v3971_v59 = vsel %vm2015_vm2, %v14330_v52, -inf }
 0x67c   : > { %3960 = vmax.xlane.f32.xlu1 %v3959_v54  ;;  %3963 = vmax.xlane.f32.xlu0 %v3962_v35  ;;  %v3844_v54 = vpop.f32.mrf.mxu0 }
 0x67e   : > { %v11053_v0 = vpop.f32.mrf.mxu0 }
 0x67f   : > { %v14377_v29 = vadd.f32 %v11053_v0, %v14249_v5 }
 0x680   : > { %3966 = vmax.xlane.f32.xlu1 %v3965_v27  ;;  %3969 = vmax.xlane.f32.xlu0 %v3968_v7  ;;  %v3847_v48 = vpop.f32.mrf.mxu0 }
 0x681   : > { %v4001_v0 = vsel %vm2015_vm2, %v14377_v29, -inf }
 0x682   : > { %v11044_v6 = vpop.f32.mrf.mxu1 }
 0x683   : > { %v14347_v27 = vadd.f32 %v11044_v6, %v14239_v31 }
 0x684   : > { %v3783_v35 = vpop.f32.mrf.mxu1  ;;  %3972 = vmax.xlane.f32.xlu1 %v3971_v59  ;;  %3975 = vmax.xlane.f32.xlu0 %v3974_v57  ;;  %v14357_v57 = vadd.f32 %v14237_v42, %v3844_v54 }
 0x685   : > { %v14344_v23 = vadd.f32 %v14237_v42, %v3783_v35  ;;  %v3986_v32 = vsel %vm2015_vm2, %v14347_v27, -inf }
 0x686   : > { %v11045_v50 = vpop.f32.mrf.mxu1 }
 0x687   : > { %v3980_v7 = vsel %vm2015_vm2, %v14344_v23, -inf  ;;  %v14360_v35 = vadd.f32 %v11045_v50, %v14249_v5  ;;  %v3992_v50 = vsel %vm2015_vm2, %v14357_v57, -inf }
 0x688   : > { %v3786_v1 = vpop.f32.mrf.mxu1  ;;  %3978 = vmax.xlane.f32.xlu1 %v3977_v60  ;;  %3981 = vmax.xlane.f32.xlu0 %v3980_v7  ;;  %v14367_v60 = vadd.f32 %v11052_v15, %v14239_v31 }
 0x689   : > { %v14354_v59 = vadd.f32 %v14244_v40, %v3786_v1  ;;  %v14370_v1 = vadd.f32 %v14244_v40, %v3847_v48  ;;  %v3989_v54 = vsel %vm2015_vm2, %v14360_v35, -inf }
 0x68a   : > { %v3998_v15 = vsel %vm2015_vm2, %v14367_v60, -inf }
 0x68b   : > { %v3983_v6 = vsel %vm2015_vm2, %v14354_v59, -inf }
 0x68c   : > { %3984 = vmax.xlane.f32.xlu1 %v3983_v6  ;;  %3987 = vmax.xlane.f32.xlu0 %v3986_v32  ;;  %v3995_v32 = vsel %vm2015_vm2, %v14370_v1, -inf }
 0x690   : > { %3990 = vmax.xlane.f32.xlu1 %v3989_v54  ;;  %3993 = vmax.xlane.f32.xlu0 %v3992_v50 }
 0x692   : > { %v11060_v7 = vpop.f32.mrf.mxu1 }
 0x693   : > { %v14387_v54 = vadd.f32 %v11060_v7, %v14239_v31 }
 0x694   : > { %v3905_v48 = vpop.f32.mrf.mxu1  ;;  %3996 = vmax.xlane.f32.xlu1 %v3995_v32  ;;  %3999 = vmax.xlane.f32.xlu0 %v3998_v15 }
 0x695   : > { %v14384_v6 = vadd.f32 %v14237_v42, %v3905_v48  ;;  %v4010_v31 = vsel %vm2015_vm2, %v14387_v54, -inf }
 0x696   : > { %v11061_v33 = vpop.f32.mrf.mxu1 }
 0x697   : > { %v4004_v50 = vsel %vm2015_vm2, %v14384_v6, -inf  ;;  %v14397_v32 = vadd.f32 %v11061_v33, %v14249_v5 }
 0x698   : > { %v3908_v41 = vpop.f32.mrf.mxu1  ;;  %4002 = vmax.xlane.f32.xlu1 %v4001_v0  ;;  %4005 = vmax.xlane.f32.xlu0 %v4004_v50 }
 0x699   : > { %v14394_v51 = vadd.f32 %v14244_v40, %v3908_v41  ;;  %v4013_v7 = vsel %vm2015_vm2, %v14397_v32, -inf }
 0x69b   : > { %v4007_v42 = vsel %vm2015_vm2, %v14394_v51, -inf }
 0x69c   : > { %4008 = vmax.xlane.f32.xlu1 %v4007_v42  ;;  %4011 = vmax.xlane.f32.xlu0 %v4010_v31 }
 0x6a0   : > { %4014 = vmax.xlane.f32.xlu1 %v4013_v7 }
 0x6d1   : > { %v3922_v15 = vpop.xlane.xlu0 %3921 }
 0x6d2   : > { %v4016_v48 = vsub.f32 %v14242_v30, %v3922_v15 }
 0x6d4   : > { %v4048_v41 = vmul.f32 1.442695, %v4016_v48 }
 0x6d5   : > { %v3925_v40 = vpop.xlane.xlu1 %3924  ;;  %v3928_v0 = vpop.xlane.xlu0 %3927 }
 0x6d6   : > { %12020 = vpow2.f32 %v4048_v41  ;;  %v4017_v33 = vsub.f32 %v14254_v12, %v3925_v40  ;;  %v4018_v5 = vsub.f32 %v14247_v16, %v3928_v0 }
 0x6d8   : > { %v4050_v50 = vmul.f32 1.442695, %v4017_v33  ;;  %v4052_v63 = vmul.f32 1.442695, %v4018_v5 }
 0x6d9   : > { %v3931_v56 = vpop.xlane.xlu1 %3930 }
 0x6da   : > { %12022 = vpow2.f32 %v4050_v50  ;;  %v4019_v42 = vsub.f32 %v14257_v19, %v3931_v56 }
 0x6db   : > { %12024 = vpow2.f32 %v4052_v63 }
 0x6dc   : > { %v4054_v31 = vmul.f32 1.442695, %v4019_v42 }
 0x6de   : > { %12026 = vpow2.f32 %v4054_v31 }
 0x6e1   : > { %v3934_v7 = vpop.xlane.xlu0 %3933 }
 0x6e2   : > { %v4020_v30 = vsub.f32 %v14266_v47, %v3934_v7 }
 0x6e3   : > { %v14410_v15 = vpop.eup %12020 }
 0x6e4   : > { %v4056_v48 = vmul.f32 1.442695, %v4020_v30  ;;  %v4112_v12 = vsel %vm2015_vm2, %v14410_v15, 0.0 }
 0x6e5   : > { %v3937_v41 = vpop.xlane.xlu1 %3936  ;;  %v3940_v16 = vpop.xlane.xlu0 %3939  ;;  %4113 = vadd.xlane.f32.xlu0 %v4112_v12 }
 0x6e6   : > { %12028 = vpow2.f32 %v4056_v48  ;;  %v4021_v40 = vsub.f32 %v14274_v45, %v3937_v41  ;;  %v4022_v56 = vsub.f32 %v14269_v26, %v3940_v16 }
 0x6e7   : > { %v14416_v63 = vpop.eup %12022 }
 0x6e8   : > { %v14418_v19 = vpop.eup %12024  ;;  %v4058_v0 = vmul.f32 1.442695, %v4021_v40  ;;  %v4060_v47 = vmul.f32 1.442695, %v4022_v56  ;;  %v4115_v33 = vsel %vm2015_vm2, %v14416_v63, 0.0 }
 0x6e9   : > { %v3943_v5 = vpop.xlane.xlu1 %3942  ;;  %4116 = vadd.xlane.f32.xlu1 %v4115_v33  ;;  %v4118_v50 = vsel %vm2015_vm2, %v14418_v19, 0.0 }
 0x6ea   : > { %12030 = vpow2.f32 %v4058_v0  ;;  %v4023_v42 = vsub.f32 %v14277_v14, %v3943_v5  ;;  %4119 = vadd.xlane.f32.xlu0 %v4118_v50 }
 0x6eb   : > { %v14425_v45 = vpop.eup %12026  ;;  %12032 = vpow2.f32 %v4060_v47 }
 0x6ec   : > { %v4062_v26 = vmul.f32 1.442695, %v4023_v42  ;;  %v4121_v31 = vsel %vm2015_vm2, %v14425_v45, 0.0 }
 0x6ed   : > { %4122 = vadd.xlane.f32.xlu1 %v4121_v31 }
 0x6ee   : > { %12034 = vpow2.f32 %v4062_v26 }
 0x6f1   : > { %v3946_v7 = vpop.xlane.xlu0 %3945 }
 0x6f2   : > { %v4024_v30 = vsub.f32 %v14286_v28, %v3946_v7 }
 0x6f3   : > { %v14430_v48 = vpop.eup %12028 }
 0x6f4   : > { %v4064_v12 = vmul.f32 1.442695, %v4024_v30  ;;  %v4124_v41 = vsel %vm2015_vm2, %v14430_v48, 0.0 }
 0x6f5   : > { %v3949_v14 = vpop.xlane.xlu1 %3948  ;;  %4125 = vadd.xlane.f32.xlu0 %v4124_v41  ;;  %v3952_v16 = vpop.xlane.xlu0 %3951 }
 0x6f6   : > { %12036 = vpow2.f32 %v4064_v12  ;;  %v4025_v40 = vsub.f32 %v14294_v21, %v3949_v14  ;;  %v4026_v56 = vsub.f32 %v14289_v8, %v3952_v16 }
 0x6f7   : > { %v14436_v0 = vpop.eup %12030 }
 0x6f8   : > { %v14438_v47 = vpop.eup %12032  ;;  %v4066_v33 = vmul.f32 1.442695, %v4025_v40  ;;  %v4068_v28 = vmul.f32 1.442695, %v4026_v56  ;;  %v4127_v5 = vsel %vm2015_vm2, %v14436_v0, 0.0 }
 0x6f9   : > { %4128 = vadd.xlane.f32.xlu1 %v4127_v5  ;;  %v3955_v50 = vpop.xlane.xlu1 %3954  ;;  %v4130_v42 = vsel %vm2015_vm2, %v14438_v47, 0.0 }
 0x6fa   : > { %12038 = vpow2.f32 %v4066_v33  ;;  %v4027_v26 = vsub.f32 %v14297_v37, %v3955_v50  ;;  %4131 = vadd.xlane.f32.xlu0 %v4130_v42 }
 0x6fb   : > { %v14445_v21 = vpop.eup %12034  ;;  %12040 = vpow2.f32 %v4068_v28 }
 0x6fc   : > { %v4070_v8 = vmul.f32 1.442695, %v4027_v26  ;;  %v4133_v31 = vsel %vm2015_vm2, %v14445_v21, 0.0 }
 0x6fd   : > { %4134 = vadd.xlane.f32.xlu1 %v4133_v31 }
 0x6fe   : > { %12042 = vpow2.f32 %v4070_v8 }
 0x701   : > { %v3958_v7 = vpop.xlane.xlu0 %3957 }
 0x702   : > { %v4028_v30 = vsub.f32 %v14306_v25, %v3958_v7 }
 0x703   : > { %v14450_v12 = vpop.eup %12036 }
 0x704   : > { %v4072_v41 = vmul.f32 1.442695, %v4028_v30  ;;  %v4136_v14 = vsel %vm2015_vm2, %v14450_v12, 0.0 }
 0x705   : > { %v3961_v37 = vpop.xlane.xlu1 %3960  ;;  %4137 = vadd.xlane.f32.xlu0 %v4136_v14  ;;  %v3964_v16 = vpop.xlane.xlu0 %3963 }
 0x706   : > { %12044 = vpow2.f32 %v4072_v41  ;;  %v4029_v40 = vsub.f32 %v14314_v34, %v3961_v37  ;;  %v4030_v56 = vsub.f32 %v14309_v46, %v3964_v16 }
 0x707   : > { %v14456_v33 = vpop.eup %12038 }
 0x708   : > { %v14458_v28 = vpop.eup %12040  ;;  %v4074_v5 = vmul.f32 1.442695, %v4029_v40  ;;  %v4076_v25 = vmul.f32 1.442695, %v4030_v56  ;;  %v4139_v50 = vsel %vm2015_vm2, %v14456_v33, 0.0 }
 0x709   : > { %4140 = vadd.xlane.f32.xlu1 %v4139_v50  ;;  %v3967_v42 = vpop.xlane.xlu1 %3966  ;;  %v4142_v26 = vsel %vm2015_vm2, %v14458_v28, 0.0  ;;  %v3970_v8 = vpop.xlane.xlu0 %3969 }
 0x70a   : > { %12046 = vpow2.f32 %v4074_v5  ;;  %v4031_v34 = vsub.f32 %v14320_v36, %v3967_v42  ;;  %4143 = vadd.xlane.f32.xlu0 %v4142_v26  ;;  %v4032_v46 = vsub.f32 %v14317_v38, %v3970_v8 }
 0x70b   : > { %v14466_v31 = vpop.eup %12042  ;;  %12048 = vpow2.f32 %v4076_v25 }
 0x70c   : > { %v4078_v7 = vmul.f32 1.442695, %v4031_v34  ;;  %v4080_v30 = vmul.f32 1.442695, %v4032_v46  ;;  %v4145_v41 = vsel %vm2015_vm2, %v14466_v31, 0.0 }
 0x70d   : > { %4146 = vadd.xlane.f32.xlu1 %v4145_v41  ;;  %v3973_v14 = vpop.xlane.xlu1 %3972  ;;  %v3976_v37 = vpop.xlane.xlu0 %3975 }
 0x70e   : > { %12050 = vpow2.f32 %v4078_v7  ;;  %v4033_v16 = vsub.f32 %v14330_v52, %v3973_v14  ;;  %v4034_v40 = vsub.f32 %v14327_v4, %v3976_v37 }
 0x70f   : > { %12052 = vpow2.f32 %v4080_v30 }
 0x710   : > { %v4082_v36 = vmul.f32 1.442695, %v4033_v16  ;;  %v4084_v56 = vmul.f32 1.442695, %v4034_v40 }
 0x711   : > { %v3979_v38 = vpop.xlane.xlu1 %3978  ;;  %v3982_v5 = vpop.xlane.xlu0 %3981 }
 0x712   : > { %12054 = vpow2.f32 %v4082_v36  ;;  %v4035_v25 = vsub.f32 %v14337_v55, %v3979_v38  ;;  %v4036_v50 = vsub.f32 %v14344_v23, %v3982_v5 }
 0x713   : > { %v14474_v42 = vpop.eup %12044  ;;  %12056 = vpow2.f32 %v4084_v56 }
 0x714   : > { %v4086_v26 = vmul.f32 1.442695, %v4035_v25  ;;  %v4088_v8 = vmul.f32 1.442695, %v4036_v50  ;;  %v4148_v52 = vsel %vm2015_vm2, %v14474_v42, 0.0 }
 0x715   : > { %v3985_v34 = vpop.xlane.xlu1 %3984  ;;  %4149 = vadd.xlane.f32.xlu0 %v4148_v52  ;;  %v3988_v4 = vpop.xlane.xlu0 %3987 }
 0x716   : > { %12058 = vpow2.f32 %v4086_v26  ;;  %v4037_v46 = vsub.f32 %v14354_v59, %v3985_v34  ;;  %v4038_v7 = vsub.f32 %v14347_v27, %v3988_v4 }
 0x717   : > { %v14480_v30 = vpop.eup %12046  ;;  %12060 = vpow2.f32 %v4088_v8 }
 0x718   : > { %v14482_v23 = vpop.eup %12048  ;;  %v4090_v55 = vmul.f32 1.442695, %v4037_v46  ;;  %v4092_v41 = vmul.f32 1.442695, %v4038_v7  ;;  %v4151_v14 = vsel %vm2015_vm2, %v14480_v30, 0.0 }
 0x719   : > { %4152 = vadd.xlane.f32.xlu1 %v4151_v14  ;;  %v3991_v37 = vpop.xlane.xlu1 %3990  ;;  %v4154_v16 = vsel %vm2015_vm2, %v14482_v23, 0.0  ;;  %v3994_v40 = vpop.xlane.xlu0 %3993 }
 0x71a   : > { %12062 = vpow2.f32 %v4090_v55  ;;  %v4039_v59 = vsub.f32 %v14360_v35, %v3991_v37  ;;  %4155 = vadd.xlane.f32.xlu0 %v4154_v16  ;;  %v4040_v27 = vsub.f32 %v14357_v57, %v3994_v40 }
 0x71b   : > { %v14490_v36 = vpop.eup %12050  ;;  %12064 = vpow2.f32 %v4092_v41 }
 0x71c   : > { %v14492_v56 = vpop.eup %12052  ;;  %v4094_v38 = vmul.f32 1.442695, %v4039_v59  ;;  %v4096_v5 = vmul.f32 1.442695, %v4040_v27  ;;  %v4157_v25 = vsel %vm2015_vm2, %v14490_v36, 0.0 }
 0x71d   : > { %4158 = vadd.xlane.f32.xlu1 %v4157_v25  ;;  %v3997_v50 = vpop.xlane.xlu1 %3996  ;;  %v4160_v26 = vsel %vm2015_vm2, %v14492_v56, 0.0  ;;  %v4000_v8 = vpop.xlane.xlu0 %3999 }
 0x71e   : > { %12066 = vpow2.f32 %v4094_v38  ;;  %v4041_v35 = vsub.f32 %v14370_v1, %v3997_v50  ;;  %4161 = vadd.xlane.f32.xlu0 %v4160_v26  ;;  %v4042_v57 = vsub.f32 %v14367_v60, %v4000_v8 }
 0x71f   : > { %v14500_v52 = vpop.eup %12054  ;;  %12068 = vpow2.f32 %v4096_v5 }
 0x720   : > { %v14502_v34 = vpop.eup %12056  ;;  %v4098_v4 = vmul.f32 1.442695, %v4041_v35  ;;  %v4100_v46 = vmul.f32 1.442695, %v4042_v57  ;;  %v4163_v7 = vsel %vm2015_vm2, %v14500_v52, 0.0 }
 0x721   : > { %4164 = vadd.xlane.f32.xlu1 %v4163_v7  ;;  %v4003_v55 = vpop.xlane.xlu1 %4002  ;;  %v4166_v41 = vsel %vm2015_vm2, %v14502_v34, 0.0  ;;  %v4006_v14 = vpop.xlane.xlu0 %4005 }
 0x722   : > { %12070 = vpow2.f32 %v4098_v4  ;;  %v4043_v1 = vsub.f32 %v14377_v29, %v4003_v55  ;;  %4167 = vadd.xlane.f32.xlu0 %v4166_v41  ;;  %v4044_v60 = vsub.f32 %v14384_v6, %v4006_v14 }
 0x723   : > { %v14510_v37 = vpop.eup %12058  ;;  %12072 = vpow2.f32 %v4100_v46 }
 0x724   : > { %v14512_v16 = vpop.eup %12060  ;;  %v4102_v40 = vmul.f32 1.442695, %v4043_v1  ;;  %v4104_v59 = vmul.f32 1.442695, %v4044_v60  ;;  %v4169_v27 = vsel %vm2015_vm2, %v14510_v37, 0.0 }
 0x725   : > { %4170 = vadd.xlane.f32.xlu1 %v4169_v27  ;;  %v4009_v38 = vpop.xlane.xlu1 %4008  ;;  %v4172_v5 = vsel %vm2015_vm2, %v14512_v16, 0.0  ;;  %v4012_v25 = vpop.xlane.xlu0 %4011 }
 0x726   : > { %12074 = vpow2.f32 %v4102_v40  ;;  %v4045_v29 = vsub.f32 %v14394_v51, %v4009_v38  ;;  %4173 = vadd.xlane.f32.xlu0 %v4172_v5  ;;  %v4046_v6 = vsub.f32 %v14387_v54, %v4012_v25 }
 0x727   : > { %v14520_v50 = vpop.eup %12062  ;;  %12076 = vpow2.f32 %v4104_v59 }
 0x728   : > { %v14522_v26 = vpop.eup %12064  ;;  %v4106_v8 = vmul.f32 1.442695, %v4045_v29  ;;  %v4108_v35 = vmul.f32 1.442695, %v4046_v6  ;;  %v4175_v57 = vsel %vm2015_vm2, %v14520_v50, 0.0 }
 0x729   : > { %4176 = vadd.xlane.f32.xlu1 %v4175_v57  ;;  %v4015_v4 = vpop.xlane.xlu1 %4014  ;;  %v4178_v46 = vsel %vm2015_vm2, %v14522_v26, 0.0 }
 0x72a   : > { %12078 = vpow2.f32 %v4106_v8  ;;  %v4047_v51 = vsub.f32 %v14397_v32, %v4015_v4  ;;  %4179 = vadd.xlane.f32.xlu0 %v4178_v46 }
 0x72b   : > { %v14529_v54 = vpop.eup %12066  ;;  %12080 = vpow2.f32 %v4108_v35 }
 0x72c   : > { %v14531_v7 = vpop.eup %12068  ;;  %v4110_v55 = vmul.f32 1.442695, %v4047_v51  ;;  %v4181_v41 = vsel %vm2015_vm2, %v14529_v54, 0.0 }
 0x72d   : > { %4182 = vadd.xlane.f32.xlu1 %v4181_v41  ;;  %v4184_v14 = vsel %vm2015_vm2, %v14531_v7, 0.0 }
 0x72e   : > { %12082 = vpow2.f32 %v4110_v55  ;;  %4185 = vadd.xlane.f32.xlu0 %v4184_v14 }
 0x72f   : > { %v14537_v1 = vpop.eup %12070 }
 0x730   : > { %v14539_v60 = vpop.eup %12072  ;;  %v4187_v32 = vsel %vm2015_vm2, %v14537_v1, 0.0 }
 0x731   : > { %4188 = vadd.xlane.f32.xlu1 %v4187_v32  ;;  %v4190_v40 = vsel %vm2015_vm2, %v14539_v60, 0.0 }
 0x732   : > { %4191 = vadd.xlane.f32.xlu0 %v4190_v40 }
 0x733   : > { %v14545_v59 = vpop.eup %12074 }
 0x734   : > { %v14547_v27 = vpop.eup %12076  ;;  %v4193_v38 = vsel %vm2015_vm2, %v14545_v59, 0.0 }
 0x735   : > { %4194 = vadd.xlane.f32.xlu1 %v4193_v38  ;;  %v4196_v5 = vsel %vm2015_vm2, %v14547_v27, 0.0 }
 0x736   : > { %4197 = vadd.xlane.f32.xlu0 %v4196_v5 }
 0x737   : > { %v14553_v25 = vpop.eup %12078 }
 0x738   : > { %v14555_v29 = vpop.eup %12080  ;;  %v4199_v6 = vsel %vm2015_vm2, %v14553_v25, 0.0 }
 0x739   : > { %4200 = vadd.xlane.f32.xlu1 %v4199_v6  ;;  %v4202_v8 = vsel %vm2015_vm2, %v14555_v29, 0.0 }
 0x73a   : > { %4203 = vadd.xlane.f32.xlu0 %v4202_v8 }
 0x73b   : > { %v14561_v35 = vpop.eup %12082 }
 0x73c   : > { %v4205_v57 = vsel %vm2015_vm2, %v14561_v35, 0.0 }
 0x73d   : > { %4206 = vadd.xlane.f32.xlu1 %v4205_v57 }
 0x76e   : > { %v4114_v4 = vpop.xlane.xlu0 %4113 }
 0x76f   : > { %12084 = vrcp.f32 %v4114_v4 }
 0x772   : > { %v4117_v46 = vpop.xlane.xlu1 %4116 }
 0x773   : > { %12086 = vrcp.f32 %v4117_v46  ;;  %v4120_v51 = vpop.xlane.xlu0 %4119 }
 0x774   : > { %12088 = vrcp.f32 %v4120_v51 }
 0x776   : > { %v4123_v55 = vpop.xlane.xlu1 %4122 }
 0x777   : > { %12090 = vrcp.f32 %v4123_v55 }
 0x77c   : > { %v12085_v41 = vpop.eup %12084 }
 0x77d   : > { %v4240_v40 = vmul.f32 %v12085_v41, %v14410_v15 }
 0x77e   : > { %v4126_v14 = vpop.xlane.xlu0 %4125 }
 0x77f   : > { %12092 = vrcp.f32 %v4126_v14 }
 0x780   : > { %v12087_v32 = vpop.eup %12086 }
 0x781   : > { %v4241_v38 = vmul.f32 %v12087_v32, %v14416_v63  ;;  %v12089_v5 = vpop.eup %12088 }
 0x782   : > { %v4129_v6 = vpop.xlane.xlu1 %4128  ;;  %v4242_v46 = vmul.f32 %v12089_v5, %v14418_v19 }
 0x783   : > { %12094 = vrcp.f32 %v4129_v6  ;;  %v4132_v8 = vpop.xlane.xlu0 %4131  ;;  %v4272_v57 = vpack.c.bf16 %v4241_v38, %v4240_v40 }
 0x784   : > { %v12091_v4 = vpop.eup %12090  ;;  %12096 = vrcp.f32 %v4132_v8 }
 0x785   : > { %v4243_v51 = vmul.f32 %v12091_v4, %v14425_v45  ;;  %11066 = vmatprep.mubr.msk.bf16.mxu0 %vm2015_vm2, %v4272_v57 }
 0x786   : > { %v4135_v55 = vpop.xlane.xlu1 %4134 }
 0x787   : > { %12098 = vrcp.f32 %v4135_v55  ;;  %v4273_v14 = vpack.c.bf16 %v4243_v51, %v4242_v46 }
 0x789   : > { %11067 = vmatmul.mubr.msk.bf16.vlgmr.msra.gmra.mxu0 %vm2015_vm2, %v4273_v14 }
 0x78a   : > { %11079 = vmatpush3.bf16.msra.mxu0 %v14179_v11 }
 0x78b   : > { %11080 = vmatprep.subr.bf16.mxu0 %v14185_v62 }
 0x78c   : > { %v12093_v15 = vpop.eup %12092 }
 0x78d   : > { %v4244_v45 = vmul.f32 %v12093_v15, %v14430_v48 }
 0x78e   : > { %11081 = vmatpush3.bf16.msra.mxu0 %v14185_v62  ;;  %v4138_v63 = vpop.xlane.xlu0 %4137 }
 0x78f   : > { %11094 = vmatprep.subr.bf16.mxu0 %v14202_v3  ;;  %12100 = vrcp.f32 %v4138_v63 }
 0x790   : > { %v12095_v19 = vpop.eup %12094 }
 0x791   : > { %v4245_v41 = vmul.f32 %v12095_v19, %v14436_v0  ;;  %v12097_v32 = vpop.eup %12096 }
 0x792   : > { %v4141_v40 = vpop.xlane.xlu1 %4140  ;;  %v4246_v6 = vmul.f32 %v12097_v32, %v14438_v47 }
 0x793   : > { %12102 = vrcp.f32 %v4141_v40  ;;  %v4144_v38 = vpop.xlane.xlu0 %4143  ;;  %v4274_v5 = vpack.c.bf16 %v4245_v41, %v4244_v45 }
 0x794   : > { %v12099_v11 = vpop.eup %12098  ;;  %12104 = vrcp.f32 %v4144_v38 }
 0x795   : > { %v4247_v8 = vmul.f32 %v12099_v11, %v14445_v21  ;;  %11074 = vmatprep.mubr.msk.bf16.mxu1 %vm2015_vm2, %v4274_v5 }
 0x796   : > { %v4147_v62 = vpop.xlane.xlu1 %4146 }
 0x797   : > { %12106 = vrcp.f32 %v4147_v62  ;;  %v4275_v57 = vpack.c.bf16 %v4247_v8, %v4246_v6 }
 0x799   : > { %11075 = vmatmul.mubr.msk.bf16.vlgmr.msra.gmra.mxu1 %vm2015_vm2, %v4275_v57 }
 0x79a   : > { %11087 = vmatpush3.bf16.msra.mxu1 %v14193_v13 }
 0x79b   : > { %11088 = vmatprep.subr.bf16.mxu1 %v14196_v24 }
 0x79c   : > { %v12101_v48 = vpop.eup %12100 }
 0x79d   : > { %v4248_v21 = vmul.f32 %v12101_v48, %v14450_v12 }
 0x79e   : > { %11089 = vmatpush3.bf16.msra.mxu1 %v14196_v24  ;;  %v4150_v0 = vpop.xlane.xlu0 %4149 }
 0x79f   : > { %11102 = vmatprep.subr.bf16.mxu1 %v14210_v49  ;;  %12108 = vrcp.f32 %v4150_v0 }
 0x7a0   : > { %v12103_v47 = vpop.eup %12102 }
 0x7a1   : > { %v4249_v4 = vmul.f32 %v12103_v47, %v14456_v33  ;;  %v12105_v46 = vpop.eup %12104 }
 0x7a2   : > { %v4153_v51 = vpop.xlane.xlu1 %4152  ;;  %v4250_v15 = vmul.f32 %v12105_v46, %v14458_v28 }
 0x7a3   : > { %12110 = vrcp.f32 %v4153_v51  ;;  %v4156_v55 = vpop.xlane.xlu0 %4155  ;;  %v4276_v14 = vpack.c.bf16 %v4249_v4, %v4248_v21 }
 0x7a4   : > { %v12107_v13 = vpop.eup %12106  ;;  %12112 = vrcp.f32 %v4156_v55 }
 0x7a5   : > { %v4251_v63 = vmul.f32 %v12107_v13, %v14466_v31  ;;  %11082 = vmatprep.mubr.msk.bf16.mxu0 %vm2015_vm2, %v4276_v14 }
 0x7a6   : > { %v4159_v24 = vpop.xlane.xlu1 %4158 }
 0x7a7   : > { %12114 = vrcp.f32 %v4159_v24  ;;  %v4162_v19 = vpop.xlane.xlu0 %4161  ;;  %v4277_v45 = vpack.c.bf16 %v4251_v63, %v4250_v15 }
 0x7a8   : > { %12116 = vrcp.f32 %v4162_v19 }
 0x7a9   : > { %11083 = vmatmul.mubr.msk.bf16.vlgmr.msra.gmra.mxu0 %vm2015_vm2, %v4277_v45 }
 0x7aa   : > { %11095 = vmatpush3.bf16.msra.mxu0 %v14202_v3  ;;  %v4165_v12 = vpop.xlane.xlu1 %4164 }
 0x7ab   : > { %12118 = vrcp.f32 %v4165_v12  ;;  %11096 = vmatprep.subr.bf16.mxu0 %v14205_v43  ;;  %v4168_v33 = vpop.xlane.xlu0 %4167 }
 0x7ac   : > { %12120 = vrcp.f32 %v4168_v33  ;;  %v12109_v28 = vpop.eup %12108 }
 0x7ad   : > { %v4252_v40 = vmul.f32 %v12109_v28, %v14474_v42 }
 0x7ae   : > { %11097 = vmatpush3.bf16.msra.mxu0 %v14205_v43  ;;  %v4171_v31 = vpop.xlane.xlu1 %4170 }
 0x7af   : > { %12122 = vrcp.f32 %v4171_v31  ;;  %11110 = vmatprep.subr.bf16.mxu0 %v14218_v61  ;;  %v4174_v41 = vpop.xlane.xlu0 %4173 }
 0x7b0   : > { %v12111_v32 = vpop.eup %12110  ;;  %12124 = vrcp.f32 %v4174_v41 }
 0x7b1   : > { %v4253_v3 = vmul.f32 %v12111_v32, %v14480_v30  ;;  %v12113_v38 = vpop.eup %12112 }
 0x7b2   : > { %v4177_v5 = vpop.xlane.xlu1 %4176  ;;  %v4254_v62 = vmul.f32 %v12113_v38, %v14482_v23  ;;  %v9829_v38 = vld [vmem:[%s16730_s6 + $0x2] sm:$0x3] }
 0x7b3   : > { %12126 = vrcp.f32 %v4177_v5  ;;  %v4180_v11 = vpop.xlane.xlu0 %4179  ;;  %v4278_v6 = vpack.c.bf16 %v4253_v3, %v4252_v40 }
 0x7b4   : > { %v12115_v8 = vpop.eup %12114  ;;  %12128 = vrcp.f32 %v4180_v11 }
 0x7b5   : > { %v4255_v43 = vmul.f32 %v12115_v8, %v14490_v36  ;;  %11090 = vmatprep.mubr.msk.bf16.mxu1 %vm2015_vm2, %v4278_v6  ;;  %v12117_v57 = vpop.eup %12116 }
 0x7b6   : > { %v4183_v48 = vpop.xlane.xlu1 %4182  ;;  %v4256_v30 = vmul.f32 %v12117_v57, %v14492_v56 }
 0x7b7   : > { %12130 = vrcp.f32 %v4183_v48  ;;  %v4186_v0 = vpop.xlane.xlu0 %4185  ;;  %v4279_v42 = vpack.c.bf16 %v4255_v43, %v4254_v62  ;;  %v16866_v48 = vld [vmem:[#allocation33_spill] sm:$0xff] }
 0x7b8   : > { %v12119_v47 = vpop.eup %12118  ;;  %12132 = vrcp.f32 %v4186_v0  ;;  %v16868_v0 = vld [vmem:[#allocation18_spill] sm:$0xff] }
 0x7b9   : > { %11091 = vmatmul.mubr.msk.bf16.vlgmr.msra.gmra.mxu1 %vm2015_vm2, %v4279_v42  ;;  %v4257_v21 = vmul.f32 %v12119_v47, %v14500_v52  ;;  %v12121_v4 = vpop.eup %12120  ;;  %v16870_v47 = vld [vmem:[#allocation23_spill] sm:$0xff] }
 0x7ba   : > { %11103 = vmatpush3.bf16.msra.mxu1 %v14210_v49  ;;  %v4189_v23 = vpop.xlane.xlu1 %4188  ;;  %v4258_v55 = vmul.f32 %v12121_v4, %v14502_v34  ;;  %v16876_v4 = vld [vmem:[#allocation38_spill] sm:$0xff] }
 0x7bb   : > { %12134 = vrcp.f32 %v4189_v23  ;;  %11104 = vmatprep.subr.bf16.mxu1 %v14213_v10  ;;  %v4192_v36 = vpop.xlane.xlu0 %4191  ;;  %v4280_v46 = vpack.c.bf16 %v4257_v21, %v4256_v30  ;;  %v16872_v30 = vld [vmem:[#allocation21_spill] sm:$0xff]  ;;  %v16875_v21 = vld [vmem:[#allocation36_spill] sm:$0xff] }
 0x7bc   : > { %v12123_v51 = vpop.eup %12122  ;;  %12136 = vrcp.f32 %v4192_v36  ;;  %v16877_v23 = vld [vmem:[#allocation24_spill] sm:$0xff]  ;;  %v16878_v36 = vld [vmem:[#allocation22_spill] sm:$0xff] }
 0x7bd   : > { %v4259_v14 = vmul.f32 %v12123_v51, %v14510_v37  ;;  %11098 = vmatprep.mubr.msk.bf16.mxu0 %vm2015_vm2, %v4280_v46  ;;  %v12125_v56 = vpop.eup %12124  ;;  %v16879_v46 = vpack.c.bf16 %v16877_v23, %v16878_v36  ;;  %v16880_v51 = vld [vmem:[#allocation27_spill] sm:$0xff] }
 0x7be   : > { %11105 = vmatpush3.bf16.msra.mxu1 %v14213_v10  ;;  %v4195_v52 = vpop.xlane.xlu1 %4194  ;;  %v4260_v34 = vmul.f32 %v12125_v56, %v14512_v16  ;;  %v16882_v56 = vld [vmem:[#allocation37_spill] sm:$0xff] }
 0x7bf   : > { %12138 = vrcp.f32 %v4195_v52  ;;  %11118 = vmatprep.subr.bf16.mxu1 %v14226_v39  ;;  %v4198_v49 = vpop.xlane.xlu0 %4197  ;;  %v4281_v13 = vpack.c.bf16 %v4259_v14, %v4258_v55  ;;  %v16881_v55 = vld [vmem:[#allocation29_spill] sm:$0xff]  ;;  %v16883_v52 = vld [vmem:[#allocation35_spill] sm:$0xff] }
 0x7c0   : > { %v12127_v15 = vpop.eup %12126  ;;  %12140 = vrcp.f32 %v4198_v49  ;;  %v2834_v14 = vpack.c.bf16 %v16881_v55, %v16880_v51  ;;  %v16884_v49 = vpack.c.bf16 %v16882_v56, %v16883_v52 }
 0x7c1   : > { %11099 = vmatmul.mubr.msk.bf16.vlgmr.msra.gmra.mxu0 %vm2015_vm2, %v4281_v13  ;;  %v4261_v37 = vmul.f32 %v12127_v15, %v14520_v50  ;;  %v12129_v63 = vpop.eup %12128  ;;  %v16885_v13 = vld [vmem:[#allocation40_spill] sm:$0xff]  ;;  %v16886_v15 = vld [vmem:[#allocation42_spill] sm:$0xff] }
 0x7c2   : > { %11111 = vmatpush3.bf16.msra.mxu0 %v14218_v61  ;;  %v4201_v24 = vpop.xlane.xlu1 %4200  ;;  %v4262_v12 = vmul.f32 %v12129_v63, %v14522_v26  ;;  %v16888_v63 = vld [vmem:[#allocation26_spill] sm:$0xff] }
 0x7c3   : > { %12142 = vrcp.f32 %v4201_v24  ;;  %11112 = vmatprep.subr.bf16.mxu0 %v14221_v22  ;;  %v4204_v10 = vpop.xlane.xlu0 %4203  ;;  %v4282_v19 = vpack.c.bf16 %v4261_v37, %v4260_v34  ;;  %v2836_v34 = vpack.c.bf16 %v16886_v15, %v16885_v13  ;;  %v16887_v37 = vld [vmem:[#allocation28_spill] sm:$0xff] }
 0x7c4   : > { %v12131_v45 = vpop.eup %12130  ;;  %12144 = vrcp.f32 %v4204_v10  ;;  %v16889_v24 = vpack.c.bf16 %v16887_v37, %v16888_v63  ;;  %v16890_v10 = vld [vmem:[#allocation31_spill] sm:$0xff] }
 0x7c5   : > { %v4263_v33 = vmul.f32 %v12131_v45, %v14529_v54  ;;  %11106 = vmatprep.mubr.msk.bf16.mxu1 %vm2015_vm2, %v4282_v19  ;;  %v12133_v16 = vpop.eup %12132  ;;  %v16891_v19 = vld [vmem:[#allocation34_spill] sm:$0xff] }
 0x7c6   : > { %11113 = vmatpush3.bf16.msra.mxu0 %v14221_v22  ;;  %v4207_v50 = vpop.xlane.xlu1 %4206  ;;  %v4264_v31 = vmul.f32 %v12133_v16, %v14531_v7  ;;  %v2840_v22 = vld [vmem:[%s16730_s6] sm:$0x3]  ;;  %v2838_v45 = vpack.c.bf16 %v16891_v19, %v16890_v10 }
 0x7c7   : > { %12146 = vrcp.f32 %v4207_v50  ;;  %v4283_v61 = vpack.c.bf16 %v4263_v33, %v4262_v12  ;;  %11756 = vmatprep.subr.msk.bf16.mxu0 %vm4794_vm3, %v9829_v38  ;;  %v5008_v57 = vsel %vm4794_vm3, %v2840_v22, 0  ;;  %v16892_v12 = vld [vmem:[#allocation41_spill] sm:$0xff]  ;;  %v16893_v33 = vld [vmem:[#allocation39_spill] sm:$0xff]  ;;  %v16895_v50 = vld [vmem:[#allocation32_spill] sm:$0xff] }
 0x7c8   : > { %v12135_v28 = vpop.eup %12134  ;;  %v16894_v16 = vpack.c.bf16 %v16892_v12, %v16893_v33 }
 0x7c9   : > { %11107 = vmatmul.mubr.msk.bf16.vlgmr.msra.gmra.mxu1 %vm2015_vm2, %v4283_v61  ;;  %v4265_v41 = vmul.f32 %v12135_v28, %v14537_v1  ;;  %v12137_v32 = vpop.eup %12136  ;;  %v16896_v61 = vld [vmem:[#allocation30_spill] sm:$0xff] }
 0x7ca   : > { %11119 = vmatpush3.bf16.msra.mxu1 %v14226_v39  ;;  %v4266_v40 = vmul.f32 %v12137_v32, %v14539_v60  ;;  %v16897_v28 = vpack.c.bf16 %v16895_v50, %v16896_v61  ;;  %v16899_v32 = vld [vmem:[#allocation11_spill] sm:$0xff] }
 0x7cb   : > { %11120 = vmatprep.subr.bf16.mxu1 %v14229_v9  ;;  %v4284_v26 = vpack.c.bf16 %v4265_v41, %v4264_v31  ;;  %v16898_v31 = vld [vmem:[#allocation10_spill] sm:$0xff]  ;;  %v11823_v41 = vld [vmem:[%s16728_s4 + $0x10] sm:$0xff]  }
 0x7cc   : > { %v12139_v54 = vpop.eup %12138 }
 0x7cd   : > { %v4267_v3 = vmul.f32 %v12139_v54, %v14545_v59  ;;  %11114 = vmatprep.mubr.msk.bf16.mxu0 %vm2015_vm2, %v4284_v26  ;;  %v12141_v7 = vpop.eup %12140  ;;  %v4796_v59 = vsel %vm4794_vm3, %v9829_v38, 0  ;;  %v16900_v26 = vld [vmem:[#allocation12_spill] sm:$0xff]  ;;  %v16901_v54 = vld [vmem:[#allocation13_spill] sm:$0xff] }
 0x7ce   : > { %11121 = vmatpush3.bf16.msra.mxu1 %v14229_v9  ;;  %v4268_v5 = vmul.f32 %v12141_v7, %v14547_v27  ;;  %v11822_v27 = vld [vmem:[%s16728_s4 + $0x30] sm:$0xff]   ;;  %v16905_v7 = vld [vmem:[#allocation17_spill] sm:$0xff] }
 0x7cf   : > { %v4285_v1 = vpack.c.bf16 %v4267_v3, %v4266_v40  ;;  %11757 = vmatprep.subr.msk.bf16.mxu1 %vm4794_vm3, %v2840_v22  ;;  %v16902_v22 = vld [vmem:[#allocation14_spill] sm:$0xff]  ;;  %v16903_v40 = vld [vmem:[#allocation15_spill] sm:$0xff]  ;;  %v16904_v3 = vld [vmem:[#allocation16_spill] sm:$0xff] }
 0x7d0   : > { %v12143_v39 = vpop.eup %12142  ;;  %v16908_v38 = vld [vmem:[#allocation4_spill] sm:$0xff] }
 0x7d1   : > { %11115 = vmatmul.mubr.msk.bf16.vlgmr.msra.gmra.mxu0 %vm2015_vm2, %v4285_v1  ;;  %v4269_v60 = vmul.f32 %v12143_v39, %v14553_v25  ;;  %v12145_v11 = vpop.eup %12144  ;;  %v2824_v25 = vpack.c.bf16 %v13947_v18, %v13921_v2  ;;  %v2828_v2 = vpack.c.bf16 %v16866_v48, %v13953_v20  ;;  %v16867_v18 = vld [vmem:[#allocation19_spill] sm:$0xff]  ;;  %v2832_v20 = vpack.c.bf16 %v16876_v4, %v16875_v21  ;;  %v16906_v1 = vld [vmem:[#allocation2_spill] sm:$0xff] }
 0x7d2   : > { %11127 = vmatpush3.bf16.msra.mxu0 %v4796_v59  ;;  %v4270_v8 = vmul.f32 %v12145_v11, %v14555_v29  ;;  %v2826_v29 = vpack.c.bf16 %v13959_v58, %v13937_v44  ;;  %v16869_v42 = vpack.c.bf16 %v16867_v18, %v16868_v0  ;;  %v16871_v44 = vld [vmem:[#allocation25_spill] sm:$0xff]  ;;  %v16907_v39 = vld [vmem:[#allocation3_spill] sm:$0xff]  ;;  %v16910_v59 = vld [vmem:[#allocation6_spill] sm:$0xff] }
 0x7d3   : > { %v4286_v9 = vpack.c.bf16 %v4269_v60, %v4268_v5  ;;  %v2830_v58 = vpack.c.bf16 %v16871_v44, %v16870_v47  ;;  %11194 = vmatprep.subr.bf16.mxu0 %v11823_v41  ;;  %v16909_v5 = vld [vmem:[#allocation5_spill] sm:$0xff]  ;;  %v11824_v0 = vld [vmem:[%s16728_s4 + $0x50] sm:$0xff]  }
 0x7d4   : > { %v12147_v6 = vpop.eup %12146 }
 0x7d5   : > { %v4271_v62 = vmul.f32 %v12147_v6, %v14561_v35  ;;  %11122 = vmatprep.mubr.msk.bf16.mxu1 %vm2015_vm2, %v4286_v9  ;;  %v16865_v35 = vpack.c.bf16 %v13923_v17, %v13917_v53  ;;  %v16873_v53 = vld [vmem:[#allocation20_spill] sm:$0xff] }
 0x7d6   : > { %v16874_v17 = vpack.c.bf16 %v16872_v30, %v16873_v53 }
 0x7d7   : > { %v4287_v43 = vpack.c.bf16 %v4271_v62, %v4270_v8 }
 0x7d9   : > { %11123 = vmatmul.mubr.msk.bf16.vlgmr.msra.gmra.mxu1 %vm2015_vm2, %v4287_v43  ;;  %v16911_v43 = vld [vmem:[#allocation7_spill] sm:$0xff] }
 0x7da   : > { %11162 = vmatprep.mubr.msk.bf16.mxu1 %vm1526_vm1, %v2824_v25  ;;  %11161 = vmatpush3.bf16.msra.mxu1 %v5008_v57  ;;  %v16912_v57 = vld [vmem:[#allocation8_spill] sm:$0xff]  ;;  %v16913_v25 = vld [vmem:[#allocation9_spill] sm:$0xff] }
 0x7db   : > { %11228 = vmatprep.subr.bf16.mxu1 %v11822_v27 }
 0x7e1   : > { %11163 = vmatmul.mubr.msk.bf16.vlgmr.msra.gmra.mxu1 %vm1526_vm1, %v16865_v35 }
 0x7e2   : > { %11166 = vmatprep.mubr.msk.bf16.mxu1 %vm1526_vm1, %v2826_v29  ;;  %11229 = vmatpush3.bf16.msra.mxu1 %v11822_v27 }
 0x7e9   : > { %11167 = vmatmul.mubr.msk.bf16.gmra.mxu1 %vm1526_vm1, %v16869_v42 }
 0x7ea   : > { %11170 = vmatprep.mubr.msk.bf16.mxu1 %vm1526_vm1, %v2828_v2 }
 0x7f1   : > { %11171 = vmatmul.mubr.msk.bf16.gmra.mxu1 %vm1526_vm1, %v16874_v17 }
 0x7f2   : > { %11174 = vmatprep.mubr.msk.bf16.mxu1 %vm1526_vm1, %v2830_v58 }
 0x7f9   : > { %11175 = vmatmul.mubr.msk.bf16.gmra.mxu1 %vm1526_vm1, %v16879_v46 }
 0x7fa   : > { %11178 = vmatprep.mubr.msk.bf16.mxu1 %vm1526_vm1, %v2832_v20 }
 0x801   : > { %11179 = vmatmul.mubr.msk.bf16.gmra.mxu1 %vm1526_vm1, %v16884_v49 }
 0x802   : > { %11182 = vmatprep.mubr.msk.bf16.mxu1 %vm1526_vm1, %v2834_v14 }
 0x809   : > { %11183 = vmatmul.mubr.msk.bf16.gmra.mxu1 %vm1526_vm1, %v16889_v24 }
 0x80a   : > { %11186 = vmatprep.mubr.msk.bf16.mxu1 %vm1526_vm1, %v2836_v34 }
 0x811   : > { %11187 = vmatmul.mubr.msk.bf16.gmra.mxu1 %vm1526_vm1, %v16894_v16 }
 0x812   : > { %11190 = vmatprep.mubr.msk.bf16.mxu1 %vm1526_vm1, %v2838_v45 }
 0x819   : > { %11191 = vmatmul.mubr.msk.bf16.gmra.mxu1 %vm1526_vm1, %v16897_v28 }
 0x81a   : > { %11230 = vmatprep.mubr.msk.bf16.mxu1 %vm378_vm0, %v16898_v31 }
 0x821   : > { %11231 = vmatmul.mubr.msk.bf16.vlgmr.msra.gmra.mxu1 %vm378_vm0, %v16899_v32 }
 0x822   : > { %11234 = vmatprep.mubr.msk.bf16.mxu1 %vm378_vm0, %v16900_v26 }
 0x829   : > { %11235 = vmatmul.mubr.msk.bf16.gmra.mxu1 %vm378_vm0, %v16901_v54 }
 0x82a   : > { %11238 = vmatprep.mubr.msk.bf16.mxu1 %vm378_vm0, %v16902_v22 }
 0x831   : > { %11239 = vmatmul.mubr.msk.bf16.gmra.mxu1 %vm378_vm0, %v16903_v40 }
 0x832   : > { %11242 = vmatprep.mubr.msk.bf16.mxu1 %vm378_vm0, %v16904_v3 }
 0x839   : > { %11243 = vmatmul.mubr.msk.bf16.gmra.mxu1 %vm378_vm0, %v16905_v7 }
 0x83a   : > { %11246 = vmatprep.mubr.msk.bf16.mxu1 %vm378_vm0, %v16906_v1 }
 0x841   : > { %11247 = vmatmul.mubr.msk.bf16.gmra.mxu1 %vm378_vm0, %v16907_v39 }
 0x842   : > { %11250 = vmatprep.mubr.msk.bf16.mxu1 %vm378_vm0, %v16908_v38 }
 0x849   : > { %11251 = vmatmul.mubr.msk.bf16.gmra.mxu1 %vm378_vm0, %v16909_v5  ;;  %v11068_v60 = vpop.f32.mrf.mxu0 }
 0x84a   : > { %11254 = vmatprep.mubr.msk.bf16.mxu1 %vm378_vm0, %v16910_v59 }
 0x84b   : > { %v4328_v11 = vpop.f32.mrf.mxu0 }
 0x84d   : > { %v11069_v9 = vpop.f32.mrf.mxu0 }
 0x84e   : > { %v4729_v62 = vpack.c.bf16 %v11069_v9, %v11068_v60 }
 0x84f   : > { %v4331_v6 = vpop.f32.mrf.mxu0 }
 0x850   : > { %v4728_v8 = vpack.c.bf16 %v4331_v6, %v4328_v11 }
 0x851   : > { %11255 = vmatmul.mubr.msk.bf16.gmra.mxu1 %vm378_vm0, %v16911_v43 }
 0x852   : > { %11258 = vmatprep.mubr.msk.bf16.mxu1 %vm378_vm0, %v16912_v57  ;;  %11128 = vmatprep.mubr.msk.bf16.mxu0 %vm1526_vm1, %v4728_v8 }
 0x853   : > { %11129 = vmatmul.mubr.msk.bf16.vlgmr.msra.gmra.mxu0 %vm1526_vm1, %v4729_v62 }
 0x854   : > { %11195 = vmatpush3.bf16.msra.mxu0 %v11823_v41 }
 0x855   : > { %11262 = vmatprep.subr.bf16.mxu0 %v11824_v0 }
 0x859   : > { %v11076_v27 = vpop.f32.mrf.mxu1  ;;  %11259 = vmatmul.mubr.msk.bf16.gmra.mxu1 %vm378_vm0, %v16913_v25 }
 0x85b   : > { %v4383_v29 = vpop.f32.mrf.mxu1 }
 0x85d   : > { %v11077_v35 = vpop.f32.mrf.mxu1 }
 0x85e   : > { %v4731_v18 = vpack.c.bf16 %v11077_v35, %v11076_v27 }
 0x85f   : > { %v4386_v48 = vpop.f32.mrf.mxu1 }
 0x860   : > { %v4730_v2 = vpack.c.bf16 %v4386_v48, %v4383_v29 }
 0x862   : > { %11132 = vmatprep.mubr.msk.bf16.mxu0 %vm1526_vm1, %v4730_v2 }
 0x863   : > { %11133 = vmatmul.mubr.msk.bf16.gmra.mxu0 %vm1526_vm1, %v4731_v18 }
 0x869   : > { %v11084_v42 = vpop.f32.mrf.mxu0 }
 0x86b   : > { %v4438_v47 = vpop.f32.mrf.mxu0 }
 0x86d   : > { %v11085_v44 = vpop.f32.mrf.mxu0 }
 0x86e   : > { %v4733_v53 = vpack.c.bf16 %v11085_v44, %v11084_v42 }
 0x86f   : > { %v4441_v58 = vpop.f32.mrf.mxu0 }
 0x870   : > { %v4732_v30 = vpack.c.bf16 %v4441_v58, %v4438_v47 }
 0x872   : > { %11136 = vmatprep.mubr.msk.bf16.mxu0 %vm1526_vm1, %v4732_v30 }
 0x873   : > { %11137 = vmatmul.mubr.msk.bf16.gmra.mxu0 %vm1526_vm1, %v4733_v53 }
 0x879   : > { %v11092_v17 = vpop.f32.mrf.mxu1 }
 0x87b   : > { %v4493_v21 = vpop.f32.mrf.mxu1 }
 0x87d   : > { %v11093_v4 = vpop.f32.mrf.mxu1 }
 0x87e   : > { %v4735_v36 = vpack.c.bf16 %v11093_v4, %v11092_v17 }
 0x87f   : > { %v4496_v20 = vpop.f32.mrf.mxu1 }
 0x880   : > { %v4734_v23 = vpack.c.bf16 %v4496_v20, %v4493_v21 }
 0x881   : > { %v11100_v46 = vpop.f32.mrf.mxu0 }
 0x882   : > { %11140 = vmatprep.mubr.msk.bf16.mxu0 %vm1526_vm1, %v4734_v23 }
 0x883   : > { %v4548_v51 = vpop.f32.mrf.mxu0  ;;  %11141 = vmatmul.mubr.msk.bf16.gmra.mxu0 %vm1526_vm1, %v4735_v36 }
 0x885   : > { %v11101_v55 = vpop.f32.mrf.mxu0 }
 0x886   : > { %v4737_v52 = vpack.c.bf16 %v11101_v55, %v11100_v46 }
 0x887   : > { %v4551_v14 = vpop.f32.mrf.mxu0 }
 0x888   : > { %v4736_v56 = vpack.c.bf16 %v4551_v14, %v4548_v51 }
 0x889   : > { %v11108_v49 = vpop.f32.mrf.mxu1 }
 0x88a   : > { %11144 = vmatprep.mubr.msk.bf16.mxu0 %vm1526_vm1, %v4736_v56 }
 0x88b   : > { %v4603_v13 = vpop.f32.mrf.mxu1  ;;  %11145 = vmatmul.mubr.msk.bf16.gmra.mxu0 %vm1526_vm1, %v4737_v52 }
 0x88d   : > { %v11109_v15 = vpop.f32.mrf.mxu1 }
 0x88e   : > { %v4739_v63 = vpack.c.bf16 %v11109_v15, %v11108_v49 }
 0x88f   : > { %v4606_v34 = vpop.f32.mrf.mxu1 }
 0x890   : > { %v4738_v37 = vpack.c.bf16 %v4606_v34, %v4603_v13  ;;  %v14855_v34 = vld [vmem:[%s16729_s5 + $0x6] ss:$0 sm:$0xff] }
 0x891   : > { %v11116_v24 = vpop.f32.mrf.mxu0 }
 0x892   : > { %11148 = vmatprep.mubr.msk.bf16.mxu0 %vm1526_vm1, %v4738_v37 }
 0x893   : > { %v4658_v10 = vpop.f32.mrf.mxu0  ;;  %11149 = vmatmul.mubr.msk.bf16.gmra.mxu0 %vm1526_vm1, %v4739_v63 }
 0x895   : > { %v11117_v19 = vpop.f32.mrf.mxu0 }
 0x896   : > { %v4741_v33 = vpack.c.bf16 %v11117_v19, %v11116_v24 }
 0x897   : > { %v4661_v45 = vpop.f32.mrf.mxu0 }
 0x898   : > { %v4740_v12 = vpack.c.bf16 %v4661_v45, %v4658_v10 }
 0x899   : > { %v11124_v16 = vpop.f32.mrf.mxu1 }
 0x89a   : > { %11152 = vmatprep.mubr.msk.bf16.mxu0 %vm1526_vm1, %v4740_v12 }
 0x89b   : > { %v4713_v50 = vpop.f32.mrf.mxu1  ;;  %11153 = vmatmul.mubr.msk.bf16.gmra.mxu0 %vm1526_vm1, %v4741_v33 }
 0x89d   : > { %v11125_v61 = vpop.f32.mrf.mxu1 }
 0x89e   : > { %v4743_v60 = vpack.c.bf16 %v11125_v61, %v11124_v16 }
 0x89f   : > { %v4716_v28 = vpop.f32.mrf.mxu1 }
 0x8a0   : > { %v4742_v41 = vpack.c.bf16 %v4716_v28, %v4713_v50 }
 0x8a1   : > { %v14756_v11 = vpop.f32.mrf.mxu1 }
 0x8a2   : > { %16914 = vst [vmem:[#allocation33_spill] sm:$0xff] %v14756_v11  ;;  %11156 = vmatprep.mubr.msk.bf16.mxu0 %vm1526_vm1, %v4742_v41 }
 0x8a3   : > { %11157 = vmatmul.mubr.msk.bf16.gmra.mxu0 %vm1526_vm1, %v4743_v60  ;;  %v14760_v9 = vpop.f32.mrf.mxu1 }
 0x8a4   : > { %16915 = vst [vmem:[#allocation19_spill] sm:$0xff] %v14760_v9  ;;  %11196 = vmatprep.mubr.msk.bf16.mxu0 %vm378_vm0, %v16898_v31 }
 0x8a5   : > { %v14764_v6 = vpop.f32.mrf.mxu1 }
 0x8a6   : > { %16916 = vst [vmem:[#allocation18_spill] sm:$0xff] %v14764_v6 }
 0x8a7   : > { %v14766_v8 = vpop.f32.mrf.mxu1 }
 0x8a8   : > { %16917 = vst [vmem:[#allocation23_spill] sm:$0xff] %v14766_v8 }
 0x8a9   : > { %v14768_v62 = vpop.f32.mrf.mxu1 }
 0x8aa   : > { %16918 = vst [vmem:[#allocation25_spill] sm:$0xff] %v14768_v62 }
 0x8ab   : > { %v14770_v27 = vpop.f32.mrf.mxu1  ;;  %11197 = vmatmul.mubr.msk.bf16.vlgmr.msra.gmra.mxu0 %vm378_vm0, %v16899_v32 }
 0x8ac   : > { %16919 = vst [vmem:[#allocation21_spill] sm:$0xff] %v14770_v27  ;;  %11200 = vmatprep.mubr.msk.bf16.mxu0 %vm378_vm0, %v16900_v26  ;;  %11263 = vmatpush3.bf16.msra.mxu0 %v11824_v0 }
 0x8ad   : > { %v14776_v29 = vpop.f32.mrf.mxu1 }
 0x8ae   : > { %16920 = vst [vmem:[#allocation20_spill] sm:$0xff] %v14776_v29 }
 0x8af   : > { %v14778_v35 = vpop.f32.mrf.mxu1 }
 0x8b0   : > { %16921 = vst [vmem:[#allocation36_spill] sm:$0xff] %v14778_v35 }
 0x8b1   : > { %v14780_v48 = vpop.f32.mrf.mxu1 }
 0x8b2   : > { %16922 = vst [vmem:[#allocation38_spill] sm:$0xff] %v14780_v48 }
 0x8b3   : > { %v14782_v2 = vpop.f32.mrf.mxu1  ;;  %11201 = vmatmul.mubr.msk.bf16.gmra.mxu0 %vm378_vm0, %v16901_v54 }
 0x8b4   : > { %16923 = vst [vmem:[#allocation24_spill] sm:$0xff] %v14782_v2  ;;  %11204 = vmatprep.mubr.msk.bf16.mxu0 %vm378_vm0, %v16902_v22 }
 0x8b5   : > { %v14788_v18 = vpop.f32.mrf.mxu1 }
 0x8b6   : > { %16924 = vst [vmem:[#allocation22_spill] sm:$0xff] %v14788_v18 }
 0x8b7   : > { %v14790_v42 = vpop.f32.mrf.mxu1 }
 0x8b8   : > { %16925 = vst [vmem:[#allocation27_spill] sm:$0xff] %v14790_v42 }
 0x8b9   : > { %v14792_v47 = vpop.f32.mrf.mxu1 }
 0x8ba   : > { %16926 = vst [vmem:[#allocation29_spill] sm:$0xff] %v14792_v47 }
 0x8bb   : > { %v14794_v0 = vpop.f32.mrf.mxu1  ;;  %11205 = vmatmul.mubr.msk.bf16.gmra.mxu0 %vm378_vm0, %v16903_v40 }
 0x8bc   : > { %16927 = vst [vmem:[#allocation37_spill] sm:$0xff] %v14794_v0  ;;  %11208 = vmatprep.mubr.msk.bf16.mxu0 %vm378_vm0, %v16904_v3 }
 0x8bd   : > { %v14800_v44 = vpop.f32.mrf.mxu1 }
 0x8be   : > { %16928 = vst [vmem:[#allocation35_spill] sm:$0xff] %v14800_v44 }
 0x8bf   : > { %v14802_v58 = vpop.f32.mrf.mxu1 }
 0x8c0   : > { %16929 = vst [vmem:[#allocation40_spill] sm:$0xff] %v14802_v58 }
 0x8c1   : > { %v14804_v30 = vpop.f32.mrf.mxu1 }
 0x8c2   : > { %16930 = vst [vmem:[#allocation42_spill] sm:$0xff] %v14804_v30 }
 0x8c3   : > { %v14806_v53 = vpop.f32.mrf.mxu1  ;;  %11209 = vmatmul.mubr.msk.bf16.gmra.mxu0 %vm378_vm0, %v16905_v7 }
 0x8c4   : > { %16931 = vst [vmem:[#allocation28_spill] sm:$0xff] %v14806_v53  ;;  %11212 = vmatprep.mubr.msk.bf16.mxu0 %vm378_vm0, %v16906_v1 }
 0x8c5   : > { %v14812_v17 = vpop.f32.mrf.mxu1 }
 0x8c6   : > { %16932 = vst [vmem:[#allocation26_spill] sm:$0xff] %v14812_v17 }
 0x8c7   : > { %v14814_v21 = vpop.f32.mrf.mxu1 }
 0x8c8   : > { %16933 = vst [vmem:[#allocation31_spill] sm:$0xff] %v14814_v21 }
 0x8c9   : > { %v14816_v4 = vpop.f32.mrf.mxu1 }
 0x8ca   : > { %16934 = vst [vmem:[#allocation34_spill] sm:$0xff] %v14816_v4 }
 0x8cb   : > { %v14818_v20 = vpop.f32.mrf.mxu1  ;;  %11213 = vmatmul.mubr.msk.bf16.gmra.mxu0 %vm378_vm0, %v16907_v39 }
 0x8cc   : > { %16935 = vst [vmem:[#allocation41_spill] sm:$0xff] %v14818_v20  ;;  %11216 = vmatprep.mubr.msk.bf16.mxu0 %vm378_vm0, %v16908_v38 }
 0x8cd   : > { %v14824_v23 = vpop.f32.mrf.mxu1 }
 0x8ce   : > { %16936 = vst [vmem:[#allocation39_spill] sm:$0xff] %v14824_v23 }
 0x8cf   : > { %v14826_v36 = vpop.f32.mrf.mxu1 }
 0x8d0   : > { %16937 = vst [vmem:[#allocation32_spill] sm:$0xff] %v14826_v36 }
 0x8d1   : > { %v14828_v46 = vpop.f32.mrf.mxu1 }
 0x8d2   : > { %16938 = vst [vmem:[#allocation30_spill] sm:$0xff] %v14828_v46 }
 0x8d3   : > { %v14830_v51 = vpop.f32.mrf.mxu1  ;;  %11217 = vmatmul.mubr.msk.bf16.gmra.mxu0 %vm378_vm0, %v16909_v5 }
 0x8d4   : > { %16939 = vst [vmem:[#allocation10_spill] sm:$0xff] %v14830_v51  ;;  %11220 = vmatprep.mubr.msk.bf16.mxu0 %vm378_vm0, %v16910_v59 }
 0x8d5   : > { %v14836_v55 = vpop.f32.mrf.mxu1 }
 0x8d6   : > { %16940 = vst [vmem:[#allocation11_spill] sm:$0xff] %v14836_v55 }
 0x8d7   : > { %v14838_v14 = vpop.f32.mrf.mxu1 }
 0x8d8   : > { %16941 = vst [vmem:[#allocation12_spill] sm:$0xff] %v14838_v14 }
 0x8d9   : > { %v14840_v56 = vpop.f32.mrf.mxu1 }
 0x8da   : > { %16942 = vst [vmem:[#allocation13_spill] sm:$0xff] %v14840_v56 }
 0x8db   : > { %v14842_v52 = vpop.f32.mrf.mxu1  ;;  %11221 = vmatmul.mubr.msk.bf16.gmra.mxu0 %vm378_vm0, %v16911_v43 }
 0x8dc   : > { %16943 = vst [vmem:[#allocation14_spill] sm:$0xff] %v14842_v52  ;;  %11224 = vmatprep.mubr.msk.bf16.mxu0 %vm378_vm0, %v16912_v57 }
 0x8dd   : > { %v14848_v49 = vpop.f32.mrf.mxu1 }
 0x8de   : > { %16944 = vst [vmem:[#allocation15_spill] sm:$0xff] %v14848_v49 }
 0x8df   : > { %v14850_v13 = vpop.f32.mrf.mxu1 }
 0x8e0   : > { %16945 = vst [vmem:[#allocation43_spill] sm:$0xff] %v14850_v13 }
 0x8e1   : > { %v11232_v15 = vpop.f32.mrf.mxu1 }
 0x8e2   : > { %v5409_v24 = vadd.f32 %v11232_v15, %v14855_v34 }
 0x8e3   : > { %11225 = vmatmul.mubr.msk.bf16.gmra.mxu0 %vm378_vm0, %v16913_v25  ;;  %v5400_v37 = vpop.f32.mrf.mxu1 }
 0x8e4   : > { %11264 = vmatprep.mubr.msk.bf16.mxu0 %vm378_vm0, %v16898_v31  ;;  %v5401_v45 = vadd.f32 %v14855_v34, %v5400_v37 }
 0x8e5   : > { %v11233_v63 = vpop.f32.mrf.mxu1 }
 0x8e6   : > { %v5412_v10 = vadd.f32 %v11233_v63, %v14855_v34 }
 0x8e7   : > { %v5403_v19 = vpop.f32.mrf.mxu1 }
 0x8e8   : > { %v5722_v12 = vpack.c.bf16 %v5412_v10, %v5409_v24  ;;  %v5404_v33 = vadd.f32 %v14855_v34, %v5403_v19 }
 0x8e9   : > { %v11236_v16 = vpop.f32.mrf.mxu1 }
 0x8ea   : > { %v5721_v50 = vpack.c.bf16 %v5404_v33, %v5401_v45  ;;  %11758 = vmatprep.subr.msk.bf16.mxu1 %vm1526_vm1, %v5722_v12  ;;  %v5772_v61 = vsel %vm1526_vm1, %v5722_v12, 0  ;;  %v5425_v63 = vadd.f32 %v11236_v16, %v14855_v34 }
 0x8eb   : > { %v5416_v28 = vpop.f32.mrf.mxu1  ;;  %11265 = vmatmul.mubr.msk.bf16.vlgmr.msra.gmra.mxu0 %vm378_vm0, %v16899_v32  ;;  %11297 = vmatpush3.bf16.xpose.msra.mxu1 %v5772_v61 }
 0x8ec   : > { %v5417_v41 = vadd.f32 %v14855_v34, %v5416_v28  ;;  %11268 = vmatprep.mubr.msk.bf16.mxu0 %vm378_vm0, %v16900_v26  ;;  %11759 = vmatprep.subr.msk.bf16.mxu1 %vm1526_vm1, %v5721_v50  ;;  %v5769_v33 = vsel %vm1526_vm1, %v5721_v50, 0 }
 0x8ed   : > { %v11237_v60 = vpop.f32.mrf.mxu1 }
 0x8ee   : > { %v5428_v15 = vadd.f32 %v11237_v60, %v14855_v34 }
 0x8ef   : > { %v5419_v37 = vpop.f32.mrf.mxu1 }
 0x8f0   : > { %v5420_v24 = vadd.f32 %v14855_v34, %v5419_v37  ;;  %v14876_v19 = vpack.c.bf16 %v5428_v15, %v5425_v63 }
 0x8f1   : > { %v11240_v10 = vpop.f32.mrf.mxu1 }
 0x8f2   : > { %v14878_v45 = vpack.c.bf16 %v5420_v24, %v5417_v41  ;;  %v5441_v12 = vadd.f32 %v11240_v10, %v14855_v34 }
 0x8f3   : > { %v5432_v61 = vpop.f32.mrf.mxu1  ;;  %11269 = vmatmul.mubr.msk.bf16.gmra.mxu0 %vm378_vm0, %v16901_v54  ;;  %11299 = vmatpush3.bf16.xpose.msra.mxu1 %v5769_v33 }
 0x8f4   : > { %v5433_v28 = vadd.f32 %v14855_v34, %v5432_v61  ;;  %11272 = vmatprep.mubr.msk.bf16.mxu0 %vm378_vm0, %v16902_v22  ;;  %11760 = vmatprep.subr.msk.bf16.mxu1 %vm1526_vm1, %v14876_v19 }
 0x8f5   : > { %v11241_v16 = vpop.f32.mrf.mxu1 }
 0x8f6   : > { %v5444_v41 = vadd.f32 %v11241_v16, %v14855_v34 }
 0x8f7   : > { %v5435_v60 = vpop.f32.mrf.mxu1 }
 0x8f8   : > { %v14890_v15 = vpack.c.bf16 %v5444_v41, %v5441_v12  ;;  %v5436_v50 = vadd.f32 %v14855_v34, %v5435_v60 }
 0x8f9   : > { %v11244_v37 = vpop.f32.mrf.mxu1 }
 0x8fa   : > { %v14893_v63 = vpack.c.bf16 %v5436_v50, %v5433_v28  ;;  %v5457_v24 = vadd.f32 %v11244_v37, %v14855_v34 }
 0x8fb   : > { %v5448_v10 = vpop.f32.mrf.mxu1  ;;  %11273 = vmatmul.mubr.msk.bf16.gmra.mxu0 %vm378_vm0, %v16903_v40 }
 0x8fc   : > { %v5449_v33 = vadd.f32 %v14855_v34, %v5448_v10  ;;  %11276 = vmatprep.mubr.msk.bf16.mxu0 %vm378_vm0, %v16904_v3 }
 0x8fd   : > { %v11245_v61 = vpop.f32.mrf.mxu1 }
 0x8fe   : > { %v5460_v12 = vadd.f32 %v11245_v61, %v14855_v34 }
 0x8ff   : > { %v5451_v16 = vpop.f32.mrf.mxu1 }
 0x900   : > { %v14902_v41 = vpack.c.bf16 %v5460_v12, %v5457_v24  ;;  %v5452_v28 = vadd.f32 %v14855_v34, %v5451_v16 }
 0x901   : > { %v11248_v60 = vpop.f32.mrf.mxu1 }
 0x902   : > { %v14905_v50 = vpack.c.bf16 %v5452_v28, %v5449_v33  ;;  %v5473_v13 = vadd.f32 %v11248_v60, %v14855_v34 }
 0x903   : > { %v5464_v37 = vpop.f32.mrf.mxu1  ;;  %11277 = vmatmul.mubr.msk.bf16.gmra.mxu0 %vm378_vm0, %v16905_v7 }
 0x904   : > { %11280 = vmatprep.mubr.msk.bf16.mxu0 %vm378_vm0, %v16906_v1  ;;  %v5465_v24 = vadd.f32 %v14855_v34, %v5464_v37 }
 0x905   : > { %v11249_v10 = vpop.f32.mrf.mxu1 }
 0x906   : > { %v5476_v61 = vadd.f32 %v11249_v10, %v14855_v34 }
 0x907   : > { %v5467_v14 = vpop.f32.mrf.mxu1 }
 0x908   : > { %v5730_v12 = vpack.c.bf16 %v5476_v61, %v5473_v13  ;;  %v5468_v16 = vadd.f32 %v14855_v34, %v5467_v14 }
 0x909   : > { %v11252_v33 = vpop.f32.mrf.mxu1 }
 0x90a   : > { %v5729_v28 = vpack.c.bf16 %v5468_v16, %v5465_v24  ;;  %v5489_v36 = vadd.f32 %v11252_v33, %v14855_v34  ;;  %11766 = vmatprep.subr.msk.bf16.mxu0 %vm1526_vm1, %v5730_v12  ;;  %v6016_v21 = vsel %vm1526_vm1, %v5730_v12, 0 }
 0x90b   : > { %v5480_v58 = vpop.f32.mrf.mxu1  ;;  %11281 = vmatmul.mubr.msk.bf16.gmra.mxu0 %vm378_vm0, %v16907_v39 }
 0x90c   : > { %v5481_v60 = vadd.f32 %v14855_v34, %v5480_v58  ;;  %11329 = vmatpush3.bf16.xpose.msra.mxu0 %v6016_v21  ;;  %11284 = vmatprep.mubr.msk.bf16.mxu0 %vm378_vm0, %v16908_v38  ;;  %v6013_v58 = vsel %vm1526_vm1, %v5729_v28, 0 }
 0x90d   : > { %11767 = vmatprep.subr.msk.bf16.mxu0 %vm1526_vm1, %v5729_v28  ;;  %v11253_v14 = vpop.f32.mrf.mxu1 }
 0x90e   : > { %v5492_v13 = vadd.f32 %v11253_v14, %v14855_v34 }
 0x90f   : > { %v5483_v37 = vpop.f32.mrf.mxu1 }
 0x910   : > { %v14925_v10 = vpack.c.bf16 %v5492_v13, %v5489_v36  ;;  %v5484_v61 = vadd.f32 %v14855_v34, %v5483_v37 }
 0x911   : > { %v11256_v24 = vpop.f32.mrf.mxu1 }
 0x912   : > { %v14928_v12 = vpack.c.bf16 %v5484_v61, %v5481_v60  ;;  %v5505_v36 = vadd.f32 %v11256_v24, %v14855_v34 }
 0x913   : > { %v5496_v16 = vpop.f32.mrf.mxu1  ;;  %11285 = vmatmul.mubr.msk.bf16.gmra.mxu0 %vm378_vm0, %v16909_v5  ;;  %v14941_v61 = vpop.f32.mrf.mxu0 }
 0x914   : > { %v5497_v21 = vadd.f32 %v14855_v34, %v5496_v16  ;;  %11331 = vmatpush3.bf16.xpose.msra.mxu0 %v6013_v58  ;;  %11288 = vmatprep.mubr.msk.bf16.mxu0 %vm378_vm0, %v16910_v59  ;;  %16946 = vst [vmem:[#allocation44_spill] sm:$0xff] %v14941_v61 }
 0x915   : > { %v11257_v33 = vpop.f32.mrf.mxu1  ;;  %v14951_v28 = vpop.f32.mrf.mxu0 }
 0x916   : > { %v5508_v14 = vadd.f32 %v11257_v33, %v14855_v34  ;;  %16947 = vst [vmem:[#allocation45_spill] sm:$0xff] %v14951_v28 }
 0x917   : > { %v5499_v13 = vpop.f32.mrf.mxu1  ;;  %v14953_v24 = vpop.f32.mrf.mxu0 }
 0x918   : > { %v14938_v60 = vpack.c.bf16 %v5508_v14, %v5505_v36  ;;  %v5500_v37 = vadd.f32 %v14855_v34, %v5499_v13  ;;  %16948 = vst [vmem:[#allocation46_spill] sm:$0xff] %v14953_v24 }
 0x919   : > { %v14957_v16 = vpop.f32.mrf.mxu0 }
 0x91a   : > { %v14943_v42 = vpack.c.bf16 %v5500_v37, %v5497_v21  ;;  %11770 = vmatprep.subr.msk.bf16.mxu0 %vm1526_vm1, %v14938_v60  ;;  %16949 = vst [vmem:[#allocation47_spill] sm:$0xff] %v14957_v16 }
 0x91b   : > { %11289 = vmatmul.mubr.msk.bf16.gmra.mxu0 %vm378_vm0, %v16911_v43 }
 0x91c   : > { %11292 = vmatprep.mubr.msk.bf16.mxu0 %vm378_vm0, %v16912_v57 }
 0x923   : > { %11293 = vmatmul.mubr.msk.bf16.gmra.mxu0 %vm378_vm0, %v16913_v25  ;;  %v14959_v58 = vpop.f32.mrf.mxu0 }
 0x924   : > { %16950 = vst [vmem:[#allocation48_spill] sm:$0xff] %v14959_v58 }
 0x925   : > { %v14961_v21 = vpop.f32.mrf.mxu0 }
 0x926   : > { %16951 = vst [vmem:[#allocation49_spill] sm:$0xff] %v14961_v21 }
 0x927   : > { %v14963_v33 = vpop.f32.mrf.mxu0 }
 0x928   : > { %16952 = vst [vmem:[#allocation50_spill] sm:$0xff] %v14963_v33 }
 0x929   : > { %v14965_v36 = vpop.f32.mrf.mxu0 }
 0x92a   : > { %16953 = vst [vmem:[#allocation51_spill] sm:$0xff] %v14965_v36 }
 0x933   : > { %v14967_v14 = vpop.f32.mrf.mxu0 }
 0x934   : > { %16954 = vst [vmem:[#allocation52_spill] sm:$0xff] %v14967_v14 }
 0x935   : > { %v14969_v13 = vpop.f32.mrf.mxu0 }
 0x936   : > { %16955 = vst [vmem:[#allocation53_spill] sm:$0xff] %v14969_v13 }
 0x937   : > { %v14971_v37 = vpop.f32.mrf.mxu0 }
 0x938   : > { %16956 = vst [vmem:[#allocation54_spill] sm:$0xff] %v14971_v37 }
 0x939   : > { %v14973_v35 = vpop.f32.mrf.mxu0 }
 0x93a   : > { %16957 = vst [vmem:[#allocation55_spill] sm:$0xff] %v14973_v35 }
 0x943   : > { %v14975_v8 = vpop.f32.mrf.mxu0 }
 0x944   : > { %16958 = vst [vmem:[#allocation56_spill] sm:$0xff] %v14975_v8 }
 0x945   : > { %v14977_v49 = vpop.f32.mrf.mxu0 }
 0x946   : > { %16959 = vst [vmem:[#allocation57_spill] sm:$0xff] %v14977_v49 }
 0x947   : > { %v14979_v16 = vpop.f32.mrf.mxu0 }
 0x948   : > { %16960 = vst [vmem:[#allocation58_spill] sm:$0xff] %v14979_v16  ;;  %v5833_v16 = vsel %vm1526_vm1, %v14876_v19, 0 }
 0x949   : > { %v14981_v52 = vpop.f32.mrf.mxu0 }
 0x94a   : > { %16961 = vst [vmem:[#allocation59_spill] sm:$0xff] %v14981_v52 }
 0x94b   : > { %v14983_v56 = vpop.f32.mrf.mxu0 }
 0x94c   : > { %16962 = vst [vmem:[#allocation60_spill] sm:$0xff] %v14983_v56 }
 0x94d   : > { %v14985_v55 = vpop.f32.mrf.mxu0 }
 0x94e   : > { %16963 = vst [vmem:[#allocation61_spill] sm:$0xff] %v14985_v55 }
 0x94f   : > { %v14987_v36 = vpop.f32.mrf.mxu0 }
 0x950   : > { %16964 = vst [vmem:[#allocation62_spill] sm:$0xff] %v14987_v36 }
 0x951   : > { %v14989_v51 = vpop.f32.mrf.mxu0 }
 0x952   : > { %16965 = vst [vmem:[#allocation63_spill] sm:$0xff] %v14989_v51 }
 0x953   : > { %v14991_v46 = vpop.f32.mrf.mxu0 }
 0x954   : > { %16966 = vst [vmem:[#allocation64_spill] sm:$0xff] %v14991_v46 }
 0x955   : > { %v14993_v23 = vpop.f32.mrf.mxu0 }
 0x956   : > { %16967 = vst [vmem:[#allocation65_spill] sm:$0xff] %v14993_v23 }
 0x957   : > { %v14995_v35 = vpop.f32.mrf.mxu0 }
 0x958   : > { %16968 = vst [vmem:[#allocation66_spill] sm:$0xff] %v14995_v35 }
 0x959   : > { %v14997_v20 = vpop.f32.mrf.mxu0 }
 0x95a   : > { %16969 = vst [vmem:[#allocation67_spill] sm:$0xff] %v14997_v20  ;;  %v15018_v20 = vld [vmem:[%s16729_s5 + $0x2] ss:$0 sm:$0xff] }
 0x95b   : > { %v14999_v4 = vpop.f32.mrf.mxu0 }
 0x95c   : > { %16970 = vst [vmem:[#allocation68_spill] sm:$0xff] %v14999_v4 }
 0x95d   : > { %v15001_v17 = vpop.f32.mrf.mxu0 }
 0x95e   : > { %16971 = vst [vmem:[#allocation69_spill] sm:$0xff] %v15001_v17 }
 0x95f   : > { %v15003_v52 = vpop.f32.mrf.mxu0 }
 0x960   : > { %16972 = vst [vmem:[#allocation70_spill] sm:$0xff] %v15003_v52 }
 0x961   : > { %v15005_v53 = vpop.f32.mrf.mxu0 }
 0x962   : > { %16973 = vst [vmem:[#allocation71_spill] sm:$0xff] %v15005_v53 }
 0x963   : > { %v15007_v55 = vpop.f32.mrf.mxu0 }
 0x964   : > { %16974 = vst [vmem:[#allocation72_spill] sm:$0xff] %v15007_v55 }
 0x965   : > { %v15009_v36 = vpop.f32.mrf.mxu0 }
 0x966   : > { %16975 = vst [vmem:[#allocation73_spill] sm:$0xff] %v15009_v36 }
 0x967   : > { %v15011_v51 = vpop.f32.mrf.mxu0 }
 0x968   : > { %16976 = vst [vmem:[#allocation74_spill] sm:$0xff] %v15011_v51 }
 0x969   : > { %v15013_v46 = vpop.f32.mrf.mxu0 }
 0x96a   : > { %16977 = vst [vmem:[#allocation75_spill] sm:$0xff] %v15013_v46 }
 0x96b   : > { %v11198_v23 = vpop.f32.mrf.mxu0 }
 0x96c   : > { %v5231_v36 = vadd.f32 %v11198_v23, %v15018_v20 }
 0x96d   : > { %v5222_v35 = vpop.f32.mrf.mxu0 }
 0x96e   : > { %v5223_v53 = vadd.f32 %v15018_v20, %v5222_v35 }
 0x96f   : > { %v11199_v30 = vpop.f32.mrf.mxu0 }
 0x970   : > { %v5234_v52 = vadd.f32 %v11199_v30, %v15018_v20 }
 0x971   : > { %v5225_v17 = vpop.f32.mrf.mxu0 }
 0x972   : > { %v5226_v55 = vadd.f32 %v15018_v20, %v5225_v17  ;;  %v5706_v46 = vpack.c.bf16 %v5234_v52, %v5231_v36 }
 0x973   : > { %v11202_v51 = vpop.f32.mrf.mxu0 }
 0x974   : > { %v5705_v4 = vpack.c.bf16 %v5226_v55, %v5223_v53  ;;  %v5247_v36 = vadd.f32 %v11202_v51, %v15018_v20 }
 0x975   : > { %v5238_v56 = vpop.f32.mrf.mxu0 }
 0x976   : > { %11300 = vmatprep.mubr.msk.bf16.mxu1 %vm1526_vm1, %v5705_v4  ;;  %v5239_v30 = vadd.f32 %v15018_v20, %v5238_v56 }
 0x977   : > { %v11203_v44 = vpop.f32.mrf.mxu0  ;;  %11301 = vmatmul.mubr.msk.bf16.vlgmr.msra.gmra.mxu1 %vm1526_vm1, %v5706_v46  ;;  %v5830_v46 = vsel %vm1526_vm1, %v14878_v45, 0 }
 0x978   : > { %11305 = vmatpush3.bf16.xpose.msra.mxu1 %v5833_v16  ;;  %v5250_v52 = vadd.f32 %v11203_v44, %v15018_v20  ;;  %v5894_v44 = vsel %vm1526_vm1, %v14890_v15, 0 }
 0x979   : > { %11761 = vmatprep.subr.msk.bf16.mxu1 %vm1526_vm1, %v14878_v45  ;;  %v5241_v35 = vpop.f32.mrf.mxu0 }
 0x97a   : > { %v5242_v17 = vadd.f32 %v15018_v20, %v5241_v35 }
 0x97b   : > { %v11206_v53 = vpop.f32.mrf.mxu0 }
 0x97c   : > { %v5707_v23 = vpack.c.bf16 %v5242_v17, %v5239_v30  ;;  %v5708_v17 = vpack.c.bf16 %v5250_v52, %v5247_v36  ;;  %v5891_v52 = vsel %vm1526_vm1, %v14893_v63, 0 }
 0x97d   : > { %v5254_v55 = vpop.f32.mrf.mxu0 }
 0x97e   : > { %11308 = vmatprep.mubr.msk.bf16.mxu1 %vm1526_vm1, %v5707_v23  ;;  %v5255_v56 = vadd.f32 %v15018_v20, %v5254_v55 }
 0x97f   : > { %v11207_v4 = vpop.f32.mrf.mxu0 }
 0x980   : > { %11307 = vmatpush3.bf16.xpose.msra.mxu1 %v5830_v46 }
 0x981   : > { %11762 = vmatprep.subr.msk.bf16.mxu1 %vm1526_vm1, %v14890_v15  ;;  %v5257_v19 = vpop.f32.mrf.mxu0 }
 0x982   : > { %v5258_v16 = vadd.f32 %v15018_v20, %v5257_v19 }
 0x983   : > { %v11210_v35 = vpop.f32.mrf.mxu0 }
 0x984   : > { %v5709_v30 = vpack.c.bf16 %v5258_v16, %v5255_v56  ;;  %v5266_v56 = vadd.f32 %v11207_v4, %v15018_v20 }
 0x985   : > { %v5270_v23 = vpop.f32.mrf.mxu0 }
 0x986   : > { %v5271_v4 = vadd.f32 %v15018_v20, %v5270_v23 }
 0x987   : > { %11309 = vmatmul.mubr.msk.bf16.vlgmr.msra.gmra.mxu1 %vm1526_vm1, %v5708_v17  ;;  %v11211_v45 = vpop.f32.mrf.mxu0 }
 0x988   : > { %11313 = vmatpush3.bf16.xpose.msra.mxu1 %v5894_v44  ;;  %11316 = vmatprep.mubr.msk.bf16.mxu1 %vm1526_vm1, %v5709_v30  ;;  %v5263_v44 = vadd.f32 %v11206_v53, %v15018_v20  ;;  %v6138_v53 = vsel %vm1526_vm1, %v14938_v60, 0  ;;  %v5282_v60 = vadd.f32 %v11211_v45, %v15018_v20 }
 0x989   : > { %11763 = vmatprep.subr.msk.bf16.mxu1 %vm1526_vm1, %v14893_v63  ;;  %v5273_v55 = vpop.f32.mrf.mxu0 }
 0x98a   : > { %v5274_v36 = vadd.f32 %v15018_v20, %v5273_v55 }
 0x98b   : > { %v11214_v46 = vpop.f32.mrf.mxu0 }
 0x98c   : > { %v5295_v0 = vadd.f32 %v11214_v46, %v15018_v20  ;;  %v5711_v8 = vpack.c.bf16 %v5274_v36, %v5271_v4 }
 0x98d   : > { %v5286_v19 = vpop.f32.mrf.mxu0 }
 0x98e   : > { %v5287_v30 = vadd.f32 %v15018_v20, %v5286_v19  ;;  %v5955_v19 = vsel %vm1526_vm1, %v14902_v41, 0 }
 0x98f   : > { %v11215_v51 = vpop.f32.mrf.mxu0 }
 0x990   : > { %11315 = vmatpush3.bf16.xpose.msra.mxu1 %v5891_v52  ;;  %v5298_v16 = vadd.f32 %v11215_v51, %v15018_v20  ;;  %v5710_v51 = vpack.c.bf16 %v5266_v56, %v5263_v44 }
 0x991   : > { %11764 = vmatprep.subr.msk.bf16.mxu1 %vm1526_vm1, %v14902_v41  ;;  %v5289_v15 = vpop.f32.mrf.mxu0  ;;  %v11260_v41 = vpop.f32.mrf.mxu1 }
 0x992   : > { %v5290_v17 = vadd.f32 %v15018_v20, %v5289_v15  ;;  %v5714_v49 = vpack.c.bf16 %v5298_v16, %v5295_v0 }
 0x993   : > { %v15058_v63 = vpop.f32.mrf.mxu0 }
 0x994   : > { %v5713_v52 = vpack.c.bf16 %v5290_v17, %v5287_v30 }
 0x995   : > { %v5302_v47 = vpop.f32.mrf.mxu0 }
 0x996   : > { %11332 = vmatprep.mubr.msk.bf16.mxu0 %vm1526_vm1, %v5713_v52  ;;  %v5303_v45 = vadd.f32 %v15018_v20, %v5302_v47 }
 0x997   : > { %11317 = vmatmul.mubr.msk.bf16.vlgmr.msra.gmra.mxu1 %vm1526_vm1, %v5710_v51  ;;  %v11219_v55 = vpop.f32.mrf.mxu0  ;;  %11333 = vmatmul.mubr.msk.bf16.vlgmr.msra.gmra.mxu0 %vm1526_vm1, %v5714_v49  ;;  %v5952_v49 = vsel %vm1526_vm1, %v14905_v50, 0 }
 0x998   : > { %11321 = vmatpush3.bf16.xpose.msra.mxu1 %v5955_v19  ;;  %11324 = vmatprep.mubr.msk.bf16.mxu1 %vm1526_vm1, %v5711_v8  ;;  %v6135_v8 = vsel %vm1526_vm1, %v14943_v42, 0 }
 0x999   : > { %11345 = vmatpush3.bf16.xpose.msra.mxu0 %v6138_v53  ;;  %11765 = vmatprep.subr.msk.bf16.mxu1 %vm1526_vm1, %v14905_v50  ;;  %v5305_v0 = vpop.f32.mrf.mxu0  ;;  %v5279_v50 = vadd.f32 %v11210_v35, %v15018_v20  ;;  %v6077_v35 = vsel %vm1526_vm1, %v14925_v10, 0 }
 0x99a   : > { %11771 = vmatprep.subr.msk.bf16.mxu0 %vm1526_vm1, %v14943_v42  ;;  %v5306_v15 = vadd.f32 %v15018_v20, %v5305_v0  ;;  %v5512_v42 = vpop.f32.mrf.mxu1 }
 0x99b   : > { %v11222_v23 = vpop.f32.mrf.mxu0  ;;  %v5712_v52 = vpack.c.bf16 %v5282_v60, %v5279_v50  ;;  %v15102_v60 = vld [vmem:[%s16729_s5 + $0xa] ss:$0 sm:$0xff] }
 0x99c   : > { %v5327_v51 = vadd.f32 %v11222_v23, %v15018_v20  ;;  %v5715_v53 = vpack.c.bf16 %v5306_v15, %v5303_v45  ;;  %v5314_v45 = vadd.f32 %v11219_v55, %v15018_v20  ;;  %v5513_v55 = vadd.f32 %v14855_v34, %v5512_v42 }
 0x99d   : > { %v5318_v46 = vpop.f32.mrf.mxu0 }
 0x99e   : > { %v5319_v36 = vadd.f32 %v15018_v20, %v5318_v46 }
 0x99f   : > { %v11223_v56 = vpop.f32.mrf.mxu0 }
 0x9a0   : > { %11323 = vmatpush3.bf16.xpose.msra.mxu1 %v5952_v49  ;;  %v5330_v17 = vadd.f32 %v11223_v56, %v15018_v20  ;;  %v11261_v56 = vpop.f32.mrf.mxu1 }
 0x9a1   : > { %11347 = vmatpush3.bf16.xpose.msra.mxu0 %v6135_v8  ;;  %11768 = vmatprep.subr.msk.bf16.mxu1 %vm1526_vm1, %v14925_v10  ;;  %v5321_v16 = vpop.f32.mrf.mxu0  ;;  %v5524_v23 = vadd.f32 %v11261_v56, %v14855_v34  ;;  %v5521_v8 = vadd.f32 %v11260_v41, %v14855_v34 }
 0x9a2   : > { %v5322_v30 = vadd.f32 %v15018_v20, %v5321_v16  ;;  %v5718_v0 = vpack.c.bf16 %v5330_v17, %v5327_v51 }
 0x9a3   : > { %v15085_v44 = vpop.f32.mrf.mxu0  ;;  %v5736_v16 = vpack.c.bf16 %v5524_v23, %v5521_v8 }
 0x9a4   : > { %v5717_v4 = vpack.c.bf16 %v5322_v30, %v5319_v36  ;;  %v6074_v36 = vsel %vm1526_vm1, %v14928_v12, 0  ;;  %v5515_v30 = vpop.f32.mrf.mxu1 }
 0x9a5   : > { %v5334_v19 = vpop.f32.mrf.mxu0 }
 0x9a6   : > { %11348 = vmatprep.mubr.msk.bf16.mxu0 %vm1526_vm1, %v5717_v4  ;;  %v5335_v56 = vadd.f32 %v15018_v20, %v5334_v19 }
 0x9a7   : > { %11325 = vmatmul.mubr.msk.bf16.vlgmr.msra.gmra.mxu1 %vm1526_vm1, %v5712_v52  ;;  %v11227_v46 = vpop.f32.mrf.mxu0 }
 0x9a8   : > { %11337 = vmatpush3.bf16.xpose.msra.mxu1 %v6077_v35  ;;  %11340 = vmatprep.mubr.msk.bf16.mxu1 %vm1526_vm1, %v5715_v53 }
 0x9a9   : > { %11349 = vmatmul.mubr.msk.bf16.vlgmr.msra.gmra.mxu0 %vm1526_vm1, %v5718_v0  ;;  %11769 = vmatprep.subr.msk.bf16.mxu1 %vm1526_vm1, %v14928_v12  ;;  %v5337_v47 = vpop.f32.mrf.mxu0  ;;  %v5516_v12 = vadd.f32 %v14855_v34, %v5515_v30  ;;  %v5311_v0 = vadd.f32 %v15058_v63, %v15018_v20 }
 0x9aa   : > { %v5338_v4 = vadd.f32 %v15018_v20, %v5337_v47 }
 0x9ab   : > { %v11266_v49 = vpop.f32.mrf.mxu0 }
 0x9ac   : > { %v5587_v50 = vadd.f32 %v11266_v49, %v15102_v60  ;;  %v5716_v49 = vpack.c.bf16 %v5314_v45, %v5311_v0  ;;  %v5719_v47 = vpack.c.bf16 %v5338_v4, %v5335_v56  ;;  %v5343_v0 = vadd.f32 %v15085_v44, %v15018_v20 }
 0x9ad   : > { %v5578_v10 = vpop.f32.mrf.mxu0 }
 0x9ae   : > { %v5579_v52 = vadd.f32 %v15102_v60, %v5578_v10  ;;  %v5735_v10 = vpack.c.bf16 %v5516_v12, %v5513_v55 }
 0x9af   : > { %v11267_v15 = vpop.f32.mrf.mxu0 }
 0x9b0   : > { %v5590_v17 = vadd.f32 %v11267_v15, %v15102_v60  ;;  %11339 = vmatpush3.bf16.xpose.msra.mxu1 %v6074_v36  ;;  %v6199_v36 = vsel %vm1526_vm1, %v5736_v16, 0 }
 0x9b1   : > { %11772 = vmatprep.subr.msk.bf16.mxu1 %vm1526_vm1, %v5736_v16  ;;  %v5581_v41 = vpop.f32.mrf.mxu0 }
 0x9b2   : > { %v5738_v51 = vpack.c.bf16 %v5590_v17, %v5587_v50  ;;  %v5582_v53 = vadd.f32 %v15102_v60, %v5581_v41  ;;  %v6196_v41 = vsel %vm1526_vm1, %v5735_v10, 0 }
 0x9b3   : > { %v11270_v35 = vpop.f32.mrf.mxu0 }
 0x9b4   : > { %v5737_v23 = vpack.c.bf16 %v5582_v53, %v5579_v52  ;;  %11360 = vmatprep.subr.bf16.mxu0 %v5738_v51  ;;  %v5603_v19 = vadd.f32 %v11270_v35, %v15102_v60  ;;  %v5346_v52 = vadd.f32 %v11227_v46, %v15018_v20 }
 0x9b5   : > { %v5594_v8 = vpop.f32.mrf.mxu0  ;;  %11361 = vmatpush3.bf16.msra.mxu0 %v5738_v51 }
 0x9b6   : > { %11362 = vmatprep.subr.bf16.mxu0 %v5737_v23  ;;  %v5720_v55 = vpack.c.bf16 %v5346_v52, %v5343_v0 }
 0x9b7   : > { %11341 = vmatmul.mubr.msk.bf16.vlgmr.msra.gmra.mxu1 %vm1526_vm1, %v5716_v49  ;;  %v11271_v15 = vpop.f32.mrf.mxu0  ;;  %v5595_v49 = vadd.f32 %v15102_v60, %v5594_v8 }
 0x9b8   : > { %11353 = vmatpush3.bf16.xpose.msra.mxu1 %v6199_v36  ;;  %11356 = vmatprep.mubr.msk.bf16.mxu1 %vm1526_vm1, %v5719_v47  ;;  %v5606_v34 = vadd.f32 %v11271_v15, %v15102_v60 }
 0x9b9   : > { %11773 = vmatprep.subr.msk.bf16.mxu1 %vm1526_vm1, %v5735_v10  ;;  %v5597_v63 = vpop.f32.mrf.mxu0  ;;  %11363 = vmatpush3.bf16.msra.mxu0 %v5737_v23 }
 0x9ba   : > { %v5740_v17 = vpack.c.bf16 %v5606_v34, %v5603_v19  ;;  %v5598_v35 = vadd.f32 %v15102_v60, %v5597_v63 }
 0x9bb   : > { %v11274_v42 = vpop.f32.mrf.mxu0 }
 0x9bc   : > { %v5619_v16 = vadd.f32 %v11274_v42, %v15102_v60  ;;  %v5739_v10 = vpack.c.bf16 %v5598_v35, %v5595_v49 }
 0x9bd   : > { %v5610_v30 = vpop.f32.mrf.mxu0 }
 0x9be   : > { %v5611_v50 = vadd.f32 %v15102_v60, %v5610_v30 }
 0x9bf   : > { %v11275_v45 = vpop.f32.mrf.mxu0 }
 0x9c0   : > { %v5622_v4 = vadd.f32 %v11275_v45, %v15102_v60  ;;  %11355 = vmatpush3.bf16.xpose.msra.mxu1 %v6196_v41 }
 0x9c1   : > { %11368 = vmatprep.subr.bf16.mxu1 %v5740_v17  ;;  %v5613_v51 = vpop.f32.mrf.mxu0 }
 0x9c2   : > { %v15129_v53 = vpack.c.bf16 %v5622_v4, %v5619_v16  ;;  %v5614_v12 = vadd.f32 %v15102_v60, %v5613_v51 }
 0x9c3   : > { %v11278_v56 = vpop.f32.mrf.mxu0 }
 0x9c4   : > { %v15135_v23 = vpack.c.bf16 %v5614_v12, %v5611_v50  ;;  %11376 = vmatprep.subr.bf16.mxu0 %v15129_v53  ;;  %v5635_v36 = vadd.f32 %v11278_v56, %v15102_v60 }
 0x9c5   : > { %v5626_v46 = vpop.f32.mrf.mxu0 }
 0x9c6   : > { %v5627_v47 = vadd.f32 %v15102_v60, %v5626_v46 }
 0x9c7   : > { %11357 = vmatmul.mubr.msk.bf16.vlgmr.msra.gmra.mxu1 %vm1526_vm1, %v5720_v55  ;;  %v11279_v15 = vpop.f32.mrf.mxu0 }
 0x9c8   : > { %v5638_v20 = vadd.f32 %v11279_v15, %v15102_v60  ;;  %11369 = vmatpush3.bf16.msra.mxu1 %v5740_v17 }
 0x9c9   : > { %11370 = vmatprep.subr.bf16.mxu1 %v5739_v10  ;;  %v5629_v44 = vpop.f32.mrf.mxu0 }
 0x9ca   : > { %v15143_v63 = vpack.c.bf16 %v5638_v20, %v5635_v36  ;;  %v5630_v34 = vadd.f32 %v15102_v60, %v5629_v44 }
 0x9cb   : > { %v11282_v42 = vpop.f32.mrf.mxu0 }
 0x9cc   : > { %v15146_v8 = vpack.c.bf16 %v5630_v34, %v5627_v47  ;;  %v5651_v19 = vadd.f32 %v11282_v42, %v15102_v60  ;;  %11371 = vmatpush3.bf16.msra.mxu1 %v5739_v10 }
 0x9cd   : > { %11384 = vmatprep.subr.bf16.mxu1 %v15143_v63  ;;  %v5642_v30 = vpop.f32.mrf.mxu0 }
 0x9ce   : > { %v5643_v50 = vadd.f32 %v15102_v60, %v5642_v30 }
 0x9cf   : > { %v11283_v45 = vpop.f32.mrf.mxu0 }
 0x9d0   : > { %v5654_v17 = vadd.f32 %v11283_v45, %v15102_v60 }
 0x9d1   : > { %v5645_v41 = vpop.f32.mrf.mxu0 }
 0x9d2   : > { %v15152_v16 = vpack.c.bf16 %v5654_v17, %v5651_v19  ;;  %v5646_v4 = vadd.f32 %v15102_v60, %v5645_v41 }
 0x9d3   : > { %v11286_v52 = vpop.f32.mrf.mxu0 }
 0x9d4   : > { %v15155_v51 = vpack.c.bf16 %v5646_v4, %v5643_v50  ;;  %v5667_v12 = vadd.f32 %v11286_v52, %v15102_v60 }
 0x9d5   : > { %v5658_v0 = vpop.f32.mrf.mxu0 }
 0x9d6   : > { %v5659_v35 = vadd.f32 %v15102_v60, %v5658_v0 }
 0x9d7   : > { %v11287_v56 = vpop.f32.mrf.mxu0 }
 0x9d8   : > { %v5670_v55 = vadd.f32 %v11287_v56, %v15102_v60 }
 0x9d9   : > { %v5661_v49 = vpop.f32.mrf.mxu0 }
 0x9da   : > { %v15160_v46 = vpack.c.bf16 %v5670_v55, %v5667_v12  ;;  %v5662_v47 = vadd.f32 %v15102_v60, %v5661_v49 }
 0x9db   : > { %v11290_v10 = vpop.f32.mrf.mxu0 }
 0x9dc   : > { %v15163_v15 = vpack.c.bf16 %v5662_v47, %v5659_v35  ;;  %v5683_v36 = vadd.f32 %v11290_v10, %v15102_v60  ;;  %v10134_v47 = vld [vmem:[%s16727_s3 + $0x20] sm:$0xff]   ;;  %v10135_v10 = vld [vmem:[%s16727_s3 + $0x28] sm:$0xff]  }
 0x9dd   : > { %v5674_v20 = vpop.f32.mrf.mxu0 }
 0x9de   : > { %v5675_v44 = vadd.f32 %v15102_v60, %v5674_v20 }
 0x9df   : > { %v11291_v34 = vpop.f32.mrf.mxu0 }
 0x9e0   : > { %v5686_v42 = vadd.f32 %v11291_v34, %v15102_v60 }
 0x9e1   : > { %v5677_v19 = vpop.f32.mrf.mxu0 }
 0x9e2   : > { %v15168_v30 = vpack.c.bf16 %v5686_v42, %v5683_v36  ;;  %v5678_v50 = vadd.f32 %v15102_v60, %v5677_v19  ;;  %v15187_v36 = vunpack.c.l.bf16 %v10134_v47 }
 0x9e3   : > { %v11294_v45 = vpop.f32.mrf.mxu0 }
 0x9e4   : > { %v15171_v17 = vpack.c.bf16 %v5678_v50, %v5675_v44  ;;  %v5699_v41 = vadd.f32 %v11294_v45, %v15102_v60  ;;  %v15189_v44 = vunpack.c.l.bf16 %v10135_v10  ;;  %v15199_v45 = vunpack.c.h.bf16 %v10135_v10 }
 0x9e5   : > { %v5690_v4 = vpop.f32.mrf.mxu0 }
 0x9e6   : > { %v5691_v52 = vadd.f32 %v15102_v60, %v5690_v4 }
 0x9e7   : > { %v11295_v12 = vpop.f32.mrf.mxu0 }
 0x9e8   : > { %v5702_v0 = vadd.f32 %v11295_v12, %v15102_v60 }
 0x9e9   : > { %v5693_v35 = vpop.f32.mrf.mxu0 }
 0x9ea   : > { %v15176_v56 = vpack.c.bf16 %v5702_v0, %v5699_v41  ;;  %v5694_v55 = vadd.f32 %v15102_v60, %v5693_v35  ;;  %v15194_v60 = vunpack.c.h.bf16 %v10134_v47 }
 0x9ec   : > { %v15179_v49 = vpack.c.bf16 %v5694_v55, %v5691_v52 }
 0xa37   : > { %v11302_v20 = vpop.f32.mrf.mxu1 }
 0xa38   : > { %v15197_v50 = vadd.f32 %v11302_v20, %v15189_v44 }
 0xa39   : > { %v5808_v34 = vpop.f32.mrf.mxu1 }
 0xa3a   : > { %v15192_v42 = vadd.f32 %v15187_v36, %v5808_v34  ;;  %v6256_v35 = vsel %vm2015_vm2, %v15197_v50, -inf }
 0xa3b   : > { %v11303_v19 = vpop.f32.mrf.mxu1 }
 0xa3c   : > { %v6250_v41 = vsel %vm2015_vm2, %v15192_v42, -inf  ;;  %v15207_v12 = vadd.f32 %v11303_v19, %v15199_v45 }
 0xa3d   : > { %v5811_v4 = vpop.f32.mrf.mxu1  ;;  %6251 = vmax.xlane.f32.xlu0 %v6250_v41 }
 0xa3e   : > { %v15204_v52 = vadd.f32 %v15194_v60, %v5811_v4  ;;  %v6259_v55 = vsel %vm2015_vm2, %v15207_v12, -inf }
 0xa40   : > { %v6253_v0 = vsel %vm2015_vm2, %v15204_v52, -inf }
 0xa41   : > { %6254 = vmax.xlane.f32.xlu1 %v6253_v0  ;;  %6257 = vmax.xlane.f32.xlu0 %v6256_v35 }
 0xa45   : > { %6260 = vmax.xlane.f32.xlu1 %v6259_v55 }
 0xa47   : > { %v11310_v47 = vpop.f32.mrf.mxu1 }
 0xa48   : > { %v15219_v19 = vadd.f32 %v11310_v47, %v15189_v44 }
 0xa49   : > { %v5869_v10 = vpop.f32.mrf.mxu1 }
 0xa4a   : > { %v15216_v20 = vadd.f32 %v15187_v36, %v5869_v10  ;;  %v6268_v10 = vsel %vm2015_vm2, %v15219_v19, -inf }
 0xa4b   : > { %v11311_v34 = vpop.f32.mrf.mxu1 }
 0xa4c   : > { %v6262_v41 = vsel %vm2015_vm2, %v15216_v20, -inf  ;;  %v15227_v35 = vadd.f32 %v11311_v34, %v15199_v45 }
 0xa4d   : > { %v5872_v4 = vpop.f32.mrf.mxu1  ;;  %6263 = vmax.xlane.f32.xlu0 %v6262_v41 }
 0xa4e   : > { %v15224_v0 = vadd.f32 %v15194_v60, %v5872_v4  ;;  %v6271_v47 = vsel %vm2015_vm2, %v15227_v35, -inf }
 0xa50   : > { %v6265_v55 = vsel %vm2015_vm2, %v15224_v0, -inf }
 0xa51   : > { %6266 = vmax.xlane.f32.xlu1 %v6265_v55  ;;  %6269 = vmax.xlane.f32.xlu0 %v6268_v10 }
 0xa55   : > { %6272 = vmax.xlane.f32.xlu1 %v6271_v47 }
 0xa57   : > { %v11318_v18 = vpop.f32.mrf.mxu1  ;;  %v11334_v48 = vpop.f32.mrf.mxu0 }
 0xa58   : > { %v15239_v34 = vadd.f32 %v11318_v18, %v15189_v44 }
 0xa59   : > { %v5930_v41 = vpop.f32.mrf.mxu1  ;;  %v6052_v14 = vpop.f32.mrf.mxu0 }
 0xa5a   : > { %v15236_v4 = vadd.f32 %v15187_v36, %v5930_v41  ;;  %v6280_v41 = vsel %vm2015_vm2, %v15239_v34, -inf }
 0xa5b   : > { %v11319_v37 = vpop.f32.mrf.mxu1 }
 0xa5c   : > { %v6274_v2 = vsel %vm2015_vm2, %v15236_v4, -inf  ;;  %v15247_v10 = vadd.f32 %v11319_v37, %v15199_v45 }
 0xa5d   : > { %v5933_v13 = vpop.f32.mrf.mxu1  ;;  %6275 = vmax.xlane.f32.xlu0 %v6274_v2 }
 0xa5e   : > { %v15244_v55 = vadd.f32 %v15194_v60, %v5933_v13  ;;  %v6283_v18 = vsel %vm2015_vm2, %v15247_v10, -inf }
 0xa60   : > { %v6277_v47 = vsel %vm2015_vm2, %v15244_v55, -inf }
 0xa61   : > { %6278 = vmax.xlane.f32.xlu1 %v6277_v47  ;;  %6281 = vmax.xlane.f32.xlu0 %v6280_v41  ;;  %v11335_v47 = vpop.f32.mrf.mxu0 }
 0xa62   : > { %v15287_v9 = vadd.f32 %v11335_v47, %v15199_v45 }
 0xa63   : > { %v6055_v58 = vpop.f32.mrf.mxu0 }
 0xa64   : > { %v6307_v47 = vsel %vm2015_vm2, %v15287_v9, -inf }
 0xa65   : > { %6284 = vmax.xlane.f32.xlu1 %v6283_v18  ;;  %v15267_v18 = vadd.f32 %v15187_v36, %v6052_v14 }
 0xa67   : > { %v11326_v2 = vpop.f32.mrf.mxu1 }
 0xa68   : > { %v15259_v33 = vadd.f32 %v11326_v2, %v15189_v44 }
 0xa69   : > { %v5991_v13 = vpop.f32.mrf.mxu1  ;;  %v11350_v6 = vpop.f32.mrf.mxu0 }
 0xa6a   : > { %v15256_v29 = vadd.f32 %v15187_v36, %v5991_v13  ;;  %v6292_v2 = vsel %vm2015_vm2, %v15259_v33, -inf }
 0xa6b   : > { %v11327_v37 = vpop.f32.mrf.mxu1 }
 0xa6c   : > { %v6286_v27 = vsel %vm2015_vm2, %v15256_v29, -inf  ;;  %v15270_v62 = vadd.f32 %v11327_v37, %v15199_v45  ;;  %v6298_v37 = vsel %vm2015_vm2, %v15267_v18, -inf }
 0xa6d   : > { %v5994_v41 = vpop.f32.mrf.mxu1  ;;  %6287 = vmax.xlane.f32.xlu0 %v6286_v27  ;;  %v15277_v27 = vadd.f32 %v11334_v48, %v15189_v44 }
 0xa6e   : > { %v15264_v21 = vadd.f32 %v15194_v60, %v5994_v41  ;;  %v15280_v41 = vadd.f32 %v15194_v60, %v6055_v58  ;;  %v6295_v14 = vsel %vm2015_vm2, %v15270_v62, -inf }
 0xa6f   : > { %v6304_v58 = vsel %vm2015_vm2, %v15277_v27, -inf }
 0xa70   : > { %v6289_v13 = vsel %vm2015_vm2, %v15264_v21, -inf  ;;  %v6301_v48 = vsel %vm2015_vm2, %v15280_v41, -inf }
 0xa71   : > { %6290 = vmax.xlane.f32.xlu1 %v6289_v13  ;;  %6293 = vmax.xlane.f32.xlu0 %v6292_v2  ;;  %v6174_v13 = vpop.f32.mrf.mxu0 }
 0xa73   : > { %v11351_v61 = vpop.f32.mrf.mxu0 }
 0xa74   : > { %v15327_v59 = vadd.f32 %v11351_v61, %v15199_v45 }
 0xa75   : > { %6296 = vmax.xlane.f32.xlu1 %v6295_v14  ;;  %6299 = vmax.xlane.f32.xlu0 %v6298_v37  ;;  %v6177_v43 = vpop.f32.mrf.mxu0 }
 0xa76   : > { %v6331_v61 = vsel %vm2015_vm2, %v15327_v59, -inf }
 0xa77   : > { %v11342_v24 = vpop.f32.mrf.mxu1 }
 0xa78   : > { %v15297_v14 = vadd.f32 %v11342_v24, %v15189_v44 }
 0xa79   : > { %v6113_v2 = vpop.f32.mrf.mxu1  ;;  %6302 = vmax.xlane.f32.xlu1 %v6301_v48  ;;  %6305 = vmax.xlane.f32.xlu0 %v6304_v58  ;;  %v15307_v58 = vadd.f32 %v15187_v36, %v6174_v13 }
 0xa7a   : > { %v15294_v28 = vadd.f32 %v15187_v36, %v6113_v2  ;;  %v6316_v57 = vsel %vm2015_vm2, %v15297_v14, -inf }
 0xa7b   : > { %v11343_v11 = vpop.f32.mrf.mxu1 }
 0xa7c   : > { %v6310_v37 = vsel %vm2015_vm2, %v15294_v28, -inf  ;;  %v15310_v2 = vadd.f32 %v11343_v11, %v15199_v45  ;;  %v6322_v11 = vsel %vm2015_vm2, %v15307_v58, -inf }
 0xa7d   : > { %v6116_v25 = vpop.f32.mrf.mxu1  ;;  %6308 = vmax.xlane.f32.xlu1 %v6307_v47  ;;  %6311 = vmax.xlane.f32.xlu0 %v6310_v37  ;;  %v15317_v47 = vadd.f32 %v11350_v6, %v15189_v44 }
 0xa7e   : > { %v15304_v48 = vadd.f32 %v15194_v60, %v6116_v25  ;;  %v15320_v25 = vadd.f32 %v15194_v60, %v6177_v43  ;;  %v6319_v13 = vsel %vm2015_vm2, %v15310_v2, -inf }
 0xa7f   : > { %v6328_v6 = vsel %vm2015_vm2, %v15317_v47, -inf }
 0xa80   : > { %v6313_v24 = vsel %vm2015_vm2, %v15304_v48, -inf }
 0xa81   : > { %6314 = vmax.xlane.f32.xlu1 %v6313_v24  ;;  %6317 = vmax.xlane.f32.xlu0 %v6316_v57  ;;  %v6325_v57 = vsel %vm2015_vm2, %v15320_v25, -inf }
 0xa85   : > { %6320 = vmax.xlane.f32.xlu1 %v6319_v13  ;;  %6323 = vmax.xlane.f32.xlu0 %v6322_v11 }
 0xa87   : > { %v11358_v37 = vpop.f32.mrf.mxu1 }
 0xa88   : > { %v15337_v13 = vadd.f32 %v11358_v37, %v15189_v44 }
 0xa89   : > { %v6235_v43 = vpop.f32.mrf.mxu1  ;;  %6326 = vmax.xlane.f32.xlu1 %v6325_v57  ;;  %6329 = vmax.xlane.f32.xlu0 %v6328_v6 }
 0xa8a   : > { %v15334_v24 = vadd.f32 %v15187_v36, %v6235_v43  ;;  %v6340_v44 = vsel %vm2015_vm2, %v15337_v13, -inf }
 0xa8b   : > { %v11359_v5 = vpop.f32.mrf.mxu1 }
 0xa8c   : > { %v6334_v11 = vsel %vm2015_vm2, %v15334_v24, -inf  ;;  %v15347_v57 = vadd.f32 %v11359_v5, %v15199_v45 }
 0xa8d   : > { %v6238_v38 = vpop.f32.mrf.mxu1  ;;  %6332 = vmax.xlane.f32.xlu1 %v6331_v61  ;;  %6335 = vmax.xlane.f32.xlu0 %v6334_v11 }
 0xa8e   : > { %v15344_v39 = vadd.f32 %v15194_v60, %v6238_v38  ;;  %v6343_v37 = vsel %vm2015_vm2, %v15347_v57, -inf }
 0xa90   : > { %v6337_v36 = vsel %vm2015_vm2, %v15344_v39, -inf }
 0xa91   : > { %6338 = vmax.xlane.f32.xlu1 %v6337_v36  ;;  %6341 = vmax.xlane.f32.xlu0 %v6340_v44 }
 0xa95   : > { %6344 = vmax.xlane.f32.xlu1 %v6343_v37 }
 0xac6   : > { %v6252_v6 = vpop.xlane.xlu0 %6251 }
 0xac7   : > { %v6346_v43 = vsub.f32 %v15192_v42, %v6252_v6 }
 0xac9   : > { %v6378_v38 = vmul.f32 1.442695, %v6346_v43 }
 0xaca   : > { %v6255_v60 = vpop.xlane.xlu1 %6254  ;;  %v6258_v61 = vpop.xlane.xlu0 %6257 }
 0xacb   : > { %12148 = vpow2.f32 %v6378_v38  ;;  %v6347_v5 = vsub.f32 %v15204_v52, %v6255_v60  ;;  %v6348_v45 = vsub.f32 %v15197_v50, %v6258_v61 }
 0xacd   : > { %v6380_v11 = vmul.f32 1.442695, %v6347_v5  ;;  %v6382_v1 = vmul.f32 1.442695, %v6348_v45 }
 0xace   : > { %v6261_v7 = vpop.xlane.xlu1 %6260 }
 0xacf   : > { %12150 = vpow2.f32 %v6380_v11  ;;  %v6349_v36 = vsub.f32 %v15207_v12, %v6261_v7 }
 0xad0   : > { %12152 = vpow2.f32 %v6382_v1 }
 0xad1   : > { %v6384_v44 = vmul.f32 1.442695, %v6349_v36 }
 0xad3   : > { %12154 = vpow2.f32 %v6384_v44 }
 0xad6   : > { %v6264_v37 = vpop.xlane.xlu0 %6263 }
 0xad7   : > { %v6350_v42 = vsub.f32 %v15216_v20, %v6264_v37 }
 0xad8   : > { %v15360_v6 = vpop.eup %12148 }
 0xad9   : > { %v6386_v43 = vmul.f32 1.442695, %v6350_v42  ;;  %v6442_v52 = vsel %vm2015_vm2, %v15360_v6, 0.0 }
 0xada   : > { %v6267_v38 = vpop.xlane.xlu1 %6266  ;;  %v6270_v50 = vpop.xlane.xlu0 %6269  ;;  %6443 = vadd.xlane.f32.xlu0 %v6442_v52 }
 0xadb   : > { %12156 = vpow2.f32 %v6386_v43  ;;  %v6351_v60 = vsub.f32 %v15224_v0, %v6267_v38  ;;  %v6352_v7 = vsub.f32 %v15219_v19, %v6270_v50 }
 0xadc   : > { %v15366_v1 = vpop.eup %12150 }
 0xadd   : > { %v15368_v12 = vpop.eup %12152  ;;  %v6388_v61 = vmul.f32 1.442695, %v6351_v60  ;;  %v6390_v20 = vmul.f32 1.442695, %v6352_v7  ;;  %v6445_v5 = vsel %vm2015_vm2, %v15366_v1, 0.0 }
 0xade   : > { %v6273_v45 = vpop.xlane.xlu1 %6272  ;;  %6446 = vadd.xlane.f32.xlu1 %v6445_v5  ;;  %v6448_v11 = vsel %vm2015_vm2, %v15368_v12, 0.0 }
 0xadf   : > { %12158 = vpow2.f32 %v6388_v61  ;;  %v6353_v36 = vsub.f32 %v15227_v35, %v6273_v45  ;;  %6449 = vadd.xlane.f32.xlu0 %v6448_v11 }
 0xae0   : > { %v15375_v0 = vpop.eup %12154  ;;  %12160 = vpow2.f32 %v6390_v20 }
 0xae1   : > { %v6392_v19 = vmul.f32 1.442695, %v6353_v36  ;;  %v6451_v44 = vsel %vm2015_vm2, %v15375_v0, 0.0 }
 0xae2   : > { %6452 = vadd.xlane.f32.xlu1 %v6451_v44 }
 0xae3   : > { %12162 = vpow2.f32 %v6392_v19 }
 0xae6   : > { %v6276_v37 = vpop.xlane.xlu0 %6275 }
 0xae7   : > { %v6354_v42 = vsub.f32 %v15236_v4, %v6276_v37 }
 0xae8   : > { %v15380_v43 = vpop.eup %12156 }
 0xae9   : > { %v6394_v52 = vmul.f32 1.442695, %v6354_v42  ;;  %v6454_v38 = vsel %vm2015_vm2, %v15380_v43, 0.0 }
 0xaea   : > { %v6279_v35 = vpop.xlane.xlu1 %6278  ;;  %6455 = vadd.xlane.f32.xlu0 %v6454_v38  ;;  %v6282_v50 = vpop.xlane.xlu0 %6281 }
 0xaeb   : > { %12164 = vpow2.f32 %v6394_v52  ;;  %v6355_v60 = vsub.f32 %v15244_v55, %v6279_v35  ;;  %v6356_v7 = vsub.f32 %v15239_v34, %v6282_v50 }
 0xaec   : > { %v15386_v61 = vpop.eup %12158 }
 0xaed   : > { %v15388_v20 = vpop.eup %12160  ;;  %v6396_v5 = vmul.f32 1.442695, %v6355_v60  ;;  %v6398_v4 = vmul.f32 1.442695, %v6356_v7  ;;  %v6457_v45 = vsel %vm2015_vm2, %v15386_v61, 0.0 }
 0xaee   : > { %6458 = vadd.xlane.f32.xlu1 %v6457_v45  ;;  %v6285_v11 = vpop.xlane.xlu1 %6284  ;;  %v6460_v36 = vsel %vm2015_vm2, %v15388_v20, 0.0 }
 0xaef   : > { %12166 = vpow2.f32 %v6396_v5  ;;  %v6357_v19 = vsub.f32 %v15247_v10, %v6285_v11  ;;  %6461 = vadd.xlane.f32.xlu0 %v6460_v36 }
 0xaf0   : > { %v15395_v55 = vpop.eup %12162  ;;  %12168 = vpow2.f32 %v6398_v4 }
 0xaf1   : > { %v6400_v34 = vmul.f32 1.442695, %v6357_v19  ;;  %v6463_v44 = vsel %vm2015_vm2, %v15395_v55, 0.0 }
 0xaf2   : > { %6464 = vadd.xlane.f32.xlu1 %v6463_v44 }
 0xaf3   : > { %12170 = vpow2.f32 %v6400_v34 }
 0xaf6   : > { %v6288_v37 = vpop.xlane.xlu0 %6287 }
 0xaf7   : > { %v6358_v42 = vsub.f32 %v15256_v29, %v6288_v37 }
 0xaf8   : > { %v15400_v52 = vpop.eup %12164 }
 0xaf9   : > { %v6402_v38 = vmul.f32 1.442695, %v6358_v42  ;;  %v6466_v35 = vsel %vm2015_vm2, %v15400_v52, 0.0 }
 0xafa   : > { %v6291_v10 = vpop.xlane.xlu1 %6290  ;;  %6467 = vadd.xlane.f32.xlu0 %v6466_v35  ;;  %v6294_v50 = vpop.xlane.xlu0 %6293 }
 0xafb   : > { %12172 = vpow2.f32 %v6402_v38  ;;  %v6359_v60 = vsub.f32 %v15264_v21, %v6291_v10  ;;  %v6360_v7 = vsub.f32 %v15259_v33, %v6294_v50 }
 0xafc   : > { %v15406_v5 = vpop.eup %12166 }
 0xafd   : > { %v15408_v4 = vpop.eup %12168  ;;  %v6404_v45 = vmul.f32 1.442695, %v6359_v60  ;;  %v6406_v29 = vmul.f32 1.442695, %v6360_v7  ;;  %v6469_v11 = vsel %vm2015_vm2, %v15406_v5, 0.0 }
 0xafe   : > { %6470 = vadd.xlane.f32.xlu1 %v6469_v11  ;;  %v6297_v36 = vpop.xlane.xlu1 %6296  ;;  %v6472_v19 = vsel %vm2015_vm2, %v15408_v4, 0.0  ;;  %v6300_v34 = vpop.xlane.xlu0 %6299 }
 0xaff   : > { %12174 = vpow2.f32 %v6404_v45  ;;  %v6361_v21 = vsub.f32 %v15270_v62, %v6297_v36  ;;  %6473 = vadd.xlane.f32.xlu0 %v6472_v19  ;;  %v6362_v33 = vsub.f32 %v15267_v18, %v6300_v34 }
 0xb00   : > { %v15416_v44 = vpop.eup %12170  ;;  %12176 = vpow2.f32 %v6406_v29 }
 0xb01   : > { %v6408_v37 = vmul.f32 1.442695, %v6361_v21  ;;  %v6410_v42 = vmul.f32 1.442695, %v6362_v33  ;;  %v6475_v38 = vsel %vm2015_vm2, %v15416_v44, 0.0 }
 0xb02   : > { %6476 = vadd.xlane.f32.xlu1 %v6475_v38  ;;  %v6303_v35 = vpop.xlane.xlu1 %6302  ;;  %v6306_v10 = vpop.xlane.xlu0 %6305 }
 0xb03   : > { %12178 = vpow2.f32 %v6408_v37  ;;  %v6363_v50 = vsub.f32 %v15280_v41, %v6303_v35  ;;  %v6364_v60 = vsub.f32 %v15277_v27, %v6306_v10 }
 0xb04   : > { %12180 = vpow2.f32 %v6410_v42 }
 0xb05   : > { %v6412_v62 = vmul.f32 1.442695, %v6363_v50  ;;  %v6414_v7 = vmul.f32 1.442695, %v6364_v60 }
 0xb06   : > { %v6309_v18 = vpop.xlane.xlu1 %6308  ;;  %v6312_v45 = vpop.xlane.xlu0 %6311 }
 0xb07   : > { %12182 = vpow2.f32 %v6412_v62  ;;  %v6365_v29 = vsub.f32 %v15287_v9, %v6309_v18  ;;  %v6366_v11 = vsub.f32 %v15294_v28, %v6312_v45 }
 0xb08   : > { %v15424_v36 = vpop.eup %12172  ;;  %12184 = vpow2.f32 %v6414_v7 }
 0xb09   : > { %v6416_v19 = vmul.f32 1.442695, %v6365_v29  ;;  %v6418_v34 = vmul.f32 1.442695, %v6366_v11  ;;  %v6478_v41 = vsel %vm2015_vm2, %v15424_v36, 0.0 }
 0xb0a   : > { %v6315_v21 = vpop.xlane.xlu1 %6314  ;;  %6479 = vadd.xlane.f32.xlu0 %v6478_v41  ;;  %v6318_v27 = vpop.xlane.xlu0 %6317 }
 0xb0b   : > { %12186 = vpow2.f32 %v6416_v19  ;;  %v6367_v33 = vsub.f32 %v15304_v48, %v6315_v21  ;;  %v6368_v37 = vsub.f32 %v15297_v14, %v6318_v27 }
 0xb0c   : > { %v15430_v42 = vpop.eup %12174  ;;  %12188 = vpow2.f32 %v6418_v34 }
 0xb0d   : > { %v15432_v9 = vpop.eup %12176  ;;  %v6420_v28 = vmul.f32 1.442695, %v6367_v33  ;;  %v6422_v38 = vmul.f32 1.442695, %v6368_v37  ;;  %v6481_v35 = vsel %vm2015_vm2, %v15430_v42, 0.0 }
 0xb0e   : > { %6482 = vadd.xlane.f32.xlu1 %v6481_v35  ;;  %v6321_v10 = vpop.xlane.xlu1 %6320  ;;  %v6484_v50 = vsel %vm2015_vm2, %v15432_v9, 0.0  ;;  %v6324_v60 = vpop.xlane.xlu0 %6323 }
 0xb0f   : > { %12190 = vpow2.f32 %v6420_v28  ;;  %v6369_v48 = vsub.f32 %v15310_v2, %v6321_v10  ;;  %6485 = vadd.xlane.f32.xlu0 %v6484_v50  ;;  %v6370_v14 = vsub.f32 %v15307_v58, %v6324_v60 }
 0xb10   : > { %v15440_v62 = vpop.eup %12178  ;;  %12192 = vpow2.f32 %v6422_v38 }
 0xb11   : > { %v15442_v7 = vpop.eup %12180  ;;  %v6424_v18 = vmul.f32 1.442695, %v6369_v48  ;;  %v6426_v45 = vmul.f32 1.442695, %v6370_v14  ;;  %v6487_v29 = vsel %vm2015_vm2, %v15440_v62, 0.0 }
 0xb12   : > { %6488 = vadd.xlane.f32.xlu1 %v6487_v29  ;;  %v6327_v11 = vpop.xlane.xlu1 %6326  ;;  %v6490_v19 = vsel %vm2015_vm2, %v15442_v7, 0.0  ;;  %v6330_v34 = vpop.xlane.xlu0 %6329 }
 0xb13   : > { %12194 = vpow2.f32 %v6424_v18  ;;  %v6371_v2 = vsub.f32 %v15320_v25, %v6327_v11  ;;  %6491 = vadd.xlane.f32.xlu0 %v6490_v19  ;;  %v6372_v58 = vsub.f32 %v15317_v47, %v6330_v34 }
 0xb14   : > { %v15450_v41 = vpop.eup %12182  ;;  %12196 = vpow2.f32 %v6426_v45 }
 0xb15   : > { %v15452_v21 = vpop.eup %12184  ;;  %v6428_v27 = vmul.f32 1.442695, %v6371_v2  ;;  %v6430_v33 = vmul.f32 1.442695, %v6372_v58  ;;  %v6493_v37 = vsel %vm2015_vm2, %v15450_v41, 0.0 }
 0xb16   : > { %6494 = vadd.xlane.f32.xlu1 %v6493_v37  ;;  %v6333_v28 = vpop.xlane.xlu1 %6332  ;;  %v6496_v38 = vsel %vm2015_vm2, %v15452_v21, 0.0  ;;  %v6336_v35 = vpop.xlane.xlu0 %6335 }
 0xb17   : > { %12198 = vpow2.f32 %v6428_v27  ;;  %v6373_v25 = vsub.f32 %v15327_v59, %v6333_v28  ;;  %6497 = vadd.xlane.f32.xlu0 %v6496_v38  ;;  %v6374_v47 = vsub.f32 %v15334_v24, %v6336_v35 }
 0xb18   : > { %v15460_v10 = vpop.eup %12186  ;;  %12200 = vpow2.f32 %v6430_v33 }
 0xb19   : > { %v15462_v50 = vpop.eup %12188  ;;  %v6432_v60 = vmul.f32 1.442695, %v6373_v25  ;;  %v6434_v48 = vmul.f32 1.442695, %v6374_v47  ;;  %v6499_v14 = vsel %vm2015_vm2, %v15460_v10, 0.0 }
 0xb1a   : > { %6500 = vadd.xlane.f32.xlu1 %v6499_v14  ;;  %v6339_v18 = vpop.xlane.xlu1 %6338  ;;  %v6502_v45 = vsel %vm2015_vm2, %v15462_v50, 0.0  ;;  %v6342_v29 = vpop.xlane.xlu0 %6341 }
 0xb1b   : > { %12202 = vpow2.f32 %v6432_v60  ;;  %v6375_v59 = vsub.f32 %v15344_v39, %v6339_v18  ;;  %6503 = vadd.xlane.f32.xlu0 %v6502_v45  ;;  %v6376_v24 = vsub.f32 %v15337_v13, %v6342_v29 }
 0xb1c   : > { %v15470_v11 = vpop.eup %12190  ;;  %12204 = vpow2.f32 %v6434_v48 }
 0xb1d   : > { %v15472_v19 = vpop.eup %12192  ;;  %v6436_v34 = vmul.f32 1.442695, %v6375_v59  ;;  %v6438_v2 = vmul.f32 1.442695, %v6376_v24  ;;  %v6505_v58 = vsel %vm2015_vm2, %v15470_v11, 0.0 }
 0xb1e   : > { %6506 = vadd.xlane.f32.xlu1 %v6505_v58  ;;  %v6345_v27 = vpop.xlane.xlu1 %6344  ;;  %v6508_v33 = vsel %vm2015_vm2, %v15472_v19, 0.0 }
 0xb1f   : > { %12206 = vpow2.f32 %v6436_v34  ;;  %v6377_v39 = vsub.f32 %v15347_v57, %v6345_v27  ;;  %6509 = vadd.xlane.f32.xlu0 %v6508_v33 }
 0xb20   : > { %v15479_v13 = vpop.eup %12194  ;;  %12208 = vpow2.f32 %v6438_v2 }
 0xb21   : > { %v15481_v37 = vpop.eup %12196  ;;  %v6440_v28 = vmul.f32 1.442695, %v6377_v39  ;;  %v6511_v38 = vsel %vm2015_vm2, %v15479_v13, 0.0 }
 0xb22   : > { %6512 = vadd.xlane.f32.xlu1 %v6511_v38  ;;  %v6514_v35 = vsel %vm2015_vm2, %v15481_v37, 0.0 }
 0xb23   : > { %12210 = vpow2.f32 %v6440_v28  ;;  %6515 = vadd.xlane.f32.xlu0 %v6514_v35 }
 0xb24   : > { %v15487_v25 = vpop.eup %12198 }
 0xb25   : > { %v15489_v47 = vpop.eup %12200  ;;  %v6517_v57 = vsel %vm2015_vm2, %v15487_v25, 0.0 }
 0xb26   : > { %6518 = vadd.xlane.f32.xlu1 %v6517_v57  ;;  %v6520_v60 = vsel %vm2015_vm2, %v15489_v47, 0.0 }
 0xb27   : > { %6521 = vadd.xlane.f32.xlu0 %v6520_v60 }
 0xb28   : > { %v15495_v48 = vpop.eup %12202 }
 0xb29   : > { %v15497_v14 = vpop.eup %12204  ;;  %v6523_v18 = vsel %vm2015_vm2, %v15495_v48, 0.0 }
 0xb2a   : > { %6524 = vadd.xlane.f32.xlu1 %v6523_v18  ;;  %v6526_v45 = vsel %vm2015_vm2, %v15497_v14, 0.0 }
 0xb2b   : > { %6527 = vadd.xlane.f32.xlu0 %v6526_v45 }
 0xb2c   : > { %v15503_v29 = vpop.eup %12206 }
 0xb2d   : > { %v15505_v59 = vpop.eup %12208  ;;  %v6529_v24 = vsel %vm2015_vm2, %v15503_v29, 0.0 }
 0xb2e   : > { %6530 = vadd.xlane.f32.xlu1 %v6529_v24  ;;  %v6532_v34 = vsel %vm2015_vm2, %v15505_v59, 0.0 }
 0xb2f   : > { %6533 = vadd.xlane.f32.xlu0 %v6532_v34 }
 0xb30   : > { %v15511_v2 = vpop.eup %12210 }
 0xb31   : > { %v6535_v58 = vsel %vm2015_vm2, %v15511_v2, 0.0 }
 0xb32   : > { %6536 = vadd.xlane.f32.xlu1 %v6535_v58 }
 0xb63   : > { %v6444_v27 = vpop.xlane.xlu0 %6443 }
 0xb64   : > { %12212 = vrcp.f32 %v6444_v27 }
 0xb67   : > { %v6447_v33 = vpop.xlane.xlu1 %6446 }
 0xb68   : > { %12214 = vrcp.f32 %v6447_v33  ;;  %v6450_v39 = vpop.xlane.xlu0 %6449 }
 0xb69   : > { %12216 = vrcp.f32 %v6450_v39 }
 0xb6b   : > { %v6453_v28 = vpop.xlane.xlu1 %6452 }
 0xb6c   : > { %12218 = vrcp.f32 %v6453_v28 }
 0xb71   : > { %v12213_v38 = vpop.eup %12212 }
 0xb72   : > { %v6570_v60 = vmul.f32 %v12213_v38, %v15360_v6 }
 0xb73   : > { %v6456_v35 = vpop.xlane.xlu0 %6455 }
 0xb74   : > { %12220 = vrcp.f32 %v6456_v35 }
 0xb75   : > { %v12215_v57 = vpop.eup %12214 }
 0xb76   : > { %v6571_v18 = vmul.f32 %v12215_v57, %v15366_v1  ;;  %v12217_v45 = vpop.eup %12216 }
 0xb77   : > { %v6459_v24 = vpop.xlane.xlu1 %6458  ;;  %v6572_v33 = vmul.f32 %v12217_v45, %v15368_v12 }
 0xb78   : > { %12222 = vrcp.f32 %v6459_v24  ;;  %v6462_v34 = vpop.xlane.xlu0 %6461  ;;  %v6602_v58 = vpack.c.bf16 %v6571_v18, %v6570_v60 }
 0xb79   : > { %v12219_v27 = vpop.eup %12218  ;;  %12224 = vrcp.f32 %v6462_v34 }
 0xb7a   : > { %v6573_v39 = vmul.f32 %v12219_v27, %v15375_v0  ;;  %11364 = vmatprep.mubr.msk.bf16.mxu0 %vm2015_vm2, %v6602_v58 }
 0xb7b   : > { %v6465_v28 = vpop.xlane.xlu1 %6464 }
 0xb7c   : > { %v6603_v3 = vpack.c.bf16 %v6573_v39, %v6572_v33  ;;  %12226 = vrcp.f32 %v6465_v28 }
 0xb7e   : > { %11365 = vmatmul.mubr.msk.bf16.vlgmr.msra.gmra.mxu0 %vm2015_vm2, %v6603_v3 }
 0xb7f   : > { %11377 = vmatpush3.bf16.msra.mxu0 %v15129_v53 }
 0xb80   : > { %11378 = vmatprep.subr.bf16.mxu0 %v15135_v23 }
 0xb81   : > { %v12221_v6 = vpop.eup %12220 }
 0xb82   : > { %v6574_v0 = vmul.f32 %v12221_v6, %v15380_v43 }
 0xb83   : > { %11379 = vmatpush3.bf16.msra.mxu0 %v15135_v23  ;;  %v6468_v1 = vpop.xlane.xlu0 %6467 }
 0xb84   : > { %11392 = vmatprep.subr.bf16.mxu0 %v15152_v16  ;;  %12228 = vrcp.f32 %v6468_v1 }
 0xb85   : > { %v12223_v12 = vpop.eup %12222 }
 0xb86   : > { %v6575_v38 = vmul.f32 %v12223_v12, %v15386_v61  ;;  %v12225_v35 = vpop.eup %12224 }
 0xb87   : > { %v6471_v57 = vpop.xlane.xlu1 %6470  ;;  %v6576_v18 = vmul.f32 %v12225_v35, %v15388_v20 }
 0xb88   : > { %12230 = vrcp.f32 %v6471_v57  ;;  %v6474_v3 = vpop.xlane.xlu0 %6473  ;;  %v6604_v60 = vpack.c.bf16 %v6575_v38, %v6574_v0 }
 0xb89   : > { %v12227_v53 = vpop.eup %12226  ;;  %12232 = vrcp.f32 %v6474_v3 }
 0xb8a   : > { %v6577_v45 = vmul.f32 %v12227_v53, %v15395_v55  ;;  %11372 = vmatprep.mubr.msk.bf16.mxu1 %vm2015_vm2, %v6604_v60 }
 0xb8b   : > { %v6477_v23 = vpop.xlane.xlu1 %6476 }
 0xb8c   : > { %v6605_v24 = vpack.c.bf16 %v6577_v45, %v6576_v18  ;;  %12234 = vrcp.f32 %v6477_v23 }
 0xb8e   : > { %11373 = vmatmul.mubr.msk.bf16.vlgmr.msra.gmra.mxu1 %vm2015_vm2, %v6605_v24 }
 0xb8f   : > { %11385 = vmatpush3.bf16.msra.mxu1 %v15143_v63 }
 0xb90   : > { %11386 = vmatprep.subr.bf16.mxu1 %v15146_v8 }
 0xb91   : > { %v12229_v43 = vpop.eup %12228 }
 0xb92   : > { %v6578_v55 = vmul.f32 %v12229_v43, %v15400_v52 }
 0xb93   : > { %11387 = vmatpush3.bf16.msra.mxu1 %v15146_v8  ;;  %v6480_v61 = vpop.xlane.xlu0 %6479 }
 0xb94   : > { %11400 = vmatprep.subr.bf16.mxu1 %v15160_v46  ;;  %12236 = vrcp.f32 %v6480_v61 }
 0xb95   : > { %v12231_v20 = vpop.eup %12230 }
 0xb96   : > { %v6579_v34 = vmul.f32 %v12231_v20, %v15406_v5  ;;  %v12233_v58 = vpop.eup %12232 }
 0xb97   : > { %v6483_v27 = vpop.xlane.xlu1 %6482  ;;  %v6580_v28 = vmul.f32 %v12233_v58, %v15408_v4 }
 0xb98   : > { %12238 = vrcp.f32 %v6483_v27  ;;  %v6486_v33 = vpop.xlane.xlu0 %6485  ;;  %v6606_v39 = vpack.c.bf16 %v6579_v34, %v6578_v55 }
 0xb99   : > { %v12235_v63 = vpop.eup %12234  ;;  %12240 = vrcp.f32 %v6486_v33 }
 0xb9a   : > { %v6581_v6 = vmul.f32 %v12235_v63, %v15416_v44  ;;  %11380 = vmatprep.mubr.msk.bf16.mxu0 %vm2015_vm2, %v6606_v39 }
 0xb9b   : > { %v6489_v8 = vpop.xlane.xlu1 %6488 }
 0xb9c   : > { %v6607_v1 = vpack.c.bf16 %v6581_v6, %v6580_v28  ;;  %12242 = vrcp.f32 %v6489_v8  ;;  %v6492_v12 = vpop.xlane.xlu0 %6491 }
 0xb9d   : > { %12244 = vrcp.f32 %v6492_v12 }
 0xb9e   : > { %11381 = vmatmul.mubr.msk.bf16.vlgmr.msra.gmra.mxu0 %vm2015_vm2, %v6607_v1 }
 0xb9f   : > { %11393 = vmatpush3.bf16.msra.mxu0 %v15152_v16  ;;  %v6495_v52 = vpop.xlane.xlu1 %6494 }
 0xba0   : > { %12246 = vrcp.f32 %v6495_v52  ;;  %11394 = vmatprep.subr.bf16.mxu0 %v15155_v51  ;;  %v6498_v5 = vpop.xlane.xlu0 %6497 }
 0xba1   : > { %12248 = vrcp.f32 %v6498_v5  ;;  %v12237_v4 = vpop.eup %12236 }
 0xba2   : > { %v6582_v35 = vmul.f32 %v12237_v4, %v15424_v36 }
 0xba3   : > { %11395 = vmatpush3.bf16.msra.mxu0 %v15155_v51  ;;  %v6501_v44 = vpop.xlane.xlu1 %6500 }
 0xba4   : > { %12250 = vrcp.f32 %v6501_v44  ;;  %11408 = vmatprep.subr.bf16.mxu0 %v15168_v30  ;;  %v6504_v0 = vpop.xlane.xlu0 %6503 }
 0xba5   : > { %v12239_v38 = vpop.eup %12238  ;;  %12252 = vrcp.f32 %v6504_v0 }
 0xba6   : > { %v6583_v16 = vmul.f32 %v12239_v38, %v15430_v42  ;;  %v12241_v57 = vpop.eup %12240 }
 0xba7   : > { %v6507_v3 = vpop.xlane.xlu1 %6506  ;;  %v6584_v45 = vmul.f32 %v12241_v57, %v15432_v9 }
 0xba8   : > { %12254 = vrcp.f32 %v6507_v3  ;;  %v6510_v60 = vpop.xlane.xlu0 %6509  ;;  %v6608_v53 = vpack.c.bf16 %v6583_v16, %v6582_v35  ;;  %v9961_v16 = vld [vmem:[%s16730_s6 + $0x4] sm:$0x3] }
 0xba9   : > { %v12243_v18 = vpop.eup %12242  ;;  %12256 = vrcp.f32 %v6510_v60 }
 0xbaa   : > { %v6585_v51 = vmul.f32 %v12243_v18, %v15440_v62  ;;  %11388 = vmatprep.mubr.msk.bf16.mxu1 %vm2015_vm2, %v6608_v53  ;;  %v12245_v23 = vpop.eup %12244 }
 0xbab   : > { %v6513_v24 = vpop.xlane.xlu1 %6512  ;;  %v6586_v42 = vmul.f32 %v12245_v23, %v15442_v7  ;;  %v16982_v23 = vld [vmem:[#allocation4_spill] sm:$0xff] }
 0xbac   : > { %v6609_v43 = vpack.c.bf16 %v6585_v51, %v6584_v45  ;;  %12258 = vrcp.f32 %v6513_v24  ;;  %v6516_v36 = vpop.xlane.xlu0 %6515  ;;  %v16981_v51 = vld [vmem:[#allocation3_spill] sm:$0xff]  ;;  %v16983_v24 = vld [vmem:[#allocation5_spill] sm:$0xff] }
 0xbad   : > { %v12247_v61 = vpop.eup %12246  ;;  %12260 = vrcp.f32 %v6516_v36  ;;  %v16985_v36 = vld [vmem:[#allocation7_spill] sm:$0xff] }
 0xbae   : > { %11389 = vmatmul.mubr.msk.bf16.vlgmr.msra.gmra.mxu1 %vm2015_vm2, %v6609_v43  ;;  %v6587_v20 = vmul.f32 %v12247_v61, %v15450_v41  ;;  %v12249_v55 = vpop.eup %12248  ;;  %v16984_v43 = vld [vmem:[#allocation6_spill] sm:$0xff]  ;;  %v16986_v61 = vld [vmem:[#allocation8_spill] sm:$0xff] }
 0xbaf   : > { %11401 = vmatpush3.bf16.msra.mxu1 %v15160_v46  ;;  %v6519_v9 = vpop.xlane.xlu1 %6518  ;;  %v6588_v27 = vmul.f32 %v12249_v55, %v15452_v21 }
 0xbb0   : > { %12262 = vrcp.f32 %v6519_v9  ;;  %11402 = vmatprep.subr.bf16.mxu1 %v15163_v15  ;;  %v6522_v62 = vpop.xlane.xlu0 %6521  ;;  %v6610_v34 = vpack.c.bf16 %v6587_v20, %v6586_v42  ;;  %v16987_v42 = vld [vmem:[#allocation9_spill] sm:$0xff] }
 0xbb1   : > { %v12251_v58 = vpop.eup %12250  ;;  %12264 = vrcp.f32 %v6522_v62  ;;  %v11827_v20 = vld [vmem:[%s16728_s4 + $0x38] sm:$0xff]  }
 0xbb2   : > { %v6589_v33 = vmul.f32 %v12251_v58, %v15460_v10  ;;  %11396 = vmatprep.mubr.msk.bf16.mxu0 %vm2015_vm2, %v6610_v34  ;;  %v12253_v7 = vpop.eup %12252 }
 0xbb3   : > { %11403 = vmatpush3.bf16.msra.mxu1 %v15163_v15  ;;  %v6525_v41 = vpop.xlane.xlu1 %6524  ;;  %v6590_v21 = vmul.f32 %v12253_v7, %v15462_v50 }
 0xbb4   : > { %v6611_v39 = vpack.c.bf16 %v6589_v33, %v6588_v27  ;;  %12266 = vrcp.f32 %v6525_v41  ;;  %11416 = vmatprep.subr.bf16.mxu1 %v15176_v56  ;;  %v6528_v46 = vpop.xlane.xlu0 %6527 }
 0xbb5   : > { %v12255_v63 = vpop.eup %12254  ;;  %12268 = vrcp.f32 %v6528_v46 }
 0xbb6   : > { %11397 = vmatmul.mubr.msk.bf16.vlgmr.msra.gmra.mxu0 %vm2015_vm2, %v6611_v39  ;;  %v6591_v10 = vmul.f32 %v12255_v63, %v15470_v11  ;;  %v12257_v28 = vpop.eup %12256 }
 0xbb7   : > { %11409 = vmatpush3.bf16.msra.mxu0 %v15168_v30  ;;  %v6531_v6 = vpop.xlane.xlu1 %6530  ;;  %v6592_v12 = vmul.f32 %v12257_v28, %v15472_v19 }
 0xbb8   : > { %12270 = vrcp.f32 %v6531_v6  ;;  %11410 = vmatprep.subr.bf16.mxu0 %v15171_v17  ;;  %v6534_v15 = vpop.xlane.xlu0 %6533  ;;  %v6612_v8 = vpack.c.bf16 %v6591_v10, %v6590_v21 }
 0xbb9   : > { %v12259_v1 = vpop.eup %12258  ;;  %12272 = vrcp.f32 %v6534_v15 }
 0xbba   : > { %v6593_v52 = vmul.f32 %v12259_v1, %v15479_v13  ;;  %11404 = vmatprep.mubr.msk.bf16.mxu1 %vm2015_vm2, %v6612_v8  ;;  %v12261_v50 = vpop.eup %12260 }
 0xbbb   : > { %11411 = vmatpush3.bf16.msra.mxu0 %v15171_v17  ;;  %v6537_v11 = vpop.xlane.xlu1 %6536  ;;  %v6594_v4 = vmul.f32 %v12261_v50, %v15481_v37  ;;  %v11825_v17 = vld [vmem:[%s16728_s4 + $0x18] sm:$0xff]  }
 0xbbc   : > { %v6613_v5 = vpack.c.bf16 %v6593_v52, %v6592_v12  ;;  %12274 = vrcp.f32 %v6537_v11  ;;  %11774 = vmatprep.subr.msk.bf16.mxu0 %vm4794_vm3, %v9961_v16 }
 0xbbd   : > { %v12263_v30 = vpop.eup %12262 }
 0xbbe   : > { %11405 = vmatmul.mubr.msk.bf16.vlgmr.msra.gmra.mxu1 %vm2015_vm2, %v6613_v5  ;;  %v6595_v44 = vmul.f32 %v12263_v30, %v15487_v25  ;;  %v12265_v0 = vpop.eup %12264 }
 0xbbf   : > { %11417 = vmatpush3.bf16.msra.mxu1 %v15176_v56  ;;  %v6596_v38 = vmul.f32 %v12265_v0, %v15489_v47 }
 0xbc0   : > { %11418 = vmatprep.subr.bf16.mxu1 %v15179_v49  ;;  %v6614_v19 = vpack.c.bf16 %v6595_v44, %v6594_v4 }
 0xbc1   : > { %v12267_v13 = vpop.eup %12266 }
 0xbc2   : > { %v6597_v35 = vmul.f32 %v12267_v13, %v15495_v48  ;;  %11412 = vmatprep.mubr.msk.bf16.mxu0 %vm2015_vm2, %v6614_v19  ;;  %v12269_v37 = vpop.eup %12268  ;;  %v7125_v48 = vsel %vm4794_vm3, %v9961_v16, 0 }
 0xbc3   : > { %11419 = vmatpush3.bf16.msra.mxu1 %v15179_v49  ;;  %v6598_v57 = vmul.f32 %v12269_v37, %v15497_v14  ;;  %v11826_v14 = vld [vmem:[%s16728_s4 + $0x58] sm:$0xff]  }
 0xbc4   : > { %v6615_v25 = vpack.c.bf16 %v6597_v35, %v6596_v38  ;;  %11458 = vmatprep.subr.bf16.mxu1 %v11825_v17 }
 0xbc5   : > { %v12271_v56 = vpop.eup %12270 }
 0xbc6   : > { %11413 = vmatmul.mubr.msk.bf16.vlgmr.msra.gmra.mxu0 %vm2015_vm2, %v6615_v25  ;;  %v6599_v47 = vmul.f32 %v12271_v56, %v15503_v29  ;;  %v12273_v3 = vpop.eup %12272  ;;  %v16978_v29 = vld [vmem:[#allocation16_spill] sm:$0xff] }
 0xbc7   : > { %11425 = vmatpush3.bf16.msra.mxu0 %v7125_v48  ;;  %v6600_v53 = vmul.f32 %v12273_v3, %v15505_v59  ;;  %v16979_v59 = vld [vmem:[#allocation17_spill] sm:$0xff] }
 0xbc8   : > { %v6616_v49 = vpack.c.bf16 %v6599_v47, %v6598_v57  ;;  %11492 = vmatprep.subr.bf16.mxu0 %v11827_v20 }
 0xbc9   : > { %v12275_v60 = vpop.eup %12274 }
 0xbca   : > { %v6601_v18 = vmul.f32 %v12275_v60, %v15511_v2  ;;  %11420 = vmatprep.mubr.msk.bf16.mxu1 %vm2015_vm2, %v6616_v49  ;;  %v16980_v2 = vld [vmem:[#allocation2_spill] sm:$0xff] }
 0xbcc   : > { %v6617_v45 = vpack.c.bf16 %v6601_v18, %v6600_v53 }
 0xbce   : > { %11421 = vmatmul.mubr.msk.bf16.vlgmr.msra.gmra.mxu1 %vm2015_vm2, %v6617_v45 }
 0xbcf   : > { %11460 = vmatprep.mubr.msk.bf16.mxu1 %vm378_vm0, %v16898_v31  ;;  %11459 = vmatpush3.bf16.msra.mxu1 %v11825_v17 }
 0xbd0   : > { %11526 = vmatprep.subr.bf16.mxu1 %v11826_v14 }
 0xbd6   : > { %11461 = vmatmul.mubr.msk.bf16.vlgmr.msra.gmra.mxu1 %vm378_vm0, %v16899_v32 }
 0xbd7   : > { %11464 = vmatprep.mubr.msk.bf16.mxu1 %vm378_vm0, %v16900_v26  ;;  %11527 = vmatpush3.bf16.msra.mxu1 %v11826_v14  ;;  %v15680_v14 = vld [vmem:[%s16729_s5 + $0x3] ss:$0 sm:$0xff] }
 0xbde   : > { %11465 = vmatmul.mubr.msk.bf16.gmra.mxu1 %vm378_vm0, %v16901_v54 }
 0xbdf   : > { %11468 = vmatprep.mubr.msk.bf16.mxu1 %vm378_vm0, %v16902_v22 }
 0xbe6   : > { %11469 = vmatmul.mubr.msk.bf16.gmra.mxu1 %vm378_vm0, %v16903_v40 }
 0xbe7   : > { %11472 = vmatprep.mubr.msk.bf16.mxu1 %vm378_vm0, %v16978_v29 }
 0xbee   : > { %11473 = vmatmul.mubr.msk.bf16.gmra.mxu1 %vm378_vm0, %v16979_v59 }
 0xbef   : > { %11476 = vmatprep.mubr.msk.bf16.mxu1 %vm378_vm0, %v16980_v2 }
 0xbf6   : > { %11477 = vmatmul.mubr.msk.bf16.gmra.mxu1 %vm378_vm0, %v16981_v51 }
 0xbf7   : > { %11480 = vmatprep.mubr.msk.bf16.mxu1 %vm378_vm0, %v16982_v23 }
 0xbfe   : > { %11481 = vmatmul.mubr.msk.bf16.gmra.mxu1 %vm378_vm0, %v16983_v24 }
 0xbff   : > { %11484 = vmatprep.mubr.msk.bf16.mxu1 %vm378_vm0, %v16984_v43 }
 0xc06   : > { %11485 = vmatmul.mubr.msk.bf16.gmra.mxu1 %vm378_vm0, %v16985_v36 }
 0xc07   : > { %11488 = vmatprep.mubr.msk.bf16.mxu1 %vm378_vm0, %v16986_v61 }
 0xc0e   : > { %11489 = vmatmul.mubr.msk.bf16.gmra.mxu1 %vm378_vm0, %v16987_v42 }
 0xc0f   : > { %11528 = vmatprep.mubr.msk.bf16.mxu1 %vm378_vm0, %v16898_v31 }
 0xc16   : > { %11529 = vmatmul.mubr.msk.bf16.vlgmr.msra.gmra.mxu1 %vm378_vm0, %v16899_v32 }
 0xc17   : > { %11532 = vmatprep.mubr.msk.bf16.mxu1 %vm378_vm0, %v16900_v26 }
 0xc1e   : > { %11533 = vmatmul.mubr.msk.bf16.gmra.mxu1 %vm378_vm0, %v16901_v54 }
 0xc1f   : > { %11536 = vmatprep.mubr.msk.bf16.mxu1 %vm378_vm0, %v16902_v22 }
 0xc26   : > { %11537 = vmatmul.mubr.msk.bf16.gmra.mxu1 %vm378_vm0, %v16903_v40 }
 0xc27   : > { %11540 = vmatprep.mubr.msk.bf16.mxu1 %vm378_vm0, %v16978_v29 }
 0xc2e   : > { %11541 = vmatmul.mubr.msk.bf16.gmra.mxu1 %vm378_vm0, %v16979_v59 }
 0xc2f   : > { %11544 = vmatprep.mubr.msk.bf16.mxu1 %vm378_vm0, %v16980_v2 }
 0xc36   : > { %11545 = vmatmul.mubr.msk.bf16.gmra.mxu1 %vm378_vm0, %v16981_v51 }
 0xc37   : > { %11548 = vmatprep.mubr.msk.bf16.mxu1 %vm378_vm0, %v16982_v23 }
 0xc3e   : > { %11549 = vmatmul.mubr.msk.bf16.gmra.mxu1 %vm378_vm0, %v16983_v24  ;;  %v11366_v55 = vpop.f32.mrf.mxu0 }
 0xc3f   : > { %11552 = vmatprep.mubr.msk.bf16.mxu1 %vm378_vm0, %v16984_v43 }
 0xc40   : > { %v6658_v9 = vpop.f32.mrf.mxu0 }
 0xc42   : > { %v11367_v62 = vpop.f32.mrf.mxu0 }
 0xc43   : > { %v7059_v27 = vpack.c.bf16 %v11367_v62, %v11366_v55 }
 0xc44   : > { %v6661_v34 = vpop.f32.mrf.mxu0 }
 0xc45   : > { %v7058_v58 = vpack.c.bf16 %v6661_v34, %v6658_v9 }
 0xc46   : > { %11553 = vmatmul.mubr.msk.bf16.gmra.mxu1 %vm378_vm0, %v16985_v36 }
 0xc47   : > { %11556 = vmatprep.mubr.msk.bf16.mxu1 %vm378_vm0, %v16986_v61  ;;  %11426 = vmatprep.mubr.msk.bf16.mxu0 %vm1526_vm1, %v7058_v58 }
 0xc48   : > { %11427 = vmatmul.mubr.msk.bf16.vlgmr.msra.gmra.mxu0 %vm1526_vm1, %v7059_v27 }
 0xc49   : > { %11493 = vmatpush3.bf16.msra.mxu0 %v11827_v20 }
 0xc4e   : > { %v11374_v33 = vpop.f32.mrf.mxu1  ;;  %11557 = vmatmul.mubr.msk.bf16.gmra.mxu1 %vm378_vm0, %v16987_v42 }
 0xc50   : > { %v6713_v7 = vpop.f32.mrf.mxu1 }
 0xc52   : > { %v11375_v41 = vpop.f32.mrf.mxu1 }
 0xc53   : > { %v7061_v63 = vpack.c.bf16 %v11375_v41, %v11374_v33 }
 0xc54   : > { %v6716_v39 = vpop.f32.mrf.mxu1 }
 0xc55   : > { %v7060_v46 = vpack.c.bf16 %v6716_v39, %v6713_v7 }
 0xc57   : > { %11430 = vmatprep.mubr.msk.bf16.mxu0 %vm1526_vm1, %v7060_v46 }
 0xc58   : > { %11431 = vmatmul.mubr.msk.bf16.gmra.mxu0 %vm1526_vm1, %v7061_v63 }
 0xc5e   : > { %v11382_v21 = vpop.f32.mrf.mxu0 }
 0xc60   : > { %v6768_v10 = vpop.f32.mrf.mxu0 }
 0xc62   : > { %v11383_v28 = vpop.f32.mrf.mxu0 }
 0xc63   : > { %v7063_v8 = vpack.c.bf16 %v11383_v28, %v11382_v21  ;;  %v16994_v28 = vld [vmem:[#allocation45_spill] sm:$0xff] }
 0xc64   : > { %v6771_v6 = vpop.f32.mrf.mxu0 }
 0xc65   : > { %v7062_v15 = vpack.c.bf16 %v6771_v6, %v6768_v10 }
 0xc67   : > { %11434 = vmatprep.mubr.msk.bf16.mxu0 %vm1526_vm1, %v7062_v15 }
 0xc68   : > { %11435 = vmatmul.mubr.msk.bf16.gmra.mxu0 %vm1526_vm1, %v7063_v8 }
 0xc6e   : > { %v11390_v1 = vpop.f32.mrf.mxu1 }
 0xc70   : > { %v6823_v12 = vpop.f32.mrf.mxu1 }
 0xc72   : > { %v11391_v52 = vpop.f32.mrf.mxu1 }
 0xc73   : > { %v7065_v5 = vpack.c.bf16 %v11391_v52, %v11390_v1 }
 0xc74   : > { %v6826_v50 = vpop.f32.mrf.mxu1 }
 0xc75   : > { %v7064_v11 = vpack.c.bf16 %v6826_v50, %v6823_v12 }
 0xc76   : > { %v11398_v30 = vpop.f32.mrf.mxu0 }
 0xc77   : > { %11438 = vmatprep.mubr.msk.bf16.mxu0 %vm1526_vm1, %v7064_v11 }
 0xc78   : > { %v6878_v4 = vpop.f32.mrf.mxu0  ;;  %11439 = vmatmul.mubr.msk.bf16.gmra.mxu0 %vm1526_vm1, %v7065_v5 }
 0xc7a   : > { %v11399_v44 = vpop.f32.mrf.mxu0 }
 0xc7b   : > { %v7067_v17 = vpack.c.bf16 %v11399_v44, %v11398_v30 }
 0xc7c   : > { %v6881_v0 = vpop.f32.mrf.mxu0 }
 0xc7d   : > { %v7066_v19 = vpack.c.bf16 %v6881_v0, %v6878_v4 }
 0xc7e   : > { %v11406_v13 = vpop.f32.mrf.mxu1 }
 0xc7f   : > { %11442 = vmatprep.mubr.msk.bf16.mxu0 %vm1526_vm1, %v7066_v19 }
 0xc80   : > { %v6933_v38 = vpop.f32.mrf.mxu1  ;;  %11443 = vmatmul.mubr.msk.bf16.gmra.mxu0 %vm1526_vm1, %v7067_v17 }
 0xc82   : > { %v11407_v35 = vpop.f32.mrf.mxu1 }
 0xc83   : > { %v7069_v56 = vpack.c.bf16 %v11407_v35, %v11406_v13 }
 0xc84   : > { %v6936_v37 = vpop.f32.mrf.mxu1 }
 0xc85   : > { %v7068_v25 = vpack.c.bf16 %v6936_v37, %v6933_v38 }
 0xc86   : > { %v11414_v16 = vpop.f32.mrf.mxu0 }
 0xc87   : > { %11446 = vmatprep.mubr.msk.bf16.mxu0 %vm1526_vm1, %v7068_v25 }
 0xc88   : > { %v6988_v57 = vpop.f32.mrf.mxu0  ;;  %11447 = vmatmul.mubr.msk.bf16.gmra.mxu0 %vm1526_vm1, %v7069_v56 }
 0xc8a   : > { %v11415_v47 = vpop.f32.mrf.mxu0 }
 0xc8b   : > { %v7071_v49 = vpack.c.bf16 %v11415_v47, %v11414_v16 }
 0xc8c   : > { %v6991_v48 = vpop.f32.mrf.mxu0 }
 0xc8d   : > { %v7070_v3 = vpack.c.bf16 %v6991_v48, %v6988_v57 }
 0xc8e   : > { %v11422_v60 = vpop.f32.mrf.mxu1 }
 0xc8f   : > { %11450 = vmatprep.mubr.msk.bf16.mxu0 %vm1526_vm1, %v7070_v3 }
 0xc90   : > { %v7043_v53 = vpop.f32.mrf.mxu1  ;;  %11451 = vmatmul.mubr.msk.bf16.gmra.mxu0 %vm1526_vm1, %v7071_v49 }
 0xc92   : > { %v11423_v18 = vpop.f32.mrf.mxu1 }
 0xc93   : > { %v7073_v55 = vpack.c.bf16 %v11423_v18, %v11422_v60 }
 0xc94   : > { %v7046_v45 = vpop.f32.mrf.mxu1 }
 0xc95   : > { %v7072_v20 = vpack.c.bf16 %v7046_v45, %v7043_v53 }
 0xc96   : > { %v11462_v9 = vpop.f32.mrf.mxu1 }
 0xc97   : > { %v15683_v62 = vadd.f32 %v11462_v9, %v15680_v14  ;;  %11454 = vmatprep.mubr.msk.bf16.mxu0 %vm1526_vm1, %v7072_v20 }
 0xc98   : > { %11455 = vmatmul.mubr.msk.bf16.gmra.mxu0 %vm1526_vm1, %v7073_v55  ;;  %v7371_v34 = vpop.f32.mrf.mxu1 }
 0xc99   : > { %11494 = vmatprep.mubr.msk.bf16.mxu0 %vm378_vm0, %v16898_v31 }
 0xc9a   : > { %v11463_v58 = vpop.f32.mrf.mxu1 }
 0xc9b   : > { %v15690_v27 = vadd.f32 %v11463_v58, %v15680_v14 }
 0xc9c   : > { %v7374_v33 = vpop.f32.mrf.mxu1 }
 0xc9e   : > { %v11466_v41 = vpop.f32.mrf.mxu1 }
 0xc9f   : > { %v15695_v39 = vadd.f32 %v11466_v41, %v15680_v14 }
 0xca0   : > { %v7387_v46 = vpop.f32.mrf.mxu1  ;;  %11495 = vmatmul.mubr.msk.bf16.vlgmr.msra.gmra.mxu0 %vm378_vm0, %v16899_v32 }
 0xca1   : > { %11498 = vmatprep.mubr.msk.bf16.mxu0 %vm378_vm0, %v16900_v26  ;;  %v7388_v10 = vadd.f32 %v15680_v14, %v7387_v46 }
 0xca2   : > { %v11467_v31 = vpop.f32.mrf.mxu1 }
 0xca3   : > { %v15702_v63 = vadd.f32 %v11467_v31, %v15680_v14 }
 0xca4   : > { %v7390_v21 = vpop.f32.mrf.mxu1 }
 0xca5   : > { %v7391_v6 = vadd.f32 %v15680_v14, %v7390_v21 }
 0xca6   : > { %v15708_v15 = vpop.f32.mrf.mxu1 }
 0xca7   : > { %v7856_v8 = vpack.c.bf16 %v7391_v6, %v7388_v10 }
 0xca8   : > { %v15710_v1 = vpop.f32.mrf.mxu1  ;;  %11499 = vmatmul.mubr.msk.bf16.gmra.mxu0 %vm378_vm0, %v16901_v54 }
 0xca9   : > { %11502 = vmatprep.mubr.msk.bf16.mxu0 %vm378_vm0, %v16902_v22  ;;  %11572 = vmatprep.mubr.msk.bf16.mxu1 %vm1526_vm1, %v7856_v8 }
 0xcaa   : > { %v15717_v32 = vpop.f32.mrf.mxu1 }
 0xcac   : > { %v15719_v26 = vpop.f32.mrf.mxu1 }
 0xcae   : > { %v15721_v12 = vpop.f32.mrf.mxu1 }
 0xcb0   : > { %v15723_v52 = vpop.f32.mrf.mxu1  ;;  %11503 = vmatmul.mubr.msk.bf16.gmra.mxu0 %vm378_vm0, %v16903_v40 }
 0xcb1   : > { %11506 = vmatprep.mubr.msk.bf16.mxu0 %vm378_vm0, %v16978_v29 }
 0xcb2   : > { %v15729_v54 = vpop.f32.mrf.mxu1 }
 0xcb4   : > { %v15731_v50 = vpop.f32.mrf.mxu1 }
 0xcb6   : > { %v15733_v22 = vpop.f32.mrf.mxu1 }
 0xcb8   : > { %v15735_v11 = vpop.f32.mrf.mxu1  ;;  %11507 = vmatmul.mubr.msk.bf16.gmra.mxu0 %vm378_vm0, %v16979_v59 }
 0xcb9   : > { %11510 = vmatprep.mubr.msk.bf16.mxu0 %vm378_vm0, %v16980_v2 }
 0xcba   : > { %v15741_v5 = vpop.f32.mrf.mxu1 }
 0xcbc   : > { %v15743_v40 = vpop.f32.mrf.mxu1 }
 0xcbe   : > { %v15745_v30 = vpop.f32.mrf.mxu1 }
 0xcc0   : > { %v15747_v29 = vpop.f32.mrf.mxu1  ;;  %11511 = vmatmul.mubr.msk.bf16.gmra.mxu0 %vm378_vm0, %v16981_v51 }
 0xcc1   : > { %11514 = vmatprep.mubr.msk.bf16.mxu0 %vm378_vm0, %v16982_v23 }
 0xcc2   : > { %v15753_v4 = vpop.f32.mrf.mxu1 }
 0xcc4   : > { %v15755_v59 = vpop.f32.mrf.mxu1 }
 0xcc6   : > { %v15757_v44 = vpop.f32.mrf.mxu1 }
 0xcc8   : > { %v15759_v2 = vpop.f32.mrf.mxu1  ;;  %11515 = vmatmul.mubr.msk.bf16.gmra.mxu0 %vm378_vm0, %v16983_v24  ;;  %v7375_v24 = vadd.f32 %v15680_v14, %v7374_v33 }
 0xcc9   : > { %11518 = vmatprep.mubr.msk.bf16.mxu0 %vm378_vm0, %v16984_v43  ;;  %v7372_v43 = vadd.f32 %v15680_v14, %v7371_v34 }
 0xcca   : > { %v15765_v0 = vpop.f32.mrf.mxu1 }
 0xccb   : > { %v7854_v35 = vpack.c.bf16 %v7375_v24, %v7372_v43 }
 0xccc   : > { %v15767_v51 = vpop.f32.mrf.mxu1 }
 0xcce   : > { %v15769_v19 = vpop.f32.mrf.mxu1 }
 0xcd0   : > { %v15771_v23 = vpop.f32.mrf.mxu1  ;;  %11519 = vmatmul.mubr.msk.bf16.gmra.mxu0 %vm378_vm0, %v16985_v36 }
 0xcd1   : > { %11522 = vmatprep.mubr.msk.bf16.mxu0 %vm378_vm0, %v16986_v61 }
 0xcd2   : > { %v15777_v17 = vpop.f32.mrf.mxu1 }
 0xcd4   : > { %v15780_v13 = vpop.f32.mrf.mxu1 }
 0xcd6   : > { %v15783_v38 = vpop.f32.mrf.mxu1 }
 0xcd8   : > { %11523 = vmatmul.mubr.msk.bf16.gmra.mxu0 %vm378_vm0, %v16987_v42  ;;  %v15787_v37 = vpop.f32.mrf.mxu1  ;;  %v15807_v42 = vld [vmem:[%s16729_s5 + $0xb] ss:$0 sm:$0xff] }
 0xcd9   : > { %11564 = vmatprep.mubr.msk.bf16.mxu0 %vm1526_vm1, %v7854_v35 }
 0xcda   : > { %v15790_v36 = vpop.f32.mrf.mxu1 }
 0xcdc   : > { %v15792_v61 = vpop.f32.mrf.mxu1 }
 0xcde   : > { %v15794_v25 = vpop.f32.mrf.mxu1 }
 0xce0   : > { %v15796_v56 = vpop.f32.mrf.mxu1 }
 0xce2   : > { %v15798_v16 = vpop.f32.mrf.mxu1 }
 0xce4   : > { %v15800_v57 = vpop.f32.mrf.mxu1 }
 0xce6   : > { %v15802_v47 = vpop.f32.mrf.mxu1 }
 0xce8   : > { %v7759_v48 = vpop.f32.mrf.mxu1 }
 0xce9   : > { %v7760_v3 = vadd.f32 %v15807_v42, %v7759_v48 }
 0xcea   : > { %v15810_v49 = vpop.f32.mrf.mxu1 }
 0xcec   : > { %v7762_v60 = vpop.f32.mrf.mxu1 }
 0xced   : > { %v7763_v53 = vadd.f32 %v15807_v42, %v7762_v60 }
 0xcee   : > { %v15813_v18 = vpop.f32.mrf.mxu1 }
 0xcef   : > { %v15815_v45 = vpack.c.bf16 %v7763_v53, %v7760_v3 }
 0xcf0   : > { %v7775_v20 = vpop.f32.mrf.mxu1 }
 0xcf1   : > { %v7776_v55 = vadd.f32 %v15807_v42, %v7775_v20 }
 0xcf2   : > { %v15818_v9 = vpop.f32.mrf.mxu1 }
 0xcf4   : > { %v7778_v34 = vpop.f32.mrf.mxu1 }
 0xcf5   : > { %v7779_v58 = vadd.f32 %v15807_v42, %v7778_v34 }
 0xcf6   : > { %v11546_v33 = vpop.f32.mrf.mxu1 }
 0xcf7   : > { %v15821_v41 = vpack.c.bf16 %v7779_v58, %v7776_v55  ;;  %v7800_v46 = vadd.f32 %v11546_v33, %v15807_v42 }
 0xcf8   : > { %v7791_v31 = vpop.f32.mrf.mxu1 }
 0xcf9   : > { %16988 = vst [vmem:[#allocation16_spill] sm:$0xff] %v15821_v41  ;;  %v7792_v21 = vadd.f32 %v15807_v42, %v7791_v31  ;;  %v16991_v31 = vld [vmem:[#allocation44_spill] sm:$0xff] }
 0xcfa   : > { %v11547_v10 = vpop.f32.mrf.mxu1 }
 0xcfb   : > { %v7803_v6 = vadd.f32 %v11547_v10, %v15807_v42  ;;  %v16992_v10 = vld [vmem:[#allocation33_spill] sm:$0xff] }
 0xcfc   : > { %v7794_v8 = vpop.f32.mrf.mxu1 }
 0xcfd   : > { %v15826_v24 = vpack.c.bf16 %v7803_v6, %v7800_v46  ;;  %v7795_v43 = vadd.f32 %v15807_v42, %v7794_v8  ;;  %v5053_v6 = vadd.f32 %v16992_v10, %v16991_v31 }
 0xcfe   : > { %v11550_v35 = vpop.f32.mrf.mxu1 }
 0xcff   : > { %v15829_v48 = vpack.c.bf16 %v7795_v43, %v7792_v21  ;;  %v7816_v3 = vadd.f32 %v11550_v35, %v15807_v42 }
 0xd00   : > { %v7807_v60 = vpop.f32.mrf.mxu1 }
 0xd01   : > { %16989 = vst [vmem:[#allocation17_spill] sm:$0xff] %v15829_v48  ;;  %v7808_v53 = vadd.f32 %v15807_v42, %v7807_v60  ;;  %v16995_v60 = vld [vmem:[#allocation19_spill] sm:$0xff] }
 0xd02   : > { %v11551_v20 = vpop.f32.mrf.mxu1  ;;  %v5045_v7 = vadd.f32 %v16995_v60, %v16994_v28 }
 0xd03   : > { %v7819_v55 = vadd.f32 %v11551_v20, %v15807_v42 }
 0xd04   : > { %v7810_v34 = vpop.f32.mrf.mxu1 }
 0xd05   : > { %v15834_v58 = vpack.c.bf16 %v7819_v55, %v7816_v3  ;;  %v7811_v33 = vadd.f32 %v15807_v42, %v7810_v34  ;;  %v16997_v34 = vld [vmem:[#allocation46_spill] sm:$0xff] }
 0xd06   : > { %v11554_v46 = vpop.f32.mrf.mxu1 }
 0xd07   : > { %16990 = vst [vmem:[#allocation2_spill] sm:$0xff] %v15834_v58  ;;  %v15839_v8 = vpack.c.bf16 %v7811_v33, %v7808_v53  ;;  %v7832_v21 = vadd.f32 %v11554_v46, %v15807_v42  ;;  %v16998_v58 = vld [vmem:[#allocation18_spill] sm:$0xff] }
 0xd08   : > { %v7823_v43 = vpop.f32.mrf.mxu1  ;;  %v11428_v35 = vpop.f32.mrf.mxu0  ;;  %v5056_v41 = vadd.f32 %v16998_v58, %v16997_v34 }
 0xd09   : > { %16993 = vst [vmem:[#allocation3_spill] sm:$0xff] %v15839_v8  ;;  %v7824_v20 = vadd.f32 %v15807_v42, %v7823_v43  ;;  %v15845_v48 = vadd.f32 %v11428_v35, %v5053_v6 }
 0xd0a   : > { %v11555_v3 = vpop.f32.mrf.mxu1  ;;  %v7161_v55 = vpop.f32.mrf.mxu0 }
 0xd0b   : > { %16996 = vst [vmem:[#allocation4_spill] sm:$0xff] %v15845_v48  ;;  %v7835_v31 = vadd.f32 %v11555_v3, %v15807_v42  ;;  %v15850_v53 = vadd.f32 %v7161_v55, %v5045_v7 }
 0xd0c   : > { %v7826_v33 = vpop.f32.mrf.mxu1  ;;  %v11429_v46 = vpop.f32.mrf.mxu0 }
 0xd0d   : > { %16999 = vst [vmem:[#allocation5_spill] sm:$0xff] %v15850_v53  ;;  %v15852_v10 = vpack.c.bf16 %v7835_v31, %v7832_v21  ;;  %v7827_v8 = vadd.f32 %v15807_v42, %v7826_v33  ;;  %v15855_v28 = vadd.f32 %v11429_v46, %v5056_v41  ;;  %v17005_v41 = vld [vmem:[#allocation48_spill] sm:$0xff]  ;;  %v17006_v33 = vld [vmem:[#allocation25_spill] sm:$0xff] }
 0xd0e   : > { %v11558_v43 = vpop.f32.mrf.mxu1  ;;  %v15865_v31 = vpop.f32.mrf.mxu0  ;;  %v5069_v46 = vadd.f32 %v17006_v33, %v17005_v41  ;;  %v17016_v41 = vld [vmem:[#allocation52_spill] sm:$0xff] }
 0xd0f   : > { %17000 = vst [vmem:[#allocation6_spill] sm:$0xff] %v15852_v10  ;;  %17001 = vst [vmem:[#allocation7_spill] sm:$0xff] %v15855_v28  ;;  %v15857_v6 = vpack.c.bf16 %v7827_v8, %v7824_v20  ;;  %v7848_v35 = vadd.f32 %v11558_v43, %v15807_v42  ;;  %v17008_v43 = vld [vmem:[#allocation49_spill] sm:$0xff]  ;;  %v17019_v10 = vld [vmem:[#allocation24_spill] sm:$0xff] }
 0xd10   : > { %v7839_v60 = vpop.f32.mrf.mxu1  ;;  %17004 = vst [vmem:[#allocation44_spill] sm:$0xff] %v15865_v31  ;;  %v17009_v28 = vld [vmem:[#allocation21_spill] sm:$0xff] }
 0xd11   : > { %17002 = vst [vmem:[#allocation8_spill] sm:$0xff] %v15857_v6  ;;  %v7840_v58 = vadd.f32 %v15807_v42, %v7839_v60  ;;  %v5061_v53 = vadd.f32 %v17009_v28, %v17008_v43  ;;  %v17012_v6 = vld [vmem:[#allocation20_spill] sm:$0xff]  ;;  %v17021_v43 = vld [vmem:[#allocation54_spill] sm:$0xff] }
 0xd12   : > { %v11559_v34 = vpop.f32.mrf.mxu1 }
 0xd13   : > { %v7851_v7 = vadd.f32 %v11559_v34, %v15807_v42  ;;  %v17011_v34 = vld [vmem:[#allocation50_spill] sm:$0xff] }
 0xd14   : > { %v7842_v3 = vpop.f32.mrf.mxu1 }
 0xd15   : > { %v15862_v55 = vpack.c.bf16 %v7851_v7, %v7848_v35  ;;  %v7843_v21 = vadd.f32 %v15807_v42, %v7842_v3  ;;  %v5072_v35 = vadd.f32 %v17012_v6, %v17011_v34 }
 0xd17   : > { %17003 = vst [vmem:[#allocation9_spill] sm:$0xff] %v15862_v55  ;;  %v15869_v8 = vpack.c.bf16 %v7843_v21, %v7840_v58  ;;  %v17017_v58 = vld [vmem:[#allocation38_spill] sm:$0xff] }
 0xd18   : > { %v11432_v20 = vpop.f32.mrf.mxu0  ;;  %v5085_v21 = vadd.f32 %v17017_v58, %v17016_v41 }
 0xd19   : > { %17007 = vst [vmem:[#allocation33_spill] sm:$0xff] %v15869_v8  ;;  %v15873_v60 = vadd.f32 %v11432_v20, %v5069_v46  ;;  %v17018_v8 = vld [vmem:[#allocation53_spill] sm:$0xff] }
 0xd1a   : > { %v7177_v48 = vpop.f32.mrf.mxu0  ;;  %v5077_v28 = vadd.f32 %v17019_v10, %v17018_v8 }
 0xd1b   : > { %17010 = vst [vmem:[#allocation45_spill] sm:$0xff] %v15873_v60  ;;  %v15877_v7 = vadd.f32 %v7177_v48, %v5061_v53  ;;  %v17022_v60 = vld [vmem:[#allocation22_spill] sm:$0xff] }
 0xd1c   : > { %v11433_v3 = vpop.f32.mrf.mxu0  ;;  %v5088_v6 = vadd.f32 %v17022_v60, %v17021_v43 }
 0xd1d   : > { %17013 = vst [vmem:[#allocation19_spill] sm:$0xff] %v15877_v7  ;;  %v15879_v55 = vadd.f32 %v11433_v3, %v5072_v35  ;;  %v17026_v3 = vld [vmem:[#allocation56_spill] sm:$0xff]  ;;  %v17029_v7 = vld [vmem:[#allocation37_spill] sm:$0xff] }
 0xd1e   : > { %v15881_v31 = vpop.f32.mrf.mxu0 }
 0xd1f   : > { %17014 = vst [vmem:[#allocation46_spill] sm:$0xff] %v15879_v55  ;;  %17015 = vst [vmem:[#allocation18_spill] sm:$0xff] %v15881_v31  ;;  %v17027_v55 = vld [vmem:[#allocation29_spill] sm:$0xff] }
 0xd20   : > { %v5101_v41 = vadd.f32 %v17027_v55, %v17026_v3  ;;  %v17028_v31 = vld [vmem:[#allocation57_spill] sm:$0xff] }
 0xd21   : > { %v5093_v10 = vadd.f32 %v17029_v7, %v17028_v31 }
 0xd28   : > { %v11436_v33 = vpop.f32.mrf.mxu0 }
 0xd29   : > { %v15887_v46 = vadd.f32 %v11436_v33, %v5085_v21  ;;  %v17031_v33 = vld [vmem:[#allocation58_spill] sm:$0xff] }
 0xd2a   : > { %v7193_v20 = vpop.f32.mrf.mxu0 }
 0xd2b   : > { %17020 = vst [vmem:[#allocation48_spill] sm:$0xff] %v15887_v46  ;;  %v15891_v48 = vadd.f32 %v7193_v20, %v5077_v28  ;;  %v17032_v46 = vld [vmem:[#allocation35_spill] sm:$0xff] }
 0xd2c   : > { %v11437_v53 = vpop.f32.mrf.mxu0  ;;  %v5104_v60 = vadd.f32 %v17032_v46, %v17031_v33 }
 0xd2d   : > { %17023 = vst [vmem:[#allocation25_spill] sm:$0xff] %v15891_v48  ;;  %v15893_v34 = vadd.f32 %v11437_v53, %v5088_v6  ;;  %v17036_v53 = vld [vmem:[#allocation60_spill] sm:$0xff] }
 0xd2e   : > { %v15895_v35 = vpop.f32.mrf.mxu0  ;;  %v17039_v48 = vld [vmem:[#allocation28_spill] sm:$0xff] }
 0xd2f   : > { %17024 = vst [vmem:[#allocation49_spill] sm:$0xff] %v15893_v34  ;;  %17025 = vst [vmem:[#allocation21_spill] sm:$0xff] %v15895_v35  ;;  %v17037_v34 = vld [vmem:[#allocation42_spill] sm:$0xff]  ;;  %v17038_v35 = vld [vmem:[#allocation61_spill] sm:$0xff] }
 0xd30   : > { %v5117_v55 = vadd.f32 %v17037_v34, %v17036_v53  ;;  %v5109_v31 = vadd.f32 %v17039_v48, %v17038_v35 }
 0xd38   : > { %v11440_v58 = vpop.f32.mrf.mxu0 }
 0xd39   : > { %v15901_v8 = vadd.f32 %v11440_v58, %v5101_v41  ;;  %v17041_v58 = vld [vmem:[#allocation62_spill] sm:$0xff] }
 0xd3a   : > { %v7209_v21 = vpop.f32.mrf.mxu0 }
 0xd3b   : > { %17030 = vst [vmem:[#allocation50_spill] sm:$0xff] %v15901_v8  ;;  %v15905_v28 = vadd.f32 %v7209_v21, %v5093_v10  ;;  %v17042_v8 = vld [vmem:[#allocation26_spill] sm:$0xff] }
 0xd3c   : > { %v11441_v20 = vpop.f32.mrf.mxu0  ;;  %v5120_v46 = vadd.f32 %v17042_v8, %v17041_v58 }
 0xd3d   : > { %17033 = vst [vmem:[#allocation20_spill] sm:$0xff] %v15905_v28  ;;  %v15907_v43 = vadd.f32 %v11441_v20, %v5104_v60  ;;  %v17046_v20 = vld [vmem:[#allocation64_spill] sm:$0xff]  ;;  %v17049_v28 = vld [vmem:[#allocation41_spill] sm:$0xff] }
 0xd3e   : > { %v15909_v6 = vpop.f32.mrf.mxu0 }
 0xd3f   : > { %17034 = vst [vmem:[#allocation52_spill] sm:$0xff] %v15907_v43  ;;  %17035 = vst [vmem:[#allocation38_spill] sm:$0xff] %v15909_v6  ;;  %v17047_v43 = vld [vmem:[#allocation34_spill] sm:$0xff]  ;;  %v17048_v6 = vld [vmem:[#allocation65_spill] sm:$0xff] }
 0xd40   : > { %v11444_v3 = vpop.f32.mrf.mxu0  ;;  %v5133_v34 = vadd.f32 %v17047_v43, %v17046_v20  ;;  %v5125_v48 = vadd.f32 %v17049_v28, %v17048_v6 }
 0xd41   : > { %v15915_v7 = vadd.f32 %v11444_v3, %v5117_v55  ;;  %v17051_v3 = vld [vmem:[#allocation66_spill] sm:$0xff] }
 0xd42   : > { %v7225_v41 = vpop.f32.mrf.mxu0 }
 0xd43   : > { %17040 = vst [vmem:[#allocation53_spill] sm:$0xff] %v15915_v7  ;;  %v15919_v10 = vadd.f32 %v7225_v41, %v5109_v31  ;;  %v17052_v7 = vld [vmem:[#allocation39_spill] sm:$0xff] }
 0xd44   : > { %v11445_v21 = vpop.f32.mrf.mxu0  ;;  %v5136_v8 = vadd.f32 %v17052_v7, %v17051_v3 }
 0xd45   : > { %17043 = vst [vmem:[#allocation24_spill] sm:$0xff] %v15919_v10  ;;  %v15921_v33 = vadd.f32 %v11445_v21, %v5120_v46  ;;  %v17056_v21 = vld [vmem:[#allocation68_spill] sm:$0xff]  ;;  %v17059_v10 = vld [vmem:[#allocation10_spill] sm:$0xff] }
 0xd46   : > { %v15923_v60 = vpop.f32.mrf.mxu0 }
 0xd47   : > { %17044 = vst [vmem:[#allocation54_spill] sm:$0xff] %v15921_v33  ;;  %17045 = vst [vmem:[#allocation22_spill] sm:$0xff] %v15923_v60  ;;  %v17057_v33 = vld [vmem:[#allocation30_spill] sm:$0xff]  ;;  %v17058_v60 = vld [vmem:[#allocation69_spill] sm:$0xff] }
 0xd48   : > { %v11448_v53 = vpop.f32.mrf.mxu0  ;;  %v5149_v43 = vadd.f32 %v17057_v33, %v17056_v21  ;;  %v5141_v28 = vadd.f32 %v17059_v10, %v17058_v60 }
 0xd49   : > { %v15929_v35 = vadd.f32 %v11448_v53, %v5133_v34  ;;  %v17061_v53 = vld [vmem:[#allocation70_spill] sm:$0xff] }
 0xd4a   : > { %v7241_v55 = vpop.f32.mrf.mxu0 }
 0xd4b   : > { %17050 = vst [vmem:[#allocation56_spill] sm:$0xff] %v15929_v35  ;;  %v15933_v31 = vadd.f32 %v7241_v55, %v5125_v48  ;;  %v17062_v35 = vld [vmem:[#allocation11_spill] sm:$0xff] }
 0xd4c   : > { %v11449_v41 = vpop.f32.mrf.mxu0  ;;  %v5152_v7 = vadd.f32 %v17062_v35, %v17061_v53 }
 0xd4d   : > { %17053 = vst [vmem:[#allocation29_spill] sm:$0xff] %v15933_v31  ;;  %v15935_v58 = vadd.f32 %v11449_v41, %v5136_v8  ;;  %v17063_v41 = vld [vmem:[#allocation72_spill] sm:$0xff]  ;;  %v17066_v31 = vld [vmem:[#allocation14_spill] sm:$0xff] }
 0xd4e   : > { %v15937_v46 = vpop.f32.mrf.mxu0 }
 0xd4f   : > { %17054 = vst [vmem:[#allocation57_spill] sm:$0xff] %v15935_v58  ;;  %17055 = vst [vmem:[#allocation37_spill] sm:$0xff] %v15937_v46  ;;  %v17064_v58 = vld [vmem:[#allocation13_spill] sm:$0xff] }
 0xd50   : > { %v11452_v20 = vpop.f32.mrf.mxu0  ;;  %v5165_v33 = vadd.f32 %v17064_v58, %v17063_v41  ;;  %v17065_v46 = vld [vmem:[#allocation73_spill] sm:$0xff]  ;;  %v15970_v58 = vld [vmem:[%s16729_s5 + $0x7] ss:$0 sm:$0xff] }
 0xd51   : > { %v15943_v6 = vadd.f32 %v11452_v20, %v5149_v43  ;;  %v5157_v10 = vadd.f32 %v17066_v31, %v17065_v46  ;;  %v17068_v20 = vld [vmem:[#allocation74_spill] sm:$0xff] }
 0xd52   : > { %v7257_v34 = vpop.f32.mrf.mxu0 }
 0xd53   : > { %17060 = vst [vmem:[#allocation58_spill] sm:$0xff] %v15943_v6  ;;  %v15947_v48 = vadd.f32 %v7257_v34, %v5141_v28  ;;  %v17069_v6 = vld [vmem:[#allocation15_spill] sm:$0xff] }
 0xd54   : > { %v11453_v55 = vpop.f32.mrf.mxu0  ;;  %v5168_v35 = vadd.f32 %v17069_v6, %v17068_v20 }
 0xd55   : > { %v15949_v3 = vadd.f32 %v11453_v55, %v5152_v7 }
 0xd56   : > { %v15951_v8 = vpop.f32.mrf.mxu0 }
 0xd58   : > { %v11456_v21 = vpop.f32.mrf.mxu0 }
 0xd59   : > { %v15957_v60 = vadd.f32 %v11456_v21, %v5165_v33 }
 0xd5a   : > { %v7273_v43 = vpop.f32.mrf.mxu0 }
 0xd5b   : > { %17067 = vst [vmem:[#allocation35_spill] sm:$0xff] %v15957_v60  ;;  %v15961_v28 = vadd.f32 %v7273_v43, %v5157_v10  ;;  %v17073_v60 = vpack.c.bf16 %v15690_v27, %v15683_v62 }
 0xd5c   : > { %v11457_v34 = vpop.f32.mrf.mxu0 }
 0xd5d   : > { %17070 = vst [vmem:[#allocation60_spill] sm:$0xff] %v15961_v28  ;;  %v15963_v53 = vadd.f32 %v11457_v34, %v5168_v35 }
 0xd5e   : > { %v15965_v7 = vpop.f32.mrf.mxu0 }
 0xd5f   : > { %17071 = vst [vmem:[#allocation42_spill] sm:$0xff] %v15963_v53  ;;  %17072 = vst [vmem:[#allocation61_spill] sm:$0xff] %v15965_v7 }
 0xd60   : > { %v11496_v55 = vpop.f32.mrf.mxu0 }
 0xd61   : > { %v7558_v41 = vadd.f32 %v11496_v55, %v15970_v58 }
 0xd62   : > { %v7549_v31 = vpop.f32.mrf.mxu0 }
 0xd63   : > { %v7550_v21 = vadd.f32 %v15970_v58, %v7549_v31 }
 0xd64   : > { %v11497_v46 = vpop.f32.mrf.mxu0 }
 0xd65   : > { %v7561_v33 = vadd.f32 %v11497_v46, %v15970_v58 }
 0xd66   : > { %v7552_v6 = vpop.f32.mrf.mxu0 }
 0xd67   : > { %v7871_v10 = vpack.c.bf16 %v7561_v33, %v7558_v41  ;;  %v7553_v43 = vadd.f32 %v15970_v58, %v7552_v6 }
 0xd68   : > { %v11500_v20 = vpop.f32.mrf.mxu0 }
 0xd69   : > { %v7870_v35 = vpack.c.bf16 %v7553_v43, %v7550_v21  ;;  %11775 = vmatprep.subr.msk.bf16.mxu0 %vm1526_vm1, %v7871_v10  ;;  %v7921_v34 = vsel %vm1526_vm1, %v7871_v10, 0  ;;  %v7574_v55 = vadd.f32 %v11500_v20, %v15970_v58 }
 0xd6a   : > { %v7565_v53 = vpop.f32.mrf.mxu0  ;;  %11561 = vmatpush3.bf16.xpose.msra.mxu0 %v7921_v34 }
 0xd6b   : > { %11776 = vmatprep.subr.msk.bf16.mxu0 %vm1526_vm1, %v7870_v35  ;;  %v7566_v31 = vadd.f32 %v15970_v58, %v7565_v53  ;;  %v7918_v10 = vsel %vm1526_vm1, %v7870_v35, 0  ;;  %v7407_v53 = vadd.f32 %v15680_v14, %v15719_v26 }
 0xd6c   : > { %v11501_v7 = vpop.f32.mrf.mxu0 }
 0xd6d   : > { %v7577_v46 = vadd.f32 %v11501_v7, %v15970_v58 }
 0xd6e   : > { %v7568_v28 = vpop.f32.mrf.mxu0 }
 0xd6f   : > { %v7873_v41 = vpack.c.bf16 %v7577_v46, %v7574_v55  ;;  %v7569_v33 = vadd.f32 %v15970_v58, %v7568_v28  ;;  %v7404_v46 = vadd.f32 %v15680_v14, %v15710_v1 }
 0xd70   : > { %v11504_v6 = vpop.f32.mrf.mxu0 }
 0xd71   : > { %v7872_v21 = vpack.c.bf16 %v7569_v33, %v7566_v31  ;;  %11777 = vmatprep.subr.msk.bf16.mxu1 %vm1526_vm1, %v7873_v41  ;;  %v7982_v43 = vsel %vm1526_vm1, %v7873_v41, 0  ;;  %v7590_v20 = vadd.f32 %v11504_v6, %v15970_v58 }
 0xd72   : > { %v7581_v34 = vpop.f32.mrf.mxu0  ;;  %11563 = vmatpush3.bf16.xpose.msra.mxu0 %v7918_v10  ;;  %11569 = vmatpush3.bf16.xpose.msra.mxu1 %v7982_v43  ;;  %v7858_v10 = vpack.c.bf16 %v7407_v53, %v7404_v46 }
 0xd73   : > { %11778 = vmatprep.subr.msk.bf16.mxu1 %vm1526_vm1, %v7872_v21  ;;  %v7582_v35 = vadd.f32 %v15970_v58, %v7581_v34  ;;  %v7979_v26 = vsel %vm1526_vm1, %v7872_v21, 0  ;;  %v7420_v21 = vadd.f32 %v15680_v14, %v15723_v52  ;;  %v7415_v52 = vadd.f32 %v15717_v32, %v15680_v14 }
 0xd74   : > { %v11505_v7 = vpop.f32.mrf.mxu0 }
 0xd75   : > { %v7593_v28 = vadd.f32 %v11505_v7, %v15970_v58  ;;  %v7423_v7 = vadd.f32 %v15680_v14, %v15731_v50 }
 0xd76   : > { %v7584_v55 = vpop.f32.mrf.mxu0 }
 0xd77   : > { %v7875_v31 = vpack.c.bf16 %v7593_v28, %v7590_v20  ;;  %v7585_v41 = vadd.f32 %v15970_v58, %v7584_v55  ;;  %v7860_v46 = vpack.c.bf16 %v7423_v7, %v7420_v21 }
 0xd78   : > { %v11508_v33 = vpop.f32.mrf.mxu0 }
 0xd79   : > { %v7874_v43 = vpack.c.bf16 %v7585_v41, %v7582_v35  ;;  %11565 = vmatmul.mubr.msk.bf16.vlgmr.msra.gmra.mxu0 %vm1526_vm1, %v17073_v60  ;;  %11779 = vmatprep.subr.msk.bf16.mxu0 %vm1526_vm1, %v7875_v31  ;;  %v8043_v6 = vsel %vm1526_vm1, %v7875_v31, 0  ;;  %v7606_v62 = vadd.f32 %v11508_v33, %v15970_v58  ;;  %v17074_v31 = vpack.c.bf16 %v15702_v63, %v15695_v39 }
 0xd7a   : > { %v7597_v1 = vpop.f32.mrf.mxu0  ;;  %11571 = vmatpush3.bf16.xpose.msra.mxu1 %v7979_v26  ;;  %11577 = vmatpush3.bf16.xpose.msra.mxu0 %v8043_v6  ;;  %v7412_v39 = vadd.f32 %v15708_v15, %v15680_v14 }
 0xd7b   : > { %11580 = vmatprep.mubr.msk.bf16.mxu0 %vm1526_vm1, %v7858_v10  ;;  %11780 = vmatprep.subr.msk.bf16.mxu0 %vm1526_vm1, %v7874_v43  ;;  %v7598_v53 = vadd.f32 %v15970_v58, %v7597_v1  ;;  %v8040_v50 = vsel %vm1526_vm1, %v7874_v43, 0  ;;  %v7439_v10 = vadd.f32 %v15680_v14, %v15743_v40  ;;  %v7436_v1 = vadd.f32 %v15680_v14, %v15735_v11 }
 0xd7c   : > { %v11509_v34 = vpop.f32.mrf.mxu0  ;;  %v7859_v6 = vpack.c.bf16 %v7415_v52, %v7412_v39 }
 0xd7d   : > { %v7609_v27 = vadd.f32 %v11509_v34, %v15970_v58  ;;  %v7862_v15 = vpack.c.bf16 %v7439_v10, %v7436_v1 }
 0xd7e   : > { %v7600_v60 = vpop.f32.mrf.mxu0 }
 0xd7f   : > { %v7877_v20 = vpack.c.bf16 %v7609_v27, %v7606_v62  ;;  %v7601_v28 = vadd.f32 %v15970_v58, %v7600_v60 }
 0xd80   : > { %v11512_v55 = vpop.f32.mrf.mxu0 }
 0xd81   : > { %v7876_v35 = vpack.c.bf16 %v7601_v28, %v7598_v53  ;;  %11573 = vmatmul.mubr.msk.bf16.vlgmr.msra.gmra.mxu1 %vm1526_vm1, %v17074_v31  ;;  %11781 = vmatprep.subr.msk.bf16.mxu1 %vm1526_vm1, %v7877_v20  ;;  %v8104_v41 = vsel %vm1526_vm1, %v7877_v20, 0  ;;  %v7622_v43 = vadd.f32 %v11512_v55, %v15970_v58  ;;  %v7431_v53 = vadd.f32 %v15729_v54, %v15680_v14 }
 0xd82   : > { %v7613_v33 = vpop.f32.mrf.mxu0  ;;  %11579 = vmatpush3.bf16.xpose.msra.mxu0 %v8040_v50  ;;  %11585 = vmatpush3.bf16.xpose.msra.mxu1 %v8104_v41  ;;  %v7428_v20 = vadd.f32 %v15721_v12, %v15680_v14  ;;  %v7455_v55 = vadd.f32 %v15680_v14, %v15755_v59  ;;  %v7452_v50 = vadd.f32 %v15680_v14, %v15747_v29 }
 0xd83   : > { %11588 = vmatprep.mubr.msk.bf16.mxu1 %vm1526_vm1, %v7860_v46  ;;  %11782 = vmatprep.subr.msk.bf16.mxu1 %vm1526_vm1, %v7876_v35  ;;  %v7614_v34 = vadd.f32 %v15970_v58, %v7613_v33  ;;  %v8101_v40 = vsel %vm1526_vm1, %v7876_v35, 0 }
 0xd84   : > { %v11513_v63 = vpop.f32.mrf.mxu0  ;;  %v7861_v31 = vpack.c.bf16 %v7431_v53, %v7428_v20  ;;  %v7864_v12 = vpack.c.bf16 %v7455_v55, %v7452_v50  ;;  %v7460_v20 = vadd.f32 %v15745_v30, %v15680_v14  ;;  %v7487_v55 = vadd.f32 %v15680_v14, %v15780_v13 }
 0xd85   : > { %v7625_v26 = vadd.f32 %v11513_v63, %v15970_v58  ;;  %v7484_v50 = vadd.f32 %v15680_v14, %v15771_v23  ;;  %v7736_v13 = vadd.f32 %v15783_v38, %v15807_v42  ;;  %v7479_v23 = vadd.f32 %v15765_v0, %v15680_v14 }
 0xd86   : > { %v7616_v32 = vpop.f32.mrf.mxu0  ;;  %v7476_v38 = vadd.f32 %v15757_v44, %v15680_v14  ;;  %v7752_v0 = vadd.f32 %v15794_v25, %v15807_v42  ;;  %v7492_v25 = vadd.f32 %v15769_v19, %v15680_v14 }
 0xd87   : > { %v7879_v7 = vpack.c.bf16 %v7625_v26, %v7622_v43  ;;  %v7617_v62 = vadd.f32 %v15970_v58, %v7616_v32  ;;  %v7447_v43 = vadd.f32 %v15741_v5, %v15680_v14  ;;  %v7444_v26 = vadd.f32 %v15733_v22, %v15680_v14 }
 0xd88   : > { %v11516_v27 = vpop.f32.mrf.mxu0  ;;  %v7471_v32 = vadd.f32 %v15680_v14, %v15767_v51 }
 0xd89   : > { %v7878_v60 = vpack.c.bf16 %v7617_v62, %v7614_v34  ;;  %11581 = vmatmul.mubr.msk.bf16.vlgmr.msra.gmra.mxu0 %vm1526_vm1, %v7859_v6  ;;  %11783 = vmatprep.subr.msk.bf16.mxu0 %vm1526_vm1, %v7879_v7  ;;  %v8165_v21 = vsel %vm1526_vm1, %v7879_v7, 0  ;;  %v7638_v46 = vadd.f32 %v11516_v27, %v15970_v58  ;;  %v7863_v7 = vpack.c.bf16 %v7447_v43, %v7444_v26 }
 0xd8a   : > { %v7629_v11 = vpop.f32.mrf.mxu0  ;;  %11587 = vmatpush3.bf16.xpose.msra.mxu1 %v8101_v40  ;;  %11593 = vmatpush3.bf16.xpose.msra.mxu0 %v8165_v21  ;;  %v7468_v62 = vadd.f32 %v15680_v14, %v15759_v2  ;;  %v7728_v43 = vadd.f32 %v15807_v42, %v15787_v37  ;;  %v7768_v37 = vadd.f32 %v15802_v47, %v15807_v42 }
 0xd8b   : > { %11596 = vmatprep.mubr.msk.bf16.mxu0 %vm1526_vm1, %v7862_v15  ;;  %11784 = vmatprep.subr.msk.bf16.mxu0 %vm1526_vm1, %v7878_v60  ;;  %v7630_v41 = vadd.f32 %v15970_v58, %v7629_v11  ;;  %v8162_v59 = vsel %vm1526_vm1, %v7878_v60, 0  ;;  %v7463_v11 = vadd.f32 %v15753_v4, %v15680_v14  ;;  %v7739_v4 = vadd.f32 %v15790_v36, %v15807_v42 }
 0xd8c   : > { %v11517_v28 = vpop.f32.mrf.mxu0  ;;  %v7866_v22 = vpack.c.bf16 %v7471_v32, %v7468_v62  ;;  %v7787_v47 = vadd.f32 %v15818_v9, %v15807_v42 }
 0xd8d   : > { %v7641_v35 = vadd.f32 %v11517_v28, %v15970_v58 }
 0xd8e   : > { %v7632_v54 = vpop.f32.mrf.mxu0 }
 0xd8f   : > { %v7881_v52 = vpack.c.bf16 %v7641_v35, %v7638_v46  ;;  %v7633_v33 = vadd.f32 %v15970_v58, %v7632_v54 }
 0xd90   : > { %v11520_v39 = vpop.f32.mrf.mxu0 }
 0xd91   : > { %v7880_v63 = vpack.c.bf16 %v7633_v33, %v7630_v41  ;;  %11589 = vmatmul.mubr.msk.bf16.vlgmr.msra.gmra.mxu1 %vm1526_vm1, %v7861_v31  ;;  %11785 = vmatprep.subr.msk.bf16.mxu1 %vm1526_vm1, %v7881_v52  ;;  %v8226_v10 = vsel %vm1526_vm1, %v7881_v52, 0  ;;  %v7654_v1 = vadd.f32 %v11520_v39, %v15970_v58  ;;  %v7865_v31 = vpack.c.bf16 %v7463_v11, %v7460_v20 }
 0xd92   : > { %v7645_v29 = vpop.f32.mrf.mxu0  ;;  %11595 = vmatpush3.bf16.xpose.msra.mxu0 %v8162_v59  ;;  %11601 = vmatpush3.bf16.xpose.msra.mxu1 %v8226_v10  ;;  %v7868_v33 = vpack.c.bf16 %v7487_v55, %v7484_v50  ;;  %v7755_v59 = vadd.f32 %v15798_v16, %v15807_v42  ;;  %v7867_v10 = vpack.c.bf16 %v7479_v23, %v7476_v38 }
 0xd93   : > { %11604 = vmatprep.mubr.msk.bf16.mxu1 %vm1526_vm1, %v7864_v12  ;;  %11786 = vmatprep.subr.msk.bf16.mxu1 %vm1526_vm1, %v7880_v63  ;;  %v7646_v27 = vadd.f32 %v15970_v58, %v7645_v29  ;;  %v8223_v51 = vsel %vm1526_vm1, %v7880_v63, 0  ;;  %v7887_v63 = vpack.c.bf16 %v7739_v4, %v7736_v13  ;;  %v7747_v16 = vadd.f32 %v15807_v42, %v15800_v57  ;;  %v10137_v57 = vld [vmem:[%s16727_s3 + $0x38] sm:$0xff]  }
 0xd94   : > { %v11521_v6 = vpop.f32.mrf.mxu0  ;;  %v7889_v26 = vpack.c.bf16 %v7755_v59, %v7752_v0 }
 0xd95   : > { %v7657_v34 = vadd.f32 %v11521_v6, %v15970_v58  ;;  %v7771_v6 = vadd.f32 %v15810_v49, %v15807_v42 }
 0xd96   : > { %v7648_v5 = vpop.f32.mrf.mxu0 }
 0xd97   : > { %v7883_v15 = vpack.c.bf16 %v7657_v34, %v7654_v1  ;;  %v7649_v60 = vadd.f32 %v15970_v58, %v7648_v5  ;;  %v16121_v49 = vpack.c.bf16 %v7771_v6, %v7768_v37  ;;  %v7744_v1 = vadd.f32 %v15807_v42, %v15796_v56  ;;  %v10136_v56 = vld [vmem:[%s16727_s3 + $0x30] sm:$0xff]  }
 0xd98   : > { %v11524_v40 = vpop.f32.mrf.mxu0  ;;  %v16140_v9 = vunpack.c.l.bf16 %v10136_v56  ;;  %v16147_v5 = vunpack.c.h.bf16 %v10136_v56 }
 0xd99   : > { %v7882_v21 = vpack.c.bf16 %v7649_v60, %v7646_v27  ;;  %11597 = vmatmul.mubr.msk.bf16.vlgmr.msra.gmra.mxu0 %vm1526_vm1, %v7863_v7  ;;  %11787 = vmatprep.subr.msk.bf16.mxu0 %vm1526_vm1, %v7883_v15  ;;  %v8287_v53 = vsel %vm1526_vm1, %v7883_v15, 0  ;;  %v7670_v46 = vadd.f32 %v11524_v40, %v15970_v58  ;;  %v16142_v7 = vunpack.c.l.bf16 %v10137_v57 }
 0xd9a   : > { %v7661_v2 = vpop.f32.mrf.mxu0  ;;  %11603 = vmatpush3.bf16.xpose.msra.mxu1 %v8223_v51  ;;  %11609 = vmatpush3.bf16.xpose.msra.mxu0 %v8287_v53  ;;  %v16152_v15 = vunpack.c.h.bf16 %v10137_v57 }
 0xd9b   : > { %11612 = vmatprep.mubr.msk.bf16.mxu0 %vm1526_vm1, %v7866_v22  ;;  %11788 = vmatprep.subr.msk.bf16.mxu0 %vm1526_vm1, %v7882_v21  ;;  %v7662_v41 = vadd.f32 %v15970_v58, %v7661_v2  ;;  %v8284_v36 = vsel %vm1526_vm1, %v7882_v21, 0 }
 0xd9c   : > { %v11525_v28 = vpop.f32.mrf.mxu0 }
 0xd9d   : > { %v7673_v35 = vadd.f32 %v11525_v28, %v15970_v58 }
 0xd9e   : > { %v7664_v54 = vpop.f32.mrf.mxu0 }
 0xd9f   : > { %v7885_v52 = vpack.c.bf16 %v7673_v35, %v7670_v46  ;;  %v7665_v30 = vadd.f32 %v15970_v58, %v7664_v54  ;;  %v7731_v58 = vadd.f32 %v15807_v42, %v15792_v61  ;;  %v7495_v61 = vadd.f32 %v15777_v17, %v15680_v14 }
 0xda0   : > { %v7888_v17 = vpack.c.bf16 %v7747_v16, %v7744_v1  ;;  %v7784_v14 = vadd.f32 %v15813_v18, %v15807_v42 }
 0xda1   : > { %v7884_v39 = vpack.c.bf16 %v7665_v30, %v7662_v41  ;;  %11605 = vmatmul.mubr.msk.bf16.vlgmr.msra.gmra.mxu1 %vm1526_vm1, %v7865_v31  ;;  %11789 = vmatprep.subr.msk.bf16.mxu1 %vm1526_vm1, %v7885_v52  ;;  %v8348_v12 = vsel %vm1526_vm1, %v7885_v52, 0  ;;  %v7886_v29 = vpack.c.bf16 %v7731_v58, %v7728_v43  ;;  %v7869_v32 = vpack.c.bf16 %v7495_v61, %v7492_v25 }
 0xda2   : > { %11611 = vmatpush3.bf16.xpose.msra.mxu0 %v8284_v36  ;;  %11617 = vmatpush3.bf16.xpose.msra.mxu1 %v8348_v12  ;;  %v16131_v19 = vpack.c.bf16 %v7787_v47, %v7784_v14 }
 0xda3   : > { %11620 = vmatprep.mubr.msk.bf16.mxu1 %vm1526_vm1, %v7868_v33  ;;  %11790 = vmatprep.subr.msk.bf16.mxu1 %vm1526_vm1, %v7884_v39  ;;  %v8345_v44 = vsel %vm1526_vm1, %v7884_v39, 0 }
 0xda4   : > { %11624 = vmatprep.subr.bf16.mxu0 %v7887_v63 }
 0xda9   : > { %11613 = vmatmul.mubr.msk.bf16.vlgmr.msra.gmra.mxu0 %vm1526_vm1, %v7867_v10 }
 0xdaa   : > { %11619 = vmatpush3.bf16.xpose.msra.mxu1 %v8345_v44  ;;  %11625 = vmatpush3.bf16.msra.mxu0 %v7887_v63 }
 0xdab   : > { %11626 = vmatprep.subr.bf16.mxu0 %v7886_v29  ;;  %11632 = vmatprep.subr.bf16.mxu1 %v7889_v26 }
 0xdae   : > { %11627 = vmatpush3.bf16.msra.mxu0 %v7886_v29 }
 0xdaf   : > { %11640 = vmatprep.subr.bf16.mxu0 %v16121_v49 }
 0xdb1   : > { %11621 = vmatmul.mubr.msk.bf16.vlgmr.msra.gmra.mxu1 %vm1526_vm1, %v7869_v32 }
 0xdb2   : > { %11633 = vmatpush3.bf16.msra.mxu1 %v7889_v26 }
 0xdb3   : > { %11634 = vmatprep.subr.bf16.mxu1 %v7888_v17 }
 0xdb6   : > { %11635 = vmatpush3.bf16.msra.mxu1 %v7888_v17 }
 0xdb7   : > { %11648 = vmatprep.subr.bf16.mxu1 %v16131_v19 }
 0xe39   : > { %v11566_v34 = vpop.f32.mrf.mxu0 }
 0xe3a   : > { %v16150_v27 = vadd.f32 %v11566_v34, %v16142_v7 }
 0xe3b   : > { %v7957_v42 = vpop.f32.mrf.mxu0 }
 0xe3c   : > { %v16145_v18 = vadd.f32 %v16140_v9, %v7957_v42  ;;  %v8405_v11 = vsel %vm2015_vm2, %v16150_v27, -inf }
 0xe3d   : > { %v11567_v62 = vpop.f32.mrf.mxu0 }
 0xe3e   : > { %v8399_v60 = vsel %vm2015_vm2, %v16145_v18, -inf  ;;  %v16160_v51 = vadd.f32 %v11567_v62, %v16152_v15 }
 0xe3f   : > { %v7960_v40 = vpop.f32.mrf.mxu0  ;;  %8400 = vmax.xlane.f32.xlu0 %v8399_v60 }
 0xe40   : > { %v16157_v22 = vadd.f32 %v16147_v5, %v7960_v40  ;;  %v8408_v46 = vsel %vm2015_vm2, %v16160_v51, -inf }
 0xe41   : > { %v11574_v21 = vpop.f32.mrf.mxu1 }
 0xe42   : > { %v8402_v53 = vsel %vm2015_vm2, %v16157_v22, -inf  ;;  %v16170_v55 = vadd.f32 %v11574_v21, %v16142_v7 }
 0xe43   : > { %v8018_v2 = vpop.f32.mrf.mxu1  ;;  %8403 = vmax.xlane.f32.xlu1 %v8402_v53  ;;  %8406 = vmax.xlane.f32.xlu0 %v8405_v11 }
 0xe44   : > { %v16167_v20 = vadd.f32 %v16140_v9, %v8018_v2  ;;  %v8417_v52 = vsel %vm2015_vm2, %v16170_v55, -inf }
 0xe45   : > { %v11575_v28 = vpop.f32.mrf.mxu1 }
 0xe46   : > { %v8411_v35 = vsel %vm2015_vm2, %v16167_v20, -inf  ;;  %v16180_v50 = vadd.f32 %v11575_v28, %v16152_v15 }
 0xe47   : > { %v8021_v31 = vpop.f32.mrf.mxu1  ;;  %8409 = vmax.xlane.f32.xlu1 %v8408_v46  ;;  %8412 = vmax.xlane.f32.xlu0 %v8411_v35 }
 0xe48   : > { %v16177_v4 = vadd.f32 %v16147_v5, %v8021_v31  ;;  %v8420_v36 = vsel %vm2015_vm2, %v16180_v50, -inf }
 0xe49   : > { %v11582_v54 = vpop.f32.mrf.mxu0 }
 0xe4a   : > { %v8414_v41 = vsel %vm2015_vm2, %v16177_v4, -inf  ;;  %v16190_v39 = vadd.f32 %v11582_v54, %v16142_v7 }
 0xe4b   : > { %v8079_v30 = vpop.f32.mrf.mxu0  ;;  %8415 = vmax.xlane.f32.xlu1 %v8414_v41  ;;  %8418 = vmax.xlane.f32.xlu0 %v8417_v52 }
 0xe4c   : > { %v16187_v13 = vadd.f32 %v16140_v9, %v8079_v30  ;;  %v8429_v10 = vsel %vm2015_vm2, %v16190_v39, -inf }
 0xe4d   : > { %v11583_v33 = vpop.f32.mrf.mxu0 }
 0xe4e   : > { %v8423_v12 = vsel %vm2015_vm2, %v16187_v13, -inf  ;;  %v16200_v58 = vadd.f32 %v11583_v33, %v16152_v15 }
 0xe4f   : > { %v8082_v63 = vpop.f32.mrf.mxu0  ;;  %8421 = vmax.xlane.f32.xlu1 %v8420_v36  ;;  %8424 = vmax.xlane.f32.xlu0 %v8423_v12 }
 0xe50   : > { %v16197_v23 = vadd.f32 %v16147_v5, %v8082_v63  ;;  %v8432_v6 = vsel %vm2015_vm2, %v16200_v58, -inf }
 0xe51   : > { %v11590_v38 = vpop.f32.mrf.mxu1 }
 0xe52   : > { %v8426_v59 = vsel %vm2015_vm2, %v16197_v23, -inf  ;;  %v16210_v26 = vadd.f32 %v11590_v38, %v16142_v7 }
 0xe53   : > { %v8140_v43 = vpop.f32.mrf.mxu1  ;;  %8427 = vmax.xlane.f32.xlu1 %v8426_v59  ;;  %8430 = vmax.xlane.f32.xlu0 %v8429_v10 }
 0xe54   : > { %v16207_v0 = vadd.f32 %v16140_v9, %v8140_v43  ;;  %v8441_v1 = vsel %vm2015_vm2, %v16210_v26, -inf }
 0xe55   : > { %v11591_v29 = vpop.f32.mrf.mxu1 }
 0xe56   : > { %v8435_v44 = vsel %vm2015_vm2, %v16207_v0, -inf  ;;  %v16220_v16 = vadd.f32 %v11591_v29, %v16152_v15 }
 0xe57   : > { %v8143_v61 = vpop.f32.mrf.mxu1  ;;  %8433 = vmax.xlane.f32.xlu1 %v8432_v6  ;;  %8436 = vmax.xlane.f32.xlu0 %v8435_v44 }
 0xe58   : > { %v16217_v37 = vadd.f32 %v16147_v5, %v8143_v61  ;;  %v8444_v57 = vsel %vm2015_vm2, %v16220_v16, -inf }
 0xe59   : > { %v11598_v25 = vpop.f32.mrf.mxu0 }
 0xe5a   : > { %v8438_v32 = vsel %vm2015_vm2, %v16217_v37, -inf  ;;  %v16230_v56 = vadd.f32 %v11598_v25, %v16142_v7 }
 0xe5b   : > { %v8201_v17 = vpop.f32.mrf.mxu0  ;;  %8439 = vmax.xlane.f32.xlu1 %v8438_v32  ;;  %8442 = vmax.xlane.f32.xlu0 %v8441_v1 }
 0xe5c   : > { %v16227_v47 = vadd.f32 %v16140_v9, %v8201_v17  ;;  %v8453_v53 = vsel %vm2015_vm2, %v16230_v56, -inf }
 0xe5d   : > { %v11599_v14 = vpop.f32.mrf.mxu0 }
 0xe5e   : > { %v8447_v34 = vsel %vm2015_vm2, %v16227_v47, -inf  ;;  %v16240_v40 = vadd.f32 %v11599_v14, %v16152_v15 }
 0xe5f   : > { %v8204_v42 = vpop.f32.mrf.mxu0  ;;  %8445 = vmax.xlane.f32.xlu1 %v8444_v57  ;;  %8448 = vmax.xlane.f32.xlu0 %v8447_v34 }
 0xe60   : > { %v16237_v62 = vadd.f32 %v16147_v5, %v8204_v42  ;;  %v8456_v35 = vsel %vm2015_vm2, %v16240_v40, -inf }
 0xe61   : > { %v11606_v60 = vpop.f32.mrf.mxu1 }
 0xe62   : > { %v8450_v21 = vsel %vm2015_vm2, %v16237_v62, -inf  ;;  %v16250_v46 = vadd.f32 %v11606_v60, %v16142_v7 }
 0xe63   : > { %v8262_v11 = vpop.f32.mrf.mxu1  ;;  %8451 = vmax.xlane.f32.xlu1 %v8450_v21  ;;  %8454 = vmax.xlane.f32.xlu0 %v8453_v53 }
 0xe64   : > { %v16247_v2 = vadd.f32 %v16140_v9, %v8262_v11  ;;  %v8465_v36 = vsel %vm2015_vm2, %v16250_v46, -inf }
 0xe65   : > { %v11607_v28 = vpop.f32.mrf.mxu1 }
 0xe66   : > { %v8459_v31 = vsel %vm2015_vm2, %v16247_v2, -inf  ;;  %v16260_v30 = vadd.f32 %v11607_v28, %v16152_v15 }
 0xe67   : > { %v8265_v54 = vpop.f32.mrf.mxu1  ;;  %8457 = vmax.xlane.f32.xlu1 %v8456_v35  ;;  %8460 = vmax.xlane.f32.xlu0 %v8459_v31 }
 0xe68   : > { %v16257_v41 = vadd.f32 %v16147_v5, %v8265_v54  ;;  %v8468_v10 = vsel %vm2015_vm2, %v16260_v30, -inf }
 0xe69   : > { %v11614_v52 = vpop.f32.mrf.mxu0 }
 0xe6a   : > { %v8462_v33 = vsel %vm2015_vm2, %v16257_v41, -inf  ;;  %v16270_v59 = vadd.f32 %v11614_v52, %v16142_v7 }
 0xe6b   : > { %v8323_v12 = vpop.f32.mrf.mxu0  ;;  %8463 = vmax.xlane.f32.xlu1 %v8462_v33  ;;  %8466 = vmax.xlane.f32.xlu0 %v8465_v36 }
 0xe6c   : > { %v16267_v63 = vadd.f32 %v16140_v9, %v8323_v12  ;;  %v8477_v32 = vsel %vm2015_vm2, %v16270_v59, -inf }
 0xe6d   : > { %v11615_v38 = vpop.f32.mrf.mxu0 }
 0xe6e   : > { %v8471_v43 = vsel %vm2015_vm2, %v16267_v63, -inf  ;;  %v16280_v61 = vadd.f32 %v11615_v38, %v16152_v15 }
 0xe6f   : > { %v8326_v29 = vpop.f32.mrf.mxu0  ;;  %8469 = vmax.xlane.f32.xlu1 %v8468_v10  ;;  %8472 = vmax.xlane.f32.xlu0 %v8471_v43 }
 0xe70   : > { %v16277_v6 = vadd.f32 %v16147_v5, %v8326_v29  ;;  %v8480_v34 = vsel %vm2015_vm2, %v16280_v61, -inf }
 0xe71   : > { %v11622_v44 = vpop.f32.mrf.mxu1 }
 0xe72   : > { %v8474_v25 = vsel %vm2015_vm2, %v16277_v6, -inf  ;;  %v16290_v57 = vadd.f32 %v11622_v44, %v16142_v7 }
 0xe73   : > { %v8384_v1 = vpop.f32.mrf.mxu1  ;;  %8475 = vmax.xlane.f32.xlu1 %v8474_v25  ;;  %8478 = vmax.xlane.f32.xlu0 %v8477_v32 }
 0xe74   : > { %v16287_v17 = vadd.f32 %v16140_v9, %v8384_v1  ;;  %v8489_v7 = vsel %vm2015_vm2, %v16290_v57, -inf }
 0xe75   : > { %v11623_v14 = vpop.f32.mrf.mxu1 }
 0xe76   : > { %v8483_v42 = vsel %vm2015_vm2, %v16287_v17, -inf  ;;  %v16300_v53 = vadd.f32 %v11623_v14, %v16152_v15 }
 0xe77   : > { %v8387_v60 = vpop.f32.mrf.mxu1  ;;  %8481 = vmax.xlane.f32.xlu1 %v8480_v34  ;;  %8484 = vmax.xlane.f32.xlu0 %v8483_v42 }
 0xe78   : > { %v16297_v21 = vadd.f32 %v16147_v5, %v8387_v60  ;;  %v8492_v11 = vsel %vm2015_vm2, %v16300_v53, -inf }
 0xe7a   : > { %v8486_v9 = vsel %vm2015_vm2, %v16297_v21, -inf }
 0xe7b   : > { %8487 = vmax.xlane.f32.xlu1 %v8486_v9  ;;  %8490 = vmax.xlane.f32.xlu0 %v8489_v7 }
 0xe7f   : > { %8493 = vmax.xlane.f32.xlu1 %v8492_v11 }
 0xec8   : > { %v8401_v28 = vpop.xlane.xlu0 %8400 }
 0xec9   : > { %v8495_v35 = vsub.f32 %v16145_v18, %v8401_v28 }
 0xecb   : > { %v8527_v5 = vmul.f32 1.442695, %v8495_v35 }
 0xecc   : > { %v8404_v31 = vpop.xlane.xlu1 %8403  ;;  %v8407_v54 = vpop.xlane.xlu0 %8406 }
 0xecd   : > { %12276 = vpow2.f32 %v8527_v5  ;;  %v8496_v15 = vsub.f32 %v16157_v22, %v8404_v31  ;;  %v8497_v52 = vsub.f32 %v16150_v27, %v8407_v54 }
 0xecf   : > { %v8529_v33 = vmul.f32 1.442695, %v8496_v15  ;;  %v8531_v36 = vmul.f32 1.442695, %v8497_v52 }
 0xed0   : > { %v8410_v12 = vpop.xlane.xlu1 %8409  ;;  %v8413_v38 = vpop.xlane.xlu0 %8412 }
 0xed1   : > { %12278 = vpow2.f32 %v8529_v33  ;;  %v8498_v10 = vsub.f32 %v16160_v51, %v8410_v12  ;;  %v8499_v43 = vsub.f32 %v16167_v20, %v8413_v38 }
 0xed2   : > { %12280 = vpow2.f32 %v8531_v36 }
 0xed3   : > { %v8533_v29 = vmul.f32 1.442695, %v8498_v10  ;;  %v8535_v18 = vmul.f32 1.442695, %v8499_v43 }
 0xed4   : > { %v8416_v44 = vpop.xlane.xlu1 %8415  ;;  %v8419_v25 = vpop.xlane.xlu0 %8418 }
 0xed5   : > { %12282 = vpow2.f32 %v8533_v29  ;;  %v8500_v32 = vsub.f32 %v16177_v4, %v8416_v44  ;;  %v8501_v22 = vsub.f32 %v16170_v55, %v8419_v25 }
 0xed6   : > { %12284 = vpow2.f32 %v8535_v18 }
 0xed7   : > { %v8537_v27 = vmul.f32 1.442695, %v8500_v32  ;;  %v8539_v1 = vmul.f32 1.442695, %v8501_v22 }
 0xed8   : > { %v8422_v14 = vpop.xlane.xlu1 %8421  ;;  %v8425_v34 = vpop.xlane.xlu0 %8424 }
 0xed9   : > { %12286 = vpow2.f32 %v8537_v27  ;;  %v8502_v51 = vsub.f32 %v16180_v50, %v8422_v14  ;;  %v8503_v20 = vsub.f32 %v16187_v13, %v8425_v34 }
 0xeda   : > { %v16317_v42 = vpop.eup %12276  ;;  %12288 = vpow2.f32 %v8539_v1 }
 0xedb   : > { %v8541_v60 = vmul.f32 1.442695, %v8502_v51  ;;  %v8543_v9 = vmul.f32 1.442695, %v8503_v20  ;;  %v8591_v4 = vsel %vm2015_vm2, %v16317_v42, 0.0 }
 0xedc   : > { %v8428_v7 = vpop.xlane.xlu1 %8427  ;;  %8592 = vadd.xlane.f32.xlu0 %v8591_v4  ;;  %v8431_v55 = vpop.xlane.xlu0 %8430 }
 0xedd   : > { %12290 = vpow2.f32 %v8541_v60  ;;  %v8504_v11 = vsub.f32 %v16197_v23, %v8428_v7  ;;  %v8505_v28 = vsub.f32 %v16190_v39, %v8431_v55 }
 0xede   : > { %v16323_v35 = vpop.eup %12278  ;;  %12292 = vpow2.f32 %v8543_v9 }
 0xedf   : > { %v16325_v50 = vpop.eup %12280  ;;  %v8545_v13 = vmul.f32 1.442695, %v8504_v11  ;;  %v8547_v5 = vmul.f32 1.442695, %v8505_v28  ;;  %v8594_v31 = vsel %vm2015_vm2, %v16323_v35, 0.0 }
 0xee0   : > { %8595 = vadd.xlane.f32.xlu1 %v8594_v31  ;;  %v8434_v54 = vpop.xlane.xlu1 %8433  ;;  %v8597_v15 = vsel %vm2015_vm2, %v16325_v50, 0.0  ;;  %v8437_v52 = vpop.xlane.xlu0 %8436 }
 0xee1   : > { %12294 = vpow2.f32 %v8545_v13  ;;  %v8506_v23 = vsub.f32 %v16200_v58, %v8434_v54  ;;  %8598 = vadd.xlane.f32.xlu0 %v8597_v15  ;;  %v8507_v39 = vsub.f32 %v16207_v0, %v8437_v52 }
 0xee2   : > { %v16333_v33 = vpop.eup %12282  ;;  %12296 = vpow2.f32 %v8547_v5 }
 0xee3   : > { %v16335_v36 = vpop.eup %12284  ;;  %v8549_v12 = vmul.f32 1.442695, %v8506_v23  ;;  %v8551_v38 = vmul.f32 1.442695, %v8507_v39  ;;  %v8600_v10 = vsel %vm2015_vm2, %v16333_v33, 0.0 }
 0xee4   : > { %8601 = vadd.xlane.f32.xlu1 %v8600_v10  ;;  %v8440_v43 = vpop.xlane.xlu1 %8439  ;;  %v8603_v29 = vsel %vm2015_vm2, %v16335_v36, 0.0  ;;  %v8443_v18 = vpop.xlane.xlu0 %8442 }
 0xee5   : > { %12298 = vpow2.f32 %v8549_v12  ;;  %v8508_v58 = vsub.f32 %v16217_v37, %v8440_v43  ;;  %8604 = vadd.xlane.f32.xlu0 %v8603_v29  ;;  %v8509_v0 = vsub.f32 %v16210_v26, %v8443_v18 }
 0xee6   : > { %v16343_v44 = vpop.eup %12286  ;;  %12300 = vpow2.f32 %v8551_v38 }
 0xee7   : > { %v16345_v25 = vpop.eup %12288  ;;  %v8553_v32 = vmul.f32 1.442695, %v8508_v58  ;;  %v8555_v22 = vmul.f32 1.442695, %v8509_v0  ;;  %v8606_v27 = vsel %vm2015_vm2, %v16343_v44, 0.0 }
 0xee8   : > { %8607 = vadd.xlane.f32.xlu1 %v8606_v27  ;;  %v8446_v1 = vpop.xlane.xlu1 %8445  ;;  %v8609_v14 = vsel %vm2015_vm2, %v16345_v25, 0.0  ;;  %v8449_v34 = vpop.xlane.xlu0 %8448 }
 0xee9   : > { %12302 = vpow2.f32 %v8553_v32  ;;  %v8510_v37 = vsub.f32 %v16220_v16, %v8446_v1  ;;  %8610 = vadd.xlane.f32.xlu0 %v8609_v14  ;;  %v8511_v26 = vsub.f32 %v16227_v47, %v8449_v34 }
 0xeea   : > { %v16353_v51 = vpop.eup %12290  ;;  %12304 = vpow2.f32 %v8555_v22 }
 0xeeb   : > { %v16355_v20 = vpop.eup %12292  ;;  %v8557_v60 = vmul.f32 1.442695, %v8510_v37  ;;  %v8559_v9 = vmul.f32 1.442695, %v8511_v26  ;;  %v8612_v4 = vsel %vm2015_vm2, %v16353_v51, 0.0 }
 0xeec   : > { %8613 = vadd.xlane.f32.xlu1 %v8612_v4  ;;  %v8452_v7 = vpop.xlane.xlu1 %8451  ;;  %v8615_v55 = vsel %vm2015_vm2, %v16355_v20, 0.0  ;;  %v8455_v11 = vpop.xlane.xlu0 %8454 }
 0xeed   : > { %12306 = vpow2.f32 %v8557_v60  ;;  %v8512_v16 = vsub.f32 %v16237_v62, %v8452_v7  ;;  %8616 = vadd.xlane.f32.xlu0 %v8615_v55  ;;  %v8513_v47 = vsub.f32 %v16230_v56, %v8455_v11 }
 0xeee   : > { %v16363_v28 = vpop.eup %12294  ;;  %12308 = vpow2.f32 %v8559_v9 }
 0xeef   : > { %v16365_v13 = vpop.eup %12296  ;;  %v8561_v5 = vmul.f32 1.442695, %v8512_v16  ;;  %v8563_v31 = vmul.f32 1.442695, %v8513_v47  ;;  %v8618_v54 = vsel %vm2015_vm2, %v16363_v28, 0.0 }
 0xef0   : > { %8619 = vadd.xlane.f32.xlu1 %v8618_v54  ;;  %v8458_v15 = vpop.xlane.xlu1 %8457  ;;  %v8621_v52 = vsel %vm2015_vm2, %v16365_v13, 0.0  ;;  %v8461_v23 = vpop.xlane.xlu0 %8460 }
 0xef1   : > { %12310 = vpow2.f32 %v8561_v5  ;;  %v8514_v62 = vsub.f32 %v16240_v40, %v8458_v15  ;;  %8622 = vadd.xlane.f32.xlu0 %v8621_v52  ;;  %v8515_v56 = vsub.f32 %v16247_v2, %v8461_v23 }
 0xef2   : > { %v16373_v39 = vpop.eup %12298  ;;  %12312 = vpow2.f32 %v8563_v31 }
 0xef3   : > { %v16375_v12 = vpop.eup %12300  ;;  %v8565_v38 = vmul.f32 1.442695, %v8514_v62  ;;  %v8567_v10 = vmul.f32 1.442695, %v8515_v56  ;;  %v8624_v43 = vsel %vm2015_vm2, %v16373_v39, 0.0 }
 0xef4   : > { %8625 = vadd.xlane.f32.xlu1 %v8624_v43  ;;  %v8464_v29 = vpop.xlane.xlu1 %8463  ;;  %v8627_v18 = vsel %vm2015_vm2, %v16375_v12, 0.0  ;;  %v8467_v58 = vpop.xlane.xlu0 %8466 }
 0xef5   : > { %12314 = vpow2.f32 %v8565_v38  ;;  %v8516_v40 = vsub.f32 %v16257_v41, %v8464_v29  ;;  %8628 = vadd.xlane.f32.xlu0 %v8627_v18  ;;  %v8517_v2 = vsub.f32 %v16250_v46, %v8467_v58 }
 0xef6   : > { %v16383_v0 = vpop.eup %12302  ;;  %12316 = vpow2.f32 %v8567_v10 }
 0xef7   : > { %v16385_v32 = vpop.eup %12304  ;;  %v8569_v22 = vmul.f32 1.442695, %v8516_v40  ;;  %v8571_v27 = vmul.f32 1.442695, %v8517_v2  ;;  %v8630_v1 = vsel %vm2015_vm2, %v16383_v0, 0.0 }
 0xef8   : > { %8631 = vadd.xlane.f32.xlu1 %v8630_v1  ;;  %v8470_v14 = vpop.xlane.xlu1 %8469  ;;  %v8633_v34 = vsel %vm2015_vm2, %v16385_v32, 0.0  ;;  %v8473_v37 = vpop.xlane.xlu0 %8472 }
 0xef9   : > { %12318 = vpow2.f32 %v8569_v22  ;;  %v8518_v41 = vsub.f32 %v16260_v30, %v8470_v14  ;;  %8634 = vadd.xlane.f32.xlu0 %v8633_v34  ;;  %v8519_v46 = vsub.f32 %v16267_v63, %v8473_v37 }
 0xefa   : > { %v16393_v26 = vpop.eup %12306  ;;  %12320 = vpow2.f32 %v8571_v27 }
 0xefb   : > { %v16395_v60 = vpop.eup %12308  ;;  %v8573_v9 = vmul.f32 1.442695, %v8518_v41  ;;  %v8575_v4 = vmul.f32 1.442695, %v8519_v46  ;;  %v8636_v7 = vsel %vm2015_vm2, %v16393_v26, 0.0 }
 0xefc   : > { %8637 = vadd.xlane.f32.xlu1 %v8636_v7  ;;  %v8476_v55 = vpop.xlane.xlu1 %8475  ;;  %v8639_v11 = vsel %vm2015_vm2, %v16395_v60, 0.0  ;;  %v8479_v16 = vpop.xlane.xlu0 %8478 }
 0xefd   : > { %12322 = vpow2.f32 %v8573_v9  ;;  %v8520_v30 = vsub.f32 %v16277_v6, %v8476_v55  ;;  %8640 = vadd.xlane.f32.xlu0 %v8639_v11  ;;  %v8521_v63 = vsub.f32 %v16270_v59, %v8479_v16 }
 0xefe   : > { %v16403_v47 = vpop.eup %12310  ;;  %12324 = vpow2.f32 %v8575_v4 }
 0xeff   : > { %v16405_v5 = vpop.eup %12312  ;;  %v8577_v31 = vmul.f32 1.442695, %v8520_v30  ;;  %v8579_v54 = vmul.f32 1.442695, %v8521_v63  ;;  %v8642_v15 = vsel %vm2015_vm2, %v16403_v47, 0.0 }
 0xf00   : > { %8643 = vadd.xlane.f32.xlu1 %v8642_v15  ;;  %v8482_v52 = vpop.xlane.xlu1 %8481  ;;  %v8645_v23 = vsel %vm2015_vm2, %v16405_v5, 0.0  ;;  %v8485_v62 = vpop.xlane.xlu0 %8484 }
 0xf01   : > { %12326 = vpow2.f32 %v8577_v31  ;;  %v8522_v6 = vsub.f32 %v16280_v61, %v8482_v52  ;;  %8646 = vadd.xlane.f32.xlu0 %v8645_v23  ;;  %v8523_v59 = vsub.f32 %v16287_v17, %v8485_v62 }
 0xf02   : > { %v16413_v56 = vpop.eup %12314  ;;  %12328 = vpow2.f32 %v8579_v54 }
 0xf03   : > { %v16415_v38 = vpop.eup %12316  ;;  %v8581_v10 = vmul.f32 1.442695, %v8522_v6  ;;  %v8583_v43 = vmul.f32 1.442695, %v8523_v59  ;;  %v8648_v29 = vsel %vm2015_vm2, %v16413_v56, 0.0 }
 0xf04   : > { %8649 = vadd.xlane.f32.xlu1 %v8648_v29  ;;  %v8488_v18 = vpop.xlane.xlu1 %8487  ;;  %v8651_v58 = vsel %vm2015_vm2, %v16415_v38, 0.0  ;;  %v8491_v40 = vpop.xlane.xlu0 %8490 }
 0xf05   : > { %12330 = vpow2.f32 %v8581_v10  ;;  %v8524_v61 = vsub.f32 %v16297_v21, %v8488_v18  ;;  %8652 = vadd.xlane.f32.xlu0 %v8651_v58  ;;  %v8525_v17 = vsub.f32 %v16290_v57, %v8491_v40 }
 0xf06   : > { %v16423_v2 = vpop.eup %12318  ;;  %12332 = vpow2.f32 %v8583_v43 }
 0xf07   : > { %v16425_v22 = vpop.eup %12320  ;;  %v8585_v27 = vmul.f32 1.442695, %v8524_v61  ;;  %v8587_v1 = vmul.f32 1.442695, %v8525_v17  ;;  %v8654_v14 = vsel %vm2015_vm2, %v16423_v2, 0.0 }
 0xf08   : > { %8655 = vadd.xlane.f32.xlu1 %v8654_v14  ;;  %v8494_v34 = vpop.xlane.xlu1 %8493  ;;  %v8657_v37 = vsel %vm2015_vm2, %v16425_v22, 0.0 }
 0xf09   : > { %12334 = vpow2.f32 %v8585_v27  ;;  %v8526_v21 = vsub.f32 %v16300_v53, %v8494_v34  ;;  %8658 = vadd.xlane.f32.xlu0 %v8657_v37 }
 0xf0a   : > { %v16432_v57 = vpop.eup %12322  ;;  %12336 = vpow2.f32 %v8587_v1 }
 0xf0b   : > { %v16434_v41 = vpop.eup %12324  ;;  %v8589_v46 = vmul.f32 1.442695, %v8526_v21  ;;  %v8660_v9 = vsel %vm2015_vm2, %v16432_v57, 0.0 }
 0xf0c   : > { %8661 = vadd.xlane.f32.xlu1 %v8660_v9  ;;  %v8663_v4 = vsel %vm2015_vm2, %v16434_v41, 0.0 }
 0xf0d   : > { %12338 = vpow2.f32 %v8589_v46  ;;  %8664 = vadd.xlane.f32.xlu0 %v8663_v4 }
 0xf0e   : > { %v16440_v7 = vpop.eup %12326 }
 0xf0f   : > { %v16442_v55 = vpop.eup %12328  ;;  %v8666_v53 = vsel %vm2015_vm2, %v16440_v7, 0.0 }
 0xf10   : > { %8667 = vadd.xlane.f32.xlu1 %v8666_v53  ;;  %v8669_v11 = vsel %vm2015_vm2, %v16442_v55, 0.0 }
 0xf11   : > { %8670 = vadd.xlane.f32.xlu0 %v8669_v11 }
 0xf12   : > { %v16448_v16 = vpop.eup %12330 }
 0xf13   : > { %v16450_v30 = vpop.eup %12332  ;;  %v8672_v63 = vsel %vm2015_vm2, %v16448_v16, 0.0 }
 0xf14   : > { %8673 = vadd.xlane.f32.xlu1 %v8672_v63  ;;  %v8675_v31 = vsel %vm2015_vm2, %v16450_v30, 0.0 }
 0xf15   : > { %8676 = vadd.xlane.f32.xlu0 %v8675_v31 }
 0xf16   : > { %v16456_v54 = vpop.eup %12334 }
 0xf17   : > { %v16458_v15 = vpop.eup %12336  ;;  %v8678_v52 = vsel %vm2015_vm2, %v16456_v54, 0.0 }
 0xf18   : > { %8679 = vadd.xlane.f32.xlu1 %v8678_v52  ;;  %v8681_v23 = vsel %vm2015_vm2, %v16458_v15, 0.0 }
 0xf19   : > { %8682 = vadd.xlane.f32.xlu0 %v8681_v23 }
 0xf1a   : > { %v16464_v62 = vpop.eup %12338 }
 0xf1b   : > { %v8684_v6 = vsel %vm2015_vm2, %v16464_v62, 0.0 }
 0xf1c   : > { %8685 = vadd.xlane.f32.xlu1 %v8684_v6 }
 0xf65   : > { %v8593_v59 = vpop.xlane.xlu0 %8592 }
 0xf66   : > { %12340 = vrcp.f32 %v8593_v59 }
 0xf69   : > { %v8596_v10 = vpop.xlane.xlu1 %8595 }
 0xf6a   : > { %12342 = vrcp.f32 %v8596_v10  ;;  %v8599_v43 = vpop.xlane.xlu0 %8598 }
 0xf6b   : > { %12344 = vrcp.f32 %v8599_v43 }
 0xf6d   : > { %v8602_v29 = vpop.xlane.xlu1 %8601 }
 0xf6e   : > { %12346 = vrcp.f32 %v8602_v29  ;;  %v8605_v18 = vpop.xlane.xlu0 %8604 }
 0xf6f   : > { %12348 = vrcp.f32 %v8605_v18 }
 0xf71   : > { %v8608_v58 = vpop.xlane.xlu1 %8607 }
 0xf72   : > { %12350 = vrcp.f32 %v8608_v58  ;;  %v8611_v40 = vpop.xlane.xlu0 %8610 }
 0xf73   : > { %12352 = vrcp.f32 %v8611_v40  ;;  %v12341_v61 = vpop.eup %12340 }
 0xf74   : > { %v8719_v14 = vmul.f32 %v12341_v61, %v16317_v42 }
 0xf75   : > { %v8614_v17 = vpop.xlane.xlu1 %8613 }
 0xf76   : > { %12354 = vrcp.f32 %v8614_v17  ;;  %v8617_v27 = vpop.xlane.xlu0 %8616 }
 0xf77   : > { %v12343_v1 = vpop.eup %12342  ;;  %12356 = vrcp.f32 %v8617_v27 }
 0xf78   : > { %v8720_v34 = vmul.f32 %v12343_v1, %v16323_v35  ;;  %v12345_v37 = vpop.eup %12344 }
 0xf79   : > { %v8620_v21 = vpop.xlane.xlu1 %8619  ;;  %v8721_v53 = vmul.f32 %v12345_v37, %v16325_v50 }
 0xf7a   : > { %12358 = vrcp.f32 %v8620_v21  ;;  %v8623_v46 = vpop.xlane.xlu0 %8622  ;;  %v8751_v9 = vpack.c.bf16 %v8720_v34, %v8719_v14 }
 0xf7b   : > { %v12347_v4 = vpop.eup %12346  ;;  %12360 = vrcp.f32 %v8623_v46 }
 0xf7c   : > { %v8722_v11 = vmul.f32 %v12347_v4, %v16333_v33  ;;  %11628 = vmatprep.mubr.msk.bf16.mxu0 %vm2015_vm2, %v8751_v9  ;;  %v12349_v63 = vpop.eup %12348 }
 0xf7d   : > { %v8626_v31 = vpop.xlane.xlu1 %8625  ;;  %v8723_v35 = vmul.f32 %v12349_v63, %v16335_v36 }
 0xf7e   : > { %v8752_v52 = vpack.c.bf16 %v8722_v11, %v8721_v53  ;;  %12362 = vrcp.f32 %v8626_v31  ;;  %v8629_v42 = vpop.xlane.xlu0 %8628  ;;  %v17077_v11 = vld [vmem:[#allocation17_spill] sm:$0xff] }
 0xf7f   : > { %v12351_v23 = vpop.eup %12350  ;;  %12364 = vrcp.f32 %v8629_v42 }
 0xf80   : > { %11629 = vmatmul.mubr.msk.bf16.vlgmr.msra.gmra.mxu0 %vm2015_vm2, %v8752_v52  ;;  %v8724_v6 = vmul.f32 %v12351_v23, %v16343_v44  ;;  %v12353_v59 = vpop.eup %12352 }
 0xf81   : > { %11641 = vmatpush3.bf16.msra.mxu0 %v16121_v49  ;;  %v8632_v50 = vpop.xlane.xlu1 %8631  ;;  %v8725_v29 = vmul.f32 %v12353_v59, %v16345_v25 }
 0xf82   : > { %12366 = vrcp.f32 %v8632_v50  ;;  %11642 = vmatprep.subr.bf16.mxu0 %v15815_v45  ;;  %v8635_v33 = vpop.xlane.xlu0 %8634  ;;  %v8753_v10 = vpack.c.bf16 %v8724_v6, %v8723_v35 }
 0xf83   : > { %v12355_v43 = vpop.eup %12354  ;;  %12368 = vrcp.f32 %v8635_v33 }
 0xf84   : > { %v8726_v18 = vmul.f32 %v12355_v43, %v16353_v51  ;;  %11636 = vmatprep.mubr.msk.bf16.mxu1 %vm2015_vm2, %v8753_v10  ;;  %v12357_v36 = vpop.eup %12356  ;;  %v17079_v10 = vld [vmem:[#allocation3_spill] sm:$0xff] }
 0xf85   : > { %11643 = vmatpush3.bf16.msra.mxu0 %v15815_v45  ;;  %v8638_v44 = vpop.xlane.xlu1 %8637  ;;  %v8727_v25 = vmul.f32 %v12357_v36, %v16355_v20  ;;  %v17075_v45 = vld [vmem:[#allocation16_spill] sm:$0xff] }
 0xf86   : > { %v8754_v58 = vpack.c.bf16 %v8726_v18, %v8725_v29  ;;  %12370 = vrcp.f32 %v8638_v44  ;;  %11656 = vmatprep.subr.bf16.mxu0 %v15826_v24  ;;  %v8641_v49 = vpop.xlane.xlu0 %8640 }
 0xf87   : > { %v12359_v40 = vpop.eup %12358  ;;  %12372 = vrcp.f32 %v8641_v49  ;;  %v17080_v49 = vld [vmem:[#allocation9_spill] sm:$0xff] }
 0xf88   : > { %11637 = vmatmul.mubr.msk.bf16.vlgmr.msra.gmra.mxu1 %vm2015_vm2, %v8754_v58  ;;  %v8728_v51 = vmul.f32 %v12359_v40, %v16363_v28  ;;  %v12361_v61 = vpop.eup %12360 }
 0xf89   : > { %11649 = vmatpush3.bf16.msra.mxu1 %v16131_v19  ;;  %v8644_v17 = vpop.xlane.xlu1 %8643  ;;  %v8729_v34 = vmul.f32 %v12361_v61, %v16365_v13  ;;  %v17076_v19 = vld [vmem:[#allocation2_spill] sm:$0xff] }
 0xf8a   : > { %12374 = vrcp.f32 %v8644_v17  ;;  %11650 = vmatprep.subr.bf16.mxu1 %v17075_v45  ;;  %v8647_v27 = vpop.xlane.xlu0 %8646  ;;  %v8755_v1 = vpack.c.bf16 %v8728_v51, %v8727_v25  ;;  %v17081_v17 = vld [vmem:[#allocation8_spill] sm:$0xff] }
 0xf8b   : > { %v12363_v14 = vpop.eup %12362  ;;  %12376 = vrcp.f32 %v8647_v27 }
 0xf8c   : > { %v8730_v37 = vmul.f32 %v12363_v14, %v16373_v39  ;;  %11644 = vmatprep.mubr.msk.bf16.mxu0 %vm2015_vm2, %v8755_v1  ;;  %v12365_v20 = vpop.eup %12364 }
 0xf8d   : > { %11651 = vmatpush3.bf16.msra.mxu1 %v17075_v45  ;;  %v8650_v28 = vpop.xlane.xlu1 %8649  ;;  %v8731_v13 = vmul.f32 %v12365_v20, %v16375_v12 }
 0xf8e   : > { %v8756_v21 = vpack.c.bf16 %v8730_v37, %v8729_v34  ;;  %12378 = vrcp.f32 %v8650_v28  ;;  %11664 = vmatprep.subr.bf16.mxu1 %v17076_v19  ;;  %v8653_v46 = vpop.xlane.xlu0 %8652 }
 0xf8f   : > { %v12367_v9 = vpop.eup %12366  ;;  %12380 = vrcp.f32 %v8653_v46 }
 0xf90   : > { %11645 = vmatmul.mubr.msk.bf16.vlgmr.msra.gmra.mxu0 %vm2015_vm2, %v8756_v21  ;;  %v8732_v39 = vmul.f32 %v12367_v9, %v16383_v0  ;;  %v12369_v4 = vpop.eup %12368 }
 0xf91   : > { %11657 = vmatpush3.bf16.msra.mxu0 %v15826_v24  ;;  %v8656_v53 = vpop.xlane.xlu1 %8655  ;;  %v8733_v42 = vmul.f32 %v12369_v4, %v16385_v32  ;;  %v17078_v24 = vld [vmem:[#allocation6_spill] sm:$0xff] }
 0xf92   : > { %12382 = vrcp.f32 %v8656_v53  ;;  %11658 = vmatprep.subr.bf16.mxu0 %v17077_v11  ;;  %v8659_v63 = vpop.xlane.xlu0 %8658  ;;  %v8757_v31 = vpack.c.bf16 %v8732_v39, %v8731_v13 }
 0xf93   : > { %v12371_v52 = vpop.eup %12370  ;;  %12384 = vrcp.f32 %v8659_v63 }
 0xf94   : > { %v8734_v23 = vmul.f32 %v12371_v52, %v16393_v26  ;;  %11652 = vmatprep.mubr.msk.bf16.mxu1 %vm2015_vm2, %v8757_v31  ;;  %v12373_v12 = vpop.eup %12372 }
 0xf95   : > { %11659 = vmatpush3.bf16.msra.mxu0 %v17077_v11  ;;  %v8662_v0 = vpop.xlane.xlu1 %8661  ;;  %v8735_v32 = vmul.f32 %v12373_v12, %v16395_v60 }
 0xf96   : > { %v8758_v35 = vpack.c.bf16 %v8734_v23, %v8733_v42  ;;  %12386 = vrcp.f32 %v8662_v0  ;;  %11672 = vmatprep.subr.bf16.mxu0 %v17078_v24  ;;  %v8665_v6 = vpop.xlane.xlu0 %8664  ;;  %v10077_v42 = vld [vmem:[%s16730_s6 + $0x6] sm:$0x3] }
 0xf97   : > { %v12375_v59 = vpop.eup %12374  ;;  %12388 = vrcp.f32 %v8665_v6 }
 0xf98   : > { %11653 = vmatmul.mubr.msk.bf16.vlgmr.msra.gmra.mxu1 %vm2015_vm2, %v8758_v35  ;;  %v8736_v26 = vmul.f32 %v12375_v59, %v16403_v47  ;;  %v12377_v50 = vpop.eup %12376 }
 0xf99   : > { %11665 = vmatpush3.bf16.msra.mxu1 %v17076_v19  ;;  %v8668_v33 = vpop.xlane.xlu1 %8667  ;;  %v8737_v36 = vmul.f32 %v12377_v50, %v16405_v5 }
 0xf9a   : > { %12390 = vrcp.f32 %v8668_v33  ;;  %11666 = vmatprep.subr.bf16.mxu1 %v17079_v10  ;;  %v8671_v43 = vpop.xlane.xlu0 %8670  ;;  %v8759_v29 = vpack.c.bf16 %v8736_v26, %v8735_v32 }
 0xf9b   : > { %v12379_v18 = vpop.eup %12378  ;;  %12392 = vrcp.f32 %v8671_v43 }
 0xf9c   : > { %v8738_v44 = vmul.f32 %v12379_v18, %v16413_v56  ;;  %11660 = vmatprep.mubr.msk.bf16.mxu0 %vm2015_vm2, %v8759_v29  ;;  %v12381_v60 = vpop.eup %12380 }
 0xf9d   : > { %11667 = vmatpush3.bf16.msra.mxu1 %v17079_v10  ;;  %v8674_v47 = vpop.xlane.xlu1 %8673  ;;  %v8739_v5 = vmul.f32 %v12381_v60, %v16415_v38 }
 0xf9e   : > { %v8760_v58 = vpack.c.bf16 %v8738_v44, %v8737_v36  ;;  %12394 = vrcp.f32 %v8674_v47  ;;  %11680 = vmatprep.subr.bf16.mxu1 %v17080_v49  ;;  %v8677_v40 = vpop.xlane.xlu0 %8676 }
 0xf9f   : > { %v12383_v25 = vpop.eup %12382  ;;  %12396 = vrcp.f32 %v8677_v40 }
 0xfa0   : > { %11661 = vmatmul.mubr.msk.bf16.vlgmr.msra.gmra.mxu0 %vm2015_vm2, %v8760_v58  ;;  %v8740_v56 = vmul.f32 %v12383_v25, %v16423_v2  ;;  %v12385_v51 = vpop.eup %12384 }
 0xfa1   : > { %11673 = vmatpush3.bf16.msra.mxu0 %v17078_v24  ;;  %v8680_v61 = vpop.xlane.xlu1 %8679  ;;  %v8741_v14 = vmul.f32 %v12385_v51, %v16425_v22  ;;  %v17082_v22 = vld [vmem:[#allocation33_spill] sm:$0xff] }
 0xfa2   : > { %12398 = vrcp.f32 %v8680_v61  ;;  %11674 = vmatprep.subr.bf16.mxu0 %v17081_v17  ;;  %v8683_v45 = vpop.xlane.xlu0 %8682  ;;  %v8761_v27 = vpack.c.bf16 %v8740_v56, %v8739_v5 }
 0xfa3   : > { %v12387_v1 = vpop.eup %12386  ;;  %12400 = vrcp.f32 %v8683_v45 }
 0xfa4   : > { %v8742_v34 = vmul.f32 %v12387_v1, %v16432_v57  ;;  %11668 = vmatprep.mubr.msk.bf16.mxu1 %vm2015_vm2, %v8761_v27  ;;  %v12389_v38 = vpop.eup %12388 }
 0xfa5   : > { %11675 = vmatpush3.bf16.msra.mxu0 %v17081_v17  ;;  %v8686_v2 = vpop.xlane.xlu1 %8685  ;;  %v8743_v28 = vmul.f32 %v12389_v38, %v16434_v41 }
 0xfa6   : > { %v8762_v37 = vpack.c.bf16 %v8742_v34, %v8741_v14  ;;  %12402 = vrcp.f32 %v8686_v2  ;;  %11791 = vmatprep.subr.msk.bf16.mxu0 %vm4794_vm3, %v10077_v42 }
 0xfa7   : > { %v12391_v20 = vpop.eup %12390 }
 0xfa8   : > { %11669 = vmatmul.mubr.msk.bf16.vlgmr.msra.gmra.mxu1 %vm2015_vm2, %v8762_v37  ;;  %v8744_v21 = vmul.f32 %v12391_v20, %v16440_v7  ;;  %v12393_v19 = vpop.eup %12392 }
 0xfa9   : > { %11681 = vmatpush3.bf16.msra.mxu1 %v17080_v49  ;;  %v8745_v9 = vmul.f32 %v12393_v19, %v16442_v55 }
 0xfaa   : > { %11682 = vmatprep.subr.bf16.mxu1 %v17082_v22  ;;  %v8763_v57 = vpack.c.bf16 %v8744_v21, %v8743_v28 }
 0xfab   : > { %v12395_v46 = vpop.eup %12394 }
 0xfac   : > { %v8746_v13 = vmul.f32 %v12395_v46, %v16448_v16  ;;  %11676 = vmatprep.mubr.msk.bf16.mxu0 %vm2015_vm2, %v8763_v57  ;;  %v12397_v39 = vpop.eup %12396 }
 0xfad   : > { %11683 = vmatpush3.bf16.msra.mxu1 %v17082_v22  ;;  %v8747_v7 = vmul.f32 %v12397_v39, %v16450_v30  ;;  %v9274_v30 = vsel %vm4794_vm3, %v10077_v42, 0 }
 0xfae   : > { %v8764_v4 = vpack.c.bf16 %v8746_v13, %v8745_v9 }
 0xfaf   : > { %v12399_v41 = vpop.eup %12398 }
 0xfb0   : > { %11677 = vmatmul.mubr.msk.bf16.vlgmr.msra.gmra.mxu0 %vm2015_vm2, %v8764_v4  ;;  %v8748_v53 = vmul.f32 %v12399_v41, %v16456_v54  ;;  %v12401_v11 = vpop.eup %12400  ;;  %v16562_v4 = vld [vmem:[%s16731_s7] ss:$0 sm:$0xff]  ;;  %v17083_v41 = vld [vmem:[#allocation4_spill] sm:$0xff] }
 0xfb1   : > { %v8749_v55 = vmul.f32 %v12401_v11, %v16458_v15  ;;  %11689 = vmatpush3.bf16.msra.mxu0 %v9274_v30  ;;  %v17084_v11 = vld [vmem:[#allocation47_spill] sm:$0xff]  ;;  %v17087_v30 = vld [vmem:[#allocation44_spill] sm:$0xff] }
 0xfb2   : > { %v8765_v63 = vpack.c.bf16 %v8748_v53, %v8747_v7 }
 0xfb3   : > { %v12403_v31 = vpop.eup %12402 }
 0xfb4   : > { %v8750_v16 = vmul.f32 %v12403_v31, %v16464_v62  ;;  %11684 = vmatprep.mubr.msk.bf16.mxu1 %vm2015_vm2, %v8765_v63  ;;  %v17085_v63 = vld [vmem:[#allocation23_spill] sm:$0xff] }
 0xfb5   : > { %v5048_v31 = vadd.f32 %v17085_v63, %v17084_v11  ;;  %v17102_v11 = vld [vmem:[#allocation59_spill] sm:$0xff]  ;;  %v17103_v63 = vld [vmem:[#allocation40_spill] sm:$0xff] }
 0xfb6   : > { %v8766_v52 = vpack.c.bf16 %v8750_v16, %v8749_v55  ;;  %v17086_v16 = vld [vmem:[#allocation5_spill] sm:$0xff] }
 0xfb8   : > { %11685 = vmatmul.mubr.msk.bf16.vlgmr.msra.gmra.mxu1 %vm2015_vm2, %v8766_v52 }
0x1040   : > { %v11630_v54 = vpop.f32.mrf.mxu0 }
0x1042   : > { %v8807_v23 = vpop.f32.mrf.mxu0 }
0x1044   : > { %v11631_v12 = vpop.f32.mrf.mxu0 }
0x1045   : > { %v9208_v62 = vpack.c.bf16 %v11631_v12, %v11630_v54  ;;  %v7289_v54 = vadd.f32 %v17087_v30, %v5048_v31  ;;  %v17088_v12 = vld [vmem:[#allocation7_spill] sm:$0xff]  ;;  %v5096_v31 = vadd.f32 %v17103_v63, %v17102_v11  ;;  %v17105_v30 = vld [vmem:[#allocation38_spill] sm:$0xff]  ;;  %v17121_v63 = vld [vmem:[#allocation12_spill] sm:$0xff] }
0x1046   : > { %v8810_v15 = vpop.f32.mrf.mxu0  ;;  %v17120_v11 = vld [vmem:[#allocation71_spill] sm:$0xff] }
0x1047   : > { %v9207_v0 = vpack.c.bf16 %v8810_v15, %v8807_v23 }
0x1048   : > { %v11638_v35 = vpop.f32.mrf.mxu1 }
0x1049   : > { %11690 = vmatprep.mubr.msk.bf16.mxu0 %vm1526_vm1, %v9207_v0 }
0x104a   : > { %v8862_v24 = vpop.f32.mrf.mxu1  ;;  %11691 = vmatmul.mubr.msk.bf16.vlgmr.msra.gmra.mxu0 %vm1526_vm1, %v9208_v62 }
0x104c   : > { %v11639_v6 = vpop.f32.mrf.mxu1 }
0x104d   : > { %v9210_v26 = vpack.c.bf16 %v11639_v6, %v11638_v35 }
0x104e   : > { %v8865_v59 = vpop.f32.mrf.mxu1 }
0x104f   : > { %v9209_v32 = vpack.c.bf16 %v8865_v59, %v8862_v24  ;;  %v17089_v59 = vld [vmem:[#allocation45_spill] sm:$0xff] }
0x1050   : > { %v11646_v50 = vpop.f32.mrf.mxu0 }
0x1051   : > { %11694 = vmatprep.mubr.msk.bf16.mxu0 %vm1526_vm1, %v9209_v32 }
0x1052   : > { %v8917_v33 = vpop.f32.mrf.mxu0  ;;  %11695 = vmatmul.mubr.msk.bf16.gmra.mxu0 %vm1526_vm1, %v9210_v26 }
0x1054   : > { %v11647_v10 = vpop.f32.mrf.mxu0 }
0x1055   : > { %v9212_v18 = vpack.c.bf16 %v11647_v10, %v11646_v50  ;;  %v17090_v50 = vld [vmem:[#allocation51_spill] sm:$0xff] }
0x1056   : > { %v8920_v43 = vpop.f32.mrf.mxu0 }
0x1057   : > { %v9211_v29 = vpack.c.bf16 %v8920_v43, %v8917_v33  ;;  %v17091_v33 = vld [vmem:[#allocation36_spill] sm:$0xff] }
0x1058   : > { %v11654_v36 = vpop.f32.mrf.mxu1  ;;  %v5064_v10 = vadd.f32 %v17091_v33, %v17090_v50  ;;  %v17108_v50 = vld [vmem:[#allocation63_spill] sm:$0xff] }
0x1059   : > { %11698 = vmatprep.mubr.msk.bf16.mxu0 %vm1526_vm1, %v9211_v29  ;;  %v17092_v29 = vld [vmem:[#allocation19_spill] sm:$0xff] }
0x105a   : > { %v8972_v44 = vpop.f32.mrf.mxu1  ;;  %11699 = vmatmul.mubr.msk.bf16.gmra.mxu0 %vm1526_vm1, %v9212_v18  ;;  %v17109_v33 = vld [vmem:[#allocation31_spill] sm:$0xff] }
0x105c   : > { %v11655_v60 = vpop.f32.mrf.mxu1 }
0x105d   : > { %v9214_v49 = vpack.c.bf16 %v11655_v60, %v11654_v36 }
0x105e   : > { %v8975_v47 = vpop.f32.mrf.mxu1 }
0x105f   : > { %v9213_v58 = vpack.c.bf16 %v8975_v47, %v8972_v44  ;;  %v17093_v44 = vld [vmem:[#allocation18_spill] sm:$0xff] }
0x1060   : > { %v11662_v40 = vpop.f32.mrf.mxu0  ;;  %v7293_v60 = vadd.f32 %v17093_v44, %v5064_v10  ;;  %v5112_v10 = vadd.f32 %v17109_v33, %v17108_v50  ;;  %v17111_v44 = vld [vmem:[#allocation22_spill] sm:$0xff]  ;;  %v17126_v33 = vld [vmem:[#allocation61_spill] sm:$0xff] }
0x1061   : > { %11702 = vmatprep.mubr.msk.bf16.mxu0 %vm1526_vm1, %v9213_v58  ;;  %v17094_v58 = vld [vmem:[#allocation46_spill] sm:$0xff] }
0x1062   : > { %v9027_v25 = vpop.f32.mrf.mxu0  ;;  %11703 = vmatmul.mubr.msk.bf16.gmra.mxu0 %vm1526_vm1, %v9214_v49 }
0x1064   : > { %v11663_v5 = vpop.f32.mrf.mxu0 }
0x1065   : > { %v9216_v61 = vpack.c.bf16 %v11663_v5, %v11662_v40 }
0x1066   : > { %v9030_v56 = vpop.f32.mrf.mxu0 }
0x1067   : > { %v9215_v51 = vpack.c.bf16 %v9030_v56, %v9027_v25 }
0x1068   : > { %v11670_v17 = vpop.f32.mrf.mxu1 }
0x1069   : > { %11706 = vmatprep.mubr.msk.bf16.mxu0 %vm1526_vm1, %v9215_v51 }
0x106a   : > { %v9082_v45 = vpop.f32.mrf.mxu1  ;;  %11707 = vmatmul.mubr.msk.bf16.gmra.mxu0 %vm1526_vm1, %v9216_v61  ;;  %v17095_v61 = vld [vmem:[#allocation48_spill] sm:$0xff] }
0x106c   : > { %v11671_v27 = vpop.f32.mrf.mxu1 }
0x106d   : > { %v9218_v34 = vpack.c.bf16 %v11671_v27, %v11670_v17  ;;  %v17096_v27 = vld [vmem:[#allocation55_spill] sm:$0xff] }
0x106e   : > { %v9085_v1 = vpop.f32.mrf.mxu1 }
0x106f   : > { %v9217_v14 = vpack.c.bf16 %v9085_v1, %v9082_v45  ;;  %v17097_v1 = vld [vmem:[#allocation27_spill] sm:$0xff] }
0x1070   : > { %v11678_v38 = vpop.f32.mrf.mxu0 }
0x1071   : > { %11710 = vmatprep.mubr.msk.bf16.mxu0 %vm1526_vm1, %v9217_v14  ;;  %v5080_v14 = vadd.f32 %v17097_v1, %v17096_v27  ;;  %v17114_v27 = vld [vmem:[#allocation67_spill] sm:$0xff]  ;;  %v17115_v1 = vld [vmem:[#allocation32_spill] sm:$0xff] }
0x1072   : > { %v9137_v2 = vpop.f32.mrf.mxu0  ;;  %11711 = vmatmul.mubr.msk.bf16.gmra.mxu0 %vm1526_vm1, %v9218_v34 }
0x1074   : > { %v11679_v37 = vpop.f32.mrf.mxu0 }
0x1075   : > { %v9220_v21 = vpack.c.bf16 %v11679_v37, %v11678_v38  ;;  %v17098_v38 = vld [vmem:[#allocation25_spill] sm:$0xff] }
0x1076   : > { %v9140_v20 = vpop.f32.mrf.mxu0 }
0x1077   : > { %v9219_v28 = vpack.c.bf16 %v9140_v20, %v9137_v2  ;;  %v17099_v20 = vld [vmem:[#allocation21_spill] sm:$0xff] }
0x1078   : > { %v11686_v19 = vpop.f32.mrf.mxu1 }
0x1079   : > { %11714 = vmatprep.mubr.msk.bf16.mxu0 %vm1526_vm1, %v9219_v28  ;;  %v7297_v28 = vadd.f32 %v17099_v20, %v5080_v14  ;;  %v5128_v14 = vadd.f32 %v17115_v1, %v17114_v27  ;;  %v17117_v20 = vld [vmem:[#allocation37_spill] sm:$0xff] }
0x107a   : > { %v9192_v22 = vpop.f32.mrf.mxu1  ;;  %11715 = vmatmul.mubr.msk.bf16.gmra.mxu0 %vm1526_vm1, %v9220_v21 }
0x107c   : > { %v11687_v57 = vpop.f32.mrf.mxu1 }
0x107d   : > { %v9222_v13 = vpack.c.bf16 %v11687_v57, %v11686_v19  ;;  %v17100_v19 = vld [vmem:[#allocation49_spill] sm:$0xff] }
0x107e   : > { %v9195_v46 = vpop.f32.mrf.mxu1 }
0x107f   : > { %v9221_v9 = vpack.c.bf16 %v9195_v46, %v9192_v22 }
0x1081   : > { %11718 = vmatprep.mubr.msk.bf16.mxu0 %vm1526_vm1, %v9221_v9 }
0x1082   : > { %11719 = vmatmul.mubr.msk.bf16.gmra.mxu0 %vm1526_vm1, %v9222_v13 }
0x110a   : > { %v11692_v39 = vpop.f32.mrf.mxu0 }
0x110b   : > { %v9439_v7 = vadd.f32 %v11692_v39, %v17083_v41  ;;  %v17101_v41 = vld [vmem:[#allocation50_spill] sm:$0xff] }
0x110c   : > { %v9310_v53 = vpop.f32.mrf.mxu0 }
0x110d   : > { %v9478_v55 = vadd.f32 %v16562_v4, %v9439_v7  ;;  %v9437_v52 = vadd.f32 %v9310_v53, %v17086_v16  ;;  %v17104_v16 = vld [vmem:[#allocation20_spill] sm:$0xff] }
0x110e   : > { %v11693_v42 = vpop.f32.mrf.mxu0 }
0x110f   : > { %9510 = vst.msk [vmem:[%s16570_s25 + $0x10] sm:$0xff] %vm378_vm0, %v9478_v55  ;;  %v9476_v23 = vadd.f32 %v16562_v4, %v9437_v52  ;;  %v9440_v15 = vadd.f32 %v11693_v42, %v17088_v12  ;;  %v17106_v12 = vld [vmem:[#allocation52_spill] sm:$0xff] }
0x1110   : > { %v9313_v0 = vpop.f32.mrf.mxu0 }
0x1111   : > { %9508 = vst.msk [vmem:[%s16570_s25] sm:$0xff] %vm378_vm0, %v9476_v23  ;;  %v9479_v62 = vadd.f32 %v16562_v4, %v9440_v15  ;;  %v9438_v35 = vadd.f32 %v9313_v0, %v7289_v54  ;;  %v7301_v54 = vadd.f32 %v17105_v30, %v5096_v31  ;;  %v5144_v31 = vadd.f32 %v17121_v63, %v17120_v11 }
0x1112   : > { %v11696_v24 = vpop.f32.mrf.mxu0 }
0x1113   : > { %9511 = vst.msk [vmem:[%s16570_s25 + $0x18] sm:$0xff] %vm378_vm0, %v9479_v62  ;;  %v9477_v6 = vadd.f32 %v16562_v4, %v9438_v35  ;;  %v9443_v32 = vadd.f32 %v11696_v24, %v17089_v59  ;;  %v17107_v59 = vld [vmem:[#allocation53_spill] sm:$0xff] }
0x1114   : > { %v9326_v26 = vpop.f32.mrf.mxu0 }
0x1115   : > { %9509 = vst.msk [vmem:[%s16570_s25 + $0x8] sm:$0xff] %vm378_vm0, %v9477_v6  ;;  %v9482_v43 = vadd.f32 %v16562_v4, %v9443_v32  ;;  %v9441_v18 = vadd.f32 %v9326_v26, %v17092_v29  ;;  %v17110_v29 = vld [vmem:[#allocation24_spill] sm:$0xff] }
0x1116   : > { %v11697_v36 = vpop.f32.mrf.mxu0 }
0x1117   : > { %9514 = vst.msk [vmem:[%s16570_s25 + $0x30] sm:$0xff] %vm378_vm0, %v9482_v43  ;;  %v9480_v47 = vadd.f32 %v16562_v4, %v9441_v18  ;;  %v9444_v49 = vadd.f32 %v11697_v36, %v17094_v58  ;;  %v17112_v58 = vld [vmem:[#allocation54_spill] sm:$0xff] }
0x1118   : > { %v9329_v40 = vpop.f32.mrf.mxu0 }
0x1119   : > { %9512 = vst.msk [vmem:[%s16570_s25 + $0x20] sm:$0xff] %vm378_vm0, %v9480_v47  ;;  %v9483_v25 = vadd.f32 %v16562_v4, %v9444_v49  ;;  %v9442_v5 = vadd.f32 %v9329_v40, %v7293_v60  ;;  %v7305_v60 = vadd.f32 %v17111_v44, %v5112_v10 }
0x111a   : > { %v11700_v56 = vpop.f32.mrf.mxu0 }
0x111b   : > { %9515 = vst.msk [vmem:[%s16570_s25 + $0x38] sm:$0xff] %vm378_vm0, %v9483_v25  ;;  %v9481_v51 = vadd.f32 %v16562_v4, %v9442_v5  ;;  %v9447_v17 = vadd.f32 %v11700_v56, %v17095_v61  ;;  %v17113_v61 = vld [vmem:[#allocation56_spill] sm:$0xff] }
0x111c   : > { %v9342_v45 = vpop.f32.mrf.mxu0 }
0x111d   : > { %9513 = vst.msk [vmem:[%s16570_s25 + $0x28] sm:$0xff] %vm378_vm0, %v9481_v51  ;;  %v9486_v34 = vadd.f32 %v16562_v4, %v9447_v17  ;;  %v9445_v2 = vadd.f32 %v9342_v45, %v17098_v38  ;;  %v17116_v38 = vld [vmem:[#allocation29_spill] sm:$0xff] }
0x111e   : > { %v11701_v37 = vpop.f32.mrf.mxu0 }
0x111f   : > { %9518 = vst.msk [vmem:[%s16570_s25 + $0x50] sm:$0xff] %vm378_vm0, %v9486_v34  ;;  %v9484_v21 = vadd.f32 %v16562_v4, %v9445_v2  ;;  %v9448_v22 = vadd.f32 %v11701_v37, %v17100_v19  ;;  %v17118_v19 = vld [vmem:[#allocation57_spill] sm:$0xff] }
0x1120   : > { %v9345_v57 = vpop.f32.mrf.mxu0 }
0x1121   : > { %9516 = vst.msk [vmem:[%s16570_s25 + $0x40] sm:$0xff] %vm378_vm0, %v9484_v21  ;;  %v9487_v46 = vadd.f32 %v16562_v4, %v9448_v22  ;;  %v9446_v9 = vadd.f32 %v9345_v57, %v7297_v28  ;;  %v7309_v28 = vadd.f32 %v17117_v20, %v5128_v14 }
0x1122   : > { %v11704_v13 = vpop.f32.mrf.mxu0 }
0x1123   : > { %9519 = vst.msk [vmem:[%s16570_s25 + $0x58] sm:$0xff] %vm378_vm0, %v9487_v46  ;;  %v9485_v39 = vadd.f32 %v16562_v4, %v9446_v9  ;;  %v9451_v7 = vadd.f32 %v11704_v13, %v17101_v41  ;;  %v17119_v41 = vld [vmem:[#allocation58_spill] sm:$0xff] }
0x1124   : > { %v9358_v53 = vpop.f32.mrf.mxu0 }
0x1125   : > { %9517 = vst.msk [vmem:[%s16570_s25 + $0x48] sm:$0xff] %vm378_vm0, %v9485_v39  ;;  %v9490_v55 = vadd.f32 %v16562_v4, %v9451_v7  ;;  %v9449_v52 = vadd.f32 %v9358_v53, %v17104_v16 }
0x1126   : > { %v11705_v42 = vpop.f32.mrf.mxu0 }
0x1127   : > { %9522 = vst.msk [vmem:[%s16570_s25 + $0x70] sm:$0xff] %vm378_vm0, %v9490_v55  ;;  %v9488_v23 = vadd.f32 %v16562_v4, %v9449_v52  ;;  %v9452_v15 = vadd.f32 %v11705_v42, %v17106_v12  ;;  %v7313_v42 = vadd.f32 %v15951_v8, %v5144_v31  ;;  %v17122_v8 = vld [vmem:[#allocation35_spill] sm:$0xff] }
0x1128   : > { %v9361_v0 = vpop.f32.mrf.mxu0 }
0x1129   : > { %9520 = vst.msk [vmem:[%s16570_s25 + $0x60] sm:$0xff] %vm378_vm0, %v9488_v23  ;;  %v9491_v62 = vadd.f32 %v16562_v4, %v9452_v15  ;;  %v9450_v35 = vadd.f32 %v9361_v0, %v7301_v54 }
0x112a   : > { %v11708_v24 = vpop.f32.mrf.mxu0 }
0x112b   : > { %9523 = vst.msk [vmem:[%s16570_s25 + $0x78] sm:$0xff] %vm378_vm0, %v9491_v62  ;;  %v9489_v6 = vadd.f32 %v16562_v4, %v9450_v35  ;;  %v9455_v32 = vadd.f32 %v11708_v24, %v17107_v59  ;;  %v17123_v24 = vld [vmem:[#allocation75_spill] sm:$0xff] }
0x112c   : > { %v9374_v26 = vpop.f32.mrf.mxu0 }
0x112d   : > { %9521 = vst.msk [vmem:[%s16570_s25 + $0x68] sm:$0xff] %vm378_vm0, %v9489_v6  ;;  %v9494_v43 = vadd.f32 %v16562_v4, %v9455_v32  ;;  %v9453_v18 = vadd.f32 %v9374_v26, %v17110_v29  ;;  %v17124_v6 = vld [vmem:[#allocation43_spill] sm:$0xff]  ;;  %v17125_v32 = vld [vmem:[#allocation60_spill] sm:$0xff]  ;;  %v17127_v29 = vld [vmem:[#allocation42_spill] sm:$0xff] }
0x112e   : > { %v11709_v36 = vpop.f32.mrf.mxu0 }
0x112f   : > { %9526 = vst.msk [vmem:[%s16570_s25 + $0x90] sm:$0xff] %vm378_vm0, %v9494_v43  ;;  %v9492_v47 = vadd.f32 %v16562_v4, %v9453_v18  ;;  %v9456_v49 = vadd.f32 %v11709_v36, %v17112_v58 }
0x1130   : > { %v9377_v40 = vpop.f32.mrf.mxu0 }
0x1131   : > { %9524 = vst.msk [vmem:[%s16570_s25 + $0x80] sm:$0xff] %vm378_vm0, %v9492_v47  ;;  %v9495_v25 = vadd.f32 %v16562_v4, %v9456_v49  ;;  %v9454_v5 = vadd.f32 %v9377_v40, %v7305_v60 }
0x1132   : > { %v11712_v56 = vpop.f32.mrf.mxu0 }
0x1133   : > { %9527 = vst.msk [vmem:[%s16570_s25 + $0x98] sm:$0xff] %vm378_vm0, %v9495_v25  ;;  %v9493_v51 = vadd.f32 %v16562_v4, %v9454_v5  ;;  %v9459_v17 = vadd.f32 %v11712_v56, %v17113_v61 }
0x1134   : > { %v9390_v45 = vpop.f32.mrf.mxu0 }
0x1135   : > { %9525 = vst.msk [vmem:[%s16570_s25 + $0x88] sm:$0xff] %vm378_vm0, %v9493_v51  ;;  %v9498_v34 = vadd.f32 %v16562_v4, %v9459_v17  ;;  %v9457_v2 = vadd.f32 %v9390_v45, %v17116_v38 }
0x1136   : > { %v11713_v37 = vpop.f32.mrf.mxu0 }
0x1137   : > { %9530 = vst.msk [vmem:[%s16570_s25 + $0xb0] sm:$0xff] %vm378_vm0, %v9498_v34  ;;  %v9496_v21 = vadd.f32 %v16562_v4, %v9457_v2  ;;  %v9460_v22 = vadd.f32 %v11713_v37, %v17118_v19 }
0x1138   : > { %v9393_v57 = vpop.f32.mrf.mxu0 }
0x1139   : > { %9528 = vst.msk [vmem:[%s16570_s25 + $0xa0] sm:$0xff] %vm378_vm0, %v9496_v21  ;;  %v9499_v46 = vadd.f32 %v16562_v4, %v9460_v22  ;;  %v9458_v9 = vadd.f32 %v9393_v57, %v7309_v28 }
0x113a   : > { %v11716_v13 = vpop.f32.mrf.mxu0 }
0x113b   : > { %9531 = vst.msk [vmem:[%s16570_s25 + $0xb8] sm:$0xff] %vm378_vm0, %v9499_v46  ;;  %v9497_v39 = vadd.f32 %v16562_v4, %v9458_v9  ;;  %v9463_v7 = vadd.f32 %v11716_v13, %v17119_v41 }
0x113c   : > { %v9406_v53 = vpop.f32.mrf.mxu0 }
0x113d   : > { %9529 = vst.msk [vmem:[%s16570_s25 + $0xa8] sm:$0xff] %vm378_vm0, %v9497_v39  ;;  %v9502_v55 = vadd.f32 %v16562_v4, %v9463_v7  ;;  %v9461_v16 = vadd.f32 %v9406_v53, %v15947_v48 }
0x113e   : > { %v11717_v52 = vpop.f32.mrf.mxu0 }
0x113f   : > { %9534 = vst.msk [vmem:[%s16570_s25 + $0xd0] sm:$0xff] %vm378_vm0, %v9502_v55  ;;  %v9500_v30 = vadd.f32 %v16562_v4, %v9461_v16  ;;  %v9464_v54 = vadd.f32 %v11717_v52, %v15949_v3  ;;  %v5160_v3 = vadd.f32 %v17124_v6, %v17123_v24 }
0x1140   : > { %v9409_v23 = vpop.f32.mrf.mxu0 }
0x1141   : > { %9532 = vst.msk [vmem:[%s16570_s25 + $0xc0] sm:$0xff] %vm378_vm0, %v9500_v30  ;;  %v9503_v12 = vadd.f32 %v16562_v4, %v9464_v54  ;;  %v9462_v15 = vadd.f32 %v9409_v23, %v7313_v42  ;;  %v7317_v10 = vadd.f32 %v17126_v33, %v5160_v3 }
0x1142   : > { %v11720_v0 = vpop.f32.mrf.mxu0 }
0x1143   : > { %9535 = vst.msk [vmem:[%s16570_s25 + $0xd8] sm:$0xff] %vm378_vm0, %v9503_v12  ;;  %v9501_v48 = vadd.f32 %v16562_v4, %v9462_v15  ;;  %v9467_v62 = vadd.f32 %v11720_v0, %v17122_v8 }
0x1144   : > { %v9422_v35 = vpop.f32.mrf.mxu0 }
0x1145   : > { %9533 = vst.msk [vmem:[%s16570_s25 + $0xc8] sm:$0xff] %vm378_vm0, %v9501_v48  ;;  %v9506_v59 = vadd.f32 %v16562_v4, %v9467_v62  ;;  %v9465_v26 = vadd.f32 %v9422_v35, %v17125_v32 }
0x1146   : > { %v11721_v50 = vpop.f32.mrf.mxu0 }
0x1147   : > { %9538 = vst.msk [vmem:[%s16570_s25 + $0xf0] sm:$0xff] %vm378_vm0, %v9506_v59  ;;  %v9504_v43 = vadd.f32 %v16562_v4, %v9465_v26  ;;  %v9468_v18 = vadd.f32 %v11721_v50, %v17127_v29 }
0x1148   : > { %v9425_v36 = vpop.f32.mrf.mxu0 }
0x1149   : > { %9536 = vst.msk [vmem:[%s16570_s25 + $0xe0] sm:$0xff] %vm378_vm0, %v9504_v43  ;;  %v9507_v44 = vadd.f32 %v16562_v4, %v9468_v18  ;;  %v9466_v60 = vadd.f32 %v9425_v36, %v7317_v10 }
0x114b   : > { %9539 = vst.msk [vmem:[%s16570_s25 + $0xf8] sm:$0xff] %vm378_vm0, %v9507_v44  ;;  %v9505_v47 = vadd.f32 %v16562_v4, %v9466_v60 }
0x114d   : > { %9537 = vst.msk [vmem:[%s16570_s25 + $0xe8] sm:$0xff] %vm378_vm0, %v9505_v47 }
0x114e PF: > { %s18_s29 = sadd.s32 1, %s12426_s29   ;;  %s17128_s27 = smov %s12422_s28 }
0x114f   : > { %p15_p5 = scmp.ge.s32.totalorder %s18_s29, 4   ;;  %s17129_s28 = smov %s17131_s30 }
0x1151   :  { %17 = sbr.rel (!%p15_p5) target bundleno = 2 (0x2), region = 110 }

</bundles_post_ra>
